<compile_context>
chip_gen: v7x
topology: tpu7x:2x2x1
jax: 0.10.0
libtpu: 0.0.40
codegen_flags: <defaults>
</compile_context>

<pallas_src>
import functools
import math

import jax
import jax.numpy as jnp
from jax import lax
from jax.experimental import pallas as pl
from jax.experimental.pallas import tpu as pltpu

NUM_CLASSES = 10                  # fc head exists in __init__ but is unused by forward()
TILE_M = 256                      # patch-matrix rows per grid step (stem -> 2 parallel steps)
VMEM_LIMIT = 32 * 1024 * 1024     # conservative: fits scoped-VMEM budgets on v5e/v6e/v7x
ACT_DTYPE = jnp.bfloat16          # activation / MXU-operand dtype
BN_EPS = 1e-5


def _round_up(x, m):
    return (x + m - 1) // m * m


# ----------------------------- Pallas kernels ------------------------------

def _fused_conv_kernel(apply_relu, relu_cols, has_residual, has_pool, *refs):
    """out = [pool @] maybe_relu(patches @ w_folded + bn_shift (+ residual)).

    relu_cols: None -> ReLU all columns; int -> ReLU only columns [0, relu_cols)
               (used when the 1x1 downsample shares the matmul and must NOT be
               rectified).
    has_pool : multiply by a small [Nbatch, M] pooling matrix (global average
               pool folded into the last conv) and emit f32 [Nbatch, cout].
    """
    it = iter(refs)
    x_ref = next(it)
    w_ref = next(it)
    shift_ref = next(it)
    res_ref = next(it) if has_residual else None
    pool_ref = next(it) if has_pool else None
    o_ref = next(it)

    acc = jnp.dot(x_ref[...], w_ref[...], preferred_element_type=jnp.float32)
    acc = acc + shift_ref[...]
    if has_residual:
        acc = acc + res_ref[...].astype(jnp.float32)
    if apply_relu:
        if relu_cols is None:
            acc = jnp.maximum(acc, 0.0)
        else:
            col = lax.broadcasted_iota(jnp.int32, acc.shape, 1)
            acc = jnp.where(col < relu_cols, jnp.maximum(acc, 0.0), acc)
    if has_pool:
        o_ref[...] = jnp.dot(pool_ref[...], acc,
                             preferred_element_type=jnp.float32)
    else:
        o_ref[...] = acc.astype(o_ref.dtype)


def _gap_kernel(x_ref, o_ref):
    """Fallback global average pool over the flattened spatial axis (f32 acc)."""
    o_ref[...] = jnp.mean(x_ref[...].astype(jnp.float32), axis=1, keepdims=True)


# ------------------------------ conv wrapper -------------------------------

def _im2col(x, kh, kw, stride, pad):
    """x: [N, H, W, C] -> patches [N*Ho*Wo, kh*kw*C] (tap-major, channel-minor)."""
    N, H, W, C = x.shape
    xp = jnp.pad(x, ((0, 0), (pad, pad), (pad, pad), (0, 0))) if pad else x
    Ho = (H + 2 * pad - kh) // stride + 1
    Wo = (W + 2 * pad - kw) // stride + 1
    cols = []
    for i in range(kh):
        for j in range(kw):
            cols.append(xp[:, i:i + stride * Ho:stride,
                           j:j + stride * Wo:stride, :])
    patches = cols[0] if len(cols) == 1 else jnp.concatenate(cols, axis=-1)
    return patches.reshape(N * Ho * Wo, kh * kw * C), (N, Ho, Wo)


def global_avg_pool(x):
    """Fallback Pallas GAP: x [N, H, W, C] bf16 -> [N, C] f32, tiled over N."""
    N, H, W, C = x.shape
    pooled = pl.pallas_call(
        _gap_kernel,
        out_shape=jax.ShapeDtypeStruct((N, 1, C), jnp.float32),
        grid=(N,),
        in_specs=[pl.BlockSpec((1, H * W, C), lambda i: (i, 0, 0))],
        out_specs=pl.BlockSpec((1, 1, C), lambda i: (i, 0, 0)),
        compiler_params=pltpu.CompilerParams(
            dimension_semantics=("parallel",),
            vmem_limit_bytes=VMEM_LIMIT),
    )(x.reshape(N, H * W, C))
    return pooled.reshape(N, C)


def conv_fused(x, packed, *, stride, relu, relu_cols=None, residual=None,
               pool=False):
    """Fused 3x3 conv (optionally with embedded 1x1 downsample columns) + BN
    (+residual) (+ReLU) (+global-avg-pool).

    x        : [N, H, W, Cin] bf16 activation.
    packed   : {"w": [9*Cin, Cout] bf16 (BN scale folded), "shift": [1, Cout] f32}.
    residual : optional [N, Ho, Wo, Cout] bf16 added before the ReLU.
    pool     : fold AdaptiveAvgPool2d(1) into the epilogue -> returns [N, Cout]
               f32 (falls back to the stand-alone GAP kernel if the conv does
               not fit a single grid step).
    Returns [N, Ho, Wo, Cout] bf16, or [N, Cout] f32 when pooled.
    """
    kh = kw = 3
    pad = 1
    patches, (N, Ho, Wo) = _im2col(x.astype(ACT_DTYPE), kh, kw, stride, pad)
    M, K = patches.shape
    cout = packed["w"].shape[1]

    tile_m = TILE_M if M > TILE_M else M
    m_pad = _round_up(M, tile_m)
    if m_pad != M:                       # never triggers for this net's power-of-two M
        m_pad = _round_up(M, max(tile_m, 16))
        patches = jnp.pad(patches, ((0, m_pad - M), (0, 0)))

    fuse_pool = pool and (m_pad == M) and (tile_m == M)

    in_specs = [
        pl.BlockSpec((tile_m, K), lambda i: (i, 0)),   # patch tile (bf16), pipelined over M
        pl.BlockSpec((K, cout), lambda i: (0, 0)),     # folded weights (bf16), resident
        pl.BlockSpec((1, cout), lambda i: (0, 0)),     # BN shift (f32), resident
    ]
    args = [patches, packed["w"], packed["shift"]]

    has_residual = residual is not None
    if has_residual:
        res = residual.reshape(M, cout).astype(ACT_DTYPE)
        if m_pad != M:
            res = jnp.pad(res, ((0, m_pad - M), (0, 0)))
        in_specs.append(pl.BlockSpec((tile_m, cout), lambda i: (i, 0)))
        args.append(res)

    if fuse_pool:
        hw = Ho * Wo
        pool_mat = jnp.repeat(jnp.eye(N, dtype=jnp.float32), hw, axis=1) / float(hw)
        in_specs.append(pl.BlockSpec((N, M), lambda i: (0, 0)))
        args.append(pool_mat)
        out_shape = jax.ShapeDtypeStruct((N, cout), jnp.float32)
        out_spec = pl.BlockSpec((N, cout), lambda i: (0, 0))
    else:
        out_shape = jax.ShapeDtypeStruct((m_pad, cout), ACT_DTYPE)
        out_spec = pl.BlockSpec((tile_m, cout), lambda i: (i, 0))

    out = pl.pallas_call(
        functools.partial(_fused_conv_kernel, relu, relu_cols,
                          has_residual, fuse_pool),
        out_shape=out_shape,
        grid=(m_pad // tile_m,),
        in_specs=in_specs,
        out_specs=out_spec,
        compiler_params=pltpu.CompilerParams(
            dimension_semantics=("parallel",),
            vmem_limit_bytes=VMEM_LIMIT),
    )(*args)

    if fuse_pool:
        return out
    if m_pad != M:
        out = out[:M]
    out = out.reshape(N, Ho, Wo, cout)
    if pool:
        return global_avg_pool(out)      # shape fallback: separate Pallas GAP kernel
    return out


# ---------------------------- parameter setup ------------------------------

def _conv_init(key, kh, kw, cin, cout):
    fan_in = kh * kw * cin
    return (jax.random.normal(key, (kh, kw, cin, cout), jnp.float32)
            / math.sqrt(fan_in))


def _bn_init(key, c):
    k1, k2, k3, k4 = jax.random.split(key, 4)
    return {
        "gamma": 1.0 + 0.1 * jax.random.normal(k1, (c,), jnp.float32),
        "beta": 0.1 * jax.random.normal(k2, (c,), jnp.float32),
        "mean": 0.1 * jax.random.normal(k3, (c,), jnp.float32),
        "var": 1.0 + 0.1 * jnp.abs(jax.random.normal(k4, (c,), jnp.float32)),
    }


def _block_init(key, cin, cout, stride):
    keys = jax.random.split(key, 6)
    p = {
        "conv1_w": _conv_init(keys[0], 3, 3, cin, cout),
        "bn1": _bn_init(keys[1], cout),
        "conv2_w": _conv_init(keys[2], 3, 3, cout, cout),
        "bn2": _bn_init(keys[3], cout),
    }
    if stride != 1 or cin != cout:
        p["down_w"] = _conv_init(keys[4], 1, 1, cin, cout)
        p["down_bn"] = _bn_init(keys[5], cout)
    return p


def init_wideresnet(key, widening_factor=2):
    params = {}
    keys = jax.random.split(key, 8)
    params["conv1_w"] = _conv_init(keys[0], 3, 3, 3, 16)
    params["bn1"] = _bn_init(keys[1], 16)

    inplanes = 16

    def make_layer(lkey, planes, blocks, stride, last):
        nonlocal inplanes
        bkeys = jax.random.split(lkey, blocks)
        layer = [_block_init(bkeys[0], inplanes, planes, stride)]
        cfg = [(stride, True)]
        inplanes = planes
        if last:
            for i in range(1, blocks - 1):
                layer.append(_block_init(bkeys[i], inplanes, planes, 1))
                cfg.append((1, True))
            layer.append(_block_init(bkeys[blocks - 1], inplanes, planes, 1))
            cfg.append((1, False))          # relu=False on the final block
        else:
            for i in range(1, blocks):
                layer.append(_block_init(bkeys[i], inplanes, planes, 1))
                cfg.append((1, True))
        return layer, cfg

    params["layer1"], cfg1 = make_layer(keys[2], 64, widening_factor, 2, False)
    params["layer2"], cfg2 = make_layer(keys[3], 128, widening_factor, 2, False)
    params["layer3"], cfg3 = make_layer(keys[4], 256, widening_factor, 2, True)

    # fc head: present in the module but not used by forward().
    params["fc_w"] = (jax.random.normal(keys[5], (256, NUM_CLASSES), jnp.float32)
                      / math.sqrt(256.0))
    params["fc_b"] = jnp.zeros((NUM_CLASSES,), jnp.float32)

    cfgs = {"layer1": cfg1, "layer2": cfg2, "layer3": cfg3}
    return params, cfgs


# --------------------------- one-time weight packing ------------------------

def _fold_bn(w_flat, bn):
    """Fold eval-mode BN into a flattened [K, cout] weight -> (bf16 w, f32 shift)."""
    scale = bn["gamma"] / jnp.sqrt(bn["var"] + BN_EPS)
    shift = bn["beta"] - bn["mean"] * scale
    return ((w_flat * scale[None, :]).astype(ACT_DTYPE),
            shift.reshape(1, -1).astype(jnp.float32))


def _pack_conv(w, bn):
    kh, kw, cin, cout = w.shape
    wf, shift = _fold_bn(w.reshape(kh * kw * cin, cout), bn)
    return {"w": wf, "shift": shift}


def _pack_conv1_downsample(w1, bn1, wd, bnd):
    """Combined [9*Cin, Cout1+CoutD] weight: conv1 columns plus the 1x1
    downsample embedded in the centre-tap rows (its patches are exactly the
    centre-tap slab of the 3x3/pad-1 patches at the same stride)."""
    kh, kw, cin, cout1 = w1.shape
    coutd = wd.shape[-1]
    w1f, shift1 = _fold_bn(w1.reshape(kh * kw * cin, cout1), bn1)
    wdf, shiftd = _fold_bn(wd.reshape(cin, coutd), bnd)
    wd_full = jnp.zeros((kh * kw * cin, coutd), ACT_DTYPE)
    centre = (kh // 2) * kw + (kw // 2)          # tap (1,1) -> row block 4
    wd_full = wd_full.at[centre * cin:(centre + 1) * cin, :].set(wdf)
    return {"w": jnp.concatenate([w1f, wd_full], axis=1),
            "shift": jnp.concatenate([shift1, shiftd], axis=1)}


def pack_params(params, cfgs):
    """One-time packing: BN-folded bf16 weights + f32 shifts, conv1+downsample
    fusion.  Returns (array-only pytree, static per-block config list)."""
    arrays = {"stem": _pack_conv(params["conv1_w"], params["bn1"]), "blocks": []}
    static = []
    for name in ("layer1", "layer2", "layer3"):
        for p, (stride, relu_out) in zip(params[name], cfgs[name]):
            cout = int(p["conv1_w"].shape[-1])
            fused_ds = "down_w" in p
            blk = {"c2": _pack_conv(p["conv2_w"], p["bn2"])}
            if fused_ds:
                blk["c1d"] = _pack_conv1_downsample(p["conv1_w"], p["bn1"],
                                                    p["down_w"], p["down_bn"])
            else:
                blk["c1"] = _pack_conv(p["conv1_w"], p["bn1"])
            arrays["blocks"].append(blk)
            static.append({"stride": stride, "relu_out": relu_out,
                           "cout": cout, "fused_ds": fused_ds})
    return arrays, static


# ------------------------------ forward pass -------------------------------

def block_forward(x, bp, bcfg, pool=False):
    cout = bcfg["cout"]
    if bcfg["fused_ds"]:
        # One kernel: conv1 (ReLU'd columns) + 1x1 downsample (raw columns).
        comb = conv_fused(x, bp["c1d"], stride=bcfg["stride"], relu=True,
                          relu_cols=cout)
        h = comb[..., :cout]          # relu(bn1(conv1(x)))
        residual = comb[..., cout:]   # bn_d(downsample(x)), not rectified
    else:
        h = conv_fused(x, bp["c1"], stride=1, relu=True)
        residual = x
    return conv_fused(h, bp["c2"], stride=1, relu=bcfg["relu_out"],
                      residual=residual, pool=pool)


def wideresnet_forward(arrays, static_cfg, x_nchw):
    x = jnp.transpose(x_nchw, (0, 2, 3, 1)).astype(ACT_DTYPE)   # NCHW -> NHWC
    x = conv_fused(x, arrays["stem"], stride=1, relu=True)
    n_blocks = len(static_cfg)
    for i, (bp, bcfg) in enumerate(zip(arrays["blocks"], static_cfg)):
        x = block_forward(x, bp, bcfg, pool=(i == n_blocks - 1))
    # `x` is now the pooled [N, 256] features; matches `return (x, x)` after
    # avgpool + flatten in the PyTorch forward (fc head is unused by forward).
    return x, x


# ---------------------------------- main -----------------------------------

if __name__ == "__main__":
    key = jax.random.PRNGKey(0)
    pkey, xkey = jax.random.split(key)
    params, cfgs = init_wideresnet(pkey, widening_factor=2)
    arrays, static_cfg = pack_params(params, cfgs)   # one-time BN fold / packing

    x = jax.random.normal(xkey, (2, 3, 16, 16), jnp.float32)  # NCHW like torch
    fwd = jax.jit(lambda a, xx: wideresnet_forward(a, static_cfg, xx))
    feats, feats_dup = fwd(arrays, x)
    jax.block_until_ready(feats)

    assert feats.shape == (2, 256), feats.shape
    assert feats_dup.shape == (2, 256)
    assert bool(jnp.all(jnp.isfinite(feats)))
    print("KERNEL_OK")
</pallas_src>

<mosaic_0001>
module attributes {stable_mosaic.version = 11 : i64} {
  func.func @_fused_conv_kernel(%arg0: i32, %arg1: memref<256x27xbf16, #tpu.memory_space<vmem>>, %arg2: memref<27x16xbf16, #tpu.memory_space<vmem>>, %arg3: memref<1x16xf32, #tpu.memory_space<vmem>>, %arg4: memref<256x16xbf16, #tpu.memory_space<vmem>>) attributes {dimension_semantics = [#tpu.dimension_semantics<parallel>], iteration_bounds = array<i64: 2>, scalar_prefetch = 0 : i64, scratch_operands = 0 : i64, tpu.core_type = #tpu.core_type<tc>, window_params = [{transform_indices = @transform_0, window_bounds = array<i64: 256, 27>}, {pipeline_mode = #tpu.pipeline_mode<synchronous>, transform_indices = @transform_1, window_bounds = array<i64: 27, 16>}, {pipeline_mode = #tpu.pipeline_mode<synchronous>, transform_indices = @transform_2, window_bounds = array<i64: 1, 16>}, {transform_indices = @transform_3, window_bounds = array<i64: 256, 16>}]} {
    %c0 = arith.constant 0 : index
    %c0_0 = arith.constant 0 : index
    %0 = vector.load %arg1[%c0, %c0_0] : memref<256x27xbf16, #tpu.memory_space<vmem>>, vector<256x27xbf16>
    %c0_1 = arith.constant 0 : index
    %c0_2 = arith.constant 0 : index
    %1 = vector.load %arg2[%c0_1, %c0_2] : memref<27x16xbf16, #tpu.memory_space<vmem>>, vector<27x16xbf16>
    %cst = arith.constant dense<0.000000e+00> : vector<256x16xf32>
    %2 = tpu.matmul %0, %1, %cst {dimension_numbers = #tpu.dot_dimension_numbers<[1], [0], [0], [1], [0, 0, 1, 1], [], []>} : vector<256x27xbf16>, vector<27x16xbf16>, vector<256x16xf32> -> vector<256x16xf32>
    %c0_3 = arith.constant 0 : index
    %c0_4 = arith.constant 0 : index
    %3 = vector.load %arg3[%c0_3, %c0_4] : memref<1x16xf32, #tpu.memory_space<vmem>>, vector<1x16xf32>
    %4 = vector.broadcast %3 : vector<1x16xf32> to vector<256x16xf32>
    %5 = arith.addf %2, %4 : vector<256x16xf32>
    %cst_5 = arith.constant 0.000000e+00 : f32
    %6 = vector.broadcast %cst_5 : f32 to vector<256x16xf32>
    %7 = arith.maximumf %5, %6 : vector<256x16xf32>
    %8 = arith.truncf %7 : vector<256x16xf32> to vector<256x16xbf16>
    %c0_6 = arith.constant 0 : index
    %c0_7 = arith.constant 0 : index
    %9 = vector.load %arg4[%c0_6, %c0_7] : memref<256x16xbf16, #tpu.memory_space<vmem>>, vector<256x16xbf16>
    tpu.vector_store %arg4[%c0_6, %c0_7], %8 {strides = array<i32>} : memref<256x16xbf16, #tpu.memory_space<vmem>>, vector<256x16xbf16>,
    return
  }
  func.func @transform_0(%arg0: i32) -> (i32, i32) {
    %c0_i32 = arith.constant 0 : i32
    %c0_i32_0 = arith.constant 0 : i32
    return %arg0, %c0_i32 : i32, i32
  }
  func.func @transform_1(%arg0: i32) -> (i32, i32) {
    %c0_i32 = arith.constant 0 : i32
    %c0_i32_0 = arith.constant 0 : i32
    %c0_i32_1 = arith.constant 0 : i32
    return %c0_i32, %c0_i32_0 : i32, i32
  }
  func.func @transform_2(%arg0: i32) -> (i32, i32) {
    %c0_i32 = arith.constant 0 : i32
    %c0_i32_0 = arith.constant 0 : i32
    %c0_i32_1 = arith.constant 0 : i32
    return %c0_i32, %c0_i32_0 : i32, i32
  }
  func.func @transform_3(%arg0: i32) -> (i32, i32) {
    %c0_i32 = arith.constant 0 : i32
    %c0_i32_0 = arith.constant 0 : i32
    return %arg0, %c0_i32 : i32, i32
  }
}

module attributes {stable_mosaic.version = 11 : i64} {
  func.func @_fused_conv_kernel(%arg0: i32, %arg1: memref<128x144xbf16, #tpu.memory_space<vmem>>, %arg2: memref<144x128xbf16, #tpu.memory_space<vmem>>, %arg3: memref<1x128xf32, #tpu.memory_space<vmem>>, %arg4: memref<128x128xbf16, #tpu.memory_space<vmem>>) attributes {dimension_semantics = [#tpu.dimension_semantics<parallel>], iteration_bounds = array<i64: 1>, scalar_prefetch = 0 : i64, scratch_operands = 0 : i64, tpu.core_type = #tpu.core_type<tc>, window_params = [{transform_indices = @transform_0, window_bounds = array<i64: 128, 144>}, {pipeline_mode = #tpu.pipeline_mode<synchronous>, transform_indices = @transform_1, window_bounds = array<i64: 144, 128>}, {pipeline_mode = #tpu.pipeline_mode<synchronous>, transform_indices = @transform_2, window_bounds = array<i64: 1, 128>}, {transform_indices = @transform_3, window_bounds = array<i64: 128, 128>}]} {
    %c0 = arith.constant 0 : index
    %c0_0 = arith.constant 0 : index
    %0 = vector.load %arg1[%c0, %c0_0] : memref<128x144xbf16, #tpu.memory_space<vmem>>, vector<128x144xbf16>
    %c0_1 = arith.constant 0 : index
    %c0_2 = arith.constant 0 : index
    %1 = vector.load %arg2[%c0_1, %c0_2] : memref<144x128xbf16, #tpu.memory_space<vmem>>, vector<144x128xbf16>
    %cst = arith.constant dense<0.000000e+00> : vector<128x128xf32>
    %2 = tpu.matmul %0, %1, %cst {dimension_numbers = #tpu.dot_dimension_numbers<[1], [0], [0], [1], [0, 0, 1, 1], [], []>} : vector<128x144xbf16>, vector<144x128xbf16>, vector<128x128xf32> -> vector<128x128xf32>
    %c0_3 = arith.constant 0 : index
    %c0_4 = arith.constant 0 : index
    %3 = vector.load %arg3[%c0_3, %c0_4] : memref<1x128xf32, #tpu.memory_space<vmem>>, vector<1x128xf32>
    %4 = vector.broadcast %3 : vector<1x128xf32> to vector<128x128xf32>
    %5 = arith.addf %2, %4 : vector<128x128xf32>
    %6 = tpu.iota {dimensions = array<i32: 1>} : vector<128x128xi32>
    %c64_i32 = arith.constant 64 : i32
    %7 = vector.broadcast %c64_i32 : i32 to vector<128x128xi32>
    %8 = arith.cmpi slt, %6, %7 : vector<128x128xi32>
    %cst_5 = arith.constant 0.000000e+00 : f32
    %9 = vector.broadcast %cst_5 : f32 to vector<128x128xf32>
    %10 = arith.maximumf %5, %9 : vector<128x128xf32>
    %11 = arith.select %8, %10, %5 : vector<128x128xi1>, vector<128x128xf32>
    %12 = arith.truncf %11 : vector<128x128xf32> to vector<128x128xbf16>
    %c0_6 = arith.constant 0 : index
    %c0_7 = arith.constant 0 : index
    %13 = vector.load %arg4[%c0_6, %c0_7] : memref<128x128xbf16, #tpu.memory_space<vmem>>, vector<128x128xbf16>
    tpu.vector_store %arg4[%c0_6, %c0_7], %12 {strides = array<i32>} : memref<128x128xbf16, #tpu.memory_space<vmem>>, vector<128x128xbf16>,
    return
  }
  func.func @transform_0(%arg0: i32) -> (i32, i32) {
    %c0_i32 = arith.constant 0 : i32
    %c0_i32_0 = arith.constant 0 : i32
    return %arg0, %c0_i32 : i32, i32
  }
  func.func @transform_1(%arg0: i32) -> (i32, i32) {
    %c0_i32 = arith.constant 0 : i32
    %c0_i32_0 = arith.constant 0 : i32
    %c0_i32_1 = arith.constant 0 : i32
    return %c0_i32, %c0_i32_0 : i32, i32
  }
  func.func @transform_2(%arg0: i32) -> (i32, i32) {
    %c0_i32 = arith.constant 0 : i32
    %c0_i32_0 = arith.constant 0 : i32
    %c0_i32_1 = arith.constant 0 : i32
    return %c0_i32, %c0_i32_0 : i32, i32
  }
  func.func @transform_3(%arg0: i32) -> (i32, i32) {
    %c0_i32 = arith.constant 0 : i32
    %c0_i32_0 = arith.constant 0 : i32
    return %arg0, %c0_i32 : i32, i32
  }
}

module attributes {stable_mosaic.version = 11 : i64} {
  func.func @_fused_conv_kernel(%arg0: i32, %arg1: memref<128x576xbf16, #tpu.memory_space<vmem>>, %arg2: memref<576x64xbf16, #tpu.memory_space<vmem>>, %arg3: memref<1x64xf32, #tpu.memory_space<vmem>>, %arg4: memref<128x64xbf16, #tpu.memory_space<vmem>>, %arg5: memref<128x64xbf16, #tpu.memory_space<vmem>>) attributes {dimension_semantics = [#tpu.dimension_semantics<parallel>], iteration_bounds = array<i64: 1>, scalar_prefetch = 0 : i64, scratch_operands = 0 : i64, tpu.core_type = #tpu.core_type<tc>, window_params = [{transform_indices = @transform_0, window_bounds = array<i64: 128, 576>}, {pipeline_mode = #tpu.pipeline_mode<synchronous>, transform_indices = @transform_1, window_bounds = array<i64: 576, 64>}, {pipeline_mode = #tpu.pipeline_mode<synchronous>, transform_indices = @transform_2, window_bounds = array<i64: 1, 64>}, {transform_indices = @transform_3, window_bounds = array<i64: 128, 64>}, {transform_indices = @transform_4, window_bounds = array<i64: 128, 64>}]} {
    %c0 = arith.constant 0 : index
    %c0_0 = arith.constant 0 : index
    %0 = vector.load %arg1[%c0, %c0_0] : memref<128x576xbf16, #tpu.memory_space<vmem>>, vector<128x576xbf16>
    %c0_1 = arith.constant 0 : index
    %c0_2 = arith.constant 0 : index
    %1 = vector.load %arg2[%c0_1, %c0_2] : memref<576x64xbf16, #tpu.memory_space<vmem>>, vector<576x64xbf16>
    %cst = arith.constant dense<0.000000e+00> : vector<128x64xf32>
    %2 = tpu.matmul %0, %1, %cst {dimension_numbers = #tpu.dot_dimension_numbers<[1], [0], [0], [1], [0, 0, 1, 1], [], []>} : vector<128x576xbf16>, vector<576x64xbf16>, vector<128x64xf32> -> vector<128x64xf32>
    %c0_3 = arith.constant 0 : index
    %c0_4 = arith.constant 0 : index
    %3 = vector.load %arg3[%c0_3, %c0_4] : memref<1x64xf32, #tpu.memory_space<vmem>>, vector<1x64xf32>
    %4 = vector.broadcast %3 : vector<1x64xf32> to vector<128x64xf32>
    %5 = arith.addf %2, %4 : vector<128x64xf32>
    %c0_5 = arith.constant 0 : index
    %c0_6 = arith.constant 0 : index
    %6 = vector.load %arg4[%c0_5, %c0_6] : memref<128x64xbf16, #tpu.memory_space<vmem>>, vector<128x64xbf16>
    %7 = arith.extf %6 : vector<128x64xbf16> to vector<128x64xf32>
    %8 = arith.addf %5, %7 : vector<128x64xf32>
    %cst_7 = arith.constant 0.000000e+00 : f32
    %9 = vector.broadcast %cst_7 : f32 to vector<128x64xf32>
    %10 = arith.maximumf %8, %9 : vector<128x64xf32>
    %11 = arith.truncf %10 : vector<128x64xf32> to vector<128x64xbf16>
    %c0_8 = arith.constant 0 : index
    %c0_9 = arith.constant 0 : index
    %12 = vector.load %arg5[%c0_8, %c0_9] : memref<128x64xbf16, #tpu.memory_space<vmem>>, vector<128x64xbf16>
    tpu.vector_store %arg5[%c0_8, %c0_9], %11 {strides = array<i32>} : memref<128x64xbf16, #tpu.memory_space<vmem>>, vector<128x64xbf16>,
    return
  }
  func.func @transform_0(%arg0: i32) -> (i32, i32) {
    %c0_i32 = arith.constant 0 : i32
    %c0_i32_0 = arith.constant 0 : i32
    return %arg0, %c0_i32 : i32, i32
  }
  func.func @transform_1(%arg0: i32) -> (i32, i32) {
    %c0_i32 = arith.constant 0 : i32
    %c0_i32_0 = arith.constant 0 : i32
    %c0_i32_1 = arith.constant 0 : i32
    return %c0_i32, %c0_i32_0 : i32, i32
  }
  func.func @transform_2(%arg0: i32) -> (i32, i32) {
    %c0_i32 = arith.constant 0 : i32
    %c0_i32_0 = arith.constant 0 : i32
    %c0_i32_1 = arith.constant 0 : i32
    return %c0_i32, %c0_i32_0 : i32, i32
  }
  func.func @transform_3(%arg0: i32) -> (i32, i32) {
    %c0_i32 = arith.constant 0 : i32
    %c0_i32_0 = arith.constant 0 : i32
    return %arg0, %c0_i32 : i32, i32
  }
  func.func @transform_4(%arg0: i32) -> (i32, i32) {
    %c0_i32 = arith.constant 0 : i32
    %c0_i32_0 = arith.constant 0 : i32
    return %arg0, %c0_i32 : i32, i32
  }
}

module attributes {stable_mosaic.version = 11 : i64} {
  func.func @_fused_conv_kernel(%arg0: i32, %arg1: memref<128x576xbf16, #tpu.memory_space<vmem>>, %arg2: memref<576x64xbf16, #tpu.memory_space<vmem>>, %arg3: memref<1x64xf32, #tpu.memory_space<vmem>>, %arg4: memref<128x64xbf16, #tpu.memory_space<vmem>>) attributes {dimension_semantics = [#tpu.dimension_semantics<parallel>], iteration_bounds = array<i64: 1>, scalar_prefetch = 0 : i64, scratch_operands = 0 : i64, tpu.core_type = #tpu.core_type<tc>, window_params = [{transform_indices = @transform_0, window_bounds = array<i64: 128, 576>}, {pipeline_mode = #tpu.pipeline_mode<synchronous>, transform_indices = @transform_1, window_bounds = array<i64: 576, 64>}, {pipeline_mode = #tpu.pipeline_mode<synchronous>, transform_indices = @transform_2, window_bounds = array<i64: 1, 64>}, {transform_indices = @transform_3, window_bounds = array<i64: 128, 64>}]} {
    %c0 = arith.constant 0 : index
    %c0_0 = arith.constant 0 : index
    %0 = vector.load %arg1[%c0, %c0_0] : memref<128x576xbf16, #tpu.memory_space<vmem>>, vector<128x576xbf16>
    %c0_1 = arith.constant 0 : index
    %c0_2 = arith.constant 0 : index
    %1 = vector.load %arg2[%c0_1, %c0_2] : memref<576x64xbf16, #tpu.memory_space<vmem>>, vector<576x64xbf16>
    %cst = arith.constant dense<0.000000e+00> : vector<128x64xf32>
    %2 = tpu.matmul %0, %1, %cst {dimension_numbers = #tpu.dot_dimension_numbers<[1], [0], [0], [1], [0, 0, 1, 1], [], []>} : vector<128x576xbf16>, vector<576x64xbf16>, vector<128x64xf32> -> vector<128x64xf32>
    %c0_3 = arith.constant 0 : index
    %c0_4 = arith.constant 0 : index
    %3 = vector.load %arg3[%c0_3, %c0_4] : memref<1x64xf32, #tpu.memory_space<vmem>>, vector<1x64xf32>
    %4 = vector.broadcast %3 : vector<1x64xf32> to vector<128x64xf32>
    %5 = arith.addf %2, %4 : vector<128x64xf32>
    %cst_5 = arith.constant 0.000000e+00 : f32
    %6 = vector.broadcast %cst_5 : f32 to vector<128x64xf32>
    %7 = arith.maximumf %5, %6 : vector<128x64xf32>
    %8 = arith.truncf %7 : vector<128x64xf32> to vector<128x64xbf16>
    %c0_6 = arith.constant 0 : index
    %c0_7 = arith.constant 0 : index
    %9 = vector.load %arg4[%c0_6, %c0_7] : memref<128x64xbf16, #tpu.memory_space<vmem>>, vector<128x64xbf16>
    tpu.vector_store %arg4[%c0_6, %c0_7], %8 {strides = array<i32>} : memref<128x64xbf16, #tpu.memory_space<vmem>>, vector<128x64xbf16>,
    return
  }
  func.func @transform_0(%arg0: i32) -> (i32, i32) {
    %c0_i32 = arith.constant 0 : i32
    %c0_i32_0 = arith.constant 0 : i32
    return %arg0, %c0_i32 : i32, i32
  }
  func.func @transform_1(%arg0: i32) -> (i32, i32) {
    %c0_i32 = arith.constant 0 : i32
    %c0_i32_0 = arith.constant 0 : i32
    %c0_i32_1 = arith.constant 0 : i32
    return %c0_i32, %c0_i32_0 : i32, i32
  }
  func.func @transform_2(%arg0: i32) -> (i32, i32) {
    %c0_i32 = arith.constant 0 : i32
    %c0_i32_0 = arith.constant 0 : i32
    %c0_i32_1 = arith.constant 0 : i32
    return %c0_i32, %c0_i32_0 : i32, i32
  }
  func.func @transform_3(%arg0: i32) -> (i32, i32) {
    %c0_i32 = arith.constant 0 : i32
    %c0_i32_0 = arith.constant 0 : i32
    return %arg0, %c0_i32 : i32, i32
  }
}

module attributes {stable_mosaic.version = 11 : i64} {
  func.func @_fused_conv_kernel(%arg0: i32, %arg1: memref<32x576xbf16, #tpu.memory_space<vmem>>, %arg2: memref<576x256xbf16, #tpu.memory_space<vmem>>, %arg3: memref<1x256xf32, #tpu.memory_space<vmem>>, %arg4: memref<32x256xbf16, #tpu.memory_space<vmem>>) attributes {dimension_semantics = [#tpu.dimension_semantics<parallel>], iteration_bounds = array<i64: 1>, scalar_prefetch = 0 : i64, scratch_operands = 0 : i64, tpu.core_type = #tpu.core_type<tc>, window_params = [{transform_indices = @transform_0, window_bounds = array<i64: 32, 576>}, {pipeline_mode = #tpu.pipeline_mode<synchronous>, transform_indices = @transform_1, window_bounds = array<i64: 576, 256>}, {pipeline_mode = #tpu.pipeline_mode<synchronous>, transform_indices = @transform_2, window_bounds = array<i64: 1, 256>}, {transform_indices = @transform_3, window_bounds = array<i64: 32, 256>}]} {
    %c0 = arith.constant 0 : index
    %c0_0 = arith.constant 0 : index
    %0 = vector.load %arg1[%c0, %c0_0] : memref<32x576xbf16, #tpu.memory_space<vmem>>, vector<32x576xbf16>
    %c0_1 = arith.constant 0 : index
    %c0_2 = arith.constant 0 : index
    %1 = vector.load %arg2[%c0_1, %c0_2] : memref<576x256xbf16, #tpu.memory_space<vmem>>, vector<576x256xbf16>
    %cst = arith.constant dense<0.000000e+00> : vector<32x256xf32>
    %2 = tpu.matmul %0, %1, %cst {dimension_numbers = #tpu.dot_dimension_numbers<[1], [0], [0], [1], [0, 0, 1, 1], [], []>} : vector<32x576xbf16>, vector<576x256xbf16>, vector<32x256xf32> -> vector<32x256xf32>
    %c0_3 = arith.constant 0 : index
    %c0_4 = arith.constant 0 : index
    %3 = vector.load %arg3[%c0_3, %c0_4] : memref<1x256xf32, #tpu.memory_space<vmem>>, vector<1x256xf32>
    %4 = vector.broadcast %3 : vector<1x256xf32> to vector<32x256xf32>
    %5 = arith.addf %2, %4 : vector<32x256xf32>
    %6 = tpu.iota {dimensions = array<i32: 1>} : vector<32x256xi32>
    %c128_i32 = arith.constant 128 : i32
    %7 = vector.broadcast %c128_i32 : i32 to vector<32x256xi32>
    %8 = arith.cmpi slt, %6, %7 : vector<32x256xi32>
    %cst_5 = arith.constant 0.000000e+00 : f32
    %9 = vector.broadcast %cst_5 : f32 to vector<32x256xf32>
    %10 = arith.maximumf %5, %9 : vector<32x256xf32>
    %11 = arith.select %8, %10, %5 : vector<32x256xi1>, vector<32x256xf32>
    %12 = arith.truncf %11 : vector<32x256xf32> to vector<32x256xbf16>
    %c0_6 = arith.constant 0 : index
    %c0_7 = arith.constant 0 : index
    %13 = vector.load %arg4[%c0_6, %c0_7] : memref<32x256xbf16, #tpu.memory_space<vmem>>, vector<32x256xbf16>
    tpu.vector_store %arg4[%c0_6, %c0_7], %12 {strides = array<i32>} : memref<32x256xbf16, #tpu.memory_space<vmem>>, vector<32x256xbf16>,
    return
  }
  func.func @transform_0(%arg0: i32) -> (i32, i32) {
    %c0_i32 = arith.constant 0 : i32
    %c0_i32_0 = arith.constant 0 : i32
    return %arg0, %c0_i32 : i32, i32
  }
  func.func @transform_1(%arg0: i32) -> (i32, i32) {
    %c0_i32 = arith.constant 0 : i32
    %c0_i32_0 = arith.constant 0 : i32
    %c0_i32_1 = arith.constant 0 : i32
    return %c0_i32, %c0_i32_0 : i32, i32
  }
  func.func @transform_2(%arg0: i32) -> (i32, i32) {
    %c0_i32 = arith.constant 0 : i32
    %c0_i32_0 = arith.constant 0 : i32
    %c0_i32_1 = arith.constant 0 : i32
    return %c0_i32, %c0_i32_0 : i32, i32
  }
  func.func @transform_3(%arg0: i32) -> (i32, i32) {
    %c0_i32 = arith.constant 0 : i32
    %c0_i32_0 = arith.constant 0 : i32
    return %arg0, %c0_i32 : i32, i32
  }
}

module attributes {stable_mosaic.version = 11 : i64} {
  func.func @_fused_conv_kernel(%arg0: i32, %arg1: memref<32x1152xbf16, #tpu.memory_space<vmem>>, %arg2: memref<1152x128xbf16, #tpu.memory_space<vmem>>, %arg3: memref<1x128xf32, #tpu.memory_space<vmem>>, %arg4: memref<32x128xbf16, #tpu.memory_space<vmem>>, %arg5: memref<32x128xbf16, #tpu.memory_space<vmem>>) attributes {dimension_semantics = [#tpu.dimension_semantics<parallel>], iteration_bounds = array<i64: 1>, scalar_prefetch = 0 : i64, scratch_operands = 0 : i64, tpu.core_type = #tpu.core_type<tc>, window_params = [{transform_indices = @transform_0, window_bounds = array<i64: 32, 1152>}, {pipeline_mode = #tpu.pipeline_mode<synchronous>, transform_indices = @transform_1, window_bounds = array<i64: 1152, 128>}, {pipeline_mode = #tpu.pipeline_mode<synchronous>, transform_indices = @transform_2, window_bounds = array<i64: 1, 128>}, {transform_indices = @transform_3, window_bounds = array<i64: 32, 128>}, {transform_indices = @transform_4, window_bounds = array<i64: 32, 128>}]} {
    %c0 = arith.constant 0 : index
    %c0_0 = arith.constant 0 : index
    %0 = vector.load %arg1[%c0, %c0_0] : memref<32x1152xbf16, #tpu.memory_space<vmem>>, vector<32x1152xbf16>
    %c0_1 = arith.constant 0 : index
    %c0_2 = arith.constant 0 : index
    %1 = vector.load %arg2[%c0_1, %c0_2] : memref<1152x128xbf16, #tpu.memory_space<vmem>>, vector<1152x128xbf16>
    %cst = arith.constant dense<0.000000e+00> : vector<32x128xf32>
    %2 = tpu.matmul %0, %1, %cst {dimension_numbers = #tpu.dot_dimension_numbers<[1], [0], [0], [1], [0, 0, 1, 1], [], []>} : vector<32x1152xbf16>, vector<1152x128xbf16>, vector<32x128xf32> -> vector<32x128xf32>
    %c0_3 = arith.constant 0 : index
    %c0_4 = arith.constant 0 : index
    %3 = vector.load %arg3[%c0_3, %c0_4] : memref<1x128xf32, #tpu.memory_space<vmem>>, vector<1x128xf32>
    %4 = vector.broadcast %3 : vector<1x128xf32> to vector<32x128xf32>
    %5 = arith.addf %2, %4 : vector<32x128xf32>
    %c0_5 = arith.constant 0 : index
    %c0_6 = arith.constant 0 : index
    %6 = vector.load %arg4[%c0_5, %c0_6] : memref<32x128xbf16, #tpu.memory_space<vmem>>, vector<32x128xbf16>
    %7 = arith.extf %6 : vector<32x128xbf16> to vector<32x128xf32>
    %8 = arith.addf %5, %7 : vector<32x128xf32>
    %cst_7 = arith.constant 0.000000e+00 : f32
    %9 = vector.broadcast %cst_7 : f32 to vector<32x128xf32>
    %10 = arith.maximumf %8, %9 : vector<32x128xf32>
    %11 = arith.truncf %10 : vector<32x128xf32> to vector<32x128xbf16>
    %c0_8 = arith.constant 0 : index
    %c0_9 = arith.constant 0 : index
    %12 = vector.load %arg5[%c0_8, %c0_9] : memref<32x128xbf16, #tpu.memory_space<vmem>>, vector<32x128xbf16>
    tpu.vector_store %arg5[%c0_8, %c0_9], %11 {strides = array<i32>} : memref<32x128xbf16, #tpu.memory_space<vmem>>, vector<32x128xbf16>,
    return
  }
  func.func @transform_0(%arg0: i32) -> (i32, i32) {
    %c0_i32 = arith.constant 0 : i32
    %c0_i32_0 = arith.constant 0 : i32
    return %arg0, %c0_i32 : i32, i32
  }
  func.func @transform_1(%arg0: i32) -> (i32, i32) {
    %c0_i32 = arith.constant 0 : i32
    %c0_i32_0 = arith.constant 0 : i32
    %c0_i32_1 = arith.constant 0 : i32
    return %c0_i32, %c0_i32_0 : i32, i32
  }
  func.func @transform_2(%arg0: i32) -> (i32, i32) {
    %c0_i32 = arith.constant 0 : i32
    %c0_i32_0 = arith.constant 0 : i32
    %c0_i32_1 = arith.constant 0 : i32
    return %c0_i32, %c0_i32_0 : i32, i32
  }
  func.func @transform_3(%arg0: i32) -> (i32, i32) {
    %c0_i32 = arith.constant 0 : i32
    %c0_i32_0 = arith.constant 0 : i32
    return %arg0, %c0_i32 : i32, i32
  }
  func.func @transform_4(%arg0: i32) -> (i32, i32) {
    %c0_i32 = arith.constant 0 : i32
    %c0_i32_0 = arith.constant 0 : i32
    return %arg0, %c0_i32 : i32, i32
  }
}

module attributes {stable_mosaic.version = 11 : i64} {
  func.func @_fused_conv_kernel(%arg0: i32, %arg1: memref<32x1152xbf16, #tpu.memory_space<vmem>>, %arg2: memref<1152x128xbf16, #tpu.memory_space<vmem>>, %arg3: memref<1x128xf32, #tpu.memory_space<vmem>>, %arg4: memref<32x128xbf16, #tpu.memory_space<vmem>>) attributes {dimension_semantics = [#tpu.dimension_semantics<parallel>], iteration_bounds = array<i64: 1>, scalar_prefetch = 0 : i64, scratch_operands = 0 : i64, tpu.core_type = #tpu.core_type<tc>, window_params = [{transform_indices = @transform_0, window_bounds = array<i64: 32, 1152>}, {pipeline_mode = #tpu.pipeline_mode<synchronous>, transform_indices = @transform_1, window_bounds = array<i64: 1152, 128>}, {pipeline_mode = #tpu.pipeline_mode<synchronous>, transform_indices = @transform_2, window_bounds = array<i64: 1, 128>}, {transform_indices = @transform_3, window_bounds = array<i64: 32, 128>}]} {
    %c0 = arith.constant 0 : index
    %c0_0 = arith.constant 0 : index
    %0 = vector.load %arg1[%c0, %c0_0] : memref<32x1152xbf16, #tpu.memory_space<vmem>>, vector<32x1152xbf16>
    %c0_1 = arith.constant 0 : index
    %c0_2 = arith.constant 0 : index
    %1 = vector.load %arg2[%c0_1, %c0_2] : memref<1152x128xbf16, #tpu.memory_space<vmem>>, vector<1152x128xbf16>
    %cst = arith.constant dense<0.000000e+00> : vector<32x128xf32>
    %2 = tpu.matmul %0, %1, %cst {dimension_numbers = #tpu.dot_dimension_numbers<[1], [0], [0], [1], [0, 0, 1, 1], [], []>} : vector<32x1152xbf16>, vector<1152x128xbf16>, vector<32x128xf32> -> vector<32x128xf32>
    %c0_3 = arith.constant 0 : index
    %c0_4 = arith.constant 0 : index
    %3 = vector.load %arg3[%c0_3, %c0_4] : memref<1x128xf32, #tpu.memory_space<vmem>>, vector<1x128xf32>
    %4 = vector.broadcast %3 : vector<1x128xf32> to vector<32x128xf32>
    %5 = arith.addf %2, %4 : vector<32x128xf32>
    %cst_5 = arith.constant 0.000000e+00 : f32
    %6 = vector.broadcast %cst_5 : f32 to vector<32x128xf32>
    %7 = arith.maximumf %5, %6 : vector<32x128xf32>
    %8 = arith.truncf %7 : vector<32x128xf32> to vector<32x128xbf16>
    %c0_6 = arith.constant 0 : index
    %c0_7 = arith.constant 0 : index
    %9 = vector.load %arg4[%c0_6, %c0_7] : memref<32x128xbf16, #tpu.memory_space<vmem>>, vector<32x128xbf16>
    tpu.vector_store %arg4[%c0_6, %c0_7], %8 {strides = array<i32>} : memref<32x128xbf16, #tpu.memory_space<vmem>>, vector<32x128xbf16>,
    return
  }
  func.func @transform_0(%arg0: i32) -> (i32, i32) {
    %c0_i32 = arith.constant 0 : i32
    %c0_i32_0 = arith.constant 0 : i32
    return %arg0, %c0_i32 : i32, i32
  }
  func.func @transform_1(%arg0: i32) -> (i32, i32) {
    %c0_i32 = arith.constant 0 : i32
    %c0_i32_0 = arith.constant 0 : i32
    %c0_i32_1 = arith.constant 0 : i32
    return %c0_i32, %c0_i32_0 : i32, i32
  }
  func.func @transform_2(%arg0: i32) -> (i32, i32) {
    %c0_i32 = arith.constant 0 : i32
    %c0_i32_0 = arith.constant 0 : i32
    %c0_i32_1 = arith.constant 0 : i32
    return %c0_i32, %c0_i32_0 : i32, i32
  }
  func.func @transform_3(%arg0: i32) -> (i32, i32) {
    %c0_i32 = arith.constant 0 : i32
    %c0_i32_0 = arith.constant 0 : i32
    return %arg0, %c0_i32 : i32, i32
  }
}

module attributes {stable_mosaic.version = 11 : i64} {
  func.func @_fused_conv_kernel(%arg0: i32, %arg1: memref<8x1152xbf16, #tpu.memory_space<vmem>>, %arg2: memref<1152x512xbf16, #tpu.memory_space<vmem>>, %arg3: memref<1x512xf32, #tpu.memory_space<vmem>>, %arg4: memref<8x512xbf16, #tpu.memory_space<vmem>>) attributes {dimension_semantics = [#tpu.dimension_semantics<parallel>], iteration_bounds = array<i64: 1>, scalar_prefetch = 0 : i64, scratch_operands = 0 : i64, tpu.core_type = #tpu.core_type<tc>, window_params = [{transform_indices = @transform_0, window_bounds = array<i64: 8, 1152>}, {pipeline_mode = #tpu.pipeline_mode<synchronous>, transform_indices = @transform_1, window_bounds = array<i64: 1152, 512>}, {pipeline_mode = #tpu.pipeline_mode<synchronous>, transform_indices = @transform_2, window_bounds = array<i64: 1, 512>}, {transform_indices = @transform_3, window_bounds = array<i64: 8, 512>}]} {
    %c0 = arith.constant 0 : index
    %c0_0 = arith.constant 0 : index
    %0 = vector.load %arg1[%c0, %c0_0] : memref<8x1152xbf16, #tpu.memory_space<vmem>>, vector<8x1152xbf16>
    %c0_1 = arith.constant 0 : index
    %c0_2 = arith.constant 0 : index
    %1 = vector.load %arg2[%c0_1, %c0_2] : memref<1152x512xbf16, #tpu.memory_space<vmem>>, vector<1152x512xbf16>
    %cst = arith.constant dense<0.000000e+00> : vector<8x512xf32>
    %2 = tpu.matmul %0, %1, %cst {dimension_numbers = #tpu.dot_dimension_numbers<[1], [0], [0], [1], [0, 0, 1, 1], [], []>} : vector<8x1152xbf16>, vector<1152x512xbf16>, vector<8x512xf32> -> vector<8x512xf32>
    %c0_3 = arith.constant 0 : index
    %c0_4 = arith.constant 0 : index
    %3 = vector.load %arg3[%c0_3, %c0_4] : memref<1x512xf32, #tpu.memory_space<vmem>>, vector<1x512xf32>
    %4 = vector.broadcast %3 : vector<1x512xf32> to vector<8x512xf32>
    %5 = arith.addf %2, %4 : vector<8x512xf32>
    %6 = tpu.iota {dimensions = array<i32: 1>} : vector<8x512xi32>
    %c256_i32 = arith.constant 256 : i32
    %7 = vector.broadcast %c256_i32 : i32 to vector<8x512xi32>
    %8 = arith.cmpi slt, %6, %7 : vector<8x512xi32>
    %cst_5 = arith.constant 0.000000e+00 : f32
    %9 = vector.broadcast %cst_5 : f32 to vector<8x512xf32>
    %10 = arith.maximumf %5, %9 : vector<8x512xf32>
    %11 = arith.select %8, %10, %5 : vector<8x512xi1>, vector<8x512xf32>
    %12 = arith.truncf %11 : vector<8x512xf32> to vector<8x512xbf16>
    %c0_6 = arith.constant 0 : index
    %c0_7 = arith.constant 0 : index
    %13 = vector.load %arg4[%c0_6, %c0_7] : memref<8x512xbf16, #tpu.memory_space<vmem>>, vector<8x512xbf16>
    tpu.vector_store %arg4[%c0_6, %c0_7], %12 {strides = array<i32>} : memref<8x512xbf16, #tpu.memory_space<vmem>>, vector<8x512xbf16>,
    return
  }
  func.func @transform_0(%arg0: i32) -> (i32, i32) {
    %c0_i32 = arith.constant 0 : i32
    %c0_i32_0 = arith.constant 0 : i32
    return %arg0, %c0_i32 : i32, i32
  }
  func.func @transform_1(%arg0: i32) -> (i32, i32) {
    %c0_i32 = arith.constant 0 : i32
    %c0_i32_0 = arith.constant 0 : i32
    %c0_i32_1 = arith.constant 0 : i32
    return %c0_i32, %c0_i32_0 : i32, i32
  }
  func.func @transform_2(%arg0: i32) -> (i32, i32) {
    %c0_i32 = arith.constant 0 : i32
    %c0_i32_0 = arith.constant 0 : i32
    %c0_i32_1 = arith.constant 0 : i32
    return %c0_i32, %c0_i32_0 : i32, i32
  }
  func.func @transform_3(%arg0: i32) -> (i32, i32) {
    %c0_i32 = arith.constant 0 : i32
    %c0_i32_0 = arith.constant 0 : i32
    return %arg0, %c0_i32 : i32, i32
  }
}

module attributes {stable_mosaic.version = 11 : i64} {
  func.func @_fused_conv_kernel(%arg0: i32, %arg1: memref<8x2304xbf16, #tpu.memory_space<vmem>>, %arg2: memref<2304x256xbf16, #tpu.memory_space<vmem>>, %arg3: memref<1x256xf32, #tpu.memory_space<vmem>>, %arg4: memref<8x256xbf16, #tpu.memory_space<vmem>>, %arg5: memref<8x256xbf16, #tpu.memory_space<vmem>>) attributes {dimension_semantics = [#tpu.dimension_semantics<parallel>], iteration_bounds = array<i64: 1>, scalar_prefetch = 0 : i64, scratch_operands = 0 : i64, tpu.core_type = #tpu.core_type<tc>, window_params = [{transform_indices = @transform_0, window_bounds = array<i64: 8, 2304>}, {pipeline_mode = #tpu.pipeline_mode<synchronous>, transform_indices = @transform_1, window_bounds = array<i64: 2304, 256>}, {pipeline_mode = #tpu.pipeline_mode<synchronous>, transform_indices = @transform_2, window_bounds = array<i64: 1, 256>}, {transform_indices = @transform_3, window_bounds = array<i64: 8, 256>}, {transform_indices = @transform_4, window_bounds = array<i64: 8, 256>}]} {
    %c0 = arith.constant 0 : index
    %c0_0 = arith.constant 0 : index
    %0 = vector.load %arg1[%c0, %c0_0] : memref<8x2304xbf16, #tpu.memory_space<vmem>>, vector<8x2304xbf16>
    %c0_1 = arith.constant 0 : index
    %c0_2 = arith.constant 0 : index
    %1 = vector.load %arg2[%c0_1, %c0_2] : memref<2304x256xbf16, #tpu.memory_space<vmem>>, vector<2304x256xbf16>
    %cst = arith.constant dense<0.000000e+00> : vector<8x256xf32>
    %2 = tpu.matmul %0, %1, %cst {dimension_numbers = #tpu.dot_dimension_numbers<[1], [0], [0], [1], [0, 0, 1, 1], [], []>} : vector<8x2304xbf16>, vector<2304x256xbf16>, vector<8x256xf32> -> vector<8x256xf32>
    %c0_3 = arith.constant 0 : index
    %c0_4 = arith.constant 0 : index
    %3 = vector.load %arg3[%c0_3, %c0_4] : memref<1x256xf32, #tpu.memory_space<vmem>>, vector<1x256xf32>
    %4 = vector.broadcast %3 : vector<1x256xf32> to vector<8x256xf32>
    %5 = arith.addf %2, %4 : vector<8x256xf32>
    %c0_5 = arith.constant 0 : index
    %c0_6 = arith.constant 0 : index
    %6 = vector.load %arg4[%c0_5, %c0_6] : memref<8x256xbf16, #tpu.memory_space<vmem>>, vector<8x256xbf16>
    %7 = arith.extf %6 : vector<8x256xbf16> to vector<8x256xf32>
    %8 = arith.addf %5, %7 : vector<8x256xf32>
    %cst_7 = arith.constant 0.000000e+00 : f32
    %9 = vector.broadcast %cst_7 : f32 to vector<8x256xf32>
    %10 = arith.maximumf %8, %9 : vector<8x256xf32>
    %11 = arith.truncf %10 : vector<8x256xf32> to vector<8x256xbf16>
    %c0_8 = arith.constant 0 : index
    %c0_9 = arith.constant 0 : index
    %12 = vector.load %arg5[%c0_8, %c0_9] : memref<8x256xbf16, #tpu.memory_space<vmem>>, vector<8x256xbf16>
    tpu.vector_store %arg5[%c0_8, %c0_9], %11 {strides = array<i32>} : memref<8x256xbf16, #tpu.memory_space<vmem>>, vector<8x256xbf16>,
    return
  }
  func.func @transform_0(%arg0: i32) -> (i32, i32) {
    %c0_i32 = arith.constant 0 : i32
    %c0_i32_0 = arith.constant 0 : i32
    return %arg0, %c0_i32 : i32, i32
  }
  func.func @transform_1(%arg0: i32) -> (i32, i32) {
    %c0_i32 = arith.constant 0 : i32
    %c0_i32_0 = arith.constant 0 : i32
    %c0_i32_1 = arith.constant 0 : i32
    return %c0_i32, %c0_i32_0 : i32, i32
  }
  func.func @transform_2(%arg0: i32) -> (i32, i32) {
    %c0_i32 = arith.constant 0 : i32
    %c0_i32_0 = arith.constant 0 : i32
    %c0_i32_1 = arith.constant 0 : i32
    return %c0_i32, %c0_i32_0 : i32, i32
  }
  func.func @transform_3(%arg0: i32) -> (i32, i32) {
    %c0_i32 = arith.constant 0 : i32
    %c0_i32_0 = arith.constant 0 : i32
    return %arg0, %c0_i32 : i32, i32
  }
  func.func @transform_4(%arg0: i32) -> (i32, i32) {
    %c0_i32 = arith.constant 0 : i32
    %c0_i32_0 = arith.constant 0 : i32
    return %arg0, %c0_i32 : i32, i32
  }
}

module attributes {stable_mosaic.version = 11 : i64} {
  func.func @_fused_conv_kernel(%arg0: i32, %arg1: memref<8x2304xbf16, #tpu.memory_space<vmem>>, %arg2: memref<2304x256xbf16, #tpu.memory_space<vmem>>, %arg3: memref<1x256xf32, #tpu.memory_space<vmem>>, %arg4: memref<8x256xbf16, #tpu.memory_space<vmem>>) attributes {dimension_semantics = [#tpu.dimension_semantics<parallel>], iteration_bounds = array<i64: 1>, scalar_prefetch = 0 : i64, scratch_operands = 0 : i64, tpu.core_type = #tpu.core_type<tc>, window_params = [{transform_indices = @transform_0, window_bounds = array<i64: 8, 2304>}, {pipeline_mode = #tpu.pipeline_mode<synchronous>, transform_indices = @transform_1, window_bounds = array<i64: 2304, 256>}, {pipeline_mode = #tpu.pipeline_mode<synchronous>, transform_indices = @transform_2, window_bounds = array<i64: 1, 256>}, {transform_indices = @transform_3, window_bounds = array<i64: 8, 256>}]} {
    %c0 = arith.constant 0 : index
    %c0_0 = arith.constant 0 : index
    %0 = vector.load %arg1[%c0, %c0_0] : memref<8x2304xbf16, #tpu.memory_space<vmem>>, vector<8x2304xbf16>
    %c0_1 = arith.constant 0 : index
    %c0_2 = arith.constant 0 : index
    %1 = vector.load %arg2[%c0_1, %c0_2] : memref<2304x256xbf16, #tpu.memory_space<vmem>>, vector<2304x256xbf16>
    %cst = arith.constant dense<0.000000e+00> : vector<8x256xf32>
    %2 = tpu.matmul %0, %1, %cst {dimension_numbers = #tpu.dot_dimension_numbers<[1], [0], [0], [1], [0, 0, 1, 1], [], []>} : vector<8x2304xbf16>, vector<2304x256xbf16>, vector<8x256xf32> -> vector<8x256xf32>
    %c0_3 = arith.constant 0 : index
    %c0_4 = arith.constant 0 : index
    %3 = vector.load %arg3[%c0_3, %c0_4] : memref<1x256xf32, #tpu.memory_space<vmem>>, vector<1x256xf32>
    %4 = vector.broadcast %3 : vector<1x256xf32> to vector<8x256xf32>
    %5 = arith.addf %2, %4 : vector<8x256xf32>
    %cst_5 = arith.constant 0.000000e+00 : f32
    %6 = vector.broadcast %cst_5 : f32 to vector<8x256xf32>
    %7 = arith.maximumf %5, %6 : vector<8x256xf32>
    %8 = arith.truncf %7 : vector<8x256xf32> to vector<8x256xbf16>
    %c0_6 = arith.constant 0 : index
    %c0_7 = arith.constant 0 : index
    %9 = vector.load %arg4[%c0_6, %c0_7] : memref<8x256xbf16, #tpu.memory_space<vmem>>, vector<8x256xbf16>
    tpu.vector_store %arg4[%c0_6, %c0_7], %8 {strides = array<i32>} : memref<8x256xbf16, #tpu.memory_space<vmem>>, vector<8x256xbf16>,
    return
  }
  func.func @transform_0(%arg0: i32) -> (i32, i32) {
    %c0_i32 = arith.constant 0 : i32
    %c0_i32_0 = arith.constant 0 : i32
    return %arg0, %c0_i32 : i32, i32
  }
  func.func @transform_1(%arg0: i32) -> (i32, i32) {
    %c0_i32 = arith.constant 0 : i32
    %c0_i32_0 = arith.constant 0 : i32
    %c0_i32_1 = arith.constant 0 : i32
    return %c0_i32, %c0_i32_0 : i32, i32
  }
  func.func @transform_2(%arg0: i32) -> (i32, i32) {
    %c0_i32 = arith.constant 0 : i32
    %c0_i32_0 = arith.constant 0 : i32
    %c0_i32_1 = arith.constant 0 : i32
    return %c0_i32, %c0_i32_0 : i32, i32
  }
  func.func @transform_3(%arg0: i32) -> (i32, i32) {
    %c0_i32 = arith.constant 0 : i32
    %c0_i32_0 = arith.constant 0 : i32
    return %arg0, %c0_i32 : i32, i32
  }
}

module attributes {stable_mosaic.version = 11 : i64} {
  func.func @_fused_conv_kernel(%arg0: i32, %arg1: memref<8x2304xbf16, #tpu.memory_space<vmem>>, %arg2: memref<2304x256xbf16, #tpu.memory_space<vmem>>, %arg3: memref<1x256xf32, #tpu.memory_space<vmem>>, %arg4: memref<8x256xbf16, #tpu.memory_space<vmem>>, %arg5: memref<2x8xf32, #tpu.memory_space<vmem>>, %arg6: memref<2x256xf32, #tpu.memory_space<vmem>>) attributes {dimension_semantics = [#tpu.dimension_semantics<parallel>], iteration_bounds = array<i64: 1>, scalar_prefetch = 0 : i64, scratch_operands = 0 : i64, tpu.core_type = #tpu.core_type<tc>, window_params = [{transform_indices = @transform_0, window_bounds = array<i64: 8, 2304>}, {pipeline_mode = #tpu.pipeline_mode<synchronous>, transform_indices = @transform_1, window_bounds = array<i64: 2304, 256>}, {pipeline_mode = #tpu.pipeline_mode<synchronous>, transform_indices = @transform_2, window_bounds = array<i64: 1, 256>}, {transform_indices = @transform_3, window_bounds = array<i64: 8, 256>}, {pipeline_mode = #tpu.pipeline_mode<synchronous>, transform_indices = @transform_4, window_bounds = array<i64: 2, 8>}, {pipeline_mode = #tpu.pipeline_mode<synchronous>, transform_indices = @transform_5, window_bounds = array<i64: 2, 256>}]} {
    %c0 = arith.constant 0 : index
    %c0_0 = arith.constant 0 : index
    %0 = vector.load %arg1[%c0, %c0_0] : memref<8x2304xbf16, #tpu.memory_space<vmem>>, vector<8x2304xbf16>
    %c0_1 = arith.constant 0 : index
    %c0_2 = arith.constant 0 : index
    %1 = vector.load %arg2[%c0_1, %c0_2] : memref<2304x256xbf16, #tpu.memory_space<vmem>>, vector<2304x256xbf16>
    %cst = arith.constant dense<0.000000e+00> : vector<8x256xf32>
    %2 = tpu.matmul %0, %1, %cst {dimension_numbers = #tpu.dot_dimension_numbers<[1], [0], [0], [1], [0, 0, 1, 1], [], []>} : vector<8x2304xbf16>, vector<2304x256xbf16>, vector<8x256xf32> -> vector<8x256xf32>
    %c0_3 = arith.constant 0 : index
    %c0_4 = arith.constant 0 : index
    %3 = vector.load %arg3[%c0_3, %c0_4] : memref<1x256xf32, #tpu.memory_space<vmem>>, vector<1x256xf32>
    %4 = vector.broadcast %3 : vector<1x256xf32> to vector<8x256xf32>
    %5 = arith.addf %2, %4 : vector<8x256xf32>
    %c0_5 = arith.constant 0 : index
    %c0_6 = arith.constant 0 : index
    %6 = vector.load %arg4[%c0_5, %c0_6] : memref<8x256xbf16, #tpu.memory_space<vmem>>, vector<8x256xbf16>
    %7 = arith.extf %6 : vector<8x256xbf16> to vector<8x256xf32>
    %8 = arith.addf %5, %7 : vector<8x256xf32>
    %c0_7 = arith.constant 0 : index
    %c0_8 = arith.constant 0 : index
    %9 = vector.load %arg5[%c0_7, %c0_8] : memref<2x8xf32, #tpu.memory_space<vmem>>, vector<2x8xf32>
    %cst_9 = arith.constant dense<0.000000e+00> : vector<2x256xf32>
    %10 = tpu.matmul %9, %8, %cst_9 {dimension_numbers = #tpu.dot_dimension_numbers<[1], [0], [0], [1], [0, 0, 1, 1], [], []>} : vector<2x8xf32>, vector<8x256xf32>, vector<2x256xf32> -> vector<2x256xf32>
    %c0_10 = arith.constant 0 : index
    %c0_11 = arith.constant 0 : index
    %11 = vector.load %arg6[%c0_10, %c0_11] : memref<2x256xf32, #tpu.memory_space<vmem>>, vector<2x256xf32>
    tpu.vector_store %arg6[%c0_10, %c0_11], %10 {strides = array<i32>} : memref<2x256xf32, #tpu.memory_space<vmem>>, vector<2x256xf32>,
    return
  }
  func.func @transform_0(%arg0: i32) -> (i32, i32) {
    %c0_i32 = arith.constant 0 : i32
    %c0_i32_0 = arith.constant 0 : i32
    return %arg0, %c0_i32 : i32, i32
  }
  func.func @transform_1(%arg0: i32) -> (i32, i32) {
    %c0_i32 = arith.constant 0 : i32
    %c0_i32_0 = arith.constant 0 : i32
    %c0_i32_1 = arith.constant 0 : i32
    return %c0_i32, %c0_i32_0 : i32, i32
  }
  func.func @transform_2(%arg0: i32) -> (i32, i32) {
    %c0_i32 = arith.constant 0 : i32
    %c0_i32_0 = arith.constant 0 : i32
    %c0_i32_1 = arith.constant 0 : i32
    return %c0_i32, %c0_i32_0 : i32, i32
  }
  func.func @transform_3(%arg0: i32) -> (i32, i32) {
    %c0_i32 = arith.constant 0 : i32
    %c0_i32_0 = arith.constant 0 : i32
    return %arg0, %c0_i32 : i32, i32
  }
  func.func @transform_4(%arg0: i32) -> (i32, i32) {
    %c0_i32 = arith.constant 0 : i32
    %c0_i32_0 = arith.constant 0 : i32
    %c0_i32_1 = arith.constant 0 : i32
    return %c0_i32, %c0_i32_0 : i32, i32
  }
  func.func @transform_5(%arg0: i32) -> (i32, i32) {
    %c0_i32 = arith.constant 0 : i32
    %c0_i32_0 = arith.constant 0 : i32
    %c0_i32_1 = arith.constant 0 : i32
    return %c0_i32, %c0_i32_0 : i32, i32
  }
}

</mosaic_0001>

<bundles_post_ra>
// kernel: _lambda_.13
= control target key start
LH: loop header
LB: loop body
LE: loop exit
PB: predicated region body
PF: predicated region fallthrough
CT: control target
= control target key end

     0   :  { %8 = vsyncpa [#allocation3], 0  ;;  %s1070_s12 = smov 0   ;;  %s1276_s0 = inlined_call_operand.vmem [shape: bf16[512,27], index: 0, kind: input, shape index: {}]   ;;  %s1277_s1 = inlined_call_operand.vmem [shape: bf16[27,16], index: 1, kind: input, shape index: {}]   ;;  %s1278_s2 = inlined_call_operand.hbm [shape: f32[1,16], index: 2, kind: input, shape index: {}]   ;;  %s1279_s3 = inlined_call_operand.vmem [shape: bf16[512,16], index: 3, kind: output, shape index: {}]  }
   0x1 LB: > { %s800_s13 = sadd.s32 4294967295, %s1046_s12   ;;  %p802_p0 = scmp.ge.s32.totalorder %s1046_s12, 1  ;;  %s1046_s12 = sphi %s1070_s12, %s14_s12  }
   0x2   : > { %p113_p1 = scmp.lt.s32.totalorder %s1046_s12, 3  ;;  %p1084_p3 = scmp.eq.s32.totalorder %s800_s13, 0 }
   0x3   : > { %s1048_s16 = smov [#allocation2]   ;;  %s1008_s21 = scalar_lea.hbm %s1278_s2, 16 }
   0x4   : > { %p1078_p2 = pnand %p802_p0, %p113_p1  ;;  %s129_s17 = sshll.u32 %s1048_s16, 4  ;;  %s130_s17 = int_to_ptr.vmem [resolvable:$true] %s129_s17 }
   0x5   : > { %s1284_s15 = scalar_select %p1084_p3, 1, 0 }
   0x6   : > { %s1283_s14 = scalar_select %p1078_p2, 1, 0 }
   0x7   : > { %p974_p4 = pneg %p1078_p2  ;;  %p1009_p6 = scmp.ne.s32.totalorder %s1278_s2, %s1008_s21 }
   0x8   : > { %p1015_p10 = scmp.lt.u32.totalorder %s1008_s21, %s1278_s2 }
   0x9   : > { %p1092_p5 = pnand %p1084_p3, %p974_p4 }
   0xb   : > { %p1010_p7 = pneg %p1092_p5 }
   0xd   : > { %p1011_p8 = pnand %p1010_p7, %p1009_p6 }
   0xf   : > { %p1012_p9 = pneg %p1011_p8 }
  0x11   : > { %p1017_p11 = pnand %p1015_p10, %p1012_p9 }
  0x13   : > { %1020 = shalt.err (!%p1017_p11)
}
  0x14   : > { %s1021_s26 = scalar_lea.vmem %s130_s17, 16  ;;  %s1028_s27 = scalar_lea.vmem %s130_s17, 32 }
  0x15   : > { %p1022_p12 = scmp.ne.s32.totalorder %s130_s17, %s1021_s26  ;;  %p1029_p1 = scmp.lt.s32.totalorder %s130_s17, %s130_s17 }
  0x16   : > { %p1030_p4 = scmp.lt.s32.totalorder %s1028_s27, %s1021_s26 }
  0x17   : > { %p1024_p13 = pnand %p1022_p12, %p1010_p7 }
  0x18   : > { %p1031_p3 = por %p1030_p4, %p1029_p1 }
  0x19   : > { %p1025_p0 = pneg %p1024_p13 }
  0x1b   : > { %p1032_p2 = pnand %p1031_p3, %p1025_p0 }
  0x1d   : > { %1035 = shalt.err (!%p1032_p2)
}
  0x1e   : > { %977 = dma.hbm_to_vmem [thread:$0]  (!%p1092_p5), %s1278_s2, 16, %s130_s17, [#allocation3]  }
  0x1f   : > { %p1286_p6 = scmp.ne.s32.totalorder %s1283_s14, 0 }
  0x20   : > { %p1287_p8 = scmp.ne.s32.totalorder (!%p1286_p6), %s1284_s15, 0 }
  0x21   : > { %151 = sbr.rel (%p1286_p6) target bundleno = 298 (0x12a), region = 32 }
  0x28   : > { %1041 = dma.done.wait (%p1287_p8), [#allocation3], 16  }
  0x29   : > { %1043 = vsyncadd (%p1287_p8), [#allocation3], 4294967280  ;;  %s807_s30 = sshll.u32 %s800_s13, 5  ;;  %vm371_vm0 = vcmask 1044480   ;;  %vm372_vm1 = vcmask 1045504   ;;  %v1049_v0 = vmov 65535  }
  0x2a   : > { %p176_p2 = scmp.lt.s32.totalorder %s807_s30, 63  ;;  %v373_v1 = vsel %vm371_vm0, 4294967295, %v1049_v0  ;;  %vm322_vm2 = vcmask 220160   ;;  %v990_v2 = vld [vmem:[%s1277_s1] sm:$0xff]   ;;  %v991_v4 = vld [vmem:[%s1277_s1 + $0x8] sm:$0x3f]  }
  0x2b   : > { %v374_v3 = vsel %vm372_vm1, %v373_v1, 0  ;;  %930 = vmatprep.subr.bf16.mxu0 %v990_v2  ;;  %966 = vmatprep.subr.bf16.mxu1 %v990_v2  ;;  %v1168_v22 = vld [vmem:[#allocation2] ss:$0 sm:$0xff]  ;;  %vm699_vm3 = vcmask 125952  }
  0x2c   : > { %s1289_s30 = smov (!%p176_p2, %s807_s30), 63  ;;  %931 = vmatpush3.bf16.msra.mxu0 %v990_v2  ;;  %968 = vmatpush3.bf16.msra.mxu1 %v990_v2  ;;  %v376_v6 = vand.u32 %v991_v4, %v374_v3 }
  0x2d   : > { %s808_s4 = sshll.u32 %s1289_s30, 2 }
  0x2e   : > { %s1128_s7 = scalar_lea.vmem %s1276_s0, %s808_s4  ;;  %932 = vmatprep.subr.bf16.mxu0 %v376_v6  ;;  %967 = vmatprep.subr.bf16.mxu1 %v376_v6  ;;  %s1181_s15 = scalar_lea.vmem %s1279_s3, %s808_s4 }
  0x2f   : > { %v992_v5 = vld [vmem:[%s1128_s7] sm:$0xff]   ;;  %v994_v8 = vld [vmem:[%s1128_s7 + $0x8] sm:$0xff]   ;;  %v996_v10 = vld [vmem:[%s1128_s7 + $0x10] sm:$0xff]  }
  0x30   : > { %v993_v7 = vld [vmem:[%s1128_s7 + $0x40] sm:$0xff]   ;;  %934 = vmatprep.mubr.msk.bf16.mxu0 %vm322_vm2, %v992_v5  ;;  %v995_v9 = vld [vmem:[%s1128_s7 + $0x48] sm:$0xff]   ;;  %933 = vmatpush3.bf16.msra.mxu0 %v376_v6  ;;  %v997_v11 = vld [vmem:[%s1128_s7 + $0x50] sm:$0xff]  }
  0x31   : > { %950 = vmatprep.mubr.msk.bf16.mxu1 %vm322_vm2, %v993_v7  ;;  %969 = vmatpush3.bf16.msra.mxu1 %v376_v6  ;;  %v998_v12 = vld [vmem:[%s1128_s7 + $0x18] sm:$0xff]   ;;  %v1000_v14 = vld [vmem:[%s1128_s7 + $0x20] sm:$0xff]   ;;  %v1002_v16 = vld [vmem:[%s1128_s7 + $0x28] sm:$0xff]  }
  0x32   : > { %v999_v13 = vld [vmem:[%s1128_s7 + $0x58] sm:$0xff]   ;;  %v1001_v15 = vld [vmem:[%s1128_s7 + $0x60] sm:$0xff]   ;;  %v1003_v17 = vld [vmem:[%s1128_s7 + $0x68] sm:$0xff]  }
  0x33   : > { %935 = vmatmul.mubr.msk.bf16.vlgmr.msra.gmra.mrb[0].mxu0 %vm322_vm2, %v994_v8  ;;  %v1004_v18 = vld [vmem:[%s1128_s7 + $0x30] sm:$0xff]   ;;  %v1006_v20 = vld [vmem:[%s1128_s7 + $0x38] sm:$0xff]  }
  0x34   : > { %951 = vmatmul.mubr.msk.bf16.vlgmr.msra.gmra.mrb[0].mxu1 %vm322_vm2, %v995_v9  ;;  %938 = vmatprep.mubr.msk.bf16.mxu0 %vm322_vm2, %v996_v10  ;;  %v1005_v19 = vld [vmem:[%s1128_s7 + $0x70] sm:$0xff]   ;;  %v1007_v21 = vld [vmem:[%s1128_s7 + $0x78] sm:$0xff]  }
  0x35   : > { %954 = vmatprep.mubr.msk.bf16.mxu1 %vm322_vm2, %v997_v11 }
  0x3b   : > { %939 = vmatmul.mubr.msk.bf16.gmra.mrb[4].mxu0 %vm322_vm2, %v998_v12 }
  0x3c   : > { %955 = vmatmul.mubr.msk.bf16.gmra.mrb[4].mxu1 %vm322_vm2, %v999_v13  ;;  %942 = vmatprep.mubr.msk.bf16.mxu0 %vm322_vm2, %v1000_v14 }
  0x3d   : > { %958 = vmatprep.mubr.msk.bf16.mxu1 %vm322_vm2, %v1001_v15 }
  0x43   : > { %943 = vmatmul.mubr.msk.bf16.gmra.mrb[8].mxu0 %vm322_vm2, %v1002_v16 }
  0x44   : > { %959 = vmatmul.mubr.msk.bf16.gmra.mrb[8].mxu1 %vm322_vm2, %v1003_v17  ;;  %946 = vmatprep.mubr.msk.bf16.mxu0 %vm322_vm2, %v1004_v18 }
  0x45   : > { %962 = vmatprep.mubr.msk.bf16.mxu1 %vm322_vm2, %v1005_v19 }
  0x4b   : > { %947 = vmatmul.mubr.msk.bf16.gmra.mrb[12].mxu0 %vm322_vm2, %v1006_v20 }
  0x4c   : > { %963 = vmatmul.mubr.msk.bf16.gmra.mrb[12].mxu1 %vm322_vm2, %v1007_v21 }
 0x106   : > { %v936_v23 = vpop.f32.mrb[0].mxu0 }
 0x107   : > { %v952_v24 = vpop.f32.mrb[0].mxu1  ;;  %v421_v25 = vadd.f32 %v936_v23, %v1168_v22  ;;  %v412_v27 = vpop.f32.mrb[1].mxu0 }
 0x108   : > { %v485_v26 = vadd.f32 %v952_v24, %v1168_v22  ;;  %v476_v28 = vpop.f32.mrb[1].mxu1  ;;  %v413_v29 = vadd.f32 %v1168_v22, %v412_v27  ;;  %v937_v31 = vpop.f32.mrb[2].mxu0 }
 0x109   : > { %v477_v30 = vadd.f32 %v1168_v22, %v476_v28  ;;  %v953_v32 = vpop.f32.mrb[2].mxu1  ;;  %v541_v33 = vmax.f32 %v421_v25, 0.0  ;;  %v424_v35 = vadd.f32 %v937_v31, %v1168_v22  ;;  %v415_v37 = vpop.f32.mrb[3].mxu0 }
 0x10a   : > { %v557_v34 = vmax.f32 %v485_v26, 0.0  ;;  %v488_v36 = vadd.f32 %v953_v32, %v1168_v22  ;;  %v479_v38 = vpop.f32.mrb[3].mxu1  ;;  %v539_v39 = vmax.f32 %v413_v29, 0.0  ;;  %v416_v41 = vadd.f32 %v1168_v22, %v415_v37 }
 0x10b   : > { %v555_v40 = vmax.f32 %v477_v30, 0.0  ;;  %v480_v42 = vadd.f32 %v1168_v22, %v479_v38  ;;  %v882_v43 = vpack.c.bf16 %v541_v33, %v541_v33  ;;  %v542_v45 = vmax.f32 %v424_v35, 0.0 }
 0x10c   : > { %v898_v44 = vpack.c.bf16 %v557_v34, %v557_v34  ;;  %v558_v46 = vmax.f32 %v488_v36, 0.0  ;;  %v880_v47 = vpack.c.bf16 %v539_v39, %v539_v39  ;;  %v540_v49 = vmax.f32 %v416_v41, 0.0 }
 0x10d   : > { %v896_v48 = vpack.c.bf16 %v555_v40, %v555_v40  ;;  %v556_v50 = vmax.f32 %v480_v42, 0.0  ;;  %702 = vst.msk [vmem:[%s1181_s15 + $0x8] sm:$0xf] %vm699_vm3, %v882_v43  ;;  %v883_v51 = vpack.c.bf16 %v542_v45, %v542_v45 }
 0x10e   : > { %718 = vst.msk [vmem:[%s1181_s15 + $0x48] sm:$0xf] %vm699_vm3, %v898_v44  ;;  %v899_v52 = vpack.c.bf16 %v558_v46, %v558_v46  ;;  %700 = vst.msk [vmem:[%s1181_s15] sm:$0xf] %vm699_vm3, %v880_v47  ;;  %v881_v53 = vpack.c.bf16 %v540_v49, %v540_v49  ;;  %v940_v55 = vpop.f32.mrb[4].mxu0 }
 0x10f   : > { %716 = vst.msk [vmem:[%s1181_s15 + $0x40] sm:$0xf] %vm699_vm3, %v896_v48  ;;  %v897_v54 = vpack.c.bf16 %v556_v50, %v556_v50  ;;  %v956_v56 = vpop.f32.mrb[4].mxu1  ;;  %703 = vst.msk [vmem:[%s1181_s15 + $0xc] sm:$0xf] %vm699_vm3, %v883_v51  ;;  %v437_v57 = vadd.f32 %v940_v55, %v1168_v22  ;;  %v428_v59 = vpop.f32.mrb[5].mxu0 }
 0x110   : > { %719 = vst.msk [vmem:[%s1181_s15 + $0x4c] sm:$0xf] %vm699_vm3, %v899_v52  ;;  %v501_v58 = vadd.f32 %v956_v56, %v1168_v22  ;;  %v492_v60 = vpop.f32.mrb[5].mxu1  ;;  %701 = vst.msk [vmem:[%s1181_s15 + $0x4] sm:$0xf] %vm699_vm3, %v881_v53  ;;  %v429_v61 = vadd.f32 %v1168_v22, %v428_v59  ;;  %v941_v63 = vpop.f32.mrb[6].mxu0 }
 0x111   : > { %717 = vst.msk [vmem:[%s1181_s15 + $0x44] sm:$0xf] %vm699_vm3, %v897_v54  ;;  %v493_v62 = vadd.f32 %v1168_v22, %v492_v60  ;;  %v957_v0 = vpop.f32.mrb[6].mxu1  ;;  %v545_v1 = vmax.f32 %v437_v57, 0.0  ;;  %v440_v3 = vadd.f32 %v941_v63, %v1168_v22  ;;  %v431_v5 = vpop.f32.mrb[7].mxu0 }
 0x112   : > { %v561_v2 = vmax.f32 %v501_v58, 0.0  ;;  %v504_v4 = vadd.f32 %v957_v0, %v1168_v22  ;;  %v495_v6 = vpop.f32.mrb[7].mxu1  ;;  %v543_v7 = vmax.f32 %v429_v61, 0.0  ;;  %v432_v9 = vadd.f32 %v1168_v22, %v431_v5 }
 0x113   : > { %v559_v8 = vmax.f32 %v493_v62, 0.0  ;;  %v496_v10 = vadd.f32 %v1168_v22, %v495_v6  ;;  %v886_v11 = vpack.c.bf16 %v545_v1, %v545_v1  ;;  %v546_v13 = vmax.f32 %v440_v3, 0.0 }
 0x114   : > { %v902_v12 = vpack.c.bf16 %v561_v2, %v561_v2  ;;  %v562_v14 = vmax.f32 %v504_v4, 0.0  ;;  %v884_v15 = vpack.c.bf16 %v543_v7, %v543_v7  ;;  %v544_v17 = vmax.f32 %v432_v9, 0.0 }
 0x115   : > { %v900_v16 = vpack.c.bf16 %v559_v8, %v559_v8  ;;  %v560_v18 = vmax.f32 %v496_v10, 0.0  ;;  %706 = vst.msk [vmem:[%s1181_s15 + $0x18] sm:$0xf] %vm699_vm3, %v886_v11  ;;  %v887_v19 = vpack.c.bf16 %v546_v13, %v546_v13 }
 0x116   : > { %722 = vst.msk [vmem:[%s1181_s15 + $0x58] sm:$0xf] %vm699_vm3, %v902_v12  ;;  %v903_v20 = vpack.c.bf16 %v562_v14, %v562_v14  ;;  %704 = vst.msk [vmem:[%s1181_s15 + $0x10] sm:$0xf] %vm699_vm3, %v884_v15  ;;  %v885_v21 = vpack.c.bf16 %v544_v17, %v544_v17  ;;  %v944_v24 = vpop.f32.mrb[8].mxu0 }
 0x117   : > { %720 = vst.msk [vmem:[%s1181_s15 + $0x50] sm:$0xf] %vm699_vm3, %v900_v16  ;;  %v901_v23 = vpack.c.bf16 %v560_v18, %v560_v18  ;;  %v960_v25 = vpop.f32.mrb[8].mxu1  ;;  %707 = vst.msk [vmem:[%s1181_s15 + $0x1c] sm:$0xf] %vm699_vm3, %v887_v19  ;;  %v453_v26 = vadd.f32 %v944_v24, %v1168_v22  ;;  %v444_v28 = vpop.f32.mrb[9].mxu0 }
 0x118   : > { %723 = vst.msk [vmem:[%s1181_s15 + $0x5c] sm:$0xf] %vm699_vm3, %v903_v20  ;;  %v517_v27 = vadd.f32 %v960_v25, %v1168_v22  ;;  %v508_v29 = vpop.f32.mrb[9].mxu1  ;;  %705 = vst.msk [vmem:[%s1181_s15 + $0x14] sm:$0xf] %vm699_vm3, %v885_v21  ;;  %v445_v30 = vadd.f32 %v1168_v22, %v444_v28  ;;  %v945_v32 = vpop.f32.mrb[10].mxu0 }
 0x119   : > { %721 = vst.msk [vmem:[%s1181_s15 + $0x54] sm:$0xf] %vm699_vm3, %v901_v23  ;;  %v509_v31 = vadd.f32 %v1168_v22, %v508_v29  ;;  %v961_v33 = vpop.f32.mrb[10].mxu1  ;;  %v549_v34 = vmax.f32 %v453_v26, 0.0  ;;  %v456_v36 = vadd.f32 %v945_v32, %v1168_v22  ;;  %v447_v38 = vpop.f32.mrb[11].mxu0 }
 0x11a   : > { %v565_v35 = vmax.f32 %v517_v27, 0.0  ;;  %v520_v37 = vadd.f32 %v961_v33, %v1168_v22  ;;  %v511_v39 = vpop.f32.mrb[11].mxu1  ;;  %v547_v40 = vmax.f32 %v445_v30, 0.0  ;;  %v448_v42 = vadd.f32 %v1168_v22, %v447_v38 }
 0x11b   : > { %v563_v41 = vmax.f32 %v509_v31, 0.0  ;;  %v512_v43 = vadd.f32 %v1168_v22, %v511_v39  ;;  %v890_v44 = vpack.c.bf16 %v549_v34, %v549_v34  ;;  %v550_v46 = vmax.f32 %v456_v36, 0.0 }
 0x11c   : > { %v906_v45 = vpack.c.bf16 %v565_v35, %v565_v35  ;;  %v566_v47 = vmax.f32 %v520_v37, 0.0  ;;  %v888_v48 = vpack.c.bf16 %v547_v40, %v547_v40  ;;  %v548_v50 = vmax.f32 %v448_v42, 0.0 }
 0x11d   : > { %v904_v49 = vpack.c.bf16 %v563_v41, %v563_v41  ;;  %v564_v51 = vmax.f32 %v512_v43, 0.0  ;;  %710 = vst.msk [vmem:[%s1181_s15 + $0x28] sm:$0xf] %vm699_vm3, %v890_v44  ;;  %v891_v52 = vpack.c.bf16 %v550_v46, %v550_v46 }
 0x11e   : > { %726 = vst.msk [vmem:[%s1181_s15 + $0x68] sm:$0xf] %vm699_vm3, %v906_v45  ;;  %v907_v53 = vpack.c.bf16 %v566_v47, %v566_v47  ;;  %708 = vst.msk [vmem:[%s1181_s15 + $0x20] sm:$0xf] %vm699_vm3, %v888_v48  ;;  %v889_v54 = vpack.c.bf16 %v548_v50, %v548_v50  ;;  %v948_v56 = vpop.f32.mrb[12].mxu0 }
 0x11f   : > { %724 = vst.msk [vmem:[%s1181_s15 + $0x60] sm:$0xf] %vm699_vm3, %v904_v49  ;;  %v905_v55 = vpack.c.bf16 %v564_v51, %v564_v51  ;;  %v964_v57 = vpop.f32.mrb[12].mxu1  ;;  %711 = vst.msk [vmem:[%s1181_s15 + $0x2c] sm:$0xf] %vm699_vm3, %v891_v52  ;;  %v469_v58 = vadd.f32 %v948_v56, %v1168_v22  ;;  %v460_v60 = vpop.f32.mrb[13].mxu0 }
 0x120   : > { %727 = vst.msk [vmem:[%s1181_s15 + $0x6c] sm:$0xf] %vm699_vm3, %v907_v53  ;;  %v533_v59 = vadd.f32 %v964_v57, %v1168_v22  ;;  %v524_v61 = vpop.f32.mrb[13].mxu1  ;;  %709 = vst.msk [vmem:[%s1181_s15 + $0x24] sm:$0xf] %vm699_vm3, %v889_v54  ;;  %v461_v62 = vadd.f32 %v1168_v22, %v460_v60  ;;  %v949_v0 = vpop.f32.mrb[14].mxu0 }
 0x121   : > { %725 = vst.msk [vmem:[%s1181_s15 + $0x64] sm:$0xf] %vm699_vm3, %v905_v55  ;;  %v525_v63 = vadd.f32 %v1168_v22, %v524_v61  ;;  %v965_v1 = vpop.f32.mrb[14].mxu1  ;;  %v553_v2 = vmax.f32 %v469_v58, 0.0  ;;  %v472_v4 = vadd.f32 %v949_v0, %v1168_v22  ;;  %v463_v6 = vpop.f32.mrb[15].mxu0 }
 0x122   : > { %v569_v3 = vmax.f32 %v533_v59, 0.0  ;;  %v536_v5 = vadd.f32 %v965_v1, %v1168_v22  ;;  %v527_v7 = vpop.f32.mrb[15].mxu1  ;;  %v551_v8 = vmax.f32 %v461_v62, 0.0  ;;  %v464_v10 = vadd.f32 %v1168_v22, %v463_v6 }
 0x123   : > { %v567_v9 = vmax.f32 %v525_v63, 0.0  ;;  %v528_v11 = vadd.f32 %v1168_v22, %v527_v7  ;;  %v894_v12 = vpack.c.bf16 %v553_v2, %v553_v2  ;;  %v554_v14 = vmax.f32 %v472_v4, 0.0 }
 0x124   : > { %v910_v13 = vpack.c.bf16 %v569_v3, %v569_v3  ;;  %v570_v15 = vmax.f32 %v536_v5, 0.0  ;;  %v892_v16 = vpack.c.bf16 %v551_v8, %v551_v8  ;;  %v552_v18 = vmax.f32 %v464_v10, 0.0 }
 0x125   : > { %v908_v17 = vpack.c.bf16 %v567_v9, %v567_v9  ;;  %v568_v19 = vmax.f32 %v528_v11, 0.0  ;;  %714 = vst.msk [vmem:[%s1181_s15 + $0x38] sm:$0xf] %vm699_vm3, %v894_v12  ;;  %v895_v20 = vpack.c.bf16 %v554_v14, %v554_v14 }
 0x126   : > { %730 = vst.msk [vmem:[%s1181_s15 + $0x78] sm:$0xf] %vm699_vm3, %v910_v13  ;;  %v911_v21 = vpack.c.bf16 %v570_v15, %v570_v15  ;;  %712 = vst.msk [vmem:[%s1181_s15 + $0x30] sm:$0xf] %vm699_vm3, %v892_v16  ;;  %v893_v22 = vpack.c.bf16 %v552_v18, %v552_v18 }
 0x127   : > { %728 = vst.msk [vmem:[%s1181_s15 + $0x70] sm:$0xf] %vm699_vm3, %v908_v17  ;;  %v909_v23 = vpack.c.bf16 %v568_v19, %v568_v19  ;;  %715 = vst.msk [vmem:[%s1181_s15 + $0x3c] sm:$0xf] %vm699_vm3, %v895_v20 }
 0x128   : > { %731 = vst.msk [vmem:[%s1181_s15 + $0x7c] sm:$0xf] %vm699_vm3, %v911_v21  ;;  %713 = vst.msk [vmem:[%s1181_s15 + $0x34] sm:$0xf] %vm699_vm3, %v893_v22 }
 0x129   : > { %729 = vst.msk [vmem:[%s1181_s15 + $0x74] sm:$0xf] %vm699_vm3, %v909_v23 }
 0x12a PF: > { %s14_s12 = sadd.s32 1, %s1046_s12  }
 0x12b   : > { %p11_p3 = scmp.ge.s32.totalorder %s14_s12, 4  }
 0x12d   :  { %13 = sbr.rel (!%p11_p3) target bundleno = 1 (0x1), region = 67 }
 0x134   :  { %754 = vsyncpa [#allocation3], 1 }
 0x135   :  { %756 = vsyncpa [#allocation3 + $0x1], 1 }

// kernel: _lambda_.14
= control target key start
LH: loop header
LB: loop body
LE: loop exit
PB: predicated region body
PF: predicated region fallthrough
CT: control target
= control target key end

     0   :  { %v588_v0 = vmov 0   ;;  %vm182_vm0 = vcmask 130048   ;;  %v304_v26 = vlaneseq  ;;  %s772_s1 = inlined_call_operand.vmem [shape: bf16[144,128], index: 1, kind: input, shape index: {}]   ;;  %s773_s0 = inlined_call_operand.vmem [shape: bf16[128,144], index: 0, kind: input, shape index: {}]   ;;  %s774_s2 = inlined_call_operand.vmem [shape: f32[1,128], index: 2, kind: input, shape index: {}]   ;;  %s775_s3 = inlined_call_operand.vmem [shape: bf16[128,128], index: 3, kind: output, shape index: {}]  }
   0x1   :  { %207 = vmatprep.subr.bf16.mxu0 %v588_v0  ;;  %536 = vmatprep.subr.bf16.mxu1 %v588_v0  ;;  %v555_v1 = vld [vmem:[%s772_s1] sm:$0xff]   ;;  %v556_v2 = vld [vmem:[%s772_s1 + $0x8] sm:$0xff]   ;;  %v557_v3 = vld [vmem:[%s772_s1 + $0x10] sm:$0xff]  }
   0x2   :  { %208 = vmatpush1.bf16.msra.mxu0 %v555_v1  ;;  %545 = vmatpush1.bf16.msra.mxu1 %v555_v1  ;;  %v558_v4 = vld [vmem:[%s772_s1 + $0x18] sm:$0xff]   ;;  %v566_v5 = vld [vmem:[%s773_s0 + $0x4] ss:$8 sps:$4 sm:$0xff]   ;;  %v561_v9 = vld [vmem:[%s772_s1 + $0x30] sm:$0xff]   ;;  %v697_v29 = vand.u32 127, %v304_v26 }
   0x3   :  { %209 = vmatprep.subr.bf16.mxu0 %v588_v0  ;;  %537 = vmatprep.subr.bf16.mxu1 %v588_v0  ;;  %v569_v6 = vld [vmem:[%s773_s0 + $0x44] ss:$8 sps:$4 sm:$0xff]   ;;  %v562_v10 = vld [vmem:[%s772_s1 + $0x38] sm:$0xff]   ;;  %v564_v12 = vld [vmem:[%s773_s0] ss:$8 sps:$4 sm:$0xff]  }
   0x4   :  { %449 = vmatprep.mubr.msk.bf16.mxu0 %vm182_vm0, %v566_v5  ;;  %453 = vmatprep.mubr.msk.bf16.mxu1 %vm182_vm0, %v569_v6  ;;  %v559_v7 = vld [vmem:[%s772_s1 + $0x20] sm:$0xff]   ;;  %v560_v8 = vld [vmem:[%s772_s1 + $0x28] sm:$0xff]   ;;  %v570_v14 = vld [vmem:[%s773_s0 + $0x14] ss:$8 sps:$4 sm:$0xff]   ;;  %vm306_vm1 = vcmp.lt.s32.totalorder %v697_v29, 64 }
   0x5   :  { %v563_v11 = vld [vmem:[%s772_s1 + $0x40] sm:$0xff]   ;;  %v572_v15 = vld [vmem:[%s773_s0 + $0x54] ss:$8 sps:$4 sm:$0xff]   ;;  %v574_v16 = vld [vmem:[%s773_s0 + $0x10] ss:$8 sps:$4 sm:$0xff]  }
   0x6   :  { %210 = vmatpush1.bf16.msra.mxu0 %v556_v2  ;;  %546 = vmatpush1.bf16.msra.mxu1 %v556_v2  ;;  %v567_v13 = vld [vmem:[%s773_s0 + $0x40] ss:$8 sps:$4 sm:$0xff]   ;;  %v575_v17 = vld [vmem:[%s773_s0 + $0x50] ss:$8 sps:$4 sm:$0xff]   ;;  %v576_v18 = vld [vmem:[%s773_s0 + $0x24] ss:$8 sps:$4 sm:$0xff]  }
   0x7   :  { %211 = vmatprep.subr.bf16.mxu0 %v588_v0  ;;  %538 = vmatprep.subr.bf16.mxu1 %v588_v0  ;;  %v578_v19 = vld [vmem:[%s773_s0 + $0x64] ss:$8 sps:$4 sm:$0xff]   ;;  %v580_v20 = vld [vmem:[%s773_s0 + $0x20] ss:$8 sps:$4 sm:$0xff]   ;;  %v582_v22 = vld [vmem:[%s773_s0 + $0x34] ss:$8 sps:$4 sm:$0xff]  }
   0x8   :  { %v581_v21 = vld [vmem:[%s773_s0 + $0x60] ss:$8 sps:$4 sm:$0xff]   ;;  %v584_v23 = vld [vmem:[%s773_s0 + $0x74] ss:$8 sps:$4 sm:$0xff]   ;;  %v586_v24 = vld [vmem:[%s773_s0 + $0x30] ss:$8 sps:$4 sm:$0xff]  }
   0x9   :  { %v587_v25 = vld [vmem:[%s773_s0 + $0x70] ss:$8 sps:$4 sm:$0xff]   ;;  %v695_v27 = vld [vmem:[%s774_s2] ss:$0 sm:$0xff] }
   0xa   :  { %212 = vmatpush1.bf16.msra.mxu0 %v557_v3  ;;  %547 = vmatpush1.bf16.msra.mxu1 %v557_v3 }
   0xb   :  { %213 = vmatprep.subr.bf16.mxu0 %v588_v0  ;;  %539 = vmatprep.subr.bf16.mxu1 %v588_v0 }
   0xe   :  { %214 = vmatpush1.bf16.msra.mxu0 %v558_v4  ;;  %548 = vmatpush1.bf16.msra.mxu1 %v558_v4 }
   0xf   :  { %215 = vmatprep.subr.bf16.mxu0 %v588_v0  ;;  %540 = vmatprep.subr.bf16.mxu1 %v588_v0 }
  0x12   :  { %216 = vmatpush1.bf16.msra.mxu0 %v559_v7  ;;  %549 = vmatpush1.bf16.msra.mxu1 %v559_v7 }
  0x13   :  { %217 = vmatprep.subr.bf16.mxu0 %v588_v0  ;;  %541 = vmatprep.subr.bf16.mxu1 %v588_v0 }
  0x16   :  { %218 = vmatpush1.bf16.msra.mxu0 %v560_v8  ;;  %550 = vmatpush1.bf16.msra.mxu1 %v560_v8 }
  0x17   :  { %219 = vmatprep.subr.bf16.mxu0 %v588_v0  ;;  %542 = vmatprep.subr.bf16.mxu1 %v588_v0 }
  0x1a   :  { %220 = vmatpush1.bf16.msra.mxu0 %v561_v9  ;;  %551 = vmatpush1.bf16.msra.mxu1 %v561_v9 }
  0x1b   :  { %221 = vmatprep.subr.bf16.mxu0 %v588_v0  ;;  %543 = vmatprep.subr.bf16.mxu1 %v588_v0 }
  0x1e   :  { %222 = vmatpush1.bf16.msra.mxu0 %v562_v10  ;;  %552 = vmatpush1.bf16.msra.mxu1 %v562_v10 }
  0x1f   :  { %223 = vmatprep.subr.bf16.mxu0 %v588_v0  ;;  %544 = vmatprep.subr.bf16.mxu1 %v588_v0 }
  0x22   :  { %224 = vmatpush1.bf16.msra.mxu0 %v563_v11  ;;  %553 = vmatpush1.bf16.msra.mxu1 %v563_v11 }
  0x25   :  { %240 = vmatmul.mubr.bf16.vlgmr.msra.gmra.mrb[0].mxu0 %v564_v12  ;;  %272 = vmatmul.mubr.bf16.vlgmr.msra.gmra.mrb[0].mxu1 %v567_v13 }
  0x26   :  { %450 = vmatprep.mubr.msk.bf16.mxu0 %vm182_vm0, %v570_v14  ;;  %454 = vmatprep.mubr.msk.bf16.mxu1 %vm182_vm0, %v572_v15 }
  0x2d   :  { %248 = vmatmul.mubr.bf16.gmra.mrb[4].mxu0 %v574_v16  ;;  %280 = vmatmul.mubr.bf16.gmra.mrb[4].mxu1 %v575_v17 }
  0x2e   :  { %451 = vmatprep.mubr.msk.bf16.mxu0 %vm182_vm0, %v576_v18  ;;  %455 = vmatprep.mubr.msk.bf16.mxu1 %vm182_vm0, %v578_v19 }
  0x35   :  { %256 = vmatmul.mubr.bf16.gmra.mrb[8].mxu0 %v580_v20  ;;  %288 = vmatmul.mubr.bf16.gmra.mrb[8].mxu1 %v581_v21 }
  0x36   :  { %452 = vmatprep.mubr.msk.bf16.mxu0 %vm182_vm0, %v582_v22  ;;  %456 = vmatprep.mubr.msk.bf16.mxu1 %vm182_vm0, %v584_v23 }
  0x3d   :  { %264 = vmatmul.mubr.bf16.gmra.mrb[12].mxu0 %v586_v24  ;;  %296 = vmatmul.mubr.bf16.gmra.mrb[12].mxu1 %v587_v25 }
  0xf8   :  { %v241_v28 = vpop.f32.mrb[0].mxu0  ;;  %v273_v30 = vpop.f32.mrb[0].mxu1 }
  0xf9   :  { %v242_v31 = vadd.f32 %v695_v27, %v241_v28  ;;  %v274_v32 = vadd.f32 %v695_v27, %v273_v30  ;;  %v243_v33 = vpop.f32.mrb[1].mxu0  ;;  %v275_v34 = vpop.f32.mrb[1].mxu1 }
  0xfa   :  { %v244_v35 = vpop.f32.mrb[2].mxu0  ;;  %v276_v36 = vpop.f32.mrb[2].mxu1 }
  0xfb   :  { %v307_v37 = vmax.f32 %v242_v31, 0.0  ;;  %v315_v38 = vmax.f32 %v274_v32, 0.0  ;;  %v245_v39 = vadd.f32 %v695_v27, %v244_v35  ;;  %v277_v40 = vadd.f32 %v695_v27, %v276_v36  ;;  %v246_v41 = vpop.f32.mrb[3].mxu0  ;;  %v278_v42 = vpop.f32.mrb[3].mxu1 }
  0xfd   :  { %v308_v43 = vmax.f32 %v245_v39, 0.0  ;;  %v316_v44 = vmax.f32 %v277_v40, 0.0  ;;  %v323_v45 = vsel %vm306_vm1, %v307_v37, %v242_v31  ;;  %v331_v46 = vsel %vm306_vm1, %v315_v38, %v274_v32 }
  0xff   :  { %v324_v47 = vsel %vm306_vm1, %v308_v43, %v245_v39  ;;  %v332_v48 = vsel %vm306_vm1, %v316_v44, %v277_v40 }
 0x100   :  { %v492_v49 = vpack.c.bf16 %v324_v47, %v323_v45  ;;  %v512_v50 = vpack.c.bf16 %v332_v48, %v331_v46  ;;  %v249_v51 = vpop.f32.mrb[4].mxu0  ;;  %v281_v52 = vpop.f32.mrb[4].mxu1 }
 0x101   :  { %v250_v53 = vadd.f32 %v695_v27, %v249_v51  ;;  %v282_v54 = vadd.f32 %v695_v27, %v281_v52  ;;  %v251_v55 = vpop.f32.mrb[5].mxu0  ;;  %v283_v56 = vpop.f32.mrb[5].mxu1 }
 0x102   :  { %493 = vst [vmem:[%s775_s3] sm:$0xff] %v492_v49   ;;  %532 = vst [vmem:[%s775_s3 + $0x20] sm:$0xff] %v512_v50   ;;  %v252_v57 = vpop.f32.mrb[6].mxu0  ;;  %v284_v58 = vpop.f32.mrb[6].mxu1 }
 0x103   :  { %v309_v59 = vmax.f32 %v250_v53, 0.0  ;;  %v317_v60 = vmax.f32 %v282_v54, 0.0  ;;  %v253_v61 = vadd.f32 %v695_v27, %v252_v57  ;;  %v285_v62 = vadd.f32 %v695_v27, %v284_v58  ;;  %v254_v63 = vpop.f32.mrb[7].mxu0  ;;  %v286_v0 = vpop.f32.mrb[7].mxu1 }
 0x105   :  { %v310_v1 = vmax.f32 %v253_v61, 0.0  ;;  %v318_v2 = vmax.f32 %v285_v62, 0.0  ;;  %v325_v3 = vsel %vm306_vm1, %v309_v59, %v250_v53  ;;  %v333_v4 = vsel %vm306_vm1, %v317_v60, %v282_v54 }
 0x107   :  { %v326_v5 = vsel %vm306_vm1, %v310_v1, %v253_v61  ;;  %v334_v6 = vsel %vm306_vm1, %v318_v2, %v285_v62 }
 0x108   :  { %v497_v7 = vpack.c.bf16 %v326_v5, %v325_v3  ;;  %v517_v8 = vpack.c.bf16 %v334_v6, %v333_v4  ;;  %v257_v9 = vpop.f32.mrb[8].mxu0  ;;  %v289_v10 = vpop.f32.mrb[8].mxu1 }
 0x109   :  { %v258_v11 = vadd.f32 %v695_v27, %v257_v9  ;;  %v290_v12 = vadd.f32 %v695_v27, %v289_v10  ;;  %v259_v13 = vpop.f32.mrb[9].mxu0  ;;  %v291_v14 = vpop.f32.mrb[9].mxu1 }
 0x10a   :  { %529 = vst [vmem:[%s775_s3 + $0x8] sm:$0xff] %v497_v7   ;;  %533 = vst [vmem:[%s775_s3 + $0x28] sm:$0xff] %v517_v8   ;;  %v260_v15 = vpop.f32.mrb[10].mxu0  ;;  %v292_v16 = vpop.f32.mrb[10].mxu1 }
 0x10b   :  { %v311_v17 = vmax.f32 %v258_v11, 0.0  ;;  %v319_v18 = vmax.f32 %v290_v12, 0.0  ;;  %v261_v19 = vadd.f32 %v695_v27, %v260_v15  ;;  %v293_v20 = vadd.f32 %v695_v27, %v292_v16  ;;  %v262_v21 = vpop.f32.mrb[11].mxu0  ;;  %v294_v22 = vpop.f32.mrb[11].mxu1 }
 0x10d   :  { %v312_v23 = vmax.f32 %v261_v19, 0.0  ;;  %v320_v24 = vmax.f32 %v293_v20, 0.0  ;;  %v327_v25 = vsel %vm306_vm1, %v311_v17, %v258_v11  ;;  %v335_v26 = vsel %vm306_vm1, %v319_v18, %v290_v12 }
 0x10f   :  { %v328_v28 = vsel %vm306_vm1, %v312_v23, %v261_v19  ;;  %v336_v30 = vsel %vm306_vm1, %v320_v24, %v293_v20 }
 0x110   :  { %v502_v31 = vpack.c.bf16 %v328_v28, %v327_v25  ;;  %v522_v32 = vpack.c.bf16 %v336_v30, %v335_v26  ;;  %v265_v33 = vpop.f32.mrb[12].mxu0  ;;  %v297_v34 = vpop.f32.mrb[12].mxu1 }
 0x111   :  { %v266_v35 = vadd.f32 %v695_v27, %v265_v33  ;;  %v298_v36 = vadd.f32 %v695_v27, %v297_v34  ;;  %v267_v37 = vpop.f32.mrb[13].mxu0  ;;  %v299_v38 = vpop.f32.mrb[13].mxu1 }
 0x112   :  { %530 = vst [vmem:[%s775_s3 + $0x10] sm:$0xff] %v502_v31   ;;  %534 = vst [vmem:[%s775_s3 + $0x30] sm:$0xff] %v522_v32   ;;  %v268_v39 = vpop.f32.mrb[14].mxu0  ;;  %v300_v40 = vpop.f32.mrb[14].mxu1 }
 0x113   :  { %v313_v41 = vmax.f32 %v266_v35, 0.0  ;;  %v321_v42 = vmax.f32 %v298_v36, 0.0  ;;  %v269_v43 = vadd.f32 %v695_v27, %v268_v39  ;;  %v301_v44 = vadd.f32 %v695_v27, %v300_v40  ;;  %v270_v45 = vpop.f32.mrb[15].mxu0  ;;  %v302_v46 = vpop.f32.mrb[15].mxu1 }
 0x115   :  { %v314_v47 = vmax.f32 %v269_v43, 0.0  ;;  %v322_v48 = vmax.f32 %v301_v44, 0.0  ;;  %v329_v49 = vsel %vm306_vm1, %v313_v41, %v266_v35  ;;  %v337_v50 = vsel %vm306_vm1, %v321_v42, %v298_v36 }
 0x117   :  { %v330_v51 = vsel %vm306_vm1, %v314_v47, %v269_v43  ;;  %v338_v52 = vsel %vm306_vm1, %v322_v48, %v301_v44 }
 0x118   :  { %v507_v53 = vpack.c.bf16 %v330_v51, %v329_v49  ;;  %v527_v54 = vpack.c.bf16 %v338_v52, %v337_v50 }
 0x11a   :  { %531 = vst [vmem:[%s775_s3 + $0x18] sm:$0xff] %v507_v53   ;;  %535 = vst [vmem:[%s775_s3 + $0x38] sm:$0xff] %v527_v54  }

// kernel: _lambda_.15
= control target key start
LH: loop header
LB: loop body
LE: loop exit
PB: predicated region body
PF: predicated region fallthrough
CT: control target
= control target key end

     0   :  { %vm561_vm0 = vcmask 523264   ;;  %vm1005_vm1 = vcmask 519168   ;;  %s1891_s1 = inlined_call_operand.vmem [shape: bf16[576,64], index: 1, kind: input, shape index: {}]   ;;  %s1892_s0 = inlined_call_operand.vmem [shape: bf16[128,576], index: 0, kind: input, shape index: {}]   ;;  %s1893_s2 = inlined_call_operand.vmem [shape: f32[1,64], index: 2, kind: input, shape index: {}]   ;;  %s1894_s3 = inlined_call_operand.vmem [shape: bf16[128,64], index: 3, kind: input, shape index: {}]   ;;  %s1895_s4 = inlined_call_operand.vmem [shape: bf16[128,64], index: 4, kind: output, shape index: {}]  }
   0x1   :  { %v1354_v0 = vld [vmem:[%s1891_s1 + $0x40] sm:$0xff]   ;;  %v1358_v4 = vld [vmem:[%s1891_s1 + $0x48] sm:$0xff]   ;;  %v1362_v8 = vld [vmem:[%s1891_s1 + $0x50] sm:$0xff]  }
   0x2   :  { %v1355_v1 = vld [vmem:[%s1891_s1 + $0xc0] sm:$0xff]   ;;  %1182 = vmatprep.subr.bf16.mxu0 %v1354_v0  ;;  %v1359_v5 = vld [vmem:[%s1891_s1 + $0xc8] sm:$0xff]   ;;  %v1363_v9 = vld [vmem:[%s1891_s1 + $0xd0] sm:$0xff]  }
   0x3   :  { %v1356_v2 = vld [vmem:[%s1891_s1] sm:$0xff]   ;;  %1246 = vmatprep.subr.bf16.mxu1 %v1355_v1  ;;  %v1360_v6 = vld [vmem:[%s1891_s1 + $0x8] sm:$0xff]   ;;  %v1364_v10 = vld [vmem:[%s1891_s1 + $0x10] sm:$0xff]  }
   0x4   :  { %v1357_v3 = vld [vmem:[%s1891_s1 + $0x80] sm:$0xff]   ;;  %1183 = vmatpush3.bf16.msra.mxu0 %v1356_v2  ;;  %v1361_v7 = vld [vmem:[%s1891_s1 + $0x88] sm:$0xff]   ;;  %v1365_v11 = vld [vmem:[%s1891_s1 + $0x90] sm:$0xff]  }
   0x5   :  { %1247 = vmatpush3.bf16.msra.mxu1 %v1357_v3  ;;  %1184 = vmatprep.subr.bf16.mxu0 %v1358_v4  ;;  %v1366_v12 = vld [vmem:[%s1891_s1 + $0x58] sm:$0xff]   ;;  %v1370_v16 = vld [vmem:[%s1891_s1 + $0x60] sm:$0xff]   ;;  %v1374_v20 = vld [vmem:[%s1891_s1 + $0x68] sm:$0xff]  }
   0x6   :  { %1248 = vmatprep.subr.bf16.mxu1 %v1359_v5  ;;  %v1367_v13 = vld [vmem:[%s1891_s1 + $0xd8] sm:$0xff]   ;;  %v1371_v17 = vld [vmem:[%s1891_s1 + $0xe0] sm:$0xff]   ;;  %v1375_v21 = vld [vmem:[%s1891_s1 + $0xe8] sm:$0xff]  }
   0x7   :  { %v1368_v14 = vld [vmem:[%s1891_s1 + $0x18] sm:$0xff]   ;;  %v1372_v18 = vld [vmem:[%s1891_s1 + $0x20] sm:$0xff]   ;;  %v1376_v22 = vld [vmem:[%s1891_s1 + $0x28] sm:$0xff]  }
   0x8   :  { %1185 = vmatpush3.bf16.msra.mxu0 %v1360_v6  ;;  %v1369_v15 = vld [vmem:[%s1891_s1 + $0x98] sm:$0xff]   ;;  %v1373_v19 = vld [vmem:[%s1891_s1 + $0xa0] sm:$0xff]   ;;  %v1377_v23 = vld [vmem:[%s1891_s1 + $0xa8] sm:$0xff]  }
   0x9   :  { %1249 = vmatpush3.bf16.msra.mxu1 %v1361_v7  ;;  %1186 = vmatprep.subr.bf16.mxu0 %v1362_v8  ;;  %v1378_v24 = vld [vmem:[%s1891_s1 + $0x70] sm:$0xff]   ;;  %v1382_v28 = vld [vmem:[%s1891_s1 + $0x78] sm:$0xff]   ;;  %v1391_v35 = vld [vmem:[%s1892_s0 + $0xc] ss:$20 sps:$4 sm:$0xff]  }
   0xa   :  { %1250 = vmatprep.subr.bf16.mxu1 %v1363_v9  ;;  %v1379_v25 = vld [vmem:[%s1891_s1 + $0xf0] sm:$0xff]   ;;  %v1383_v29 = vld [vmem:[%s1891_s1 + $0xf8] sm:$0xff]   ;;  %v1392_v36 = vld [vmem:[%s1891_s1 + $0x100] sm:$0xff]   ;;  %715 = vmatprep.mubr.bf16.mxu1 %v1391_v35 }
   0xb   :  { %v1380_v26 = vld [vmem:[%s1891_s1 + $0x30] sm:$0xff]   ;;  %v1384_v30 = vld [vmem:[%s1891_s1 + $0x38] sm:$0xff]   ;;  %v1393_v37 = vld [vmem:[%s1892_s0 + $0x2c] ss:$20 sps:$4 sm:$0xff]  }
   0xc   :  { %1187 = vmatpush3.bf16.msra.mxu0 %v1364_v10  ;;  %v1381_v27 = vld [vmem:[%s1891_s1 + $0xb0] sm:$0xff]   ;;  %v1385_v31 = vld [vmem:[%s1891_s1 + $0xb8] sm:$0xff]   ;;  %v1405_v42 = vld [vmem:[%s1891_s1 + $0x108] sm:$0xff]  }
   0xd   :  { %1251 = vmatpush3.bf16.msra.mxu1 %v1365_v11  ;;  %1188 = vmatprep.subr.bf16.mxu0 %v1366_v12  ;;  %v1386_v32 = vld [vmem:[%s1892_s0] ss:$20 sps:$4 sm:$0xff]   ;;  %v1388_v33 = vld [vmem:[%s1892_s0 + $0x4] ss:$20 sps:$4 sm:$0xff]   ;;  %v1389_v34 = vld [vmem:[%s1892_s0 + $0x8] ss:$20 sps:$4 sm:$0xff]  }
   0xe   :  { %1252 = vmatprep.subr.bf16.mxu1 %v1367_v13  ;;  %618 = vmatprep.mubr.bf16.mxu0 %v1388_v33  ;;  %v1395_v38 = vld [vmem:[%s1892_s0 + $0x34] ss:$20 sps:$4 sm:$0xff]   ;;  %v1398_v40 = vld [vmem:[%s1892_s0 + $0x30] ss:$20 sps:$4 sm:$0xff]   ;;  %v1404_v45 = vld [vmem:[%s1892_s0 + $0x58] ss:$20 sps:$4 sm:$0xff]  }
   0xf   :  { %v1397_v39 = vld [vmem:[%s1892_s0 + $0x28] ss:$20 sps:$4 sm:$0xff]   ;;  %v1403_v44 = vld [vmem:[%s1892_s0 + $0x50] ss:$20 sps:$4 sm:$0xff]   ;;  %v1410_v50 = vld [vmem:[%s1892_s0 + $0x78] ss:$20 sps:$4 sm:$0xff]  }
  0x10   :  { %1189 = vmatpush3.bf16.msra.mxu0 %v1368_v14  ;;  %v1399_v41 = vld [vmem:[%s1892_s0 + $0x54] ss:$20 sps:$4 sm:$0xff]   ;;  %v1401_v43 = vld [vmem:[%s1892_s0 + $0x5c] ss:$20 sps:$4 sm:$0xff]   ;;  %v1408_v48 = vld [vmem:[%s1892_s0 + $0x84] ss:$20 sps:$4 sm:$0xff]  }
  0x11   :  { %1253 = vmatpush3.bf16.msra.mxu1 %v1369_v15  ;;  %1190 = vmatprep.subr.bf16.mxu0 %v1370_v16  ;;  %v1418_v46 = vld [vmem:[%s1891_s1 + $0x110] sm:$0xff]   ;;  %v1431_v49 = vld [vmem:[%s1891_s1 + $0x118] sm:$0xff]   ;;  %v1414_v53 = vld [vmem:[%s1892_s0 + $0xac] ss:$20 sps:$4 sm:$0xff]  }
  0x12   :  { %1254 = vmatprep.subr.bf16.mxu1 %v1371_v17  ;;  %v1406_v47 = vld [vmem:[%s1892_s0 + $0x7c] ss:$20 sps:$4 sm:$0xff]   ;;  %v1411_v51 = vld [vmem:[%s1892_s0 + $0x80] ss:$20 sps:$4 sm:$0xff]   ;;  %v1412_v52 = vld [vmem:[%s1892_s0 + $0xa4] ss:$20 sps:$4 sm:$0xff]  }
  0x13   :  { %v1416_v54 = vld [vmem:[%s1892_s0 + $0xa0] ss:$20 sps:$4 sm:$0xff]   ;;  %v1417_v55 = vld [vmem:[%s1892_s0 + $0xa8] ss:$20 sps:$4 sm:$0xff]   ;;  %v1424_v59 = vld [vmem:[%s1892_s0 + $0xd0] ss:$20 sps:$4 sm:$0xff]  }
  0x14   :  { %1191 = vmatpush3.bf16.msra.mxu0 %v1372_v18  ;;  %v1419_v56 = vld [vmem:[%s1892_s0 + $0xcc] ss:$20 sps:$4 sm:$0xff]   ;;  %v1421_v57 = vld [vmem:[%s1892_s0 + $0xd4] ss:$20 sps:$4 sm:$0xff]   ;;  %v1427_v61 = vld [vmem:[%s1892_s0 + $0xfc] ss:$20 sps:$4 sm:$0xff]  }
  0x15   :  { %1255 = vmatpush3.bf16.msra.mxu1 %v1373_v19  ;;  %1192 = vmatprep.subr.bf16.mxu0 %v1374_v20  ;;  %v1423_v58 = vld [vmem:[%s1892_s0 + $0xc8] ss:$20 sps:$4 sm:$0xff]   ;;  %v1429_v62 = vld [vmem:[%s1892_s0 + $0xf0] ss:$20 sps:$4 sm:$0xff]   ;;  %v1430_v63 = vld [vmem:[%s1892_s0 + $0xf8] ss:$20 sps:$4 sm:$0xff]  }
  0x16   :  { %1256 = vmatprep.subr.bf16.mxu1 %v1375_v21  ;;  %v1425_v60 = vld [vmem:[%s1892_s0 + $0xf4] ss:$20 sps:$4 sm:$0xff]   ;;  %v1432_v0 = vld [vmem:[%s1892_s0 + $0x11c] ss:$20 sps:$4 sm:$0xff]   ;;  %v1434_v1 = vld [vmem:[%s1892_s0 + $0x124] ss:$20 sps:$4 sm:$0xff]  }
  0x17   :  { %v1436_v2 = vld [vmem:[%s1892_s0 + $0x118] ss:$20 sps:$4 sm:$0xff]   ;;  %v1437_v3 = vld [vmem:[%s1892_s0 + $0x120] ss:$20 sps:$4 sm:$0xff]   ;;  %v1438_v4 = vld [vmem:[%s1892_s0 + $0x10] ss:$20 sps:$4 sm:$0xff]  }
  0x18   :  { %1193 = vmatpush3.bf16.msra.mxu0 %v1376_v22  ;;  %v1439_v5 = vld [vmem:[%s1892_s0 + $0xb0] ss:$20 sps:$4 sm:$0xff]   ;;  %v1440_v6 = vld [vmem:[%s1892_s0 + $0x38] ss:$20 sps:$4 sm:$0xff]   ;;  %v1442_v8 = vld [vmem:[%s1892_s0 + $0x60] ss:$20 sps:$4 sm:$0xff]  }
  0x19   :  { %1257 = vmatpush3.bf16.msra.mxu1 %v1377_v23  ;;  %1194 = vmatprep.subr.bf16.mxu0 %v1378_v24  ;;  %v1441_v7 = vld [vmem:[%s1892_s0 + $0xd8] ss:$20 sps:$4 sm:$0xff]   ;;  %v1443_v9 = vld [vmem:[%s1892_s0 + $0x100] ss:$20 sps:$4 sm:$0xff]   ;;  %v1444_v10 = vld [vmem:[%s1892_s0 + $0x88] ss:$20 sps:$4 sm:$0xff]  }
  0x1a   :  { %1258 = vmatprep.subr.bf16.mxu1 %v1379_v25  ;;  %v1445_v11 = vld [vmem:[%s1892_s0 + $0x128] ss:$20 sps:$4 sm:$0xff]   ;;  %v1710_v14 = vld [vmem:[%s1893_s2] ss:$0 sm:$0xff] }
  0x1c   :  { %1195 = vmatpush3.bf16.msra.mxu0 %v1380_v26 }
  0x1d   :  { %1259 = vmatpush3.bf16.msra.mxu1 %v1381_v27  ;;  %1196 = vmatprep.subr.bf16.mxu0 %v1382_v28 }
  0x1e   :  { %1260 = vmatprep.subr.bf16.mxu1 %v1383_v29 }
  0x20   :  { %1197 = vmatpush3.bf16.msra.mxu0 %v1384_v30 }
  0x21   :  { %1261 = vmatpush3.bf16.msra.mxu1 %v1385_v31  ;;  %1322 = vmatprep.subr.bf16.mxu0 %v1392_v36 }
  0x22   :  { %1346 = vmatprep.subr.bf16.mxu1 %v1392_v36 }
  0x23   :  { %619 = vmatmul.mubr.bf16.vlgmr.msra.gmra.mrb[0].mxu0 %v1386_v32 }
  0x24   :  { %716 = vmatmul.mubr.bf16.vlgmr.msra.gmra.mrb[0].mxu1 %v1389_v34  ;;  %1323 = vmatpush3.bf16.msra.mxu0 %v1392_v36 }
  0x25   :  { %1350 = vmatpush3.bf16.msra.mxu1 %v1392_v36  ;;  %626 = vmatprep.mubr.bf16.mxu0 %v1393_v37 }
  0x26   :  { %723 = vmatprep.mubr.bf16.mxu1 %v1395_v38  ;;  %1324 = vmatprep.subr.bf16.mxu0 %v1405_v42 }
  0x27   :  { %1347 = vmatprep.subr.bf16.mxu1 %v1405_v42 }
  0x28   :  { %1325 = vmatpush3.bf16.msra.mxu0 %v1405_v42 }
  0x29   :  { %1351 = vmatpush3.bf16.msra.mxu1 %v1405_v42  ;;  %1326 = vmatprep.subr.bf16.mxu0 %v1418_v46 }
  0x2a   :  { %1348 = vmatprep.subr.bf16.mxu1 %v1418_v46 }
  0x2b   :  { %627 = vmatmul.mubr.bf16.gmra.mrb[4].mxu0 %v1397_v39 }
  0x2c   :  { %724 = vmatmul.mubr.bf16.gmra.mrb[4].mxu1 %v1398_v40  ;;  %634 = vmatprep.mubr.bf16.mxu0 %v1399_v41 }
  0x2d   :  { %731 = vmatprep.mubr.bf16.mxu1 %v1401_v43  ;;  %1327 = vmatpush3.bf16.msra.mxu0 %v1418_v46 }
  0x2e   :  { %1352 = vmatpush3.bf16.msra.mxu1 %v1418_v46  ;;  %1328 = vmatprep.subr.bf16.mxu0 %v1431_v49 }
  0x2f   :  { %1349 = vmatprep.subr.bf16.mxu1 %v1431_v49 }
  0x31   :  { %1329 = vmatpush3.bf16.msra.mxu0 %v1431_v49 }
  0x32   :  { %1353 = vmatpush3.bf16.msra.mxu1 %v1431_v49 }
  0x33   :  { %635 = vmatmul.mubr.bf16.gmra.mrb[8].mxu0 %v1403_v44 }
  0x34   :  { %732 = vmatmul.mubr.bf16.gmra.mrb[8].mxu1 %v1404_v45  ;;  %642 = vmatprep.mubr.bf16.mxu0 %v1406_v47 }
  0x35   :  { %739 = vmatprep.mubr.bf16.mxu1 %v1408_v48 }
  0x3b   :  { %643 = vmatmul.mubr.bf16.gmra.mrb[12].mxu0 %v1410_v50 }
  0x3c   :  { %740 = vmatmul.mubr.bf16.gmra.mrb[12].mxu1 %v1411_v51  ;;  %650 = vmatprep.mubr.bf16.mxu0 %v1412_v52 }
  0x3d   :  { %747 = vmatprep.mubr.bf16.mxu1 %v1414_v53 }
  0x43   :  { %651 = vmatmul.mubr.bf16.gmra.mrb[16].mxu0 %v1416_v54 }
  0x44   :  { %748 = vmatmul.mubr.bf16.gmra.mrb[16].mxu1 %v1417_v55  ;;  %658 = vmatprep.mubr.bf16.mxu0 %v1419_v56 }
  0x45   :  { %755 = vmatprep.mubr.bf16.mxu1 %v1421_v57 }
  0x4b   :  { %659 = vmatmul.mubr.bf16.gmra.mrb[20].mxu0 %v1423_v58 }
  0x4c   :  { %756 = vmatmul.mubr.bf16.gmra.mrb[20].mxu1 %v1424_v59  ;;  %666 = vmatprep.mubr.bf16.mxu0 %v1425_v60 }
  0x4d   :  { %763 = vmatprep.mubr.bf16.mxu1 %v1427_v61 }
  0x53   :  { %667 = vmatmul.mubr.bf16.gmra.mrb[24].mxu0 %v1429_v62 }
  0x54   :  { %764 = vmatmul.mubr.bf16.gmra.mrb[24].mxu1 %v1430_v63  ;;  %674 = vmatprep.mubr.bf16.mxu0 %v1432_v0 }
  0x55   :  { %771 = vmatprep.mubr.bf16.mxu1 %v1434_v1 }
  0x5b   :  { %675 = vmatmul.mubr.bf16.gmra.mrb[28].mxu0 %v1436_v2 }
  0x5c   :  { %772 = vmatmul.mubr.bf16.gmra.mrb[28].mxu1 %v1437_v3  ;;  %1330 = vmatprep.mubr.msk.bf16.mxu0 %vm561_vm0, %v1438_v4 }
  0x5d   :  { %1338 = vmatprep.mubr.msk.bf16.mxu1 %vm561_vm0, %v1439_v5 }
  0x63   :  { %1331 = vmatmul.mubr.msk.bf16.vlgmr.msra.gmra.mrb[32].mxu0 %vm561_vm0, %v1440_v6 }
  0x64   :  { %1339 = vmatmul.mubr.msk.bf16.vlgmr.msra.gmra.mrb[32].mxu1 %vm561_vm0, %v1441_v7  ;;  %1334 = vmatprep.mubr.msk.bf16.mxu0 %vm561_vm0, %v1442_v8 }
  0x65   :  { %1342 = vmatprep.mubr.msk.bf16.mxu1 %vm561_vm0, %v1443_v9 }
  0x6b   :  { %1335 = vmatmul.mubr.msk.bf16.gmra.mrb[36].mxu0 %vm561_vm0, %v1444_v10 }
  0x6c   :  { %1343 = vmatmul.mubr.msk.bf16.gmra.mrb[36].mxu1 %vm561_vm0, %v1445_v11 }
  0xf6   :  { %v1198_v12 = vpop.f32.mrb[0].mxu0 }
  0xf7   :  { %v1262_v13 = vpop.f32.mrb[0].mxu1  ;;  %v1199_v15 = vpop.f32.mrb[1].mxu0 }
  0xf8   :  { %v1200_v16 = vadd.f32 %v1199_v15, %v1198_v12  ;;  %v1263_v17 = vpop.f32.mrb[1].mxu1  ;;  %v1201_v18 = vpop.f32.mrb[2].mxu0 }
  0xf9   :  { %v1264_v19 = vadd.f32 %v1263_v17, %v1262_v13  ;;  %v1265_v20 = vpop.f32.mrb[2].mxu1  ;;  %v1202_v21 = vpop.f32.mrb[3].mxu0 }
  0xfa   :  { %v621_v22 = vadd.f32 %v1200_v16, %v1710_v14  ;;  %v1203_v23 = vadd.f32 %v1202_v21, %v1201_v18  ;;  %v1266_v24 = vpop.f32.mrb[3].mxu1 }
  0xfb   :  { %v1267_v25 = vadd.f32 %v1266_v24, %v1265_v20 }
  0xfc   :  { %v624_v26 = vadd.f32 %v1203_v23, %v1710_v14  ;;  %v1714_v27 = vadd.f32 %v1264_v19, %v621_v22 }
  0xfe   :  { %v1204_v28 = vpop.f32.mrb[4].mxu0  ;;  %v1716_v29 = vadd.f32 %v1267_v25, %v624_v26 }
  0xff   :  { %v1268_v30 = vpop.f32.mrb[4].mxu1  ;;  %v1205_v31 = vpop.f32.mrb[5].mxu0 }
 0x100   :  { %v1206_v32 = vadd.f32 %v1205_v31, %v1204_v28  ;;  %v1269_v33 = vpop.f32.mrb[5].mxu1  ;;  %v1207_v34 = vpop.f32.mrb[6].mxu0 }
 0x101   :  { %v1270_v35 = vadd.f32 %v1269_v33, %v1268_v30  ;;  %v1271_v36 = vpop.f32.mrb[6].mxu1  ;;  %v1208_v37 = vpop.f32.mrb[7].mxu0 }
 0x102   :  { %v629_v38 = vadd.f32 %v1206_v32, %v1710_v14  ;;  %v1209_v39 = vadd.f32 %v1208_v37, %v1207_v34  ;;  %v1272_v40 = vpop.f32.mrb[7].mxu1 }
 0x103   :  { %v1273_v41 = vadd.f32 %v1272_v40, %v1271_v36 }
 0x104   :  { %v632_v42 = vadd.f32 %v1209_v39, %v1710_v14  ;;  %v1720_v43 = vadd.f32 %v1270_v35, %v629_v38 }
 0x106   :  { %v1210_v44 = vpop.f32.mrb[8].mxu0  ;;  %v1722_v45 = vadd.f32 %v1273_v41, %v632_v42 }
 0x107   :  { %v1274_v46 = vpop.f32.mrb[8].mxu1  ;;  %v1211_v47 = vpop.f32.mrb[9].mxu0 }
 0x108   :  { %v1212_v48 = vadd.f32 %v1211_v47, %v1210_v44  ;;  %v1275_v49 = vpop.f32.mrb[9].mxu1  ;;  %v1213_v50 = vpop.f32.mrb[10].mxu0 }
 0x109   :  { %v1276_v51 = vadd.f32 %v1275_v49, %v1274_v46  ;;  %v1277_v52 = vpop.f32.mrb[10].mxu1  ;;  %v1214_v53 = vpop.f32.mrb[11].mxu0 }
 0x10a   :  { %v637_v54 = vadd.f32 %v1212_v48, %v1710_v14  ;;  %v1215_v55 = vadd.f32 %v1214_v53, %v1213_v50  ;;  %v1278_v56 = vpop.f32.mrb[11].mxu1 }
 0x10b   :  { %v1279_v57 = vadd.f32 %v1278_v56, %v1277_v52 }
 0x10c   :  { %v640_v58 = vadd.f32 %v1215_v55, %v1710_v14  ;;  %v1726_v59 = vadd.f32 %v1276_v51, %v637_v54 }
 0x10e   :  { %v1216_v60 = vpop.f32.mrb[12].mxu0  ;;  %v1728_v61 = vadd.f32 %v1279_v57, %v640_v58 }
 0x10f   :  { %v1280_v62 = vpop.f32.mrb[12].mxu1  ;;  %v1217_v63 = vpop.f32.mrb[13].mxu0 }
 0x110   :  { %v1218_v0 = vadd.f32 %v1217_v63, %v1216_v60  ;;  %v1281_v1 = vpop.f32.mrb[13].mxu1  ;;  %v1219_v2 = vpop.f32.mrb[14].mxu0 }
 0x111   :  { %v1282_v3 = vadd.f32 %v1281_v1, %v1280_v62  ;;  %v1283_v4 = vpop.f32.mrb[14].mxu1  ;;  %v1220_v5 = vpop.f32.mrb[15].mxu0 }
 0x112   :  { %v645_v6 = vadd.f32 %v1218_v0, %v1710_v14  ;;  %v1221_v7 = vadd.f32 %v1220_v5, %v1219_v2  ;;  %v1284_v8 = vpop.f32.mrb[15].mxu1 }
 0x113   :  { %v1285_v9 = vadd.f32 %v1284_v8, %v1283_v4 }
 0x114   :  { %v648_v10 = vadd.f32 %v1221_v7, %v1710_v14  ;;  %v1732_v11 = vadd.f32 %v1282_v3, %v645_v6 }
 0x116   :  { %v1222_v12 = vpop.f32.mrb[16].mxu0  ;;  %v1734_v13 = vadd.f32 %v1285_v9, %v648_v10  ;;  %v1175_v10 = vld [vmem:[%s1894_s3 + $0x8] sm:$0xff]  }
 0x117   :  { %v1286_v15 = vpop.f32.mrb[16].mxu1  ;;  %v1223_v16 = vpop.f32.mrb[17].mxu0 }
 0x118   :  { %v1224_v17 = vadd.f32 %v1223_v16, %v1222_v12  ;;  %v1287_v18 = vpop.f32.mrb[17].mxu1  ;;  %v1225_v19 = vpop.f32.mrb[18].mxu0  ;;  %v1179_v12 = vld [vmem:[%s1894_s3 + $0x28] sm:$0xff]  }
 0x119   :  { %v1288_v20 = vadd.f32 %v1287_v18, %v1286_v15  ;;  %v1289_v21 = vpop.f32.mrb[18].mxu1  ;;  %v1226_v22 = vpop.f32.mrb[19].mxu0  ;;  %v1144_v18 = vld [vmem:[%s1894_s3] sm:$0xff]  }
 0x11a   :  { %v653_v23 = vadd.f32 %v1224_v17, %v1710_v14  ;;  %v1227_v24 = vadd.f32 %v1226_v22, %v1225_v19  ;;  %v1290_v25 = vpop.f32.mrb[19].mxu1  ;;  %v1178_v19 = vld [vmem:[%s1894_s3 + $0x20] sm:$0xff]  }
 0x11b   :  { %v1291_v26 = vadd.f32 %v1290_v25, %v1289_v21  ;;  %v1165_v25 = vunpack.c.l.bf16 %v1179_v12 }
 0x11c   :  { %v656_v28 = vadd.f32 %v1227_v24, %v1710_v14  ;;  %v1738_v30 = vadd.f32 %v1288_v20, %v653_v23  ;;  %v1149_v24 = vunpack.c.l.bf16 %v1175_v10 }
 0x11e   :  { %v1228_v31 = vpop.f32.mrb[20].mxu0  ;;  %v1740_v32 = vadd.f32 %v1291_v26, %v656_v28  ;;  %v1768_v26 = vld [vmem:[%s1894_s3 + $0x18] sm:$0xff]  }
 0x11f   :  { %v1292_v33 = vpop.f32.mrb[20].mxu1  ;;  %v1229_v34 = vpop.f32.mrb[21].mxu0  ;;  %v1773_v28 = vld [vmem:[%s1894_s3 + $0x38] sm:$0xff]  }
 0x120   :  { %v1230_v35 = vadd.f32 %v1229_v34, %v1228_v31  ;;  %v1293_v36 = vpop.f32.mrb[21].mxu1  ;;  %v1231_v37 = vpop.f32.mrb[22].mxu0  ;;  %v1161_v34 = vunpack.c.l.bf16 %v1178_v19 }
 0x121   :  { %v1294_v38 = vadd.f32 %v1293_v36, %v1292_v33  ;;  %v1295_v39 = vpop.f32.mrb[22].mxu1  ;;  %v1232_v40 = vpop.f32.mrb[23].mxu0  ;;  %v1145_v33 = vunpack.c.l.bf16 %v1144_v18  ;;  %v1781_v36 = vld [vmem:[%s1894_s3 + $0x10] sm:$0xff]  }
 0x122   :  { %v661_v41 = vadd.f32 %v1230_v35, %v1710_v14  ;;  %v1233_v42 = vadd.f32 %v1232_v40, %v1231_v37  ;;  %v1296_v44 = vpop.f32.mrb[23].mxu1  ;;  %v1786_v37 = vld [vmem:[%s1894_s3 + $0x30] sm:$0xff]   ;;  %v1146_v40 = vunpack.c.h.bf16 %v1144_v18 }
 0x123   :  { %v1297_v46 = vadd.f32 %v1296_v44, %v1295_v39  ;;  %v1166_v39 = vunpack.c.h.bf16 %v1179_v12  ;;  %v1173_v44 = vunpack.c.l.bf16 %v1773_v28 }
 0x124   :  { %v664_v47 = vadd.f32 %v1233_v42, %v1710_v14  ;;  %v758_v48 = vadd.f32 %v1294_v38, %v661_v41  ;;  %v1150_v38 = vunpack.c.h.bf16 %v1175_v10  ;;  %v1162_v41 = vunpack.c.h.bf16 %v1178_v19 }
 0x126   :  { %v1234_v49 = vpop.f32.mrb[24].mxu0  ;;  %v1744_v50 = vadd.f32 %v1297_v46, %v664_v47 }
 0x127   :  { %v1298_v51 = vpop.f32.mrb[24].mxu1  ;;  %v1235_v52 = vpop.f32.mrb[25].mxu0 }
 0x128   :  { %v1236_v53 = vadd.f32 %v1235_v52, %v1234_v49  ;;  %v1299_v54 = vpop.f32.mrb[25].mxu1  ;;  %v1237_v55 = vpop.f32.mrb[26].mxu0  ;;  %v1153_v52 = vunpack.c.l.bf16 %v1781_v36 }
 0x129   :  { %v1300_v56 = vadd.f32 %v1299_v54, %v1298_v51  ;;  %v1301_v57 = vpop.f32.mrb[26].mxu1  ;;  %v1238_v58 = vpop.f32.mrb[27].mxu0  ;;  %v1158_v54 = vunpack.c.h.bf16 %v1768_v26 }
 0x12a   :  { %v669_v60 = vadd.f32 %v1236_v53, %v1710_v14  ;;  %v1239_v62 = vadd.f32 %v1238_v58, %v1237_v55  ;;  %v1302_v63 = vpop.f32.mrb[27].mxu1  ;;  %v1169_v53 = vunpack.c.l.bf16 %v1786_v37 }
 0x12b   :  { %v1303_v0 = vadd.f32 %v1302_v63, %v1301_v57 }
 0x12c   :  { %v672_v1 = vadd.f32 %v1239_v62, %v1710_v14  ;;  %v1748_v2 = vadd.f32 %v1300_v56, %v669_v60  ;;  %v1174_v60 = vunpack.c.h.bf16 %v1773_v28  ;;  %v1154_v62 = vunpack.c.h.bf16 %v1781_v36 }
 0x12e   :  { %v1240_v3 = vpop.f32.mrb[28].mxu0  ;;  %v1750_v4 = vadd.f32 %v1303_v0, %v672_v1 }
 0x12f   :  { %v1304_v5 = vpop.f32.mrb[28].mxu1  ;;  %v1241_v6 = vpop.f32.mrb[29].mxu0 }
 0x130   :  { %v1242_v7 = vadd.f32 %v1241_v6, %v1240_v3  ;;  %v1305_v8 = vpop.f32.mrb[29].mxu1  ;;  %v1243_v9 = vpop.f32.mrb[30].mxu0 }
 0x131   :  { %v1306_v15 = vadd.f32 %v1305_v8, %v1304_v5  ;;  %v1307_v16 = vpop.f32.mrb[30].mxu1  ;;  %v1244_v17 = vpop.f32.mrb[31].mxu0  ;;  %v1170_v5 = vunpack.c.h.bf16 %v1786_v37 }
 0x132   :  { %v677_v20 = vadd.f32 %v1242_v7, %v1710_v14  ;;  %v1245_v21 = vadd.f32 %v1244_v17, %v1243_v9  ;;  %v1308_v22 = vpop.f32.mrb[31].mxu1 }
 0x133   :  { %v1309_v23 = vadd.f32 %v1308_v22, %v1307_v16 }
 0x134   :  { %v680_v31 = vadd.f32 %v1245_v21, %v1710_v14  ;;  %v1776_v35 = vadd.f32 %v1306_v15, %v677_v20  ;;  %v1157_v14 = vunpack.c.l.bf16 %v1768_v26 }
 0x136   :  { %v1332_v42 = vpop.f32.mrb[32].mxu0  ;;  %v1790_v46 = vadd.f32 %v1309_v23, %v680_v31 }
 0x137   :  { %v823_v47 = vadd.f32 %v1332_v42, %v1720_v43  ;;  %v1340_v49 = vpop.f32.mrb[32].mxu1  ;;  %v814_v51 = vpop.f32.mrb[33].mxu0 }
 0x138   :  { %v855_v55 = vadd.f32 %v1340_v49, %v758_v48  ;;  %v815_v56 = vadd.f32 %v814_v51, %v1714_v27  ;;  %v846_v57 = vpop.f32.mrb[33].mxu1  ;;  %v1333_v58 = vpop.f32.mrb[34].mxu0 }
 0x139   :  { %v911_v63 = vadd.f32 %v1149_v24, %v823_v47  ;;  %v847_v43 = vadd.f32 %v846_v57, %v1738_v30  ;;  %v826_v0 = vadd.f32 %v1333_v58, %v1722_v45  ;;  %v1341_v1 = vpop.f32.mrb[34].mxu1  ;;  %v817_v3 = vpop.f32.mrb[35].mxu0 }
 0x13a   :  { %v919_v6 = vadd.f32 %v1165_v25, %v855_v55  ;;  %v909_v7 = vadd.f32 %v1145_v33, %v815_v56  ;;  %v858_v48 = vadd.f32 %v1341_v1, %v1744_v50  ;;  %v818_v27 = vadd.f32 %v817_v3, %v1716_v29  ;;  %v849_v8 = vpop.f32.mrb[35].mxu1 }
 0x13b   :  { %v927_v9 = vmax.f32 %v911_v63, 0.0  ;;  %v917_v10 = vadd.f32 %v1161_v34, %v847_v43  ;;  %v912_v12 = vadd.f32 %v1150_v38, %v826_v0  ;;  %v850_v15 = vadd.f32 %v849_v8, %v1740_v32 }
 0x13c   :  { %v935_v16 = vmax.f32 %v919_v6, 0.0  ;;  %v925_v30 = vmax.f32 %v909_v7, 0.0  ;;  %v920_v17 = vadd.f32 %v1166_v39, %v858_v48  ;;  %v910_v45 = vadd.f32 %v1146_v40, %v818_v27 }
 0x13d   :  { %v1129_v18 = vpack.c.bf16 %v927_v9, %v927_v9  ;;  %v933_v19 = vmax.f32 %v917_v10, 0.0  ;;  %v928_v20 = vmax.f32 %v912_v12, 0.0  ;;  %v918_v21 = vadd.f32 %v1162_v41, %v850_v15 }
 0x13e   :  { %v1137_v22 = vpack.c.bf16 %v935_v16, %v935_v16  ;;  %v1127_v23 = vpack.c.bf16 %v925_v30, %v925_v30  ;;  %v936_v24 = vmax.f32 %v920_v17, 0.0  ;;  %v926_v50 = vmax.f32 %v910_v45, 0.0  ;;  %v1336_v25 = vpop.f32.mrb[36].mxu0 }
 0x13f   :  { %1008 = vst.msk [vmem:[%s1895_s4 + $0x8] sm:$0xf] %vm1005_vm1, %v1129_v18  ;;  %v1135_v29 = vpack.c.bf16 %v933_v19, %v933_v19  ;;  %v1130_v32 = vpack.c.bf16 %v928_v20, %v928_v20  ;;  %v934_v31 = vmax.f32 %v918_v21, 0.0  ;;  %v839_v33 = vadd.f32 %v1336_v25, %v1732_v11  ;;  %v1344_v34 = vpop.f32.mrb[36].mxu1  ;;  %v830_v38 = vpop.f32.mrb[37].mxu0 }
 0x140   :  { %1016 = vst.msk [vmem:[%s1895_s4 + $0x28] sm:$0xf] %vm1005_vm1, %v1137_v22  ;;  %1006 = vst.msk [vmem:[%s1895_s4] sm:$0xf] %vm1005_vm1, %v1127_v23  ;;  %v1138_v39 = vpack.c.bf16 %v936_v24, %v936_v24  ;;  %v1128_v40 = vpack.c.bf16 %v926_v50, %v926_v50  ;;  %v871_v41 = vadd.f32 %v1344_v34, %v1776_v35  ;;  %v862_v47 = vpop.f32.mrb[37].mxu1  ;;  %v1337_v11 = vpop.f32.mrb[38].mxu0 }
 0x141   :  { %v831_v42 = vadd.f32 %v830_v38, %v1726_v59  ;;  %1014 = vst.msk [vmem:[%s1895_s4 + $0x20] sm:$0xf] %vm1005_vm1, %v1135_v29  ;;  %1009 = vst.msk [vmem:[%s1895_s4 + $0xc] sm:$0xf] %vm1005_vm1, %v1130_v32  ;;  %v1136_v49 = vpack.c.bf16 %v934_v31, %v934_v31  ;;  %v915_v51 = vadd.f32 %v1157_v14, %v839_v33  ;;  %v1345_v56 = vpop.f32.mrb[38].mxu1  ;;  %v833_v59 = vpop.f32.mrb[39].mxu0 }
 0x142   :  { %v863_v55 = vadd.f32 %v862_v47, %v1748_v2  ;;  %v842_v35 = vadd.f32 %v1337_v11, %v1734_v13  ;;  %1017 = vst.msk [vmem:[%s1895_s4 + $0x2c] sm:$0xf] %vm1005_vm1, %v1138_v39  ;;  %1007 = vst.msk [vmem:[%s1895_s4 + $0x4] sm:$0xf] %vm1005_vm1, %v1128_v40  ;;  %v923_v57 = vadd.f32 %v1173_v44, %v871_v41  ;;  %v865_v58 = vpop.f32.mrb[39].mxu1 }
 0x143   :  { %v913_v2 = vadd.f32 %v1153_v52, %v831_v42  ;;  %v874_v13 = vadd.f32 %v1345_v56, %v1790_v46  ;;  %v834_v14 = vadd.f32 %v833_v59, %v1728_v61  ;;  %1015 = vst.msk [vmem:[%s1895_s4 + $0x24] sm:$0xf] %vm1005_vm1, %v1136_v49  ;;  %v931_v63 = vmax.f32 %v915_v51, 0.0 }
 0x144   :  { %v921_v43 = vadd.f32 %v1169_v53, %v863_v55  ;;  %v916_v44 = vadd.f32 %v1158_v54, %v842_v35  ;;  %v866_v0 = vadd.f32 %v865_v58, %v1750_v4  ;;  %v939_v52 = vmax.f32 %v923_v57, 0.0 }
 0x145   :  { %v929_v1 = vmax.f32 %v913_v2, 0.0  ;;  %v924_v61 = vadd.f32 %v1174_v60, %v874_v13  ;;  %v914_v46 = vadd.f32 %v1154_v62, %v834_v14  ;;  %v1133_v3 = vpack.c.bf16 %v931_v63, %v931_v63 }
 0x146   :  { %v937_v6 = vmax.f32 %v921_v43, 0.0  ;;  %v932_v7 = vmax.f32 %v916_v44, 0.0  ;;  %v922_v48 = vadd.f32 %v1170_v5, %v866_v0  ;;  %v1141_v53 = vpack.c.bf16 %v939_v52, %v939_v52 }
 0x147   :  { %v1131_v27 = vpack.c.bf16 %v929_v1, %v929_v1  ;;  %v940_v26 = vmax.f32 %v924_v61, 0.0  ;;  %v930_v54 = vmax.f32 %v914_v46, 0.0  ;;  %1012 = vst.msk [vmem:[%s1895_s4 + $0x18] sm:$0xf] %vm1005_vm1, %v1133_v3 }
 0x148   :  { %v1139_v4 = vpack.c.bf16 %v937_v6, %v937_v6  ;;  %v1134_v28 = vpack.c.bf16 %v932_v7, %v932_v7  ;;  %v938_v60 = vmax.f32 %v922_v48, 0.0  ;;  %1020 = vst.msk [vmem:[%s1895_s4 + $0x38] sm:$0xf] %vm1005_vm1, %v1141_v53 }
 0x149   :  { %1010 = vst.msk [vmem:[%s1895_s4 + $0x10] sm:$0xf] %vm1005_vm1, %v1131_v27  ;;  %v1142_v36 = vpack.c.bf16 %v940_v26, %v940_v26  ;;  %v1132_v37 = vpack.c.bf16 %v930_v54, %v930_v54 }
 0x14a   :  { %1018 = vst.msk [vmem:[%s1895_s4 + $0x30] sm:$0xf] %vm1005_vm1, %v1139_v4  ;;  %1013 = vst.msk [vmem:[%s1895_s4 + $0x1c] sm:$0xf] %vm1005_vm1, %v1134_v28  ;;  %v1140_v62 = vpack.c.bf16 %v938_v60, %v938_v60 }
 0x14b   :  { %1021 = vst.msk [vmem:[%s1895_s4 + $0x3c] sm:$0xf] %vm1005_vm1, %v1142_v36  ;;  %1011 = vst.msk [vmem:[%s1895_s4 + $0x14] sm:$0xf] %vm1005_vm1, %v1132_v37 }
 0x14c   :  { %1019 = vst.msk [vmem:[%s1895_s4 + $0x34] sm:$0xf] %vm1005_vm1, %v1140_v62 }

// kernel: _lambda_.16
= control target key start
LH: loop header
LB: loop body
LE: loop exit
PB: predicated region body
PF: predicated region fallthrough
CT: control target
= control target key end

     0   :  { %vm558_vm0 = vcmask 523264   ;;  %vm954_vm1 = vcmask 519168   ;;  %s1730_s1 = inlined_call_operand.vmem [shape: bf16[576,64], index: 1, kind: input, shape index: {}]   ;;  %s1731_s0 = inlined_call_operand.vmem [shape: bf16[128,576], index: 0, kind: input, shape index: {}]   ;;  %s1732_s2 = inlined_call_operand.vmem [shape: f32[1,64], index: 2, kind: input, shape index: {}]   ;;  %s1733_s3 = inlined_call_operand.vmem [shape: bf16[128,64], index: 3, kind: output, shape index: {}]  }
   0x1   :  { %v1264_v0 = vld [vmem:[%s1730_s1 + $0x40] sm:$0xff]   ;;  %v1268_v4 = vld [vmem:[%s1730_s1 + $0x48] sm:$0xff]   ;;  %v1272_v8 = vld [vmem:[%s1730_s1 + $0x50] sm:$0xff]  }
   0x2   :  { %v1265_v1 = vld [vmem:[%s1730_s1 + $0xc0] sm:$0xff]   ;;  %1092 = vmatprep.subr.bf16.mxu0 %v1264_v0  ;;  %v1269_v5 = vld [vmem:[%s1730_s1 + $0xc8] sm:$0xff]   ;;  %v1273_v9 = vld [vmem:[%s1730_s1 + $0xd0] sm:$0xff]  }
   0x3   :  { %v1266_v2 = vld [vmem:[%s1730_s1] sm:$0xff]   ;;  %1156 = vmatprep.subr.bf16.mxu1 %v1265_v1  ;;  %v1270_v6 = vld [vmem:[%s1730_s1 + $0x8] sm:$0xff]   ;;  %v1274_v10 = vld [vmem:[%s1730_s1 + $0x10] sm:$0xff]  }
   0x4   :  { %v1267_v3 = vld [vmem:[%s1730_s1 + $0x80] sm:$0xff]   ;;  %1093 = vmatpush3.bf16.msra.mxu0 %v1266_v2  ;;  %v1271_v7 = vld [vmem:[%s1730_s1 + $0x88] sm:$0xff]   ;;  %v1275_v11 = vld [vmem:[%s1730_s1 + $0x90] sm:$0xff]  }
   0x5   :  { %1157 = vmatpush3.bf16.msra.mxu1 %v1267_v3  ;;  %1094 = vmatprep.subr.bf16.mxu0 %v1268_v4  ;;  %v1276_v12 = vld [vmem:[%s1730_s1 + $0x58] sm:$0xff]   ;;  %v1280_v16 = vld [vmem:[%s1730_s1 + $0x60] sm:$0xff]   ;;  %v1284_v20 = vld [vmem:[%s1730_s1 + $0x68] sm:$0xff]  }
   0x6   :  { %1158 = vmatprep.subr.bf16.mxu1 %v1269_v5  ;;  %v1277_v13 = vld [vmem:[%s1730_s1 + $0xd8] sm:$0xff]   ;;  %v1281_v17 = vld [vmem:[%s1730_s1 + $0xe0] sm:$0xff]   ;;  %v1285_v21 = vld [vmem:[%s1730_s1 + $0xe8] sm:$0xff]  }
   0x7   :  { %v1278_v14 = vld [vmem:[%s1730_s1 + $0x18] sm:$0xff]   ;;  %v1282_v18 = vld [vmem:[%s1730_s1 + $0x20] sm:$0xff]   ;;  %v1286_v22 = vld [vmem:[%s1730_s1 + $0x28] sm:$0xff]  }
   0x8   :  { %1095 = vmatpush3.bf16.msra.mxu0 %v1270_v6  ;;  %v1279_v15 = vld [vmem:[%s1730_s1 + $0x98] sm:$0xff]   ;;  %v1283_v19 = vld [vmem:[%s1730_s1 + $0xa0] sm:$0xff]   ;;  %v1287_v23 = vld [vmem:[%s1730_s1 + $0xa8] sm:$0xff]  }
   0x9   :  { %1159 = vmatpush3.bf16.msra.mxu1 %v1271_v7  ;;  %1096 = vmatprep.subr.bf16.mxu0 %v1272_v8  ;;  %v1288_v24 = vld [vmem:[%s1730_s1 + $0x70] sm:$0xff]   ;;  %v1292_v28 = vld [vmem:[%s1730_s1 + $0x78] sm:$0xff]   ;;  %v1301_v35 = vld [vmem:[%s1731_s0 + $0xc] ss:$20 sps:$4 sm:$0xff]  }
   0xa   :  { %1160 = vmatprep.subr.bf16.mxu1 %v1273_v9  ;;  %v1289_v25 = vld [vmem:[%s1730_s1 + $0xf0] sm:$0xff]   ;;  %v1293_v29 = vld [vmem:[%s1730_s1 + $0xf8] sm:$0xff]   ;;  %v1302_v36 = vld [vmem:[%s1730_s1 + $0x100] sm:$0xff]   ;;  %712 = vmatprep.mubr.bf16.mxu1 %v1301_v35 }
   0xb   :  { %v1290_v26 = vld [vmem:[%s1730_s1 + $0x30] sm:$0xff]   ;;  %v1294_v30 = vld [vmem:[%s1730_s1 + $0x38] sm:$0xff]   ;;  %v1303_v37 = vld [vmem:[%s1731_s0 + $0x2c] ss:$20 sps:$4 sm:$0xff]  }
   0xc   :  { %1097 = vmatpush3.bf16.msra.mxu0 %v1274_v10  ;;  %v1291_v27 = vld [vmem:[%s1730_s1 + $0xb0] sm:$0xff]   ;;  %v1295_v31 = vld [vmem:[%s1730_s1 + $0xb8] sm:$0xff]   ;;  %v1315_v42 = vld [vmem:[%s1730_s1 + $0x108] sm:$0xff]  }
   0xd   :  { %1161 = vmatpush3.bf16.msra.mxu1 %v1275_v11  ;;  %1098 = vmatprep.subr.bf16.mxu0 %v1276_v12  ;;  %v1296_v32 = vld [vmem:[%s1731_s0] ss:$20 sps:$4 sm:$0xff]   ;;  %v1298_v33 = vld [vmem:[%s1731_s0 + $0x4] ss:$20 sps:$4 sm:$0xff]   ;;  %v1299_v34 = vld [vmem:[%s1731_s0 + $0x8] ss:$20 sps:$4 sm:$0xff]  }
   0xe   :  { %1162 = vmatprep.subr.bf16.mxu1 %v1277_v13  ;;  %615 = vmatprep.mubr.bf16.mxu0 %v1298_v33  ;;  %v1305_v38 = vld [vmem:[%s1731_s0 + $0x34] ss:$20 sps:$4 sm:$0xff]   ;;  %v1308_v40 = vld [vmem:[%s1731_s0 + $0x30] ss:$20 sps:$4 sm:$0xff]   ;;  %v1314_v45 = vld [vmem:[%s1731_s0 + $0x58] ss:$20 sps:$4 sm:$0xff]  }
   0xf   :  { %v1307_v39 = vld [vmem:[%s1731_s0 + $0x28] ss:$20 sps:$4 sm:$0xff]   ;;  %v1313_v44 = vld [vmem:[%s1731_s0 + $0x50] ss:$20 sps:$4 sm:$0xff]   ;;  %v1320_v50 = vld [vmem:[%s1731_s0 + $0x78] ss:$20 sps:$4 sm:$0xff]  }
  0x10   :  { %1099 = vmatpush3.bf16.msra.mxu0 %v1278_v14  ;;  %v1309_v41 = vld [vmem:[%s1731_s0 + $0x54] ss:$20 sps:$4 sm:$0xff]   ;;  %v1311_v43 = vld [vmem:[%s1731_s0 + $0x5c] ss:$20 sps:$4 sm:$0xff]   ;;  %v1318_v48 = vld [vmem:[%s1731_s0 + $0x84] ss:$20 sps:$4 sm:$0xff]  }
  0x11   :  { %1163 = vmatpush3.bf16.msra.mxu1 %v1279_v15  ;;  %1100 = vmatprep.subr.bf16.mxu0 %v1280_v16  ;;  %v1328_v46 = vld [vmem:[%s1730_s1 + $0x110] sm:$0xff]   ;;  %v1341_v49 = vld [vmem:[%s1730_s1 + $0x118] sm:$0xff]   ;;  %v1324_v53 = vld [vmem:[%s1731_s0 + $0xac] ss:$20 sps:$4 sm:$0xff]  }
  0x12   :  { %1164 = vmatprep.subr.bf16.mxu1 %v1281_v17  ;;  %v1316_v47 = vld [vmem:[%s1731_s0 + $0x7c] ss:$20 sps:$4 sm:$0xff]   ;;  %v1321_v51 = vld [vmem:[%s1731_s0 + $0x80] ss:$20 sps:$4 sm:$0xff]   ;;  %v1322_v52 = vld [vmem:[%s1731_s0 + $0xa4] ss:$20 sps:$4 sm:$0xff]  }
  0x13   :  { %v1326_v54 = vld [vmem:[%s1731_s0 + $0xa0] ss:$20 sps:$4 sm:$0xff]   ;;  %v1327_v55 = vld [vmem:[%s1731_s0 + $0xa8] ss:$20 sps:$4 sm:$0xff]   ;;  %v1334_v59 = vld [vmem:[%s1731_s0 + $0xd0] ss:$20 sps:$4 sm:$0xff]  }
  0x14   :  { %1101 = vmatpush3.bf16.msra.mxu0 %v1282_v18  ;;  %v1329_v56 = vld [vmem:[%s1731_s0 + $0xcc] ss:$20 sps:$4 sm:$0xff]   ;;  %v1331_v57 = vld [vmem:[%s1731_s0 + $0xd4] ss:$20 sps:$4 sm:$0xff]   ;;  %v1337_v61 = vld [vmem:[%s1731_s0 + $0xfc] ss:$20 sps:$4 sm:$0xff]  }
  0x15   :  { %1165 = vmatpush3.bf16.msra.mxu1 %v1283_v19  ;;  %1102 = vmatprep.subr.bf16.mxu0 %v1284_v20  ;;  %v1333_v58 = vld [vmem:[%s1731_s0 + $0xc8] ss:$20 sps:$4 sm:$0xff]   ;;  %v1339_v62 = vld [vmem:[%s1731_s0 + $0xf0] ss:$20 sps:$4 sm:$0xff]   ;;  %v1340_v63 = vld [vmem:[%s1731_s0 + $0xf8] ss:$20 sps:$4 sm:$0xff]  }
  0x16   :  { %1166 = vmatprep.subr.bf16.mxu1 %v1285_v21  ;;  %v1335_v60 = vld [vmem:[%s1731_s0 + $0xf4] ss:$20 sps:$4 sm:$0xff]   ;;  %v1342_v0 = vld [vmem:[%s1731_s0 + $0x11c] ss:$20 sps:$4 sm:$0xff]   ;;  %v1344_v1 = vld [vmem:[%s1731_s0 + $0x124] ss:$20 sps:$4 sm:$0xff]  }
  0x17   :  { %v1346_v2 = vld [vmem:[%s1731_s0 + $0x118] ss:$20 sps:$4 sm:$0xff]   ;;  %v1347_v3 = vld [vmem:[%s1731_s0 + $0x120] ss:$20 sps:$4 sm:$0xff]   ;;  %v1348_v4 = vld [vmem:[%s1731_s0 + $0x10] ss:$20 sps:$4 sm:$0xff]  }
  0x18   :  { %1103 = vmatpush3.bf16.msra.mxu0 %v1286_v22  ;;  %v1349_v5 = vld [vmem:[%s1731_s0 + $0xb0] ss:$20 sps:$4 sm:$0xff]   ;;  %v1350_v6 = vld [vmem:[%s1731_s0 + $0x38] ss:$20 sps:$4 sm:$0xff]   ;;  %v1352_v8 = vld [vmem:[%s1731_s0 + $0x60] ss:$20 sps:$4 sm:$0xff]  }
  0x19   :  { %1167 = vmatpush3.bf16.msra.mxu1 %v1287_v23  ;;  %1104 = vmatprep.subr.bf16.mxu0 %v1288_v24  ;;  %v1351_v7 = vld [vmem:[%s1731_s0 + $0xd8] ss:$20 sps:$4 sm:$0xff]   ;;  %v1353_v9 = vld [vmem:[%s1731_s0 + $0x100] ss:$20 sps:$4 sm:$0xff]   ;;  %v1354_v10 = vld [vmem:[%s1731_s0 + $0x88] ss:$20 sps:$4 sm:$0xff]  }
  0x1a   :  { %1168 = vmatprep.subr.bf16.mxu1 %v1289_v25  ;;  %v1355_v11 = vld [vmem:[%s1731_s0 + $0x128] ss:$20 sps:$4 sm:$0xff]   ;;  %v1615_v14 = vld [vmem:[%s1732_s2] ss:$0 sm:$0xff] }
  0x1c   :  { %1105 = vmatpush3.bf16.msra.mxu0 %v1290_v26 }
  0x1d   :  { %1169 = vmatpush3.bf16.msra.mxu1 %v1291_v27  ;;  %1106 = vmatprep.subr.bf16.mxu0 %v1292_v28 }
  0x1e   :  { %1170 = vmatprep.subr.bf16.mxu1 %v1293_v29 }
  0x20   :  { %1107 = vmatpush3.bf16.msra.mxu0 %v1294_v30 }
  0x21   :  { %1171 = vmatpush3.bf16.msra.mxu1 %v1295_v31  ;;  %1232 = vmatprep.subr.bf16.mxu0 %v1302_v36 }
  0x22   :  { %1256 = vmatprep.subr.bf16.mxu1 %v1302_v36 }
  0x23   :  { %616 = vmatmul.mubr.bf16.vlgmr.msra.gmra.mrb[0].mxu0 %v1296_v32 }
  0x24   :  { %713 = vmatmul.mubr.bf16.vlgmr.msra.gmra.mrb[0].mxu1 %v1299_v34  ;;  %1233 = vmatpush3.bf16.msra.mxu0 %v1302_v36 }
  0x25   :  { %1260 = vmatpush3.bf16.msra.mxu1 %v1302_v36  ;;  %623 = vmatprep.mubr.bf16.mxu0 %v1303_v37 }
  0x26   :  { %720 = vmatprep.mubr.bf16.mxu1 %v1305_v38  ;;  %1234 = vmatprep.subr.bf16.mxu0 %v1315_v42 }
  0x27   :  { %1257 = vmatprep.subr.bf16.mxu1 %v1315_v42 }
  0x28   :  { %1235 = vmatpush3.bf16.msra.mxu0 %v1315_v42 }
  0x29   :  { %1261 = vmatpush3.bf16.msra.mxu1 %v1315_v42  ;;  %1236 = vmatprep.subr.bf16.mxu0 %v1328_v46 }
  0x2a   :  { %1258 = vmatprep.subr.bf16.mxu1 %v1328_v46 }
  0x2b   :  { %624 = vmatmul.mubr.bf16.gmra.mrb[4].mxu0 %v1307_v39 }
  0x2c   :  { %721 = vmatmul.mubr.bf16.gmra.mrb[4].mxu1 %v1308_v40  ;;  %631 = vmatprep.mubr.bf16.mxu0 %v1309_v41 }
  0x2d   :  { %728 = vmatprep.mubr.bf16.mxu1 %v1311_v43  ;;  %1237 = vmatpush3.bf16.msra.mxu0 %v1328_v46 }
  0x2e   :  { %1262 = vmatpush3.bf16.msra.mxu1 %v1328_v46  ;;  %1238 = vmatprep.subr.bf16.mxu0 %v1341_v49 }
  0x2f   :  { %1259 = vmatprep.subr.bf16.mxu1 %v1341_v49 }
  0x31   :  { %1239 = vmatpush3.bf16.msra.mxu0 %v1341_v49 }
  0x32   :  { %1263 = vmatpush3.bf16.msra.mxu1 %v1341_v49 }
  0x33   :  { %632 = vmatmul.mubr.bf16.gmra.mrb[8].mxu0 %v1313_v44 }
  0x34   :  { %729 = vmatmul.mubr.bf16.gmra.mrb[8].mxu1 %v1314_v45  ;;  %639 = vmatprep.mubr.bf16.mxu0 %v1316_v47 }
  0x35   :  { %736 = vmatprep.mubr.bf16.mxu1 %v1318_v48 }
  0x3b   :  { %640 = vmatmul.mubr.bf16.gmra.mrb[12].mxu0 %v1320_v50 }
  0x3c   :  { %737 = vmatmul.mubr.bf16.gmra.mrb[12].mxu1 %v1321_v51  ;;  %647 = vmatprep.mubr.bf16.mxu0 %v1322_v52 }
  0x3d   :  { %744 = vmatprep.mubr.bf16.mxu1 %v1324_v53 }
  0x43   :  { %648 = vmatmul.mubr.bf16.gmra.mrb[16].mxu0 %v1326_v54 }
  0x44   :  { %745 = vmatmul.mubr.bf16.gmra.mrb[16].mxu1 %v1327_v55  ;;  %655 = vmatprep.mubr.bf16.mxu0 %v1329_v56 }
  0x45   :  { %752 = vmatprep.mubr.bf16.mxu1 %v1331_v57 }
  0x4b   :  { %656 = vmatmul.mubr.bf16.gmra.mrb[20].mxu0 %v1333_v58 }
  0x4c   :  { %753 = vmatmul.mubr.bf16.gmra.mrb[20].mxu1 %v1334_v59  ;;  %663 = vmatprep.mubr.bf16.mxu0 %v1335_v60 }
  0x4d   :  { %760 = vmatprep.mubr.bf16.mxu1 %v1337_v61 }
  0x53   :  { %664 = vmatmul.mubr.bf16.gmra.mrb[24].mxu0 %v1339_v62 }
  0x54   :  { %761 = vmatmul.mubr.bf16.gmra.mrb[24].mxu1 %v1340_v63  ;;  %671 = vmatprep.mubr.bf16.mxu0 %v1342_v0 }
  0x55   :  { %768 = vmatprep.mubr.bf16.mxu1 %v1344_v1 }
  0x5b   :  { %672 = vmatmul.mubr.bf16.gmra.mrb[28].mxu0 %v1346_v2 }
  0x5c   :  { %769 = vmatmul.mubr.bf16.gmra.mrb[28].mxu1 %v1347_v3  ;;  %1240 = vmatprep.mubr.msk.bf16.mxu0 %vm558_vm0, %v1348_v4 }
  0x5d   :  { %1248 = vmatprep.mubr.msk.bf16.mxu1 %vm558_vm0, %v1349_v5 }
  0x63   :  { %1241 = vmatmul.mubr.msk.bf16.vlgmr.msra.gmra.mrb[32].mxu0 %vm558_vm0, %v1350_v6 }
  0x64   :  { %1249 = vmatmul.mubr.msk.bf16.vlgmr.msra.gmra.mrb[32].mxu1 %vm558_vm0, %v1351_v7  ;;  %1244 = vmatprep.mubr.msk.bf16.mxu0 %vm558_vm0, %v1352_v8 }
  0x65   :  { %1252 = vmatprep.mubr.msk.bf16.mxu1 %vm558_vm0, %v1353_v9 }
  0x6b   :  { %1245 = vmatmul.mubr.msk.bf16.gmra.mrb[36].mxu0 %vm558_vm0, %v1354_v10 }
  0x6c   :  { %1253 = vmatmul.mubr.msk.bf16.gmra.mrb[36].mxu1 %vm558_vm0, %v1355_v11 }
  0xf6   :  { %v1108_v12 = vpop.f32.mrb[0].mxu0 }
  0xf7   :  { %v1172_v13 = vpop.f32.mrb[0].mxu1  ;;  %v1109_v15 = vpop.f32.mrb[1].mxu0 }
  0xf8   :  { %v1110_v16 = vadd.f32 %v1109_v15, %v1108_v12  ;;  %v1173_v17 = vpop.f32.mrb[1].mxu1  ;;  %v1111_v18 = vpop.f32.mrb[2].mxu0 }
  0xf9   :  { %v1174_v19 = vadd.f32 %v1173_v17, %v1172_v13  ;;  %v1175_v20 = vpop.f32.mrb[2].mxu1  ;;  %v1112_v21 = vpop.f32.mrb[3].mxu0 }
  0xfa   :  { %v618_v22 = vadd.f32 %v1110_v16, %v1615_v14  ;;  %v1113_v23 = vadd.f32 %v1112_v21, %v1111_v18  ;;  %v1176_v24 = vpop.f32.mrb[3].mxu1 }
  0xfb   :  { %v1177_v25 = vadd.f32 %v1176_v24, %v1175_v20 }
  0xfc   :  { %v621_v26 = vadd.f32 %v1113_v23, %v1615_v14  ;;  %v1619_v27 = vadd.f32 %v1174_v19, %v618_v22 }
  0xfe   :  { %v1114_v28 = vpop.f32.mrb[4].mxu0  ;;  %v1621_v29 = vadd.f32 %v1177_v25, %v621_v26 }
  0xff   :  { %v1178_v30 = vpop.f32.mrb[4].mxu1  ;;  %v1115_v31 = vpop.f32.mrb[5].mxu0 }
 0x100   :  { %v1116_v32 = vadd.f32 %v1115_v31, %v1114_v28  ;;  %v1179_v33 = vpop.f32.mrb[5].mxu1  ;;  %v1117_v34 = vpop.f32.mrb[6].mxu0 }
 0x101   :  { %v1180_v35 = vadd.f32 %v1179_v33, %v1178_v30  ;;  %v1181_v36 = vpop.f32.mrb[6].mxu1  ;;  %v1118_v37 = vpop.f32.mrb[7].mxu0 }
 0x102   :  { %v626_v38 = vadd.f32 %v1116_v32, %v1615_v14  ;;  %v1119_v39 = vadd.f32 %v1118_v37, %v1117_v34  ;;  %v1182_v40 = vpop.f32.mrb[7].mxu1 }
 0x103   :  { %v1183_v41 = vadd.f32 %v1182_v40, %v1181_v36 }
 0x104   :  { %v629_v42 = vadd.f32 %v1119_v39, %v1615_v14  ;;  %v1625_v43 = vadd.f32 %v1180_v35, %v626_v38 }
 0x106   :  { %v1120_v44 = vpop.f32.mrb[8].mxu0  ;;  %v1627_v45 = vadd.f32 %v1183_v41, %v629_v42 }
 0x107   :  { %v1184_v46 = vpop.f32.mrb[8].mxu1  ;;  %v1121_v47 = vpop.f32.mrb[9].mxu0 }
 0x108   :  { %v1122_v48 = vadd.f32 %v1121_v47, %v1120_v44  ;;  %v1185_v49 = vpop.f32.mrb[9].mxu1  ;;  %v1123_v50 = vpop.f32.mrb[10].mxu0 }
 0x109   :  { %v1186_v51 = vadd.f32 %v1185_v49, %v1184_v46  ;;  %v1187_v52 = vpop.f32.mrb[10].mxu1  ;;  %v1124_v53 = vpop.f32.mrb[11].mxu0 }
 0x10a   :  { %v634_v54 = vadd.f32 %v1122_v48, %v1615_v14  ;;  %v1125_v55 = vadd.f32 %v1124_v53, %v1123_v50  ;;  %v1188_v56 = vpop.f32.mrb[11].mxu1 }
 0x10b   :  { %v1189_v57 = vadd.f32 %v1188_v56, %v1187_v52 }
 0x10c   :  { %v637_v58 = vadd.f32 %v1125_v55, %v1615_v14  ;;  %v1631_v59 = vadd.f32 %v1186_v51, %v634_v54 }
 0x10e   :  { %v1126_v60 = vpop.f32.mrb[12].mxu0  ;;  %v1633_v61 = vadd.f32 %v1189_v57, %v637_v58 }
 0x10f   :  { %v1190_v62 = vpop.f32.mrb[12].mxu1  ;;  %v1127_v63 = vpop.f32.mrb[13].mxu0 }
 0x110   :  { %v1128_v0 = vadd.f32 %v1127_v63, %v1126_v60  ;;  %v1191_v1 = vpop.f32.mrb[13].mxu1  ;;  %v1129_v2 = vpop.f32.mrb[14].mxu0 }
 0x111   :  { %v1192_v3 = vadd.f32 %v1191_v1, %v1190_v62  ;;  %v1193_v4 = vpop.f32.mrb[14].mxu1  ;;  %v1130_v5 = vpop.f32.mrb[15].mxu0 }
 0x112   :  { %v642_v6 = vadd.f32 %v1128_v0, %v1615_v14  ;;  %v1131_v7 = vadd.f32 %v1130_v5, %v1129_v2  ;;  %v1194_v8 = vpop.f32.mrb[15].mxu1 }
 0x113   :  { %v1195_v9 = vadd.f32 %v1194_v8, %v1193_v4 }
 0x114   :  { %v645_v10 = vadd.f32 %v1131_v7, %v1615_v14  ;;  %v1637_v11 = vadd.f32 %v1192_v3, %v642_v6 }
 0x116   :  { %v1132_v12 = vpop.f32.mrb[16].mxu0  ;;  %v1639_v13 = vadd.f32 %v1195_v9, %v645_v10 }
 0x117   :  { %v1196_v15 = vpop.f32.mrb[16].mxu1  ;;  %v1133_v16 = vpop.f32.mrb[17].mxu0 }
 0x118   :  { %v1134_v17 = vadd.f32 %v1133_v16, %v1132_v12  ;;  %v1197_v18 = vpop.f32.mrb[17].mxu1  ;;  %v1135_v19 = vpop.f32.mrb[18].mxu0 }
 0x119   :  { %v1198_v20 = vadd.f32 %v1197_v18, %v1196_v15  ;;  %v1199_v21 = vpop.f32.mrb[18].mxu1  ;;  %v1136_v22 = vpop.f32.mrb[19].mxu0 }
 0x11a   :  { %v650_v23 = vadd.f32 %v1134_v17, %v1615_v14  ;;  %v1137_v24 = vadd.f32 %v1136_v22, %v1135_v19  ;;  %v1200_v25 = vpop.f32.mrb[19].mxu1 }
 0x11b   :  { %v1201_v26 = vadd.f32 %v1200_v25, %v1199_v21 }
 0x11c   :  { %v653_v28 = vadd.f32 %v1137_v24, %v1615_v14  ;;  %v747_v30 = vadd.f32 %v1198_v20, %v650_v23 }
 0x11e   :  { %v1138_v31 = vpop.f32.mrb[20].mxu0  ;;  %v1643_v32 = vadd.f32 %v1201_v26, %v653_v28 }
 0x11f   :  { %v1202_v33 = vpop.f32.mrb[20].mxu1  ;;  %v1139_v34 = vpop.f32.mrb[21].mxu0 }
 0x120   :  { %v1140_v35 = vadd.f32 %v1139_v34, %v1138_v31  ;;  %v1203_v36 = vpop.f32.mrb[21].mxu1  ;;  %v1141_v37 = vpop.f32.mrb[22].mxu0 }
 0x121   :  { %v1204_v38 = vadd.f32 %v1203_v36, %v1202_v33  ;;  %v1205_v39 = vpop.f32.mrb[22].mxu1  ;;  %v1142_v40 = vpop.f32.mrb[23].mxu0 }
 0x122   :  { %v658_v41 = vadd.f32 %v1140_v35, %v1615_v14  ;;  %v1143_v42 = vadd.f32 %v1142_v40, %v1141_v37  ;;  %v1206_v44 = vpop.f32.mrb[23].mxu1 }
 0x123   :  { %v1207_v46 = vadd.f32 %v1206_v44, %v1205_v39 }
 0x124   :  { %v661_v47 = vadd.f32 %v1143_v42, %v1615_v14  ;;  %v755_v48 = vadd.f32 %v1204_v38, %v658_v41 }
 0x126   :  { %v1144_v49 = vpop.f32.mrb[24].mxu0  ;;  %v758_v50 = vadd.f32 %v1207_v46, %v661_v47 }
 0x127   :  { %v1208_v51 = vpop.f32.mrb[24].mxu1  ;;  %v1145_v52 = vpop.f32.mrb[25].mxu0 }
 0x128   :  { %v1146_v53 = vadd.f32 %v1145_v52, %v1144_v49  ;;  %v1209_v54 = vpop.f32.mrb[25].mxu1  ;;  %v1147_v55 = vpop.f32.mrb[26].mxu0 }
 0x129   :  { %v1210_v56 = vadd.f32 %v1209_v54, %v1208_v51  ;;  %v1211_v57 = vpop.f32.mrb[26].mxu1  ;;  %v1148_v58 = vpop.f32.mrb[27].mxu0 }
 0x12a   :  { %v666_v60 = vadd.f32 %v1146_v53, %v1615_v14  ;;  %v1149_v62 = vadd.f32 %v1148_v58, %v1147_v55  ;;  %v1212_v63 = vpop.f32.mrb[27].mxu1 }
 0x12b   :  { %v1213_v0 = vadd.f32 %v1212_v63, %v1211_v57 }
 0x12c   :  { %v669_v1 = vadd.f32 %v1149_v62, %v1615_v14  ;;  %v1649_v2 = vadd.f32 %v1210_v56, %v666_v60 }
 0x12e   :  { %v1150_v3 = vpop.f32.mrb[28].mxu0  ;;  %v1651_v4 = vadd.f32 %v1213_v0, %v669_v1 }
 0x12f   :  { %v1214_v5 = vpop.f32.mrb[28].mxu1  ;;  %v1151_v6 = vpop.f32.mrb[29].mxu0 }
 0x130   :  { %v1152_v7 = vadd.f32 %v1151_v6, %v1150_v3  ;;  %v1215_v8 = vpop.f32.mrb[29].mxu1  ;;  %v1153_v9 = vpop.f32.mrb[30].mxu0 }
 0x131   :  { %v1216_v10 = vadd.f32 %v1215_v8, %v1214_v5  ;;  %v1217_v12 = vpop.f32.mrb[30].mxu1  ;;  %v1154_v15 = vpop.f32.mrb[31].mxu0 }
 0x132   :  { %v674_v16 = vadd.f32 %v1152_v7, %v1615_v14  ;;  %v1155_v17 = vadd.f32 %v1154_v15, %v1153_v9  ;;  %v1218_v18 = vpop.f32.mrb[31].mxu1 }
 0x133   :  { %v1219_v19 = vadd.f32 %v1218_v18, %v1217_v12 }
 0x134   :  { %v677_v20 = vadd.f32 %v1155_v17, %v1615_v14  ;;  %v771_v21 = vadd.f32 %v1216_v10, %v674_v16 }
 0x136   :  { %v1242_v22 = vpop.f32.mrb[32].mxu0  ;;  %v774_v23 = vadd.f32 %v1219_v19, %v677_v20 }
 0x137   :  { %v820_v24 = vadd.f32 %v1242_v22, %v1625_v43  ;;  %v1250_v25 = vpop.f32.mrb[32].mxu1  ;;  %v811_v26 = vpop.f32.mrb[33].mxu0 }
 0x138   :  { %v852_v28 = vadd.f32 %v1250_v25, %v755_v48  ;;  %v812_v31 = vadd.f32 %v811_v26, %v1619_v27  ;;  %v843_v33 = vpop.f32.mrb[33].mxu1  ;;  %v1243_v34 = vpop.f32.mrb[34].mxu0 }
 0x139   :  { %v876_v35 = vmax.f32 %v820_v24, 0.0  ;;  %v844_v36 = vadd.f32 %v843_v33, %v747_v30  ;;  %v823_v37 = vadd.f32 %v1243_v34, %v1627_v45  ;;  %v1251_v38 = vpop.f32.mrb[34].mxu1  ;;  %v814_v39 = vpop.f32.mrb[35].mxu0 }
 0x13a   :  { %v884_v14 = vmax.f32 %v852_v28, 0.0  ;;  %v874_v40 = vmax.f32 %v812_v31, 0.0  ;;  %v855_v41 = vadd.f32 %v1251_v38, %v758_v50  ;;  %v815_v42 = vadd.f32 %v814_v39, %v1621_v29  ;;  %v846_v43 = vpop.f32.mrb[35].mxu1 }
 0x13b   :  { %v1078_v44 = vpack.c.bf16 %v876_v35, %v876_v35  ;;  %v882_v46 = vmax.f32 %v844_v36, 0.0  ;;  %v877_v47 = vmax.f32 %v823_v37, 0.0  ;;  %v847_v27 = vadd.f32 %v846_v43, %v1643_v32 }
 0x13c   :  { %v1086_v48 = vpack.c.bf16 %v884_v14, %v884_v14  ;;  %v1076_v49 = vpack.c.bf16 %v874_v40, %v874_v40  ;;  %v885_v51 = vmax.f32 %v855_v41, 0.0  ;;  %v875_v52 = vmax.f32 %v815_v42, 0.0 }
 0x13d   :  { %957 = vst.msk [vmem:[%s1733_s3 + $0x8] sm:$0xf] %vm954_vm1, %v1078_v44  ;;  %v1084_v45 = vpack.c.bf16 %v882_v46, %v882_v46  ;;  %v1079_v30 = vpack.c.bf16 %v877_v47, %v877_v47  ;;  %v883_v50 = vmax.f32 %v847_v27, 0.0 }
 0x13e   :  { %965 = vst.msk [vmem:[%s1733_s3 + $0x28] sm:$0xf] %vm954_vm1, %v1086_v48  ;;  %955 = vst.msk [vmem:[%s1733_s3] sm:$0xf] %vm954_vm1, %v1076_v49  ;;  %v1087_v29 = vpack.c.bf16 %v885_v51, %v885_v51  ;;  %v1077_v32 = vpack.c.bf16 %v875_v52, %v875_v52  ;;  %v1246_v53 = vpop.f32.mrb[36].mxu0 }
 0x13f   :  { %963 = vst.msk [vmem:[%s1733_s3 + $0x20] sm:$0xf] %vm954_vm1, %v1084_v45  ;;  %958 = vst.msk [vmem:[%s1733_s3 + $0xc] sm:$0xf] %vm954_vm1, %v1079_v30  ;;  %v1085_v54 = vpack.c.bf16 %v883_v50, %v883_v50  ;;  %v836_v55 = vadd.f32 %v1246_v53, %v1637_v11  ;;  %v1254_v56 = vpop.f32.mrb[36].mxu1  ;;  %v827_v57 = vpop.f32.mrb[37].mxu0 }
 0x140   :  { %966 = vst.msk [vmem:[%s1733_s3 + $0x2c] sm:$0xf] %vm954_vm1, %v1087_v29  ;;  %956 = vst.msk [vmem:[%s1733_s3 + $0x4] sm:$0xf] %vm954_vm1, %v1077_v32  ;;  %v868_v58 = vadd.f32 %v1254_v56, %v771_v21  ;;  %v828_v60 = vadd.f32 %v827_v57, %v1631_v59  ;;  %v859_v62 = vpop.f32.mrb[37].mxu1  ;;  %v1247_v63 = vpop.f32.mrb[38].mxu0 }
 0x141   :  { %964 = vst.msk [vmem:[%s1733_s3 + $0x24] sm:$0xf] %vm954_vm1, %v1085_v54  ;;  %v880_v11 = vmax.f32 %v836_v55, 0.0  ;;  %v860_v0 = vadd.f32 %v859_v62, %v1649_v2  ;;  %v839_v1 = vadd.f32 %v1247_v63, %v1639_v13  ;;  %v1255_v3 = vpop.f32.mrb[38].mxu1  ;;  %v830_v5 = vpop.f32.mrb[39].mxu0 }
 0x142   :  { %v888_v6 = vmax.f32 %v868_v58, 0.0  ;;  %v878_v7 = vmax.f32 %v828_v60, 0.0  ;;  %v871_v8 = vadd.f32 %v1255_v3, %v774_v23  ;;  %v831_v9 = vadd.f32 %v830_v5, %v1633_v61  ;;  %v862_v59 = vpop.f32.mrb[39].mxu1 }
 0x143   :  { %v1082_v10 = vpack.c.bf16 %v880_v11, %v880_v11  ;;  %v886_v12 = vmax.f32 %v860_v0, 0.0  ;;  %v881_v15 = vmax.f32 %v839_v1, 0.0  ;;  %v863_v16 = vadd.f32 %v862_v59, %v1651_v4 }
 0x144   :  { %v1090_v17 = vpack.c.bf16 %v888_v6, %v888_v6  ;;  %v1080_v18 = vpack.c.bf16 %v878_v7, %v878_v7  ;;  %v889_v19 = vmax.f32 %v871_v8, 0.0  ;;  %v879_v20 = vmax.f32 %v831_v9, 0.0 }
 0x145   :  { %961 = vst.msk [vmem:[%s1733_s3 + $0x18] sm:$0xf] %vm954_vm1, %v1082_v10  ;;  %v1088_v13 = vpack.c.bf16 %v886_v12, %v886_v12  ;;  %v1083_v2 = vpack.c.bf16 %v881_v15, %v881_v15  ;;  %v887_v21 = vmax.f32 %v863_v16, 0.0 }
 0x146   :  { %969 = vst.msk [vmem:[%s1733_s3 + $0x38] sm:$0xf] %vm954_vm1, %v1090_v17  ;;  %959 = vst.msk [vmem:[%s1733_s3 + $0x10] sm:$0xf] %vm954_vm1, %v1080_v18  ;;  %v1091_v61 = vpack.c.bf16 %v889_v19, %v889_v19  ;;  %v1081_v4 = vpack.c.bf16 %v879_v20, %v879_v20 }
 0x147   :  { %967 = vst.msk [vmem:[%s1733_s3 + $0x30] sm:$0xf] %vm954_vm1, %v1088_v13  ;;  %962 = vst.msk [vmem:[%s1733_s3 + $0x1c] sm:$0xf] %vm954_vm1, %v1083_v2  ;;  %v1089_v22 = vpack.c.bf16 %v887_v21, %v887_v21 }
 0x148   :  { %970 = vst.msk [vmem:[%s1733_s3 + $0x3c] sm:$0xf] %vm954_vm1, %v1091_v61  ;;  %960 = vst.msk [vmem:[%s1733_s3 + $0x14] sm:$0xf] %vm954_vm1, %v1081_v4 }
 0x149   :  { %968 = vst.msk [vmem:[%s1733_s3 + $0x34] sm:$0xf] %vm954_vm1, %v1089_v22 }

// kernel: _lambda_.18
= control target key start
LH: loop header
LB: loop body
LE: loop exit
PB: predicated region body
PF: predicated region fallthrough
CT: control target
= control target key end

     0   :  { %vm521_vm0 = vcmask 523264   ;;  %s1269_s1 = inlined_call_operand.vmem [shape: bf16[576,256], index: 1, kind: input, shape index: {}]   ;;  %s1270_s0 = inlined_call_operand.vmem [shape: bf16[32,576], index: 0, kind: input, shape index: {}]   ;;  %s1271_s2 = inlined_call_operand.vmem [shape: f32[1,256], index: 2, kind: input, shape index: {}]   ;;  %s1272_s3 = inlined_call_operand.vmem [shape: bf16[32,256], index: 3, kind: output, shape index: {}]  }
   0x1   :  { %v865_v0 = vld [vmem:[%s1269_s1 + $0x4] ss:$8 sps:$4 sm:$0xff]   ;;  %v869_v2 = vld [vmem:[%s1269_s1] ss:$8 sps:$4 sm:$0xff]   ;;  %v871_v4 = vld [vmem:[%s1269_s1 + $0x14] ss:$8 sps:$4 sm:$0xff]  }
   0x2   :  { %v867_v1 = vld [vmem:[%s1269_s1 + $0x104] ss:$8 sps:$4 sm:$0xff]   ;;  %528 = vmatprep.subr.bf16.mxu1 %v865_v0  ;;  %v870_v3 = vld [vmem:[%s1269_s1 + $0x100] ss:$8 sps:$4 sm:$0xff]   ;;  %v873_v5 = vld [vmem:[%s1269_s1 + $0x114] ss:$8 sps:$4 sm:$0xff]  }
   0x3   :  { %581 = vmatprep.subr.bf16.mxu0 %v867_v1  ;;  %529 = vmatpush1.bf16.msra.mxu1 %v869_v2  ;;  %v875_v6 = vld [vmem:[%s1269_s1 + $0x10] ss:$8 sps:$4 sm:$0xff]   ;;  %v877_v8 = vld [vmem:[%s1269_s1 + $0x24] ss:$8 sps:$4 sm:$0xff]   ;;  %v881_v10 = vld [vmem:[%s1269_s1 + $0x20] ss:$8 sps:$4 sm:$0xff]  }
   0x4   :  { %582 = vmatpush1.bf16.msra.mxu0 %v870_v3  ;;  %530 = vmatprep.subr.bf16.mxu1 %v871_v4  ;;  %v876_v7 = vld [vmem:[%s1269_s1 + $0x110] ss:$8 sps:$4 sm:$0xff]   ;;  %v879_v9 = vld [vmem:[%s1269_s1 + $0x124] ss:$8 sps:$4 sm:$0xff]   ;;  %v882_v11 = vld [vmem:[%s1269_s1 + $0x120] ss:$8 sps:$4 sm:$0xff]  }
   0x5   :  { %583 = vmatprep.subr.bf16.mxu0 %v873_v5  ;;  %v883_v12 = vld [vmem:[%s1269_s1 + $0x34] ss:$8 sps:$4 sm:$0xff]   ;;  %v887_v14 = vld [vmem:[%s1269_s1 + $0x30] ss:$8 sps:$4 sm:$0xff]   ;;  %v889_v16 = vld [vmem:[%s1269_s1 + $0x44] ss:$8 sps:$4 sm:$0xff]  }
   0x6   :  { %v885_v13 = vld [vmem:[%s1269_s1 + $0x134] ss:$8 sps:$4 sm:$0xff]   ;;  %v888_v15 = vld [vmem:[%s1269_s1 + $0x130] ss:$8 sps:$4 sm:$0xff]   ;;  %v891_v17 = vld [vmem:[%s1269_s1 + $0x144] ss:$8 sps:$4 sm:$0xff]  }
   0x7   :  { %531 = vmatpush1.bf16.msra.mxu1 %v875_v6  ;;  %v893_v18 = vld [vmem:[%s1269_s1 + $0x40] ss:$8 sps:$4 sm:$0xff]   ;;  %v895_v20 = vld [vmem:[%s1269_s1 + $0x54] ss:$8 sps:$4 sm:$0xff]   ;;  %v899_v22 = vld [vmem:[%s1269_s1 + $0x50] ss:$8 sps:$4 sm:$0xff]  }
   0x8   :  { %584 = vmatpush1.bf16.msra.mxu0 %v876_v7  ;;  %532 = vmatprep.subr.bf16.mxu1 %v877_v8  ;;  %v894_v19 = vld [vmem:[%s1269_s1 + $0x140] ss:$8 sps:$4 sm:$0xff]   ;;  %v897_v21 = vld [vmem:[%s1269_s1 + $0x154] ss:$8 sps:$4 sm:$0xff]   ;;  %v900_v23 = vld [vmem:[%s1269_s1 + $0x150] ss:$8 sps:$4 sm:$0xff]  }
   0x9   :  { %585 = vmatprep.subr.bf16.mxu0 %v879_v9  ;;  %v901_v24 = vld [vmem:[%s1269_s1 + $0x64] ss:$8 sps:$4 sm:$0xff]   ;;  %v905_v26 = vld [vmem:[%s1269_s1 + $0x60] ss:$8 sps:$4 sm:$0xff]   ;;  %v907_v28 = vld [vmem:[%s1269_s1 + $0x74] ss:$8 sps:$4 sm:$0xff]  }
   0xa   :  { %v903_v25 = vld [vmem:[%s1269_s1 + $0x164] ss:$8 sps:$4 sm:$0xff]   ;;  %v906_v27 = vld [vmem:[%s1269_s1 + $0x160] ss:$8 sps:$4 sm:$0xff]   ;;  %v909_v29 = vld [vmem:[%s1269_s1 + $0x174] ss:$8 sps:$4 sm:$0xff]  }
   0xb   :  { %533 = vmatpush1.bf16.msra.mxu1 %v881_v10  ;;  %v911_v30 = vld [vmem:[%s1269_s1 + $0x70] ss:$8 sps:$4 sm:$0xff]   ;;  %v913_v32 = vld [vmem:[%s1269_s1 + $0x84] ss:$8 sps:$4 sm:$0xff]   ;;  %v917_v34 = vld [vmem:[%s1269_s1 + $0x80] ss:$8 sps:$4 sm:$0xff]  }
   0xc   :  { %586 = vmatpush1.bf16.msra.mxu0 %v882_v11  ;;  %534 = vmatprep.subr.bf16.mxu1 %v883_v12  ;;  %v912_v31 = vld [vmem:[%s1269_s1 + $0x170] ss:$8 sps:$4 sm:$0xff]   ;;  %v915_v33 = vld [vmem:[%s1269_s1 + $0x184] ss:$8 sps:$4 sm:$0xff]   ;;  %v918_v35 = vld [vmem:[%s1269_s1 + $0x180] ss:$8 sps:$4 sm:$0xff]  }
   0xd   :  { %587 = vmatprep.subr.bf16.mxu0 %v885_v13  ;;  %v919_v36 = vld [vmem:[%s1269_s1 + $0x94] ss:$8 sps:$4 sm:$0xff]   ;;  %v923_v38 = vld [vmem:[%s1269_s1 + $0x90] ss:$8 sps:$4 sm:$0xff]   ;;  %v925_v40 = vld [vmem:[%s1269_s1 + $0xa4] ss:$8 sps:$4 sm:$0xff]  }
   0xe   :  { %v921_v37 = vld [vmem:[%s1269_s1 + $0x194] ss:$8 sps:$4 sm:$0xff]   ;;  %v924_v39 = vld [vmem:[%s1269_s1 + $0x190] ss:$8 sps:$4 sm:$0xff]   ;;  %v927_v41 = vld [vmem:[%s1269_s1 + $0x1a4] ss:$8 sps:$4 sm:$0xff]  }
   0xf   :  { %535 = vmatpush1.bf16.msra.mxu1 %v887_v14  ;;  %v929_v42 = vld [vmem:[%s1269_s1 + $0xa0] ss:$8 sps:$4 sm:$0xff]   ;;  %v931_v44 = vld [vmem:[%s1269_s1 + $0xb4] ss:$8 sps:$4 sm:$0xff]   ;;  %v935_v46 = vld [vmem:[%s1269_s1 + $0xb0] ss:$8 sps:$4 sm:$0xff]  }
  0x10   :  { %588 = vmatpush1.bf16.msra.mxu0 %v888_v15  ;;  %536 = vmatprep.subr.bf16.mxu1 %v889_v16  ;;  %v930_v43 = vld [vmem:[%s1269_s1 + $0x1a0] ss:$8 sps:$4 sm:$0xff]   ;;  %v933_v45 = vld [vmem:[%s1269_s1 + $0x1b4] ss:$8 sps:$4 sm:$0xff]   ;;  %v936_v47 = vld [vmem:[%s1269_s1 + $0x1b0] ss:$8 sps:$4 sm:$0xff]  }
  0x11   :  { %589 = vmatprep.subr.bf16.mxu0 %v891_v17  ;;  %v937_v48 = vld [vmem:[%s1269_s1 + $0xc4] ss:$8 sps:$4 sm:$0xff]   ;;  %v941_v52 = vld [vmem:[%s1269_s1 + $0xc0] ss:$8 sps:$4 sm:$0xff]   ;;  %v943_v54 = vld [vmem:[%s1269_s1 + $0xd4] ss:$8 sps:$4 sm:$0xff]  }
  0x12   :  { %v963_v49 = vld [vmem:[%s1270_s0 + $0x4] ss:$20 sps:$4 sm:$0xff]   ;;  %v966_v51 = vld [vmem:[%s1270_s0 + $0xc] ss:$20 sps:$4 sm:$0xff]   ;;  %v945_v55 = vld [vmem:[%s1269_s1 + $0x1d4] ss:$8 sps:$4 sm:$0xff]  }
  0x13   :  { %537 = vmatpush1.bf16.msra.mxu1 %v893_v18  ;;  %v939_v50 = vld [vmem:[%s1269_s1 + $0x1c4] ss:$8 sps:$4 sm:$0xff]   ;;  %560 = vmatprep.mubr.bf16.mxu1 %v963_v49  ;;  %v942_v53 = vld [vmem:[%s1269_s1 + $0x1c0] ss:$8 sps:$4 sm:$0xff]   ;;  %v947_v56 = vld [vmem:[%s1269_s1 + $0xd0] ss:$8 sps:$4 sm:$0xff]  }
  0x14   :  { %590 = vmatpush1.bf16.msra.mxu0 %v894_v19  ;;  %538 = vmatprep.subr.bf16.mxu1 %v895_v20  ;;  %v948_v57 = vld [vmem:[%s1269_s1 + $0x1d0] ss:$8 sps:$4 sm:$0xff]   ;;  %v949_v58 = vld [vmem:[%s1269_s1 + $0xe4] ss:$8 sps:$4 sm:$0xff]   ;;  %v953_v60 = vld [vmem:[%s1269_s1 + $0xe0] ss:$8 sps:$4 sm:$0xff]   ;;  %v101_v19 = vlaneseq }
  0x15   :  { %591 = vmatprep.subr.bf16.mxu0 %v897_v21  ;;  %613 = vmatprep.mubr.bf16.mxu0 %v966_v51  ;;  %v951_v59 = vld [vmem:[%s1269_s1 + $0x1e4] ss:$8 sps:$4 sm:$0xff]   ;;  %v954_v61 = vld [vmem:[%s1269_s1 + $0x1e0] ss:$8 sps:$4 sm:$0xff]   ;;  %v955_v62 = vld [vmem:[%s1269_s1 + $0xf4] ss:$8 sps:$4 sm:$0xff]  }
  0x16   :  { %v957_v63 = vld [vmem:[%s1269_s1 + $0x1f4] ss:$8 sps:$4 sm:$0xff]   ;;  %v959_v0 = vld [vmem:[%s1269_s1 + $0xf0] ss:$8 sps:$4 sm:$0xff]   ;;  %v969_v2 = vld [vmem:[%s1269_s1 + $0x204] ss:$8 sps:$4 sm:$0xff]  }
  0x17   :  { %539 = vmatpush1.bf16.msra.mxu1 %v899_v22  ;;  %v960_v1 = vld [vmem:[%s1269_s1 + $0x1f0] ss:$8 sps:$4 sm:$0xff]   ;;  %v961_v3 = vld [vmem:[%s1270_s0] ss:$20 sps:$4 sm:$0xff]   ;;  %v964_v4 = vld [vmem:[%s1270_s0 + $0x8] ss:$20 sps:$4 sm:$0xff]  }
  0x18   :  { %592 = vmatpush1.bf16.msra.mxu0 %v900_v23  ;;  %540 = vmatprep.subr.bf16.mxu1 %v901_v24  ;;  %v967_v5 = vld [vmem:[%s1269_s1 + $0x200] ss:$8 sps:$4 sm:$0xff]   ;;  %v972_v6 = vld [vmem:[%s1269_s1 + $0x214] ss:$8 sps:$4 sm:$0xff]   ;;  %v970_v9 = vld [vmem:[%s1269_s1 + $0x210] ss:$8 sps:$4 sm:$0xff]  }
  0x19   :  { %593 = vmatprep.subr.bf16.mxu0 %v903_v25  ;;  %v973_v7 = vld [vmem:[%s1270_s0 + $0x2c] ss:$20 sps:$4 sm:$0xff]   ;;  %v975_v8 = vld [vmem:[%s1270_s0 + $0x34] ss:$20 sps:$4 sm:$0xff]   ;;  %v978_v12 = vld [vmem:[%s1270_s0 + $0x30] ss:$20 sps:$4 sm:$0xff]  }
  0x1a   :  { %v981_v10 = vld [vmem:[%s1269_s1 + $0x224] ss:$8 sps:$4 sm:$0xff]   ;;  %v977_v11 = vld [vmem:[%s1270_s0 + $0x28] ss:$20 sps:$4 sm:$0xff]   ;;  %v982_v15 = vld [vmem:[%s1269_s1 + $0x230] ss:$8 sps:$4 sm:$0xff]  }
  0x1b   :  { %541 = vmatpush1.bf16.msra.mxu1 %v905_v26  ;;  %v979_v13 = vld [vmem:[%s1269_s1 + $0x220] ss:$8 sps:$4 sm:$0xff]   ;;  %v984_v14 = vld [vmem:[%s1269_s1 + $0x234] ss:$8 sps:$4 sm:$0xff]   ;;  %v987_v16 = vmov 0   ;;  %v102_v20 = vshrl.u32 %v101_v19, 7 }
  0x1c   :  { %594 = vmatpush1.bf16.msra.mxu0 %v906_v27  ;;  %542 = vmatprep.subr.bf16.mxu1 %v907_v28  ;;  %v985_v17 = vld [vmem:[%s1270_s0 + $0x10] ss:$20 sps:$4 sm:$0xff]   ;;  %v986_v18 = vld [vmem:[%s1270_s0 + $0x38] ss:$20 sps:$4 sm:$0xff]   ;;  %v99_v26 = vld [vmem:[%s1271_s2] sm:$0x3] }
  0x1d   :  { %595 = vmatprep.subr.bf16.mxu0 %v909_v29  ;;  %v103_v24 = vsub.s32 0, %v102_v20  ;;  %v107_v27 = vsub.s32 1, %v102_v20 }
  0x1f   :  { %543 = vmatpush1.bf16.msra.mxu1 %v911_v30  ;;  %v104_v28 = vrot.slane %v99_v26, %v103_v24  ;;  %v108_v29 = vrot.slane %v99_v26, %v107_v27 }
  0x20   :  { %596 = vmatpush1.bf16.msra.mxu0 %v912_v31  ;;  %544 = vmatprep.subr.bf16.mxu1 %v913_v32 }
  0x21   :  { %597 = vmatprep.subr.bf16.mxu0 %v915_v33 }
  0x23   :  { %545 = vmatpush1.bf16.msra.mxu1 %v917_v34 }
  0x24   :  { %598 = vmatpush1.bf16.msra.mxu0 %v918_v35  ;;  %546 = vmatprep.subr.bf16.mxu1 %v919_v36 }
  0x25   :  { %599 = vmatprep.subr.bf16.mxu0 %v921_v37 }
  0x27   :  { %547 = vmatpush1.bf16.msra.mxu1 %v923_v38 }
  0x28   :  { %600 = vmatpush1.bf16.msra.mxu0 %v924_v39  ;;  %548 = vmatprep.subr.bf16.mxu1 %v925_v40 }
  0x29   :  { %601 = vmatprep.subr.bf16.mxu0 %v927_v41 }
  0x2b   :  { %549 = vmatpush1.bf16.msra.mxu1 %v929_v42 }
  0x2c   :  { %602 = vmatpush1.bf16.msra.mxu0 %v930_v43  ;;  %550 = vmatprep.subr.bf16.mxu1 %v931_v44 }
  0x2d   :  { %603 = vmatprep.subr.bf16.mxu0 %v933_v45 }
  0x2f   :  { %551 = vmatpush1.bf16.msra.mxu1 %v935_v46 }
  0x30   :  { %604 = vmatpush1.bf16.msra.mxu0 %v936_v47  ;;  %552 = vmatprep.subr.bf16.mxu1 %v937_v48 }
  0x31   :  { %605 = vmatprep.subr.bf16.mxu0 %v939_v50 }
  0x33   :  { %553 = vmatpush1.bf16.msra.mxu1 %v941_v52 }
  0x34   :  { %606 = vmatpush1.bf16.msra.mxu0 %v942_v53  ;;  %554 = vmatprep.subr.bf16.mxu1 %v943_v54 }
  0x35   :  { %607 = vmatprep.subr.bf16.mxu0 %v945_v55 }
  0x37   :  { %555 = vmatpush1.bf16.msra.mxu1 %v947_v56 }
  0x38   :  { %608 = vmatpush1.bf16.msra.mxu0 %v948_v57  ;;  %556 = vmatprep.subr.bf16.mxu1 %v949_v58 }
  0x39   :  { %609 = vmatprep.subr.bf16.mxu0 %v951_v59 }
  0x3b   :  { %557 = vmatpush1.bf16.msra.mxu1 %v953_v60 }
  0x3c   :  { %610 = vmatpush1.bf16.msra.mxu0 %v954_v61  ;;  %558 = vmatprep.subr.bf16.mxu1 %v955_v62 }
  0x3d   :  { %611 = vmatprep.subr.bf16.mxu0 %v957_v63 }
  0x3f   :  { %559 = vmatpush1.bf16.msra.mxu1 %v959_v0 }
  0x40   :  { %612 = vmatpush1.bf16.msra.mxu0 %v960_v1  ;;  %832 = vmatprep.subr.bf16.mxu1 %v969_v2 }
  0x41   :  { %634 = vmatprep.subr.bf16.mxu0 %v969_v2 }
  0x42   :  { %561 = vmatmul.mubr.bf16.vlgmr.msra.gmra.mrb[0].mxu1 %v961_v3 }
  0x43   :  { %614 = vmatmul.mubr.bf16.vlgmr.msra.gmra.mrb[0].mxu0 %v964_v4  ;;  %836 = vmatpush1.bf16.msra.mxu1 %v967_v5 }
  0x44   :  { %635 = vmatpush1.bf16.msra.mxu0 %v967_v5  ;;  %833 = vmatprep.subr.bf16.mxu1 %v972_v6 }
  0x45   :  { %636 = vmatprep.subr.bf16.mxu0 %v972_v6  ;;  %570 = vmatprep.mubr.bf16.mxu1 %v973_v7 }
  0x46   :  { %623 = vmatprep.mubr.bf16.mxu0 %v975_v8 }
  0x47   :  { %837 = vmatpush1.bf16.msra.mxu1 %v970_v9 }
  0x48   :  { %637 = vmatpush1.bf16.msra.mxu0 %v970_v9  ;;  %834 = vmatprep.subr.bf16.mxu1 %v981_v10 }
  0x49   :  { %638 = vmatprep.subr.bf16.mxu0 %v981_v10 }
  0x4a   :  { %571 = vmatmul.mubr.bf16.gmra.mrb[4].mxu1 %v977_v11 }
  0x4b   :  { %624 = vmatmul.mubr.bf16.gmra.mrb[4].mxu0 %v978_v12  ;;  %838 = vmatpush1.bf16.msra.mxu1 %v979_v13 }
  0x4c   :  { %639 = vmatpush1.bf16.msra.mxu0 %v979_v13  ;;  %835 = vmatprep.subr.bf16.mxu1 %v984_v14 }
  0x4d   :  { %640 = vmatprep.subr.bf16.mxu0 %v984_v14  ;;  %666 = vmatprep.mubr.bf16.mxu0 %v987_v16 }
  0x4e   :  { %676 = vmatprep.mubr.bf16.mxu1 %v987_v16 }
  0x4f   :  { %839 = vmatpush1.bf16.msra.mxu1 %v982_v15 }
  0x50   :  { %641 = vmatpush1.bf16.msra.mxu0 %v982_v15 }
  0x52   :  { %823 = vmatmul.mubr.msk.bf16.vlgmr.msra.gmra.mrb[8].mxu1 %vm521_vm0, %v986_v18 }
  0x53   :  { %822 = vmatmul.mubr.msk.bf16.vlgmr.msra.gmra.mrb[0].mxu0 %vm521_vm0, %v985_v17 }
 0x115   :  { %v562_v21 = vpop.f32.mrb[0].mxu1 }
 0x116   :  { %v564_v22 = vpop.f32.mrb[1].mxu1  ;;  %v563_v46 = vadd.f32 %v562_v21, %v104_v28 }
 0x117   :  { %v566_v23 = vpop.f32.mrb[2].mxu1  ;;  %v565_v47 = vadd.f32 %v564_v22, %v108_v29 }
 0x118   :  { %v568_v25 = vpop.f32.mrb[3].mxu1  ;;  %v567_v50 = vadd.f32 %v566_v23, %v104_v28 }
 0x119   :  { %v569_v55 = vadd.f32 %v568_v25, %v108_v29 }
 0x11d   :  { %v572_v30 = vpop.f32.mrb[4].mxu1 }
 0x11e   :  { %v625_v31 = vpop.f32.mrb[4].mxu0  ;;  %v573_v32 = vadd.f32 %v572_v30, %v104_v28  ;;  %v574_v33 = vpop.f32.mrb[5].mxu1 }
 0x11f   :  { %v627_v34 = vpop.f32.mrb[5].mxu0  ;;  %v575_v35 = vadd.f32 %v574_v33, %v108_v29  ;;  %v576_v36 = vpop.f32.mrb[6].mxu1 }
 0x120   :  { %v629_v37 = vpop.f32.mrb[6].mxu0  ;;  %v626_v38 = vadd.f32 %v625_v31, %v573_v32  ;;  %v577_v39 = vadd.f32 %v576_v36, %v104_v28  ;;  %v578_v40 = vpop.f32.mrb[7].mxu1 }
 0x121   :  { %v631_v41 = vpop.f32.mrb[7].mxu0  ;;  %v628_v42 = vadd.f32 %v627_v34, %v575_v35  ;;  %v579_v43 = vadd.f32 %v578_v40, %v108_v29 }
 0x122   :  { %v630_v44 = vadd.f32 %v629_v37, %v577_v39 }
 0x123   :  { %v632_v45 = vadd.f32 %v631_v41, %v579_v43 }
 0x125   :  { %v678_v49 = vpop.f32.mrb[8].mxu1 }
 0x126   :  { %v668_v48 = vpop.f32.mrb[0].mxu0  ;;  %v679_v52 = vadd.f32 %v678_v49, %v626_v38  ;;  %v680_v54 = vpop.f32.mrb[9].mxu1 }
 0x127   :  { %v841_v51 = vadd.f32 %v668_v48, %v563_v46  ;;  %v670_v53 = vpop.f32.mrb[1].mxu0  ;;  %v681_v57 = vadd.f32 %v680_v54, %v628_v42  ;;  %v682_v59 = vpop.f32.mrb[10].mxu1 }
 0x128   :  { %v843_v56 = vadd.f32 %v670_v53, %v565_v47  ;;  %v672_v58 = vpop.f32.mrb[2].mxu0  ;;  %v696_v61 = vmax.f32 %v679_v52, 0.0  ;;  %v683_v63 = vadd.f32 %v682_v59, %v630_v44  ;;  %v684_v1 = vpop.f32.mrb[11].mxu1 }
 0x129   :  { %v692_v60 = vmax.f32 %v841_v51, 0.0  ;;  %v845_v62 = vadd.f32 %v672_v58, %v567_v50  ;;  %v674_v0 = vpop.f32.mrb[3].mxu0  ;;  %v685_v3 = vadd.f32 %v684_v1, %v632_v45 }
 0x12a   :  { %v847_v2 = vadd.f32 %v674_v0, %v569_v55  ;;  %v830_v5 = vpack.c.bf16 %v681_v57, %v696_v61  ;;  %v698_v7 = vmax.f32 %v683_v63, 0.0 }
 0x12b   :  { %v828_v4 = vpack.c.bf16 %v843_v56, %v692_v60  ;;  %v694_v6 = vmax.f32 %v845_v62, 0.0 }
 0x12c   :  { %734 = vst [vmem:[%s1272_s3 + $0x10] sm:$0xff] %v830_v5  ;;  %v831_v9 = vpack.c.bf16 %v685_v3, %v698_v7 }
 0x12d   :  { %732 = vst [vmem:[%s1272_s3] sm:$0xff] %v828_v4  ;;  %v829_v8 = vpack.c.bf16 %v847_v2, %v694_v6 }
 0x12e   :  { %735 = vst [vmem:[%s1272_s3 + $0x18] sm:$0xff] %v831_v9 }
 0x12f   :  { %733 = vst [vmem:[%s1272_s3 + $0x8] sm:$0xff] %v829_v8 }

// kernel: _lambda_.19
= control target key start
LH: loop header
LB: loop body
LE: loop exit
PB: predicated region body
PF: predicated region fallthrough
CT: control target
= control target key end

     0   :  { %s1667_s1 = inlined_call_operand.vmem [shape: bf16[1152,128], index: 1, kind: input, shape index: {}]   ;;  %s1668_s0 = inlined_call_operand.vmem [shape: bf16[32,1152], index: 0, kind: input, shape index: {}]   ;;  %s1669_s2 = inlined_call_operand.vmem [shape: f32[1,128], index: 2, kind: input, shape index: {}]   ;;  %s1670_s3 = inlined_call_operand.vmem [shape: bf16[32,128], index: 3, kind: input, shape index: {}]   ;;  %s1671_s4 = inlined_call_operand.vmem [shape: bf16[32,128], index: 4, kind: output, shape index: {}]  }
   0x1   :  { %v1259_v0 = vld [vmem:[%s1667_s1 + $0x40] sm:$0xff]   ;;  %v1263_v4 = vld [vmem:[%s1667_s1 + $0x48] sm:$0xff]   ;;  %v1267_v8 = vld [vmem:[%s1667_s1 + $0x50] sm:$0xff]  }
   0x2   :  { %v1260_v1 = vld [vmem:[%s1667_s1] sm:$0xff]   ;;  %1117 = vmatprep.subr.bf16.mxu0 %v1259_v0  ;;  %v1264_v5 = vld [vmem:[%s1667_s1 + $0x8] sm:$0xff]   ;;  %v1268_v9 = vld [vmem:[%s1667_s1 + $0x10] sm:$0xff]  }
   0x3   :  { %v1261_v2 = vld [vmem:[%s1667_s1 + $0xc0] sm:$0xff]   ;;  %1118 = vmatpush3.bf16.msra.mxu0 %v1260_v1  ;;  %v1265_v6 = vld [vmem:[%s1667_s1 + $0xc8] sm:$0xff]   ;;  %v1269_v10 = vld [vmem:[%s1667_s1 + $0xd0] sm:$0xff]  }
   0x4   :  { %v1262_v3 = vld [vmem:[%s1667_s1 + $0x80] sm:$0xff]   ;;  %1145 = vmatprep.subr.bf16.mxu1 %v1261_v2  ;;  %1119 = vmatprep.subr.bf16.mxu0 %v1263_v4  ;;  %v1266_v7 = vld [vmem:[%s1667_s1 + $0x88] sm:$0xff]   ;;  %v1270_v11 = vld [vmem:[%s1667_s1 + $0x90] sm:$0xff]  }
   0x5   :  { %1146 = vmatpush3.bf16.msra.mxu1 %v1262_v3  ;;  %v1271_v12 = vld [vmem:[%s1667_s1 + $0x58] sm:$0xff]   ;;  %v1275_v16 = vld [vmem:[%s1667_s1 + $0x60] sm:$0xff]   ;;  %v1279_v20 = vld [vmem:[%s1667_s1 + $0x68] sm:$0xff]  }
   0x6   :  { %1147 = vmatprep.subr.bf16.mxu1 %v1265_v6  ;;  %v1272_v13 = vld [vmem:[%s1667_s1 + $0x18] sm:$0xff]   ;;  %v1276_v17 = vld [vmem:[%s1667_s1 + $0x20] sm:$0xff]   ;;  %v1280_v21 = vld [vmem:[%s1667_s1 + $0x28] sm:$0xff]  }
   0x7   :  { %1120 = vmatpush3.bf16.msra.mxu0 %v1264_v5  ;;  %v1273_v14 = vld [vmem:[%s1667_s1 + $0xd8] sm:$0xff]   ;;  %v1277_v18 = vld [vmem:[%s1667_s1 + $0xe0] sm:$0xff]   ;;  %v1281_v22 = vld [vmem:[%s1667_s1 + $0xe8] sm:$0xff]  }
   0x8   :  { %1121 = vmatprep.subr.bf16.mxu0 %v1267_v8  ;;  %v1274_v15 = vld [vmem:[%s1667_s1 + $0x98] sm:$0xff]   ;;  %v1278_v19 = vld [vmem:[%s1667_s1 + $0xa0] sm:$0xff]   ;;  %v1282_v23 = vld [vmem:[%s1667_s1 + $0xa8] sm:$0xff]  }
   0x9   :  { %1148 = vmatpush3.bf16.msra.mxu1 %v1266_v7  ;;  %v1283_v24 = vld [vmem:[%s1667_s1 + $0x70] sm:$0xff]   ;;  %v1287_v28 = vld [vmem:[%s1667_s1 + $0x78] sm:$0xff]   ;;  %v1290_v31 = vld [vmem:[%s1668_s0] ss:$36 sps:$4 sm:$0xff]  }
   0xa   :  { %1149 = vmatprep.subr.bf16.mxu1 %v1269_v10  ;;  %v1284_v25 = vld [vmem:[%s1667_s1 + $0x30] sm:$0xff]   ;;  %v1288_v29 = vld [vmem:[%s1667_s1 + $0x38] sm:$0xff]   ;;  %v1292_v32 = vld [vmem:[%s1668_s0 + $0x4] ss:$36 sps:$4 sm:$0xff]  }
   0xb   :  { %1122 = vmatpush3.bf16.msra.mxu0 %v1268_v9  ;;  %v1285_v26 = vld [vmem:[%s1667_s1 + $0xf0] sm:$0xff]   ;;  %v1289_v30 = vld [vmem:[%s1667_s1 + $0xf8] sm:$0xff]   ;;  %745 = vmatprep.mubr.bf16.mxu0 %v1292_v32  ;;  %v1294_v34 = vld [vmem:[%s1667_s1 + $0x140] sm:$0xff]  }
   0xc   :  { %1123 = vmatprep.subr.bf16.mxu0 %v1271_v12  ;;  %v1286_v27 = vld [vmem:[%s1667_s1 + $0xb0] sm:$0xff]   ;;  %v1293_v33 = vld [vmem:[%s1667_s1 + $0xb8] sm:$0xff]   ;;  %v1295_v35 = vld [vmem:[%s1668_s0 + $0x8] ss:$36 sps:$4 sm:$0xff]  }
   0xd   :  { %1150 = vmatpush3.bf16.msra.mxu1 %v1270_v11  ;;  %v1297_v36 = vld [vmem:[%s1668_s0 + $0xc] ss:$36 sps:$4 sm:$0xff]   ;;  %v1298_v37 = vld [vmem:[%s1667_s1 + $0x100] sm:$0xff]   ;;  %v1309_v48 = vld [vmem:[%s1667_s1 + $0x158] sm:$0xff]  }
   0xe   :  { %1151 = vmatprep.subr.bf16.mxu1 %v1273_v14  ;;  %794 = vmatprep.mubr.bf16.mxu1 %v1297_v36  ;;  %v1299_v38 = vld [vmem:[%s1667_s1 + $0x1c0] sm:$0xff]   ;;  %v1301_v40 = vld [vmem:[%s1667_s1 + $0x148] sm:$0xff]   ;;  %v1305_v44 = vld [vmem:[%s1667_s1 + $0x150] sm:$0xff]  }
   0xf   :  { %1124 = vmatpush3.bf16.msra.mxu0 %v1272_v13  ;;  %v1300_v39 = vld [vmem:[%s1667_s1 + $0x180] sm:$0xff]   ;;  %v1302_v41 = vld [vmem:[%s1667_s1 + $0x108] sm:$0xff]   ;;  %v1306_v45 = vld [vmem:[%s1667_s1 + $0x110] sm:$0xff]  }
  0x10   :  { %1125 = vmatprep.subr.bf16.mxu0 %v1275_v16  ;;  %v1303_v42 = vld [vmem:[%s1667_s1 + $0x1c8] sm:$0xff]   ;;  %v1307_v46 = vld [vmem:[%s1667_s1 + $0x1d0] sm:$0xff]   ;;  %v1310_v49 = vld [vmem:[%s1667_s1 + $0x118] sm:$0xff]  }
  0x11   :  { %1152 = vmatpush3.bf16.msra.mxu1 %v1274_v15  ;;  %v1304_v43 = vld [vmem:[%s1667_s1 + $0x188] sm:$0xff]   ;;  %v1308_v47 = vld [vmem:[%s1667_s1 + $0x190] sm:$0xff]   ;;  %v1311_v50 = vld [vmem:[%s1667_s1 + $0x1d8] sm:$0xff]  }
  0x12   :  { %1153 = vmatprep.subr.bf16.mxu1 %v1277_v18  ;;  %v1312_v51 = vld [vmem:[%s1667_s1 + $0x198] sm:$0xff]   ;;  %v1313_v52 = vld [vmem:[%s1667_s1 + $0x160] sm:$0xff]   ;;  %v1317_v56 = vld [vmem:[%s1667_s1 + $0x168] sm:$0xff]  }
  0x13   :  { %1126 = vmatpush3.bf16.msra.mxu0 %v1276_v17  ;;  %v1314_v53 = vld [vmem:[%s1667_s1 + $0x120] sm:$0xff]   ;;  %v1318_v57 = vld [vmem:[%s1668_s0 + $0x4c] ss:$36 sps:$4 sm:$0xff]   ;;  %v1323_v61 = vld [vmem:[%s1668_s0 + $0x54] ss:$36 sps:$4 sm:$0xff]  }
  0x14   :  { %1127 = vmatprep.subr.bf16.mxu0 %v1279_v20  ;;  %v1315_v54 = vld [vmem:[%s1667_s1 + $0x1e0] sm:$0xff]   ;;  %v1320_v58 = vld [vmem:[%s1667_s1 + $0x128] sm:$0xff]   ;;  %v1326_v63 = vld [vmem:[%s1668_s0 + $0x50] ss:$36 sps:$4 sm:$0xff]  }
  0x15   :  { %1154 = vmatpush3.bf16.msra.mxu1 %v1278_v19  ;;  %v1316_v55 = vld [vmem:[%s1667_s1 + $0x1a0] sm:$0xff]   ;;  %v1321_v59 = vld [vmem:[%s1668_s0 + $0x48] ss:$36 sps:$4 sm:$0xff]   ;;  %v1327_v0 = vld [vmem:[%s1667_s1 + $0x170] sm:$0xff]  }
  0x16   :  { %1155 = vmatprep.subr.bf16.mxu1 %v1281_v22  ;;  %v1322_v60 = vld [vmem:[%s1667_s1 + $0x1e8] sm:$0xff]   ;;  %v1328_v1 = vld [vmem:[%s1667_s1 + $0x130] sm:$0xff]   ;;  %v1331_v4 = vld [vmem:[%s1667_s1 + $0x178] sm:$0xff]  }
  0x17   :  { %1128 = vmatpush3.bf16.msra.mxu0 %v1280_v21  ;;  %v1325_v62 = vld [vmem:[%s1667_s1 + $0x1a8] sm:$0xff]   ;;  %v1329_v2 = vld [vmem:[%s1667_s1 + $0x1f0] sm:$0xff]   ;;  %v1332_v5 = vld [vmem:[%s1667_s1 + $0x138] sm:$0xff]  }
  0x18   :  { %1129 = vmatprep.subr.bf16.mxu0 %v1283_v24  ;;  %v1330_v3 = vld [vmem:[%s1667_s1 + $0x1b0] sm:$0xff]   ;;  %v1333_v6 = vld [vmem:[%s1667_s1 + $0x1f8] sm:$0xff]   ;;  %v1338_v10 = vld [vmem:[%s1667_s1 + $0x200] sm:$0xff]  }
  0x19   :  { %1156 = vmatpush3.bf16.msra.mxu1 %v1282_v23  ;;  %v1334_v7 = vld [vmem:[%s1668_s0 + $0x10] ss:$36 sps:$4 sm:$0xff]   ;;  %v1337_v9 = vld [vmem:[%s1667_s1 + $0x1b8] sm:$0xff]   ;;  %v1342_v13 = vld [vmem:[%s1667_s1 + $0x208] sm:$0xff]  }
  0x1a   :  { %1157 = vmatprep.subr.bf16.mxu1 %v1285_v26  ;;  %v1336_v8 = vld [vmem:[%s1668_s0 + $0x14] ss:$36 sps:$4 sm:$0xff]   ;;  %v1341_v12 = vld [vmem:[%s1668_s0 + $0x1c] ss:$36 sps:$4 sm:$0xff]   ;;  %v1347_v17 = vld [vmem:[%s1668_s0 + $0x64] ss:$36 sps:$4 sm:$0xff]  }
  0x1b   :  { %1130 = vmatpush3.bf16.msra.mxu0 %v1284_v25  ;;  %v1339_v11 = vld [vmem:[%s1668_s0 + $0x18] ss:$36 sps:$4 sm:$0xff]   ;;  %v1346_v16 = vld [vmem:[%s1667_s1 + $0x210] sm:$0xff]   ;;  %v1349_v18 = vld [vmem:[%s1668_s0 + $0x60] ss:$36 sps:$4 sm:$0xff]  }
  0x1c   :  { %1131 = vmatprep.subr.bf16.mxu0 %v1287_v28  ;;  %v1343_v14 = vld [vmem:[%s1668_s0 + $0x5c] ss:$36 sps:$4 sm:$0xff]   ;;  %v1352_v22 = vld [vmem:[%s1667_s1 + $0x228] sm:$0xff]   ;;  %v1353_v23 = vld [vmem:[%s1667_s1 + $0x230] sm:$0xff]  }
  0x1d   :  { %1158 = vmatpush3.bf16.msra.mxu1 %v1286_v27  ;;  %v1345_v15 = vld [vmem:[%s1668_s0 + $0x58] ss:$36 sps:$4 sm:$0xff]   ;;  %v1351_v20 = vld [vmem:[%s1667_s1 + $0x220] sm:$0xff]   ;;  %v1356_v25 = vld [vmem:[%s1668_s0 + $0x68] ss:$36 sps:$4 sm:$0xff]  }
  0x1e   :  { %1159 = vmatprep.subr.bf16.mxu1 %v1289_v30  ;;  %v1350_v19 = vld [vmem:[%s1667_s1 + $0x218] sm:$0xff]   ;;  %v1355_v21 = vld [vmem:[%s1668_s0 + $0x20] ss:$36 sps:$4 sm:$0xff]  }
  0x1f   :  { %1132 = vmatpush3.bf16.msra.mxu0 %v1288_v29  ;;  %v1354_v24 = vld [vmem:[%s1667_s1 + $0x238] sm:$0xff]   ;;  %v998_v27 = vld [vmem:[%s1669_s2] ss:$0 sm:$0xff] }
  0x20   :  { %1173 = vmatprep.subr.bf16.mxu0 %v1294_v34 }
  0x21   :  { %1160 = vmatpush3.bf16.msra.mxu1 %v1293_v33 }
  0x22   :  { %746 = vmatmul.mubr.bf16.vlgmr.msra.gmra.mrb[0].mxu0 %v1290_v31  ;;  %1201 = vmatprep.subr.bf16.mxu1 %v1299_v38 }
  0x23   :  { %1174 = vmatpush3.bf16.msra.mxu0 %v1298_v37  ;;  %753 = vmatprep.mubr.bf16.mxu0 %v1318_v57 }
  0x24   :  { %795 = vmatmul.mubr.bf16.vlgmr.msra.gmra.mrb[0].mxu1 %v1295_v35  ;;  %1175 = vmatprep.subr.bf16.mxu0 %v1301_v40 }
  0x25   :  { %1202 = vmatpush3.bf16.msra.mxu1 %v1300_v39  ;;  %802 = vmatprep.mubr.bf16.mxu1 %v1323_v61 }
  0x26   :  { %1203 = vmatprep.subr.bf16.mxu1 %v1303_v42 }
  0x27   :  { %1176 = vmatpush3.bf16.msra.mxu0 %v1302_v41 }
  0x28   :  { %1177 = vmatprep.subr.bf16.mxu0 %v1305_v44 }
  0x29   :  { %1204 = vmatpush3.bf16.msra.mxu1 %v1304_v43 }
  0x2a   :  { %1205 = vmatprep.subr.bf16.mxu1 %v1307_v46  ;;  %754 = vmatmul.mubr.bf16.gmra.mrb[4].mxu0 %v1321_v59 }
  0x2b   :  { %1178 = vmatpush3.bf16.msra.mxu0 %v1306_v45  ;;  %843 = vmatprep.mubr.bf16.mxu0 %v1336_v8 }
  0x2c   :  { %1179 = vmatprep.subr.bf16.mxu0 %v1309_v48  ;;  %803 = vmatmul.mubr.bf16.gmra.mrb[4].mxu1 %v1326_v63 }
  0x2d   :  { %1206 = vmatpush3.bf16.msra.mxu1 %v1308_v47  ;;  %892 = vmatprep.mubr.bf16.mxu1 %v1341_v12 }
  0x2e   :  { %1207 = vmatprep.subr.bf16.mxu1 %v1311_v50 }
  0x2f   :  { %1180 = vmatpush3.bf16.msra.mxu0 %v1310_v49 }
  0x30   :  { %1181 = vmatprep.subr.bf16.mxu0 %v1313_v52 }
  0x31   :  { %1208 = vmatpush3.bf16.msra.mxu1 %v1312_v51 }
  0x32   :  { %1209 = vmatprep.subr.bf16.mxu1 %v1315_v54 }
  0x33   :  { %1182 = vmatpush3.bf16.msra.mxu0 %v1314_v53 }
  0x34   :  { %1183 = vmatprep.subr.bf16.mxu0 %v1317_v56 }
  0x35   :  { %1210 = vmatpush3.bf16.msra.mxu1 %v1316_v55 }
  0x36   :  { %1211 = vmatprep.subr.bf16.mxu1 %v1322_v60 }
  0x37   :  { %1184 = vmatpush3.bf16.msra.mxu0 %v1320_v58 }
  0x38   :  { %1185 = vmatprep.subr.bf16.mxu0 %v1327_v0 }
  0x39   :  { %1212 = vmatpush3.bf16.msra.mxu1 %v1325_v62 }
  0x3a   :  { %1213 = vmatprep.subr.bf16.mxu1 %v1329_v2 }
  0x3b   :  { %1186 = vmatpush3.bf16.msra.mxu0 %v1328_v1 }
  0x3c   :  { %1187 = vmatprep.subr.bf16.mxu0 %v1331_v4 }
  0x3d   :  { %1214 = vmatpush3.bf16.msra.mxu1 %v1330_v3 }
  0x3e   :  { %1215 = vmatprep.subr.bf16.mxu1 %v1333_v6 }
  0x3f   :  { %1188 = vmatpush3.bf16.msra.mxu0 %v1332_v5 }
  0x40   :  { %1239 = vmatprep.subr.bf16.mxu0 %v1338_v10 }
  0x41   :  { %1216 = vmatpush3.bf16.msra.mxu1 %v1337_v9 }
  0x42   :  { %844 = vmatmul.mubr.bf16.vlgmr.msra.gmra.mrb[8].mxu0 %v1334_v7 }
  0x43   :  { %1240 = vmatpush3.bf16.msra.mxu0 %v1338_v10  ;;  %851 = vmatprep.mubr.bf16.mxu0 %v1343_v14 }
  0x44   :  { %893 = vmatmul.mubr.bf16.vlgmr.msra.gmra.mrb[8].mxu1 %v1339_v11  ;;  %1241 = vmatprep.subr.bf16.mxu0 %v1342_v13 }
  0x45   :  { %900 = vmatprep.mubr.bf16.mxu1 %v1347_v17 }
  0x47   :  { %1242 = vmatpush3.bf16.msra.mxu0 %v1342_v13 }
  0x48   :  { %1243 = vmatprep.subr.bf16.mxu0 %v1346_v16 }
  0x4a   :  { %852 = vmatmul.mubr.bf16.gmra.mrb[12].mxu0 %v1345_v15 }
  0x4b   :  { %1244 = vmatpush3.bf16.msra.mxu0 %v1346_v16  ;;  %1255 = vmatprep.mubr.bf16.mxu0 %v1355_v21 }
  0x4c   :  { %901 = vmatmul.mubr.bf16.gmra.mrb[12].mxu1 %v1349_v18  ;;  %1245 = vmatprep.subr.bf16.mxu0 %v1350_v19 }
  0x4f   :  { %1246 = vmatpush3.bf16.msra.mxu0 %v1350_v19 }
  0x50   :  { %1247 = vmatprep.subr.bf16.mxu0 %v1351_v20 }
  0x53   :  { %1248 = vmatpush3.bf16.msra.mxu0 %v1351_v20 }
  0x54   :  { %1249 = vmatprep.subr.bf16.mxu0 %v1352_v22 }
  0x57   :  { %1250 = vmatpush3.bf16.msra.mxu0 %v1352_v22 }
  0x58   :  { %1251 = vmatprep.subr.bf16.mxu0 %v1353_v23 }
  0x5b   :  { %1252 = vmatpush3.bf16.msra.mxu0 %v1353_v23 }
  0x5c   :  { %1253 = vmatprep.subr.bf16.mxu0 %v1354_v24 }
  0x5f   :  { %1254 = vmatpush3.bf16.msra.mxu0 %v1354_v24 }
  0x62   :  { %1256 = vmatmul.mubr.bf16.vlgmr.msra.gmra.mrb[16].mxu0 %v1356_v25 }
  0xf5   :  { %v1133_v26 = vpop.f32.mrb[0].mxu0 }
  0xf6   :  { %v1134_v28 = vpop.f32.mrb[1].mxu0 }
  0xf7   :  { %v1135_v29 = vadd.f32 %v1134_v28, %v1133_v26  ;;  %v1136_v30 = vpop.f32.mrb[2].mxu0  ;;  %v1161_v31 = vpop.f32.mrb[0].mxu1  ;;  %v1098_v28 = vld [vmem:[%s1670_s3] sm:$0xff]  }
  0xf8   :  { %v1137_v32 = vpop.f32.mrb[3].mxu0  ;;  %v1162_v35 = vpop.f32.mrb[1].mxu1 }
  0xf9   :  { %v748_v33 = vadd.f32 %v1135_v29, %v998_v27  ;;  %v1138_v34 = vadd.f32 %v1137_v32, %v1136_v30  ;;  %v1163_v36 = vadd.f32 %v1162_v35, %v1161_v31  ;;  %v1164_v37 = vpop.f32.mrb[2].mxu1  ;;  %v1099_v31 = vunpack.c.l.bf16 %v1098_v28 }
  0xfa   :  { %v1165_v39 = vpop.f32.mrb[3].mxu1 }
  0xfb   :  { %v751_v38 = vadd.f32 %v1138_v34, %v998_v27  ;;  %v797_v40 = vadd.f32 %v1163_v36, %v748_v33  ;;  %v1166_v41 = vadd.f32 %v1165_v39, %v1164_v37  ;;  %v1100_v37 = vunpack.c.h.bf16 %v1098_v28 }
  0xfd   :  { %v800_v42 = vadd.f32 %v1166_v41, %v751_v38  ;;  %v1139_v43 = vpop.f32.mrb[4].mxu0 }
  0xfe   :  { %v1140_v44 = vpop.f32.mrb[5].mxu0 }
  0xff   :  { %v1141_v45 = vadd.f32 %v1140_v44, %v1139_v43  ;;  %v1142_v46 = vpop.f32.mrb[6].mxu0  ;;  %v1167_v47 = vpop.f32.mrb[4].mxu1 }
 0x100   :  { %v1143_v48 = vpop.f32.mrb[7].mxu0  ;;  %v1168_v51 = vpop.f32.mrb[5].mxu1 }
 0x101   :  { %v756_v49 = vadd.f32 %v1141_v45, %v998_v27  ;;  %v1144_v50 = vadd.f32 %v1143_v48, %v1142_v46  ;;  %v1169_v52 = vadd.f32 %v1168_v51, %v1167_v47  ;;  %v1170_v53 = vpop.f32.mrb[6].mxu1 }
 0x102   :  { %v1171_v55 = vpop.f32.mrb[7].mxu1 }
 0x103   :  { %v759_v54 = vadd.f32 %v1144_v50, %v998_v27  ;;  %v805_v56 = vadd.f32 %v1169_v52, %v756_v49  ;;  %v1172_v57 = vadd.f32 %v1171_v55, %v1170_v53  ;;  %v1115_v27 = vld [vmem:[%s1670_s3 + $0x8] sm:$0xff]  }
 0x104   :  { %v1103_v29 = vunpack.c.l.bf16 %v1115_v27  ;;  %v1104_v34 = vunpack.c.h.bf16 %v1115_v27 }
 0x105   :  { %v808_v58 = vadd.f32 %v1172_v57, %v759_v54 }
 0x115   :  { %v1189_v59 = vpop.f32.mrb[8].mxu0 }
 0x116   :  { %v1190_v60 = vpop.f32.mrb[9].mxu0 }
 0x117   :  { %v1191_v61 = vadd.f32 %v1190_v60, %v1189_v59  ;;  %v1192_v62 = vpop.f32.mrb[10].mxu0  ;;  %v1217_v63 = vpop.f32.mrb[8].mxu1 }
 0x118   :  { %v1193_v0 = vpop.f32.mrb[11].mxu0  ;;  %v1218_v3 = vpop.f32.mrb[9].mxu1 }
 0x119   :  { %v846_v1 = vadd.f32 %v1191_v61, %v797_v40  ;;  %v1194_v2 = vadd.f32 %v1193_v0, %v1192_v62  ;;  %v1219_v4 = vadd.f32 %v1218_v3, %v1217_v63  ;;  %v1220_v5 = vpop.f32.mrb[10].mxu1 }
 0x11a   :  { %v1221_v7 = vpop.f32.mrb[11].mxu1 }
 0x11b   :  { %v849_v6 = vadd.f32 %v1194_v2, %v800_v42  ;;  %v1222_v8 = vadd.f32 %v1221_v7, %v1220_v5  ;;  %v895_v9 = vadd.f32 %v1219_v4, %v846_v1 }
 0x11d   :  { %v1195_v10 = vpop.f32.mrb[12].mxu0  ;;  %v898_v12 = vadd.f32 %v1222_v8, %v849_v6 }
 0x11e   :  { %v1196_v11 = vpop.f32.mrb[13].mxu0 }
 0x11f   :  { %v1197_v13 = vadd.f32 %v1196_v11, %v1195_v10  ;;  %v1198_v14 = vpop.f32.mrb[14].mxu0  ;;  %v1223_v15 = vpop.f32.mrb[12].mxu1 }
 0x120   :  { %v1199_v16 = vpop.f32.mrb[15].mxu0  ;;  %v1224_v19 = vpop.f32.mrb[13].mxu1 }
 0x121   :  { %v854_v17 = vadd.f32 %v1197_v13, %v805_v56  ;;  %v1200_v18 = vadd.f32 %v1199_v16, %v1198_v14  ;;  %v1225_v20 = vadd.f32 %v1224_v19, %v1223_v15  ;;  %v1226_v21 = vpop.f32.mrb[14].mxu1 }
 0x122   :  { %v1227_v23 = vpop.f32.mrb[15].mxu1 }
 0x123   :  { %v857_v22 = vadd.f32 %v1200_v18, %v808_v58  ;;  %v1228_v24 = vadd.f32 %v1227_v23, %v1226_v21  ;;  %v903_v25 = vadd.f32 %v1225_v20, %v854_v17 }
 0x125   :  { %v906_v26 = vadd.f32 %v1228_v24, %v857_v22 }
 0x135   :  { %v1257_v30 = vpop.f32.mrb[16].mxu0 }
 0x136   :  { %v952_v32 = vadd.f32 %v1257_v30, %v903_v25  ;;  %v943_v33 = vpop.f32.mrb[17].mxu0 }
 0x137   :  { %v944_v35 = vadd.f32 %v943_v33, %v895_v9  ;;  %v1258_v36 = vpop.f32.mrb[18].mxu0 }
 0x138   :  { %v968_v38 = vadd.f32 %v1103_v29, %v952_v32  ;;  %v955_v39 = vadd.f32 %v1258_v36, %v906_v26  ;;  %v946_v40 = vpop.f32.mrb[19].mxu0 }
 0x139   :  { %v966_v41 = vadd.f32 %v1099_v31, %v944_v35  ;;  %v947_v42 = vadd.f32 %v946_v40, %v898_v12 }
 0x13a   :  { %v969_v43 = vadd.f32 %v1104_v34, %v955_v39  ;;  %v972_v45 = vmax.f32 %v968_v38, 0.0 }
 0x13b   :  { %v967_v44 = vadd.f32 %v1100_v37, %v947_v42  ;;  %v970_v47 = vmax.f32 %v966_v41, 0.0 }
 0x13c   :  { %v973_v46 = vmax.f32 %v969_v43, 0.0 }
 0x13d   :  { %v971_v48 = vmax.f32 %v967_v44, 0.0 }
 0x13e   :  { %v1113_v49 = vpack.c.bf16 %v973_v46, %v972_v45 }
 0x13f   :  { %v1108_v50 = vpack.c.bf16 %v971_v48, %v970_v47 }
 0x140   :  { %1116 = vst [vmem:[%s1671_s4 + $0x8] sm:$0xff] %v1113_v49  }
 0x141   :  { %1109 = vst [vmem:[%s1671_s4] sm:$0xff] %v1108_v50  }

// kernel: _lambda_.20
= control target key start
LH: loop header
LB: loop body
LE: loop exit
PB: predicated region body
PF: predicated region fallthrough
CT: control target
= control target key end

     0   :  { %s1632_s1 = inlined_call_operand.vmem [shape: bf16[1152,128], index: 1, kind: input, shape index: {}]   ;;  %s1633_s0 = inlined_call_operand.vmem [shape: bf16[32,1152], index: 0, kind: input, shape index: {}]   ;;  %s1634_s2 = inlined_call_operand.vmem [shape: f32[1,128], index: 2, kind: input, shape index: {}]   ;;  %s1635_s3 = inlined_call_operand.vmem [shape: bf16[32,128], index: 3, kind: output, shape index: {}]  }
   0x1   :  { %v1235_v0 = vld [vmem:[%s1632_s1 + $0x40] sm:$0xff]   ;;  %v1239_v4 = vld [vmem:[%s1632_s1 + $0x48] sm:$0xff]   ;;  %v1243_v8 = vld [vmem:[%s1632_s1 + $0x50] sm:$0xff]  }
   0x2   :  { %v1236_v1 = vld [vmem:[%s1632_s1] sm:$0xff]   ;;  %1093 = vmatprep.subr.bf16.mxu0 %v1235_v0  ;;  %v1240_v5 = vld [vmem:[%s1632_s1 + $0x8] sm:$0xff]   ;;  %v1244_v9 = vld [vmem:[%s1632_s1 + $0x10] sm:$0xff]  }
   0x3   :  { %v1237_v2 = vld [vmem:[%s1632_s1 + $0xc0] sm:$0xff]   ;;  %1094 = vmatpush3.bf16.msra.mxu0 %v1236_v1  ;;  %v1241_v6 = vld [vmem:[%s1632_s1 + $0xc8] sm:$0xff]   ;;  %v1245_v10 = vld [vmem:[%s1632_s1 + $0xd0] sm:$0xff]  }
   0x4   :  { %v1238_v3 = vld [vmem:[%s1632_s1 + $0x80] sm:$0xff]   ;;  %1121 = vmatprep.subr.bf16.mxu1 %v1237_v2  ;;  %1095 = vmatprep.subr.bf16.mxu0 %v1239_v4  ;;  %v1242_v7 = vld [vmem:[%s1632_s1 + $0x88] sm:$0xff]   ;;  %v1246_v11 = vld [vmem:[%s1632_s1 + $0x90] sm:$0xff]  }
   0x5   :  { %1122 = vmatpush3.bf16.msra.mxu1 %v1238_v3  ;;  %v1247_v12 = vld [vmem:[%s1632_s1 + $0x58] sm:$0xff]   ;;  %v1251_v16 = vld [vmem:[%s1632_s1 + $0x60] sm:$0xff]   ;;  %v1255_v20 = vld [vmem:[%s1632_s1 + $0x68] sm:$0xff]  }
   0x6   :  { %1123 = vmatprep.subr.bf16.mxu1 %v1241_v6  ;;  %v1248_v13 = vld [vmem:[%s1632_s1 + $0x18] sm:$0xff]   ;;  %v1252_v17 = vld [vmem:[%s1632_s1 + $0x20] sm:$0xff]   ;;  %v1256_v21 = vld [vmem:[%s1632_s1 + $0x28] sm:$0xff]  }
   0x7   :  { %1096 = vmatpush3.bf16.msra.mxu0 %v1240_v5  ;;  %v1249_v14 = vld [vmem:[%s1632_s1 + $0xd8] sm:$0xff]   ;;  %v1253_v18 = vld [vmem:[%s1632_s1 + $0xe0] sm:$0xff]   ;;  %v1257_v22 = vld [vmem:[%s1632_s1 + $0xe8] sm:$0xff]  }
   0x8   :  { %1097 = vmatprep.subr.bf16.mxu0 %v1243_v8  ;;  %v1250_v15 = vld [vmem:[%s1632_s1 + $0x98] sm:$0xff]   ;;  %v1254_v19 = vld [vmem:[%s1632_s1 + $0xa0] sm:$0xff]   ;;  %v1258_v23 = vld [vmem:[%s1632_s1 + $0xa8] sm:$0xff]  }
   0x9   :  { %1124 = vmatpush3.bf16.msra.mxu1 %v1242_v7  ;;  %v1259_v24 = vld [vmem:[%s1632_s1 + $0x70] sm:$0xff]   ;;  %v1263_v28 = vld [vmem:[%s1632_s1 + $0x78] sm:$0xff]   ;;  %v1266_v31 = vld [vmem:[%s1633_s0] ss:$36 sps:$4 sm:$0xff]  }
   0xa   :  { %1125 = vmatprep.subr.bf16.mxu1 %v1245_v10  ;;  %v1260_v25 = vld [vmem:[%s1632_s1 + $0x30] sm:$0xff]   ;;  %v1264_v29 = vld [vmem:[%s1632_s1 + $0x38] sm:$0xff]   ;;  %v1268_v32 = vld [vmem:[%s1633_s0 + $0x4] ss:$36 sps:$4 sm:$0xff]  }
   0xb   :  { %1098 = vmatpush3.bf16.msra.mxu0 %v1244_v9  ;;  %v1261_v26 = vld [vmem:[%s1632_s1 + $0xf0] sm:$0xff]   ;;  %v1265_v30 = vld [vmem:[%s1632_s1 + $0xf8] sm:$0xff]   ;;  %742 = vmatprep.mubr.bf16.mxu0 %v1268_v32  ;;  %v1270_v34 = vld [vmem:[%s1632_s1 + $0x140] sm:$0xff]  }
   0xc   :  { %1099 = vmatprep.subr.bf16.mxu0 %v1247_v12  ;;  %v1262_v27 = vld [vmem:[%s1632_s1 + $0xb0] sm:$0xff]   ;;  %v1269_v33 = vld [vmem:[%s1632_s1 + $0xb8] sm:$0xff]   ;;  %v1271_v35 = vld [vmem:[%s1633_s0 + $0x8] ss:$36 sps:$4 sm:$0xff]  }
   0xd   :  { %1126 = vmatpush3.bf16.msra.mxu1 %v1246_v11  ;;  %v1273_v36 = vld [vmem:[%s1633_s0 + $0xc] ss:$36 sps:$4 sm:$0xff]   ;;  %v1274_v37 = vld [vmem:[%s1632_s1 + $0x100] sm:$0xff]   ;;  %v1285_v48 = vld [vmem:[%s1632_s1 + $0x158] sm:$0xff]  }
   0xe   :  { %1127 = vmatprep.subr.bf16.mxu1 %v1249_v14  ;;  %791 = vmatprep.mubr.bf16.mxu1 %v1273_v36  ;;  %v1275_v38 = vld [vmem:[%s1632_s1 + $0x1c0] sm:$0xff]   ;;  %v1277_v40 = vld [vmem:[%s1632_s1 + $0x148] sm:$0xff]   ;;  %v1281_v44 = vld [vmem:[%s1632_s1 + $0x150] sm:$0xff]  }
   0xf   :  { %1100 = vmatpush3.bf16.msra.mxu0 %v1248_v13  ;;  %v1276_v39 = vld [vmem:[%s1632_s1 + $0x180] sm:$0xff]   ;;  %v1278_v41 = vld [vmem:[%s1632_s1 + $0x108] sm:$0xff]   ;;  %v1282_v45 = vld [vmem:[%s1632_s1 + $0x110] sm:$0xff]  }
  0x10   :  { %1101 = vmatprep.subr.bf16.mxu0 %v1251_v16  ;;  %v1279_v42 = vld [vmem:[%s1632_s1 + $0x1c8] sm:$0xff]   ;;  %v1283_v46 = vld [vmem:[%s1632_s1 + $0x1d0] sm:$0xff]   ;;  %v1286_v49 = vld [vmem:[%s1632_s1 + $0x118] sm:$0xff]  }
  0x11   :  { %1128 = vmatpush3.bf16.msra.mxu1 %v1250_v15  ;;  %v1280_v43 = vld [vmem:[%s1632_s1 + $0x188] sm:$0xff]   ;;  %v1284_v47 = vld [vmem:[%s1632_s1 + $0x190] sm:$0xff]   ;;  %v1287_v50 = vld [vmem:[%s1632_s1 + $0x1d8] sm:$0xff]  }
  0x12   :  { %1129 = vmatprep.subr.bf16.mxu1 %v1253_v18  ;;  %v1288_v51 = vld [vmem:[%s1632_s1 + $0x198] sm:$0xff]   ;;  %v1289_v52 = vld [vmem:[%s1632_s1 + $0x160] sm:$0xff]   ;;  %v1293_v56 = vld [vmem:[%s1632_s1 + $0x168] sm:$0xff]  }
  0x13   :  { %1102 = vmatpush3.bf16.msra.mxu0 %v1252_v17  ;;  %v1290_v53 = vld [vmem:[%s1632_s1 + $0x120] sm:$0xff]   ;;  %v1294_v57 = vld [vmem:[%s1633_s0 + $0x4c] ss:$36 sps:$4 sm:$0xff]   ;;  %v1299_v61 = vld [vmem:[%s1633_s0 + $0x54] ss:$36 sps:$4 sm:$0xff]  }
  0x14   :  { %1103 = vmatprep.subr.bf16.mxu0 %v1255_v20  ;;  %v1291_v54 = vld [vmem:[%s1632_s1 + $0x1e0] sm:$0xff]   ;;  %v1296_v58 = vld [vmem:[%s1632_s1 + $0x128] sm:$0xff]   ;;  %v1302_v63 = vld [vmem:[%s1633_s0 + $0x50] ss:$36 sps:$4 sm:$0xff]  }
  0x15   :  { %1130 = vmatpush3.bf16.msra.mxu1 %v1254_v19  ;;  %v1292_v55 = vld [vmem:[%s1632_s1 + $0x1a0] sm:$0xff]   ;;  %v1297_v59 = vld [vmem:[%s1633_s0 + $0x48] ss:$36 sps:$4 sm:$0xff]   ;;  %v1303_v0 = vld [vmem:[%s1632_s1 + $0x170] sm:$0xff]  }
  0x16   :  { %1131 = vmatprep.subr.bf16.mxu1 %v1257_v22  ;;  %v1298_v60 = vld [vmem:[%s1632_s1 + $0x1e8] sm:$0xff]   ;;  %v1304_v1 = vld [vmem:[%s1632_s1 + $0x130] sm:$0xff]   ;;  %v1307_v4 = vld [vmem:[%s1632_s1 + $0x178] sm:$0xff]  }
  0x17   :  { %1104 = vmatpush3.bf16.msra.mxu0 %v1256_v21  ;;  %v1301_v62 = vld [vmem:[%s1632_s1 + $0x1a8] sm:$0xff]   ;;  %v1305_v2 = vld [vmem:[%s1632_s1 + $0x1f0] sm:$0xff]   ;;  %v1308_v5 = vld [vmem:[%s1632_s1 + $0x138] sm:$0xff]  }
  0x18   :  { %1105 = vmatprep.subr.bf16.mxu0 %v1259_v24  ;;  %v1306_v3 = vld [vmem:[%s1632_s1 + $0x1b0] sm:$0xff]   ;;  %v1309_v6 = vld [vmem:[%s1632_s1 + $0x1f8] sm:$0xff]   ;;  %v1314_v10 = vld [vmem:[%s1632_s1 + $0x200] sm:$0xff]  }
  0x19   :  { %1132 = vmatpush3.bf16.msra.mxu1 %v1258_v23  ;;  %v1310_v7 = vld [vmem:[%s1633_s0 + $0x10] ss:$36 sps:$4 sm:$0xff]   ;;  %v1313_v9 = vld [vmem:[%s1632_s1 + $0x1b8] sm:$0xff]   ;;  %v1318_v13 = vld [vmem:[%s1632_s1 + $0x208] sm:$0xff]  }
  0x1a   :  { %1133 = vmatprep.subr.bf16.mxu1 %v1261_v26  ;;  %v1312_v8 = vld [vmem:[%s1633_s0 + $0x14] ss:$36 sps:$4 sm:$0xff]   ;;  %v1317_v12 = vld [vmem:[%s1633_s0 + $0x1c] ss:$36 sps:$4 sm:$0xff]   ;;  %v1323_v17 = vld [vmem:[%s1633_s0 + $0x64] ss:$36 sps:$4 sm:$0xff]  }
  0x1b   :  { %1106 = vmatpush3.bf16.msra.mxu0 %v1260_v25  ;;  %v1315_v11 = vld [vmem:[%s1633_s0 + $0x18] ss:$36 sps:$4 sm:$0xff]   ;;  %v1322_v16 = vld [vmem:[%s1632_s1 + $0x210] sm:$0xff]   ;;  %v1325_v18 = vld [vmem:[%s1633_s0 + $0x60] ss:$36 sps:$4 sm:$0xff]  }
  0x1c   :  { %1107 = vmatprep.subr.bf16.mxu0 %v1263_v28  ;;  %v1319_v14 = vld [vmem:[%s1633_s0 + $0x5c] ss:$36 sps:$4 sm:$0xff]   ;;  %v1328_v22 = vld [vmem:[%s1632_s1 + $0x228] sm:$0xff]   ;;  %v1329_v23 = vld [vmem:[%s1632_s1 + $0x230] sm:$0xff]  }
  0x1d   :  { %1134 = vmatpush3.bf16.msra.mxu1 %v1262_v27  ;;  %v1321_v15 = vld [vmem:[%s1633_s0 + $0x58] ss:$36 sps:$4 sm:$0xff]   ;;  %v1327_v20 = vld [vmem:[%s1632_s1 + $0x220] sm:$0xff]   ;;  %v1332_v25 = vld [vmem:[%s1633_s0 + $0x68] ss:$36 sps:$4 sm:$0xff]  }
  0x1e   :  { %1135 = vmatprep.subr.bf16.mxu1 %v1265_v30  ;;  %v1326_v19 = vld [vmem:[%s1632_s1 + $0x218] sm:$0xff]   ;;  %v1331_v21 = vld [vmem:[%s1633_s0 + $0x20] ss:$36 sps:$4 sm:$0xff]  }
  0x1f   :  { %1108 = vmatpush3.bf16.msra.mxu0 %v1264_v29  ;;  %v1330_v24 = vld [vmem:[%s1632_s1 + $0x238] sm:$0xff]   ;;  %v983_v27 = vld [vmem:[%s1634_s2] ss:$0 sm:$0xff] }
  0x20   :  { %1149 = vmatprep.subr.bf16.mxu0 %v1270_v34 }
  0x21   :  { %1136 = vmatpush3.bf16.msra.mxu1 %v1269_v33 }
  0x22   :  { %743 = vmatmul.mubr.bf16.vlgmr.msra.gmra.mrb[0].mxu0 %v1266_v31  ;;  %1177 = vmatprep.subr.bf16.mxu1 %v1275_v38 }
  0x23   :  { %1150 = vmatpush3.bf16.msra.mxu0 %v1274_v37  ;;  %750 = vmatprep.mubr.bf16.mxu0 %v1294_v57 }
  0x24   :  { %792 = vmatmul.mubr.bf16.vlgmr.msra.gmra.mrb[0].mxu1 %v1271_v35  ;;  %1151 = vmatprep.subr.bf16.mxu0 %v1277_v40 }
  0x25   :  { %1178 = vmatpush3.bf16.msra.mxu1 %v1276_v39  ;;  %799 = vmatprep.mubr.bf16.mxu1 %v1299_v61 }
  0x26   :  { %1179 = vmatprep.subr.bf16.mxu1 %v1279_v42 }
  0x27   :  { %1152 = vmatpush3.bf16.msra.mxu0 %v1278_v41 }
  0x28   :  { %1153 = vmatprep.subr.bf16.mxu0 %v1281_v44 }
  0x29   :  { %1180 = vmatpush3.bf16.msra.mxu1 %v1280_v43 }
  0x2a   :  { %1181 = vmatprep.subr.bf16.mxu1 %v1283_v46  ;;  %751 = vmatmul.mubr.bf16.gmra.mrb[4].mxu0 %v1297_v59 }
  0x2b   :  { %1154 = vmatpush3.bf16.msra.mxu0 %v1282_v45  ;;  %840 = vmatprep.mubr.bf16.mxu0 %v1312_v8 }
  0x2c   :  { %1155 = vmatprep.subr.bf16.mxu0 %v1285_v48  ;;  %800 = vmatmul.mubr.bf16.gmra.mrb[4].mxu1 %v1302_v63 }
  0x2d   :  { %1182 = vmatpush3.bf16.msra.mxu1 %v1284_v47  ;;  %889 = vmatprep.mubr.bf16.mxu1 %v1317_v12 }
  0x2e   :  { %1183 = vmatprep.subr.bf16.mxu1 %v1287_v50 }
  0x2f   :  { %1156 = vmatpush3.bf16.msra.mxu0 %v1286_v49 }
  0x30   :  { %1157 = vmatprep.subr.bf16.mxu0 %v1289_v52 }
  0x31   :  { %1184 = vmatpush3.bf16.msra.mxu1 %v1288_v51 }
  0x32   :  { %1185 = vmatprep.subr.bf16.mxu1 %v1291_v54 }
  0x33   :  { %1158 = vmatpush3.bf16.msra.mxu0 %v1290_v53 }
  0x34   :  { %1159 = vmatprep.subr.bf16.mxu0 %v1293_v56 }
  0x35   :  { %1186 = vmatpush3.bf16.msra.mxu1 %v1292_v55 }
  0x36   :  { %1187 = vmatprep.subr.bf16.mxu1 %v1298_v60 }
  0x37   :  { %1160 = vmatpush3.bf16.msra.mxu0 %v1296_v58 }
  0x38   :  { %1161 = vmatprep.subr.bf16.mxu0 %v1303_v0 }
  0x39   :  { %1188 = vmatpush3.bf16.msra.mxu1 %v1301_v62 }
  0x3a   :  { %1189 = vmatprep.subr.bf16.mxu1 %v1305_v2 }
  0x3b   :  { %1162 = vmatpush3.bf16.msra.mxu0 %v1304_v1 }
  0x3c   :  { %1163 = vmatprep.subr.bf16.mxu0 %v1307_v4 }
  0x3d   :  { %1190 = vmatpush3.bf16.msra.mxu1 %v1306_v3 }
  0x3e   :  { %1191 = vmatprep.subr.bf16.mxu1 %v1309_v6 }
  0x3f   :  { %1164 = vmatpush3.bf16.msra.mxu0 %v1308_v5 }
  0x40   :  { %1215 = vmatprep.subr.bf16.mxu0 %v1314_v10 }
  0x41   :  { %1192 = vmatpush3.bf16.msra.mxu1 %v1313_v9 }
  0x42   :  { %841 = vmatmul.mubr.bf16.vlgmr.msra.gmra.mrb[8].mxu0 %v1310_v7 }
  0x43   :  { %1216 = vmatpush3.bf16.msra.mxu0 %v1314_v10  ;;  %848 = vmatprep.mubr.bf16.mxu0 %v1319_v14 }
  0x44   :  { %890 = vmatmul.mubr.bf16.vlgmr.msra.gmra.mrb[8].mxu1 %v1315_v11  ;;  %1217 = vmatprep.subr.bf16.mxu0 %v1318_v13 }
  0x45   :  { %897 = vmatprep.mubr.bf16.mxu1 %v1323_v17 }
  0x47   :  { %1218 = vmatpush3.bf16.msra.mxu0 %v1318_v13 }
  0x48   :  { %1219 = vmatprep.subr.bf16.mxu0 %v1322_v16 }
  0x4a   :  { %849 = vmatmul.mubr.bf16.gmra.mrb[12].mxu0 %v1321_v15 }
  0x4b   :  { %1220 = vmatpush3.bf16.msra.mxu0 %v1322_v16  ;;  %1231 = vmatprep.mubr.bf16.mxu0 %v1331_v21 }
  0x4c   :  { %898 = vmatmul.mubr.bf16.gmra.mrb[12].mxu1 %v1325_v18  ;;  %1221 = vmatprep.subr.bf16.mxu0 %v1326_v19 }
  0x4f   :  { %1222 = vmatpush3.bf16.msra.mxu0 %v1326_v19 }
  0x50   :  { %1223 = vmatprep.subr.bf16.mxu0 %v1327_v20 }
  0x53   :  { %1224 = vmatpush3.bf16.msra.mxu0 %v1327_v20 }
  0x54   :  { %1225 = vmatprep.subr.bf16.mxu0 %v1328_v22 }
  0x57   :  { %1226 = vmatpush3.bf16.msra.mxu0 %v1328_v22 }
  0x58   :  { %1227 = vmatprep.subr.bf16.mxu0 %v1329_v23 }
  0x5b   :  { %1228 = vmatpush3.bf16.msra.mxu0 %v1329_v23 }
  0x5c   :  { %1229 = vmatprep.subr.bf16.mxu0 %v1330_v24 }
  0x5f   :  { %1230 = vmatpush3.bf16.msra.mxu0 %v1330_v24 }
  0x62   :  { %1232 = vmatmul.mubr.bf16.vlgmr.msra.gmra.mrb[16].mxu0 %v1332_v25 }
  0xf5   :  { %v1109_v26 = vpop.f32.mrb[0].mxu0 }
  0xf6   :  { %v1110_v28 = vpop.f32.mrb[1].mxu0 }
  0xf7   :  { %v1111_v29 = vadd.f32 %v1110_v28, %v1109_v26  ;;  %v1112_v30 = vpop.f32.mrb[2].mxu0  ;;  %v1137_v31 = vpop.f32.mrb[0].mxu1 }
  0xf8   :  { %v1113_v32 = vpop.f32.mrb[3].mxu0  ;;  %v1138_v35 = vpop.f32.mrb[1].mxu1 }
  0xf9   :  { %v745_v33 = vadd.f32 %v1111_v29, %v983_v27  ;;  %v1114_v34 = vadd.f32 %v1113_v32, %v1112_v30  ;;  %v1139_v36 = vadd.f32 %v1138_v35, %v1137_v31  ;;  %v1140_v37 = vpop.f32.mrb[2].mxu1 }
  0xfa   :  { %v1141_v39 = vpop.f32.mrb[3].mxu1 }
  0xfb   :  { %v748_v38 = vadd.f32 %v1114_v34, %v983_v27  ;;  %v794_v40 = vadd.f32 %v1139_v36, %v745_v33  ;;  %v1142_v41 = vadd.f32 %v1141_v39, %v1140_v37 }
  0xfd   :  { %v797_v42 = vadd.f32 %v1142_v41, %v748_v38  ;;  %v1115_v43 = vpop.f32.mrb[4].mxu0 }
  0xfe   :  { %v1116_v44 = vpop.f32.mrb[5].mxu0 }
  0xff   :  { %v1117_v45 = vadd.f32 %v1116_v44, %v1115_v43  ;;  %v1118_v46 = vpop.f32.mrb[6].mxu0  ;;  %v1143_v47 = vpop.f32.mrb[4].mxu1 }
 0x100   :  { %v1119_v48 = vpop.f32.mrb[7].mxu0  ;;  %v1144_v51 = vpop.f32.mrb[5].mxu1 }
 0x101   :  { %v753_v49 = vadd.f32 %v1117_v45, %v983_v27  ;;  %v1120_v50 = vadd.f32 %v1119_v48, %v1118_v46  ;;  %v1145_v52 = vadd.f32 %v1144_v51, %v1143_v47  ;;  %v1146_v53 = vpop.f32.mrb[6].mxu1 }
 0x102   :  { %v1147_v55 = vpop.f32.mrb[7].mxu1 }
 0x103   :  { %v756_v54 = vadd.f32 %v1120_v50, %v983_v27  ;;  %v802_v56 = vadd.f32 %v1145_v52, %v753_v49  ;;  %v1148_v57 = vadd.f32 %v1147_v55, %v1146_v53 }
 0x105   :  { %v805_v58 = vadd.f32 %v1148_v57, %v756_v54 }
 0x115   :  { %v1165_v59 = vpop.f32.mrb[8].mxu0 }
 0x116   :  { %v1166_v60 = vpop.f32.mrb[9].mxu0 }
 0x117   :  { %v1167_v61 = vadd.f32 %v1166_v60, %v1165_v59  ;;  %v1168_v62 = vpop.f32.mrb[10].mxu0  ;;  %v1193_v63 = vpop.f32.mrb[8].mxu1 }
 0x118   :  { %v1169_v0 = vpop.f32.mrb[11].mxu0  ;;  %v1194_v3 = vpop.f32.mrb[9].mxu1 }
 0x119   :  { %v843_v1 = vadd.f32 %v1167_v61, %v794_v40  ;;  %v1170_v2 = vadd.f32 %v1169_v0, %v1168_v62  ;;  %v1195_v4 = vadd.f32 %v1194_v3, %v1193_v63  ;;  %v1196_v5 = vpop.f32.mrb[10].mxu1 }
 0x11a   :  { %v1197_v7 = vpop.f32.mrb[11].mxu1 }
 0x11b   :  { %v846_v6 = vadd.f32 %v1170_v2, %v797_v42  ;;  %v1198_v8 = vadd.f32 %v1197_v7, %v1196_v5  ;;  %v892_v9 = vadd.f32 %v1195_v4, %v843_v1 }
 0x11d   :  { %v1171_v10 = vpop.f32.mrb[12].mxu0  ;;  %v895_v12 = vadd.f32 %v1198_v8, %v846_v6 }
 0x11e   :  { %v1172_v11 = vpop.f32.mrb[13].mxu0 }
 0x11f   :  { %v1173_v13 = vadd.f32 %v1172_v11, %v1171_v10  ;;  %v1174_v14 = vpop.f32.mrb[14].mxu0  ;;  %v1199_v15 = vpop.f32.mrb[12].mxu1 }
 0x120   :  { %v1175_v16 = vpop.f32.mrb[15].mxu0  ;;  %v1200_v19 = vpop.f32.mrb[13].mxu1 }
 0x121   :  { %v851_v17 = vadd.f32 %v1173_v13, %v802_v56  ;;  %v1176_v18 = vadd.f32 %v1175_v16, %v1174_v14  ;;  %v1201_v20 = vadd.f32 %v1200_v19, %v1199_v15  ;;  %v1202_v21 = vpop.f32.mrb[14].mxu1 }
 0x122   :  { %v1203_v23 = vpop.f32.mrb[15].mxu1 }
 0x123   :  { %v854_v22 = vadd.f32 %v1176_v18, %v805_v58  ;;  %v1204_v24 = vadd.f32 %v1203_v23, %v1202_v21  ;;  %v900_v25 = vadd.f32 %v1201_v20, %v851_v17 }
 0x125   :  { %v903_v26 = vadd.f32 %v1204_v24, %v854_v22 }
 0x135   :  { %v1233_v27 = vpop.f32.mrb[16].mxu0 }
 0x136   :  { %v949_v28 = vadd.f32 %v1233_v27, %v900_v25  ;;  %v940_v29 = vpop.f32.mrb[17].mxu0 }
 0x137   :  { %v941_v30 = vadd.f32 %v940_v29, %v892_v9  ;;  %v1234_v31 = vpop.f32.mrb[18].mxu0 }
 0x138   :  { %v952_v32 = vadd.f32 %v1234_v31, %v903_v26  ;;  %v943_v33 = vpop.f32.mrb[19].mxu0  ;;  %v957_v35 = vmax.f32 %v949_v28, 0.0 }
 0x139   :  { %v944_v34 = vadd.f32 %v943_v33, %v895_v12  ;;  %v955_v37 = vmax.f32 %v941_v30, 0.0 }
 0x13a   :  { %v958_v36 = vmax.f32 %v952_v32, 0.0 }
 0x13b   :  { %v956_v38 = vmax.f32 %v944_v34, 0.0 }
 0x13c   :  { %v1090_v39 = vpack.c.bf16 %v958_v36, %v957_v35 }
 0x13d   :  { %v1085_v40 = vpack.c.bf16 %v956_v38, %v955_v37 }
 0x13e   :  { %1092 = vst [vmem:[%s1635_s3 + $0x8] sm:$0xff] %v1090_v39  }
 0x13f   :  { %1086 = vst [vmem:[%s1635_s3] sm:$0xff] %v1085_v40  }

// kernel: _lambda_.22
= control target key start
LH: loop header
LB: loop body
LE: loop exit
PB: predicated region body
PF: predicated region fallthrough
CT: control target
= control target key end

     0   :  { %s3957_s1 = inlined_call_operand.vmem [shape: bf16[1152,512], index: 1, kind: input, shape index: {}]   ;;  %s3958_s0 = inlined_call_operand.vmem [shape: bf16[8,1152], index: 0, kind: input, shape index: {}]   ;;  %s3959_s2 = inlined_call_operand.vmem [shape: f32[1,512], index: 2, kind: input, shape index: {}]   ;;  %s3960_s3 = inlined_call_operand.vmem [shape: bf16[8,512], index: 3, kind: output, shape index: {}]  }
   0x1   :  { %v2589_v0 = vld [vmem:[%s3957_s1 + $0x4] ss:$16 sps:$4 sm:$0xff]   ;;  %v2591_v1 = vld [vmem:[%s3957_s1 + $0xc] ss:$16 sps:$4 sm:$0xff]   ;;  %v2593_v2 = vld [vmem:[%s3957_s1] ss:$16 sps:$4 sm:$0xff]  }
   0x2   :  { %1802 = vmatprep.subr.bf16.mxu0 %v2589_v0  ;;  %v2594_v3 = vld [vmem:[%s3957_s1 + $0x8] ss:$16 sps:$4 sm:$0xff]   ;;  %2007 = vmatprep.subr.bf16.mxu1 %v2591_v1  ;;  %v2595_v4 = vld [vmem:[%s3957_s1 + $0x24] ss:$16 sps:$4 sm:$0xff]   ;;  %v2597_v5 = vld [vmem:[%s3957_s1 + $0x2c] ss:$16 sps:$4 sm:$0xff]  }
   0x3   :  { %1803 = vmatpush1.bf16.msra.mxu0 %v2593_v2  ;;  %2008 = vmatpush1.bf16.msra.mxu1 %v2594_v3  ;;  %v2599_v6 = vld [vmem:[%s3957_s1 + $0x20] ss:$16 sps:$4 sm:$0xff]   ;;  %v2600_v7 = vld [vmem:[%s3957_s1 + $0x28] ss:$16 sps:$4 sm:$0xff]   ;;  %v2601_v8 = vld [vmem:[%s3957_s1 + $0x44] ss:$16 sps:$4 sm:$0xff]  }
   0x4   :  { %1804 = vmatprep.subr.bf16.mxu0 %v2595_v4  ;;  %2009 = vmatprep.subr.bf16.mxu1 %v2597_v5  ;;  %v2603_v9 = vld [vmem:[%s3957_s1 + $0x4c] ss:$16 sps:$4 sm:$0xff]   ;;  %v2605_v10 = vld [vmem:[%s3957_s1 + $0x40] ss:$16 sps:$4 sm:$0xff]   ;;  %v2606_v11 = vld [vmem:[%s3957_s1 + $0x48] ss:$16 sps:$4 sm:$0xff]  }
   0x5   :  { %v2607_v12 = vld [vmem:[%s3957_s1 + $0x64] ss:$16 sps:$4 sm:$0xff]   ;;  %v2609_v13 = vld [vmem:[%s3957_s1 + $0x6c] ss:$16 sps:$4 sm:$0xff]   ;;  %v2611_v14 = vld [vmem:[%s3957_s1 + $0x60] ss:$16 sps:$4 sm:$0xff]  }
   0x6   :  { %v2612_v15 = vld [vmem:[%s3957_s1 + $0x68] ss:$16 sps:$4 sm:$0xff]   ;;  %v2613_v16 = vld [vmem:[%s3957_s1 + $0x84] ss:$16 sps:$4 sm:$0xff]   ;;  %v2615_v17 = vld [vmem:[%s3957_s1 + $0x8c] ss:$16 sps:$4 sm:$0xff]  }
   0x7   :  { %1805 = vmatpush1.bf16.msra.mxu0 %v2599_v6  ;;  %2010 = vmatpush1.bf16.msra.mxu1 %v2600_v7  ;;  %v2617_v18 = vld [vmem:[%s3957_s1 + $0x80] ss:$16 sps:$4 sm:$0xff]   ;;  %v2618_v19 = vld [vmem:[%s3957_s1 + $0x88] ss:$16 sps:$4 sm:$0xff]   ;;  %v2619_v20 = vld [vmem:[%s3957_s1 + $0xa4] ss:$16 sps:$4 sm:$0xff]  }
   0x8   :  { %1806 = vmatprep.subr.bf16.mxu0 %v2601_v8  ;;  %2011 = vmatprep.subr.bf16.mxu1 %v2603_v9  ;;  %v2621_v21 = vld [vmem:[%s3957_s1 + $0xac] ss:$16 sps:$4 sm:$0xff]   ;;  %v2623_v22 = vld [vmem:[%s3957_s1 + $0xa0] ss:$16 sps:$4 sm:$0xff]   ;;  %v2624_v23 = vld [vmem:[%s3957_s1 + $0xa8] ss:$16 sps:$4 sm:$0xff]  }
   0x9   :  { %v2625_v24 = vld [vmem:[%s3957_s1 + $0xc4] ss:$16 sps:$4 sm:$0xff]   ;;  %v2627_v25 = vld [vmem:[%s3957_s1 + $0xcc] ss:$16 sps:$4 sm:$0xff]   ;;  %v2629_v26 = vld [vmem:[%s3957_s1 + $0xc0] ss:$16 sps:$4 sm:$0xff]  }
   0xa   :  { %v2630_v27 = vld [vmem:[%s3957_s1 + $0xc8] ss:$16 sps:$4 sm:$0xff]   ;;  %v2631_v28 = vld [vmem:[%s3957_s1 + $0xe4] ss:$16 sps:$4 sm:$0xff]   ;;  %v2633_v29 = vld [vmem:[%s3957_s1 + $0xec] ss:$16 sps:$4 sm:$0xff]  }
   0xb   :  { %1807 = vmatpush1.bf16.msra.mxu0 %v2605_v10  ;;  %2012 = vmatpush1.bf16.msra.mxu1 %v2606_v11  ;;  %v2635_v30 = vld [vmem:[%s3957_s1 + $0xe0] ss:$16 sps:$4 sm:$0xff]   ;;  %v2636_v31 = vld [vmem:[%s3957_s1 + $0xe8] ss:$16 sps:$4 sm:$0xff]   ;;  %v2637_v32 = vld [vmem:[%s3957_s1 + $0x104] ss:$16 sps:$4 sm:$0xff]  }
   0xc   :  { %1808 = vmatprep.subr.bf16.mxu0 %v2607_v12  ;;  %2013 = vmatprep.subr.bf16.mxu1 %v2609_v13  ;;  %v2639_v33 = vld [vmem:[%s3957_s1 + $0x10c] ss:$16 sps:$4 sm:$0xff]   ;;  %v2641_v34 = vld [vmem:[%s3957_s1 + $0x100] ss:$16 sps:$4 sm:$0xff]   ;;  %v2642_v35 = vld [vmem:[%s3957_s1 + $0x108] ss:$16 sps:$4 sm:$0xff]  }
   0xd   :  { %v2643_v36 = vld [vmem:[%s3957_s1 + $0x124] ss:$16 sps:$4 sm:$0xff]   ;;  %v2645_v37 = vld [vmem:[%s3957_s1 + $0x12c] ss:$16 sps:$4 sm:$0xff]   ;;  %v2647_v38 = vld [vmem:[%s3957_s1 + $0x120] ss:$16 sps:$4 sm:$0xff]  }
   0xe   :  { %v2648_v39 = vld [vmem:[%s3957_s1 + $0x128] ss:$16 sps:$4 sm:$0xff]   ;;  %v2649_v40 = vld [vmem:[%s3957_s1 + $0x144] ss:$16 sps:$4 sm:$0xff]   ;;  %v2651_v41 = vld [vmem:[%s3957_s1 + $0x14c] ss:$16 sps:$4 sm:$0xff]  }
   0xf   :  { %1809 = vmatpush1.bf16.msra.mxu0 %v2611_v14  ;;  %2014 = vmatpush1.bf16.msra.mxu1 %v2612_v15  ;;  %v2653_v42 = vld [vmem:[%s3957_s1 + $0x140] ss:$16 sps:$4 sm:$0xff]   ;;  %v2654_v43 = vld [vmem:[%s3957_s1 + $0x148] ss:$16 sps:$4 sm:$0xff]   ;;  %v2655_v44 = vld [vmem:[%s3957_s1 + $0x164] ss:$16 sps:$4 sm:$0xff]  }
  0x10   :  { %1810 = vmatprep.subr.bf16.mxu0 %v2613_v16  ;;  %2015 = vmatprep.subr.bf16.mxu1 %v2615_v17  ;;  %v2657_v45 = vld [vmem:[%s3957_s1 + $0x16c] ss:$16 sps:$4 sm:$0xff]   ;;  %v15_v46 = vld [vmem:[%s3958_s0] sm:$0xff]  ;;  %v2660_v49 = vld [vmem:[%s3957_s1 + $0x168] ss:$16 sps:$4 sm:$0xff]  }
  0x11   :  { %v2659_v47 = vld [vmem:[%s3957_s1 + $0x160] ss:$16 sps:$4 sm:$0xff]   ;;  %v2252_v48 = vcombine.high %v15_v46, %v15_v46  ;;  %v2661_v50 = vld [vmem:[%s3957_s1 + $0x184] ss:$16 sps:$4 sm:$0xff]   ;;  %v2663_v51 = vld [vmem:[%s3957_s1 + $0x18c] ss:$16 sps:$4 sm:$0xff]   ;;  %v2251_v4 = vcombine.low %v15_v46, %v15_v46 }
  0x12   :  { %v2665_v52 = vld [vmem:[%s3957_s1 + $0x180] ss:$16 sps:$4 sm:$0xff]   ;;  %v2666_v53 = vld [vmem:[%s3957_s1 + $0x188] ss:$16 sps:$4 sm:$0xff]   ;;  %v2667_v54 = vld [vmem:[%s3957_s1 + $0x1a4] ss:$16 sps:$4 sm:$0xff]  }
  0x13   :  { %1811 = vmatpush1.bf16.msra.mxu0 %v2617_v18  ;;  %2016 = vmatpush1.bf16.msra.mxu1 %v2618_v19  ;;  %v2669_v55 = vld [vmem:[%s3957_s1 + $0x1ac] ss:$16 sps:$4 sm:$0xff]   ;;  %v2671_v56 = vld [vmem:[%s3957_s1 + $0x1a0] ss:$16 sps:$4 sm:$0xff]   ;;  %v2672_v57 = vld [vmem:[%s3957_s1 + $0x1a8] ss:$16 sps:$4 sm:$0xff]  }
  0x14   :  { %1812 = vmatprep.subr.bf16.mxu0 %v2619_v20  ;;  %2017 = vmatprep.subr.bf16.mxu1 %v2621_v21  ;;  %v2673_v58 = vld [vmem:[%s3957_s1 + $0x1c4] ss:$16 sps:$4 sm:$0xff]   ;;  %v2675_v59 = vld [vmem:[%s3957_s1 + $0x1cc] ss:$16 sps:$4 sm:$0xff]   ;;  %v2677_v60 = vld [vmem:[%s3957_s1 + $0x1c0] ss:$16 sps:$4 sm:$0xff]  }
  0x15   :  { %1834 = vmatprep.mubr.bf16.mxu0 %v2252_v48  ;;  %2039 = vmatprep.mubr.bf16.mxu1 %v2252_v48  ;;  %v2678_v61 = vld [vmem:[%s3957_s1 + $0x1c8] ss:$16 sps:$4 sm:$0xff]   ;;  %v2679_v62 = vld [vmem:[%s3957_s1 + $0x1e4] ss:$16 sps:$4 sm:$0xff]   ;;  %v2681_v63 = vld [vmem:[%s3957_s1 + $0x1ec] ss:$16 sps:$4 sm:$0xff]  }
  0x16   :  { %v2683_v0 = vld [vmem:[%s3957_s1 + $0x1e0] ss:$16 sps:$4 sm:$0xff]   ;;  %v2684_v1 = vld [vmem:[%s3957_s1 + $0x1e8] ss:$16 sps:$4 sm:$0xff]   ;;  %v2689_v2 = vld [vmem:[%s3957_s1 + $0x204] ss:$16 sps:$4 sm:$0xff]  }
  0x17   :  { %1813 = vmatpush1.bf16.msra.mxu0 %v2623_v22  ;;  %2018 = vmatpush1.bf16.msra.mxu1 %v2624_v23  ;;  %v2692_v3 = vld [vmem:[%s3957_s1 + $0x20c] ss:$16 sps:$4 sm:$0xff]   ;;  %v2687_v5 = vld [vmem:[%s3957_s1 + $0x200] ss:$16 sps:$4 sm:$0xff]   ;;  %v2690_v6 = vld [vmem:[%s3957_s1 + $0x208] ss:$16 sps:$4 sm:$0xff]  }
  0x18   :  { %1814 = vmatprep.subr.bf16.mxu0 %v2625_v24  ;;  %2019 = vmatprep.subr.bf16.mxu1 %v2627_v25  ;;  %v2695_v7 = vld [vmem:[%s3957_s1 + $0x224] ss:$16 sps:$4 sm:$0xff]   ;;  %v2698_v8 = vld [vmem:[%s3957_s1 + $0x22c] ss:$16 sps:$4 sm:$0xff]   ;;  %v2693_v9 = vld [vmem:[%s3957_s1 + $0x220] ss:$16 sps:$4 sm:$0xff]  }
  0x19   :  { %v2696_v10 = vld [vmem:[%s3957_s1 + $0x228] ss:$16 sps:$4 sm:$0xff]   ;;  %v2701_v11 = vld [vmem:[%s3957_s1 + $0x244] ss:$16 sps:$4 sm:$0xff]   ;;  %v2704_v12 = vld [vmem:[%s3957_s1 + $0x24c] ss:$16 sps:$4 sm:$0xff]  }
  0x1a   :  { %v2699_v13 = vld [vmem:[%s3957_s1 + $0x240] ss:$16 sps:$4 sm:$0xff]   ;;  %v2702_v14 = vld [vmem:[%s3957_s1 + $0x248] ss:$16 sps:$4 sm:$0xff]   ;;  %v2707_v15 = vld [vmem:[%s3957_s1 + $0x264] ss:$16 sps:$4 sm:$0xff]  }
  0x1b   :  { %1815 = vmatpush1.bf16.msra.mxu0 %v2629_v26  ;;  %2020 = vmatpush1.bf16.msra.mxu1 %v2630_v27  ;;  %v2710_v16 = vld [vmem:[%s3957_s1 + $0x26c] ss:$16 sps:$4 sm:$0xff]   ;;  %v2705_v17 = vld [vmem:[%s3957_s1 + $0x260] ss:$16 sps:$4 sm:$0xff]   ;;  %v2708_v18 = vld [vmem:[%s3957_s1 + $0x268] ss:$16 sps:$4 sm:$0xff]  }
  0x1c   :  { %1816 = vmatprep.subr.bf16.mxu0 %v2631_v28  ;;  %2021 = vmatprep.subr.bf16.mxu1 %v2633_v29  ;;  %v2713_v19 = vld [vmem:[%s3957_s1 + $0x284] ss:$16 sps:$4 sm:$0xff]   ;;  %v2716_v20 = vld [vmem:[%s3957_s1 + $0x28c] ss:$16 sps:$4 sm:$0xff]   ;;  %v2711_v21 = vld [vmem:[%s3957_s1 + $0x280] ss:$16 sps:$4 sm:$0xff]  }
  0x1d   :  { %v2714_v22 = vld [vmem:[%s3957_s1 + $0x288] ss:$16 sps:$4 sm:$0xff]   ;;  %v2719_v23 = vld [vmem:[%s3957_s1 + $0x2a4] ss:$16 sps:$4 sm:$0xff]   ;;  %v2722_v24 = vld [vmem:[%s3957_s1 + $0x2ac] ss:$16 sps:$4 sm:$0xff]  }
  0x1e   :  { %v2717_v25 = vld [vmem:[%s3957_s1 + $0x2a0] ss:$16 sps:$4 sm:$0xff]   ;;  %v2720_v26 = vld [vmem:[%s3957_s1 + $0x2a8] ss:$16 sps:$4 sm:$0xff]   ;;  %v2725_v27 = vld [vmem:[%s3957_s1 + $0x2c4] ss:$16 sps:$4 sm:$0xff]  }
  0x1f   :  { %1817 = vmatpush1.bf16.msra.mxu0 %v2635_v30  ;;  %2022 = vmatpush1.bf16.msra.mxu1 %v2636_v31  ;;  %v2728_v28 = vld [vmem:[%s3957_s1 + $0x2cc] ss:$16 sps:$4 sm:$0xff]   ;;  %v2723_v31 = vld [vmem:[%s3957_s1 + $0x2c0] ss:$16 sps:$4 sm:$0xff]   ;;  %v2750_v48 = vld [vmem:[%s3957_s1 + $0x348] ss:$16 sps:$4 sm:$0xff]  }
  0x20   :  { %1818 = vmatprep.subr.bf16.mxu0 %v2637_v32  ;;  %2023 = vmatprep.subr.bf16.mxu1 %v2639_v33  ;;  %v3327_v29 = vld [vmem:[%s3958_s0 + $0x8] sm:$0xff]  ;;  %v2731_v33 = vld [vmem:[%s3957_s1 + $0x2e4] ss:$16 sps:$4 sm:$0xff]  }
  0x21   :  { %v2254_v30 = vcombine.high %v3327_v29, %v3327_v29  ;;  %v2726_v32 = vld [vmem:[%s3957_s1 + $0x2c8] ss:$16 sps:$4 sm:$0xff]   ;;  %v2752_v46 = vld [vmem:[%s3957_s1 + $0x34c] ss:$16 sps:$4 sm:$0xff]  }
  0x23   :  { %1819 = vmatpush1.bf16.msra.mxu0 %v2641_v34  ;;  %2024 = vmatpush1.bf16.msra.mxu1 %v2642_v35  ;;  %v2734_v34 = vld [vmem:[%s3957_s1 + $0x2ec] ss:$16 sps:$4 sm:$0xff]   ;;  %v2729_v35 = vld [vmem:[%s3957_s1 + $0x2e0] ss:$16 sps:$4 sm:$0xff]  }
  0x24   :  { %1820 = vmatprep.subr.bf16.mxu0 %v2643_v36  ;;  %2025 = vmatprep.subr.bf16.mxu1 %v2645_v37  ;;  %v2732_v36 = vld [vmem:[%s3957_s1 + $0x2e8] ss:$16 sps:$4 sm:$0xff]   ;;  %v2737_v37 = vld [vmem:[%s3957_s1 + $0x304] ss:$16 sps:$4 sm:$0xff]  }
  0x27   :  { %1821 = vmatpush1.bf16.msra.mxu0 %v2647_v38  ;;  %2026 = vmatpush1.bf16.msra.mxu1 %v2648_v39  ;;  %v2740_v38 = vld [vmem:[%s3957_s1 + $0x30c] ss:$16 sps:$4 sm:$0xff]   ;;  %v2735_v39 = vld [vmem:[%s3957_s1 + $0x300] ss:$16 sps:$4 sm:$0xff]  }
  0x28   :  { %1822 = vmatprep.subr.bf16.mxu0 %v2649_v40  ;;  %2027 = vmatprep.subr.bf16.mxu1 %v2651_v41  ;;  %v2738_v40 = vld [vmem:[%s3957_s1 + $0x308] ss:$16 sps:$4 sm:$0xff]   ;;  %v2743_v41 = vld [vmem:[%s3957_s1 + $0x324] ss:$16 sps:$4 sm:$0xff]  }
  0x2b   :  { %1823 = vmatpush1.bf16.msra.mxu0 %v2653_v42  ;;  %2028 = vmatpush1.bf16.msra.mxu1 %v2654_v43  ;;  %v2746_v42 = vld [vmem:[%s3957_s1 + $0x32c] ss:$16 sps:$4 sm:$0xff]   ;;  %v2741_v43 = vld [vmem:[%s3957_s1 + $0x320] ss:$16 sps:$4 sm:$0xff]  }
  0x2c   :  { %1824 = vmatprep.subr.bf16.mxu0 %v2655_v44  ;;  %2029 = vmatprep.subr.bf16.mxu1 %v2657_v45  ;;  %v2744_v44 = vld [vmem:[%s3957_s1 + $0x328] ss:$16 sps:$4 sm:$0xff]   ;;  %v2749_v45 = vld [vmem:[%s3957_s1 + $0x344] ss:$16 sps:$4 sm:$0xff]  }
  0x2f   :  { %1825 = vmatpush1.bf16.msra.mxu0 %v2659_v47  ;;  %2030 = vmatpush1.bf16.msra.mxu1 %v2660_v49  ;;  %v2747_v47 = vld [vmem:[%s3957_s1 + $0x340] ss:$16 sps:$4 sm:$0xff]   ;;  %v2755_v49 = vld [vmem:[%s3957_s1 + $0x364] ss:$16 sps:$4 sm:$0xff]  }
  0x30   :  { %1826 = vmatprep.subr.bf16.mxu0 %v2661_v50  ;;  %2031 = vmatprep.subr.bf16.mxu1 %v2663_v51  ;;  %v2758_v50 = vld [vmem:[%s3957_s1 + $0x36c] ss:$16 sps:$4 sm:$0xff]   ;;  %v2753_v51 = vld [vmem:[%s3957_s1 + $0x360] ss:$16 sps:$4 sm:$0xff]  }
  0x33   :  { %1827 = vmatpush1.bf16.msra.mxu0 %v2665_v52  ;;  %2032 = vmatpush1.bf16.msra.mxu1 %v2666_v53  ;;  %v2756_v52 = vld [vmem:[%s3957_s1 + $0x368] ss:$16 sps:$4 sm:$0xff]   ;;  %v2761_v53 = vld [vmem:[%s3957_s1 + $0x384] ss:$16 sps:$4 sm:$0xff]  }
  0x34   :  { %1828 = vmatprep.subr.bf16.mxu0 %v2667_v54  ;;  %2033 = vmatprep.subr.bf16.mxu1 %v2669_v55  ;;  %v2764_v54 = vld [vmem:[%s3957_s1 + $0x38c] ss:$16 sps:$4 sm:$0xff]   ;;  %v2759_v55 = vld [vmem:[%s3957_s1 + $0x380] ss:$16 sps:$4 sm:$0xff]  }
  0x37   :  { %1829 = vmatpush1.bf16.msra.mxu0 %v2671_v56  ;;  %2034 = vmatpush1.bf16.msra.mxu1 %v2672_v57  ;;  %v2762_v56 = vld [vmem:[%s3957_s1 + $0x388] ss:$16 sps:$4 sm:$0xff]   ;;  %v2767_v57 = vld [vmem:[%s3957_s1 + $0x3a4] ss:$16 sps:$4 sm:$0xff]  }
  0x38   :  { %1830 = vmatprep.subr.bf16.mxu0 %v2673_v58  ;;  %2035 = vmatprep.subr.bf16.mxu1 %v2675_v59  ;;  %v2770_v58 = vld [vmem:[%s3957_s1 + $0x3ac] ss:$16 sps:$4 sm:$0xff]   ;;  %v2765_v59 = vld [vmem:[%s3957_s1 + $0x3a0] ss:$16 sps:$4 sm:$0xff]  }
  0x3b   :  { %1831 = vmatpush1.bf16.msra.mxu0 %v2677_v60  ;;  %2036 = vmatpush1.bf16.msra.mxu1 %v2678_v61  ;;  %v2768_v60 = vld [vmem:[%s3957_s1 + $0x3a8] ss:$16 sps:$4 sm:$0xff]   ;;  %v2773_v61 = vld [vmem:[%s3957_s1 + $0x3c4] ss:$16 sps:$4 sm:$0xff]  }
  0x3c   :  { %1832 = vmatprep.subr.bf16.mxu0 %v2679_v62  ;;  %2037 = vmatprep.subr.bf16.mxu1 %v2681_v63  ;;  %v2776_v62 = vld [vmem:[%s3957_s1 + $0x3cc] ss:$16 sps:$4 sm:$0xff]   ;;  %v2771_v63 = vld [vmem:[%s3957_s1 + $0x3c0] ss:$16 sps:$4 sm:$0xff]  }
  0x3f   :  { %1833 = vmatpush1.bf16.msra.mxu0 %v2683_v0  ;;  %2038 = vmatpush1.bf16.msra.mxu1 %v2684_v1  ;;  %v2774_v0 = vld [vmem:[%s3957_s1 + $0x3c8] ss:$16 sps:$4 sm:$0xff]   ;;  %v2779_v1 = vld [vmem:[%s3957_s1 + $0x3e4] ss:$16 sps:$4 sm:$0xff]  }
  0x40   :  { %1843 = vmatprep.subr.bf16.mxu0 %v2689_v2  ;;  %2048 = vmatprep.subr.bf16.mxu1 %v2692_v3  ;;  %v2782_v2 = vld [vmem:[%s3957_s1 + $0x3ec] ss:$16 sps:$4 sm:$0xff]   ;;  %v2777_v3 = vld [vmem:[%s3957_s1 + $0x3e0] ss:$16 sps:$4 sm:$0xff]  }
  0x42   :  { %1835 = vmatmul.mubr.bf16.vlgmr.msra.gmra.mrb[0].mxu0 %v2251_v4  ;;  %2040 = vmatmul.mubr.bf16.vlgmr.msra.gmra.mrb[0].mxu1 %v2251_v4  ;;  %v2780_v4 = vld [vmem:[%s3957_s1 + $0x3e8] ss:$16 sps:$4 sm:$0xff]  }
  0x43   :  { %1844 = vmatpush1.bf16.msra.mxu0 %v2687_v5  ;;  %2049 = vmatpush1.bf16.msra.mxu1 %v2690_v6  ;;  %v2787_v5 = vld [vmem:[%s3957_s1 + $0x404] ss:$16 sps:$4 sm:$0xff]   ;;  %v2790_v6 = vld [vmem:[%s3957_s1 + $0x40c] ss:$16 sps:$4 sm:$0xff]  }
  0x44   :  { %1845 = vmatprep.subr.bf16.mxu0 %v2695_v7  ;;  %2050 = vmatprep.subr.bf16.mxu1 %v2698_v8  ;;  %v2253_v7 = vcombine.low %v3327_v29, %v3327_v29  ;;  %v2785_v8 = vld [vmem:[%s3957_s1 + $0x400] ss:$16 sps:$4 sm:$0xff]   ;;  %v2820_v29 = vld [vmem:[%s3957_s1 + $0x4ac] ss:$16 sps:$4 sm:$0xff]  }
  0x45   :  { %1875 = vmatprep.mubr.bf16.mxu0 %v2254_v30  ;;  %2080 = vmatprep.mubr.bf16.mxu1 %v2254_v30  ;;  %v2815_v30 = vld [vmem:[%s3957_s1 + $0x4a0] ss:$16 sps:$4 sm:$0xff]  }
  0x47   :  { %1846 = vmatpush1.bf16.msra.mxu0 %v2693_v9  ;;  %2051 = vmatpush1.bf16.msra.mxu1 %v2696_v10  ;;  %v2788_v9 = vld [vmem:[%s3957_s1 + $0x408] ss:$16 sps:$4 sm:$0xff]   ;;  %v2793_v10 = vld [vmem:[%s3957_s1 + $0x424] ss:$16 sps:$4 sm:$0xff]  }
  0x48   :  { %1847 = vmatprep.subr.bf16.mxu0 %v2701_v11  ;;  %2052 = vmatprep.subr.bf16.mxu1 %v2704_v12  ;;  %v3465_v11 = vld [vmem:[%s3958_s0 + $0x10] sm:$0xff]  ;;  %v2796_v12 = vld [vmem:[%s3957_s1 + $0x42c] ss:$16 sps:$4 sm:$0xff]  }
  0x4b   :  { %1848 = vmatpush1.bf16.msra.mxu0 %v2699_v13  ;;  %2053 = vmatpush1.bf16.msra.mxu1 %v2702_v14  ;;  %v2256_v13 = vcombine.high %v3465_v11, %v3465_v11  ;;  %v2791_v14 = vld [vmem:[%s3957_s1 + $0x420] ss:$16 sps:$4 sm:$0xff]  }
  0x4c   :  { %1849 = vmatprep.subr.bf16.mxu0 %v2707_v15  ;;  %2054 = vmatprep.subr.bf16.mxu1 %v2710_v16  ;;  %v2794_v15 = vld [vmem:[%s3957_s1 + $0x428] ss:$16 sps:$4 sm:$0xff]   ;;  %v2799_v16 = vld [vmem:[%s3957_s1 + $0x444] ss:$16 sps:$4 sm:$0xff]  }
  0x4f   :  { %1850 = vmatpush1.bf16.msra.mxu0 %v2705_v17  ;;  %2055 = vmatpush1.bf16.msra.mxu1 %v2708_v18  ;;  %v2802_v17 = vld [vmem:[%s3957_s1 + $0x44c] ss:$16 sps:$4 sm:$0xff]   ;;  %v2797_v18 = vld [vmem:[%s3957_s1 + $0x440] ss:$16 sps:$4 sm:$0xff]  }
  0x50   :  { %1851 = vmatprep.subr.bf16.mxu0 %v2713_v19  ;;  %2056 = vmatprep.subr.bf16.mxu1 %v2716_v20  ;;  %v2800_v19 = vld [vmem:[%s3957_s1 + $0x448] ss:$16 sps:$4 sm:$0xff]   ;;  %v2805_v20 = vld [vmem:[%s3957_s1 + $0x464] ss:$16 sps:$4 sm:$0xff]  }
  0x53   :  { %1852 = vmatpush1.bf16.msra.mxu0 %v2711_v21  ;;  %2057 = vmatpush1.bf16.msra.mxu1 %v2714_v22  ;;  %v2808_v21 = vld [vmem:[%s3957_s1 + $0x46c] ss:$16 sps:$4 sm:$0xff]   ;;  %v2803_v22 = vld [vmem:[%s3957_s1 + $0x460] ss:$16 sps:$4 sm:$0xff]  }
  0x54   :  { %1853 = vmatprep.subr.bf16.mxu0 %v2719_v23  ;;  %2058 = vmatprep.subr.bf16.mxu1 %v2722_v24  ;;  %v2806_v23 = vld [vmem:[%s3957_s1 + $0x468] ss:$16 sps:$4 sm:$0xff]   ;;  %v2811_v24 = vld [vmem:[%s3957_s1 + $0x484] ss:$16 sps:$4 sm:$0xff]  }
  0x57   :  { %1854 = vmatpush1.bf16.msra.mxu0 %v2717_v25  ;;  %2059 = vmatpush1.bf16.msra.mxu1 %v2720_v26  ;;  %v2814_v25 = vld [vmem:[%s3957_s1 + $0x48c] ss:$16 sps:$4 sm:$0xff]   ;;  %v2809_v26 = vld [vmem:[%s3957_s1 + $0x480] ss:$16 sps:$4 sm:$0xff]  }
  0x58   :  { %1855 = vmatprep.subr.bf16.mxu0 %v2725_v27  ;;  %2060 = vmatprep.subr.bf16.mxu1 %v2728_v28  ;;  %v2812_v27 = vld [vmem:[%s3957_s1 + $0x488] ss:$16 sps:$4 sm:$0xff]   ;;  %v2817_v28 = vld [vmem:[%s3957_s1 + $0x4a4] ss:$16 sps:$4 sm:$0xff]  }
  0x5b   :  { %1856 = vmatpush1.bf16.msra.mxu0 %v2723_v31  ;;  %2061 = vmatpush1.bf16.msra.mxu1 %v2726_v32  ;;  %v2818_v31 = vld [vmem:[%s3957_s1 + $0x4a8] ss:$16 sps:$4 sm:$0xff]   ;;  %v2823_v32 = vld [vmem:[%s3957_s1 + $0x4c4] ss:$16 sps:$4 sm:$0xff]  }
  0x5c   :  { %1857 = vmatprep.subr.bf16.mxu0 %v2731_v33  ;;  %2062 = vmatprep.subr.bf16.mxu1 %v2734_v34  ;;  %v2826_v33 = vld [vmem:[%s3957_s1 + $0x4cc] ss:$16 sps:$4 sm:$0xff]   ;;  %v2821_v34 = vld [vmem:[%s3957_s1 + $0x4c0] ss:$16 sps:$4 sm:$0xff]  }
  0x5f   :  { %1858 = vmatpush1.bf16.msra.mxu0 %v2729_v35  ;;  %2063 = vmatpush1.bf16.msra.mxu1 %v2732_v36  ;;  %v2824_v35 = vld [vmem:[%s3957_s1 + $0x4c8] ss:$16 sps:$4 sm:$0xff]   ;;  %v2829_v36 = vld [vmem:[%s3957_s1 + $0x4e4] ss:$16 sps:$4 sm:$0xff]  }
  0x60   :  { %1859 = vmatprep.subr.bf16.mxu0 %v2737_v37  ;;  %2064 = vmatprep.subr.bf16.mxu1 %v2740_v38  ;;  %v2832_v37 = vld [vmem:[%s3957_s1 + $0x4ec] ss:$16 sps:$4 sm:$0xff]   ;;  %v2827_v38 = vld [vmem:[%s3957_s1 + $0x4e0] ss:$16 sps:$4 sm:$0xff]  }
  0x63   :  { %1860 = vmatpush1.bf16.msra.mxu0 %v2735_v39  ;;  %2065 = vmatpush1.bf16.msra.mxu1 %v2738_v40  ;;  %v2830_v39 = vld [vmem:[%s3957_s1 + $0x4e8] ss:$16 sps:$4 sm:$0xff]   ;;  %v2835_v40 = vld [vmem:[%s3957_s1 + $0x504] ss:$16 sps:$4 sm:$0xff]  }
  0x64   :  { %1861 = vmatprep.subr.bf16.mxu0 %v2743_v41  ;;  %2066 = vmatprep.subr.bf16.mxu1 %v2746_v42  ;;  %v2838_v41 = vld [vmem:[%s3957_s1 + $0x50c] ss:$16 sps:$4 sm:$0xff]   ;;  %v2833_v42 = vld [vmem:[%s3957_s1 + $0x500] ss:$16 sps:$4 sm:$0xff]  }
  0x67   :  { %1862 = vmatpush1.bf16.msra.mxu0 %v2741_v43  ;;  %2067 = vmatpush1.bf16.msra.mxu1 %v2744_v44  ;;  %v2836_v43 = vld [vmem:[%s3957_s1 + $0x508] ss:$16 sps:$4 sm:$0xff]   ;;  %v2841_v44 = vld [vmem:[%s3957_s1 + $0x524] ss:$16 sps:$4 sm:$0xff]  }
  0x68   :  { %1863 = vmatprep.subr.bf16.mxu0 %v2749_v45  ;;  %2068 = vmatprep.subr.bf16.mxu1 %v2752_v46  ;;  %v2844_v45 = vld [vmem:[%s3957_s1 + $0x52c] ss:$16 sps:$4 sm:$0xff]   ;;  %v2839_v46 = vld [vmem:[%s3957_s1 + $0x520] ss:$16 sps:$4 sm:$0xff]  }
  0x6b   :  { %1864 = vmatpush1.bf16.msra.mxu0 %v2747_v47  ;;  %2069 = vmatpush1.bf16.msra.mxu1 %v2750_v48  ;;  %v2842_v47 = vld [vmem:[%s3957_s1 + $0x528] ss:$16 sps:$4 sm:$0xff]   ;;  %v2847_v48 = vld [vmem:[%s3957_s1 + $0x544] ss:$16 sps:$4 sm:$0xff]  }
  0x6c   :  { %1865 = vmatprep.subr.bf16.mxu0 %v2755_v49  ;;  %2070 = vmatprep.subr.bf16.mxu1 %v2758_v50  ;;  %v2850_v49 = vld [vmem:[%s3957_s1 + $0x54c] ss:$16 sps:$4 sm:$0xff]   ;;  %v2845_v50 = vld [vmem:[%s3957_s1 + $0x540] ss:$16 sps:$4 sm:$0xff]  }
  0x6f   :  { %1866 = vmatpush1.bf16.msra.mxu0 %v2753_v51  ;;  %2071 = vmatpush1.bf16.msra.mxu1 %v2756_v52  ;;  %v2848_v51 = vld [vmem:[%s3957_s1 + $0x548] ss:$16 sps:$4 sm:$0xff]   ;;  %v2853_v52 = vld [vmem:[%s3957_s1 + $0x564] ss:$16 sps:$4 sm:$0xff]  }
  0x70   :  { %1867 = vmatprep.subr.bf16.mxu0 %v2761_v53  ;;  %2072 = vmatprep.subr.bf16.mxu1 %v2764_v54  ;;  %v2856_v53 = vld [vmem:[%s3957_s1 + $0x56c] ss:$16 sps:$4 sm:$0xff]   ;;  %v2851_v54 = vld [vmem:[%s3957_s1 + $0x560] ss:$16 sps:$4 sm:$0xff]  }
  0x73   :  { %1868 = vmatpush1.bf16.msra.mxu0 %v2759_v55  ;;  %2073 = vmatpush1.bf16.msra.mxu1 %v2762_v56  ;;  %v2854_v55 = vld [vmem:[%s3957_s1 + $0x568] ss:$16 sps:$4 sm:$0xff]   ;;  %v2859_v56 = vld [vmem:[%s3957_s1 + $0x584] ss:$16 sps:$4 sm:$0xff]  }
  0x74   :  { %1869 = vmatprep.subr.bf16.mxu0 %v2767_v57  ;;  %2074 = vmatprep.subr.bf16.mxu1 %v2770_v58  ;;  %v2862_v57 = vld [vmem:[%s3957_s1 + $0x58c] ss:$16 sps:$4 sm:$0xff]   ;;  %v2857_v58 = vld [vmem:[%s3957_s1 + $0x580] ss:$16 sps:$4 sm:$0xff]  }
  0x77   :  { %1870 = vmatpush1.bf16.msra.mxu0 %v2765_v59  ;;  %2075 = vmatpush1.bf16.msra.mxu1 %v2768_v60  ;;  %v2860_v59 = vld [vmem:[%s3957_s1 + $0x588] ss:$16 sps:$4 sm:$0xff]   ;;  %v2865_v60 = vld [vmem:[%s3957_s1 + $0x5a4] ss:$16 sps:$4 sm:$0xff]  }
  0x78   :  { %1871 = vmatprep.subr.bf16.mxu0 %v2773_v61  ;;  %2076 = vmatprep.subr.bf16.mxu1 %v2776_v62  ;;  %v2868_v61 = vld [vmem:[%s3957_s1 + $0x5ac] ss:$16 sps:$4 sm:$0xff]   ;;  %v2863_v62 = vld [vmem:[%s3957_s1 + $0x5a0] ss:$16 sps:$4 sm:$0xff]  }
  0x7b   :  { %1872 = vmatpush1.bf16.msra.mxu0 %v2771_v63  ;;  %2077 = vmatpush1.bf16.msra.mxu1 %v2774_v0  ;;  %v2866_v63 = vld [vmem:[%s3957_s1 + $0x5a8] ss:$16 sps:$4 sm:$0xff]   ;;  %v2871_v0 = vld [vmem:[%s3957_s1 + $0x5c4] ss:$16 sps:$4 sm:$0xff]  }
  0x7c   :  { %1873 = vmatprep.subr.bf16.mxu0 %v2779_v1  ;;  %2078 = vmatprep.subr.bf16.mxu1 %v2782_v2  ;;  %v2874_v1 = vld [vmem:[%s3957_s1 + $0x5cc] ss:$16 sps:$4 sm:$0xff]   ;;  %v2869_v2 = vld [vmem:[%s3957_s1 + $0x5c0] ss:$16 sps:$4 sm:$0xff]  }
  0x7f   :  { %1874 = vmatpush1.bf16.msra.mxu0 %v2777_v3  ;;  %2079 = vmatpush1.bf16.msra.mxu1 %v2780_v4  ;;  %v2872_v3 = vld [vmem:[%s3957_s1 + $0x5c8] ss:$16 sps:$4 sm:$0xff]   ;;  %v2877_v4 = vld [vmem:[%s3957_s1 + $0x5e4] ss:$16 sps:$4 sm:$0xff]  }
  0x80   :  { %1884 = vmatprep.subr.bf16.mxu0 %v2787_v5  ;;  %2089 = vmatprep.subr.bf16.mxu1 %v2790_v6  ;;  %v2880_v5 = vld [vmem:[%s3957_s1 + $0x5ec] ss:$16 sps:$4 sm:$0xff]   ;;  %v2875_v6 = vld [vmem:[%s3957_s1 + $0x5e0] ss:$16 sps:$4 sm:$0xff]  }
  0x82   :  { %1876 = vmatmul.mubr.bf16.vlgmr.msra.gmra.mrb[0].mxu0 %v2253_v7  ;;  %2081 = vmatmul.mubr.bf16.vlgmr.msra.gmra.mrb[0].mxu1 %v2253_v7  ;;  %v2878_v7 = vld [vmem:[%s3957_s1 + $0x5e8] ss:$16 sps:$4 sm:$0xff]  }
  0x83   :  { %1885 = vmatpush1.bf16.msra.mxu0 %v2785_v8  ;;  %2090 = vmatpush1.bf16.msra.mxu1 %v2788_v9  ;;  %v2885_v8 = vld [vmem:[%s3957_s1 + $0x604] ss:$16 sps:$4 sm:$0xff]   ;;  %v2888_v9 = vld [vmem:[%s3957_s1 + $0x60c] ss:$16 sps:$4 sm:$0xff]  }
  0x84   :  { %1886 = vmatprep.subr.bf16.mxu0 %v2793_v10  ;;  %2091 = vmatprep.subr.bf16.mxu1 %v2796_v12  ;;  %v2255_v10 = vcombine.low %v3465_v11, %v3465_v11  ;;  %v2883_v12 = vld [vmem:[%s3957_s1 + $0x600] ss:$16 sps:$4 sm:$0xff]   ;;  %v2891_v11 = vld [vmem:[%s3957_s1 + $0x624] ss:$16 sps:$4 sm:$0xff]  }
  0x85   :  { %1916 = vmatprep.mubr.bf16.mxu0 %v2256_v13  ;;  %2121 = vmatprep.mubr.bf16.mxu1 %v2256_v13  ;;  %v3660_v13 = vld [vmem:[%s3958_s0 + $0x18] sm:$0xff] }
  0x87   :  { %1887 = vmatpush1.bf16.msra.mxu0 %v2791_v14  ;;  %2092 = vmatpush1.bf16.msra.mxu1 %v2794_v15  ;;  %v2886_v14 = vld [vmem:[%s3957_s1 + $0x608] ss:$16 sps:$4 sm:$0xff]   ;;  %v2894_v15 = vld [vmem:[%s3957_s1 + $0x62c] ss:$16 sps:$4 sm:$0xff]  }
  0x88   :  { %1888 = vmatprep.subr.bf16.mxu0 %v2799_v16  ;;  %2093 = vmatprep.subr.bf16.mxu1 %v2802_v17  ;;  %v2258_v16 = vcombine.high %v3660_v13, %v3660_v13  ;;  %v2889_v17 = vld [vmem:[%s3957_s1 + $0x620] ss:$16 sps:$4 sm:$0xff]  }
  0x8b   :  { %1889 = vmatpush1.bf16.msra.mxu0 %v2797_v18  ;;  %2094 = vmatpush1.bf16.msra.mxu1 %v2800_v19  ;;  %v2892_v18 = vld [vmem:[%s3957_s1 + $0x628] ss:$16 sps:$4 sm:$0xff]   ;;  %v2897_v19 = vld [vmem:[%s3957_s1 + $0x644] ss:$16 sps:$4 sm:$0xff]  }
  0x8c   :  { %1890 = vmatprep.subr.bf16.mxu0 %v2805_v20  ;;  %2095 = vmatprep.subr.bf16.mxu1 %v2808_v21  ;;  %v2900_v20 = vld [vmem:[%s3957_s1 + $0x64c] ss:$16 sps:$4 sm:$0xff]   ;;  %v2895_v21 = vld [vmem:[%s3957_s1 + $0x640] ss:$16 sps:$4 sm:$0xff]  }
  0x8f   :  { %1891 = vmatpush1.bf16.msra.mxu0 %v2803_v22  ;;  %2096 = vmatpush1.bf16.msra.mxu1 %v2806_v23  ;;  %v2898_v22 = vld [vmem:[%s3957_s1 + $0x648] ss:$16 sps:$4 sm:$0xff]   ;;  %v2903_v23 = vld [vmem:[%s3957_s1 + $0x664] ss:$16 sps:$4 sm:$0xff]  }
  0x90   :  { %1892 = vmatprep.subr.bf16.mxu0 %v2811_v24  ;;  %2097 = vmatprep.subr.bf16.mxu1 %v2814_v25  ;;  %v2906_v24 = vld [vmem:[%s3957_s1 + $0x66c] ss:$16 sps:$4 sm:$0xff]   ;;  %v2901_v25 = vld [vmem:[%s3957_s1 + $0x660] ss:$16 sps:$4 sm:$0xff]  }
  0x93   :  { %1893 = vmatpush1.bf16.msra.mxu0 %v2809_v26  ;;  %2098 = vmatpush1.bf16.msra.mxu1 %v2812_v27  ;;  %v2904_v26 = vld [vmem:[%s3957_s1 + $0x668] ss:$16 sps:$4 sm:$0xff]   ;;  %v2909_v27 = vld [vmem:[%s3957_s1 + $0x684] ss:$16 sps:$4 sm:$0xff]  }
  0x94   :  { %1894 = vmatprep.subr.bf16.mxu0 %v2817_v28  ;;  %2099 = vmatprep.subr.bf16.mxu1 %v2820_v29  ;;  %v2912_v28 = vld [vmem:[%s3957_s1 + $0x68c] ss:$16 sps:$4 sm:$0xff]   ;;  %v2907_v29 = vld [vmem:[%s3957_s1 + $0x680] ss:$16 sps:$4 sm:$0xff]  }
  0x97   :  { %1895 = vmatpush1.bf16.msra.mxu0 %v2815_v30  ;;  %2100 = vmatpush1.bf16.msra.mxu1 %v2818_v31  ;;  %v2910_v30 = vld [vmem:[%s3957_s1 + $0x688] ss:$16 sps:$4 sm:$0xff]   ;;  %v2915_v31 = vld [vmem:[%s3957_s1 + $0x6a4] ss:$16 sps:$4 sm:$0xff]  }
  0x98   :  { %1896 = vmatprep.subr.bf16.mxu0 %v2823_v32  ;;  %2101 = vmatprep.subr.bf16.mxu1 %v2826_v33  ;;  %v2918_v32 = vld [vmem:[%s3957_s1 + $0x6ac] ss:$16 sps:$4 sm:$0xff]   ;;  %v2913_v33 = vld [vmem:[%s3957_s1 + $0x6a0] ss:$16 sps:$4 sm:$0xff]  }
  0x9b   :  { %1897 = vmatpush1.bf16.msra.mxu0 %v2821_v34  ;;  %2102 = vmatpush1.bf16.msra.mxu1 %v2824_v35  ;;  %v2916_v34 = vld [vmem:[%s3957_s1 + $0x6a8] ss:$16 sps:$4 sm:$0xff]   ;;  %v2921_v35 = vld [vmem:[%s3957_s1 + $0x6c4] ss:$16 sps:$4 sm:$0xff]  }
  0x9c   :  { %1898 = vmatprep.subr.bf16.mxu0 %v2829_v36  ;;  %2103 = vmatprep.subr.bf16.mxu1 %v2832_v37  ;;  %v2924_v36 = vld [vmem:[%s3957_s1 + $0x6cc] ss:$16 sps:$4 sm:$0xff]   ;;  %v2919_v37 = vld [vmem:[%s3957_s1 + $0x6c0] ss:$16 sps:$4 sm:$0xff]  }
  0x9f   :  { %1899 = vmatpush1.bf16.msra.mxu0 %v2827_v38  ;;  %2104 = vmatpush1.bf16.msra.mxu1 %v2830_v39  ;;  %v2922_v38 = vld [vmem:[%s3957_s1 + $0x6c8] ss:$16 sps:$4 sm:$0xff]   ;;  %v2927_v39 = vld [vmem:[%s3957_s1 + $0x6e4] ss:$16 sps:$4 sm:$0xff]  }
  0xa0   :  { %1900 = vmatprep.subr.bf16.mxu0 %v2835_v40  ;;  %2105 = vmatprep.subr.bf16.mxu1 %v2838_v41  ;;  %v2930_v40 = vld [vmem:[%s3957_s1 + $0x6ec] ss:$16 sps:$4 sm:$0xff]   ;;  %v2925_v41 = vld [vmem:[%s3957_s1 + $0x6e0] ss:$16 sps:$4 sm:$0xff]  }
  0xa3   :  { %1901 = vmatpush1.bf16.msra.mxu0 %v2833_v42  ;;  %2106 = vmatpush1.bf16.msra.mxu1 %v2836_v43  ;;  %v2928_v42 = vld [vmem:[%s3957_s1 + $0x6e8] ss:$16 sps:$4 sm:$0xff]   ;;  %v2933_v43 = vld [vmem:[%s3957_s1 + $0x704] ss:$16 sps:$4 sm:$0xff]  }
  0xa4   :  { %1902 = vmatprep.subr.bf16.mxu0 %v2841_v44  ;;  %2107 = vmatprep.subr.bf16.mxu1 %v2844_v45  ;;  %v2936_v44 = vld [vmem:[%s3957_s1 + $0x70c] ss:$16 sps:$4 sm:$0xff]   ;;  %v2931_v45 = vld [vmem:[%s3957_s1 + $0x700] ss:$16 sps:$4 sm:$0xff]  }
  0xa7   :  { %1903 = vmatpush1.bf16.msra.mxu0 %v2839_v46  ;;  %2108 = vmatpush1.bf16.msra.mxu1 %v2842_v47  ;;  %v2934_v46 = vld [vmem:[%s3957_s1 + $0x708] ss:$16 sps:$4 sm:$0xff]   ;;  %v2939_v47 = vld [vmem:[%s3957_s1 + $0x724] ss:$16 sps:$4 sm:$0xff]  }
  0xa8   :  { %1904 = vmatprep.subr.bf16.mxu0 %v2847_v48  ;;  %2109 = vmatprep.subr.bf16.mxu1 %v2850_v49  ;;  %v2942_v48 = vld [vmem:[%s3957_s1 + $0x72c] ss:$16 sps:$4 sm:$0xff]   ;;  %v2937_v49 = vld [vmem:[%s3957_s1 + $0x720] ss:$16 sps:$4 sm:$0xff]  }
  0xab   :  { %1905 = vmatpush1.bf16.msra.mxu0 %v2845_v50  ;;  %2110 = vmatpush1.bf16.msra.mxu1 %v2848_v51  ;;  %v2940_v50 = vld [vmem:[%s3957_s1 + $0x728] ss:$16 sps:$4 sm:$0xff]   ;;  %v2945_v51 = vld [vmem:[%s3957_s1 + $0x744] ss:$16 sps:$4 sm:$0xff]  }
  0xac   :  { %1906 = vmatprep.subr.bf16.mxu0 %v2853_v52  ;;  %2111 = vmatprep.subr.bf16.mxu1 %v2856_v53  ;;  %v2948_v52 = vld [vmem:[%s3957_s1 + $0x74c] ss:$16 sps:$4 sm:$0xff]   ;;  %v2943_v53 = vld [vmem:[%s3957_s1 + $0x740] ss:$16 sps:$4 sm:$0xff]  }
  0xaf   :  { %1907 = vmatpush1.bf16.msra.mxu0 %v2851_v54  ;;  %2112 = vmatpush1.bf16.msra.mxu1 %v2854_v55  ;;  %v2946_v54 = vld [vmem:[%s3957_s1 + $0x748] ss:$16 sps:$4 sm:$0xff]   ;;  %v2951_v55 = vld [vmem:[%s3957_s1 + $0x764] ss:$16 sps:$4 sm:$0xff]  }
  0xb0   :  { %1908 = vmatprep.subr.bf16.mxu0 %v2859_v56  ;;  %2113 = vmatprep.subr.bf16.mxu1 %v2862_v57  ;;  %v2954_v56 = vld [vmem:[%s3957_s1 + $0x76c] ss:$16 sps:$4 sm:$0xff]   ;;  %v2949_v57 = vld [vmem:[%s3957_s1 + $0x760] ss:$16 sps:$4 sm:$0xff]  }
  0xb3   :  { %1909 = vmatpush1.bf16.msra.mxu0 %v2857_v58  ;;  %2114 = vmatpush1.bf16.msra.mxu1 %v2860_v59  ;;  %v2952_v58 = vld [vmem:[%s3957_s1 + $0x768] ss:$16 sps:$4 sm:$0xff]   ;;  %v2957_v59 = vld [vmem:[%s3957_s1 + $0x784] ss:$16 sps:$4 sm:$0xff]  }
  0xb4   :  { %1910 = vmatprep.subr.bf16.mxu0 %v2865_v60  ;;  %2115 = vmatprep.subr.bf16.mxu1 %v2868_v61  ;;  %v2960_v60 = vld [vmem:[%s3957_s1 + $0x78c] ss:$16 sps:$4 sm:$0xff]   ;;  %v2955_v61 = vld [vmem:[%s3957_s1 + $0x780] ss:$16 sps:$4 sm:$0xff]  }
  0xb7   :  { %1911 = vmatpush1.bf16.msra.mxu0 %v2863_v62  ;;  %2116 = vmatpush1.bf16.msra.mxu1 %v2866_v63  ;;  %v2958_v62 = vld [vmem:[%s3957_s1 + $0x788] ss:$16 sps:$4 sm:$0xff]   ;;  %v2963_v63 = vld [vmem:[%s3957_s1 + $0x7a4] ss:$16 sps:$4 sm:$0xff]  }
  0xb8   :  { %1912 = vmatprep.subr.bf16.mxu0 %v2871_v0  ;;  %2117 = vmatprep.subr.bf16.mxu1 %v2874_v1  ;;  %v2966_v0 = vld [vmem:[%s3957_s1 + $0x7ac] ss:$16 sps:$4 sm:$0xff]   ;;  %v2961_v1 = vld [vmem:[%s3957_s1 + $0x7a0] ss:$16 sps:$4 sm:$0xff]  }
  0xbb   :  { %1913 = vmatpush1.bf16.msra.mxu0 %v2869_v2  ;;  %2118 = vmatpush1.bf16.msra.mxu1 %v2872_v3  ;;  %v2964_v2 = vld [vmem:[%s3957_s1 + $0x7a8] ss:$16 sps:$4 sm:$0xff]   ;;  %v2969_v3 = vld [vmem:[%s3957_s1 + $0x7c4] ss:$16 sps:$4 sm:$0xff]  }
  0xbc   :  { %1914 = vmatprep.subr.bf16.mxu0 %v2877_v4  ;;  %2119 = vmatprep.subr.bf16.mxu1 %v2880_v5  ;;  %v2972_v4 = vld [vmem:[%s3957_s1 + $0x7cc] ss:$16 sps:$4 sm:$0xff]   ;;  %v2967_v5 = vld [vmem:[%s3957_s1 + $0x7c0] ss:$16 sps:$4 sm:$0xff]  }
  0xbf   :  { %1915 = vmatpush1.bf16.msra.mxu0 %v2875_v6  ;;  %2120 = vmatpush1.bf16.msra.mxu1 %v2878_v7  ;;  %v2970_v6 = vld [vmem:[%s3957_s1 + $0x7c8] ss:$16 sps:$4 sm:$0xff]   ;;  %v2975_v7 = vld [vmem:[%s3957_s1 + $0x7e4] ss:$16 sps:$4 sm:$0xff]  }
  0xc0   :  { %1925 = vmatprep.subr.bf16.mxu0 %v2885_v8  ;;  %2130 = vmatprep.subr.bf16.mxu1 %v2888_v9  ;;  %v2978_v8 = vld [vmem:[%s3957_s1 + $0x7ec] ss:$16 sps:$4 sm:$0xff]   ;;  %v2973_v9 = vld [vmem:[%s3957_s1 + $0x7e0] ss:$16 sps:$4 sm:$0xff]  }
  0xc2   :  { %1917 = vmatmul.mubr.bf16.vlgmr.msra.gmra.mrb[0].mxu0 %v2255_v10  ;;  %2122 = vmatmul.mubr.bf16.vlgmr.msra.gmra.mrb[0].mxu1 %v2255_v10  ;;  %v2976_v10 = vld [vmem:[%s3957_s1 + $0x7e8] ss:$16 sps:$4 sm:$0xff]  }
  0xc3   :  { %1926 = vmatpush1.bf16.msra.mxu0 %v2883_v12  ;;  %2131 = vmatpush1.bf16.msra.mxu1 %v2886_v14  ;;  %v2983_v12 = vld [vmem:[%s3957_s1 + $0x804] ss:$16 sps:$4 sm:$0xff]   ;;  %v2986_v14 = vld [vmem:[%s3957_s1 + $0x80c] ss:$16 sps:$4 sm:$0xff]  }
  0xc4   :  { %1927 = vmatprep.subr.bf16.mxu0 %v2891_v11  ;;  %2132 = vmatprep.subr.bf16.mxu1 %v2894_v15  ;;  %v2257_v11 = vcombine.low %v3660_v13, %v3660_v13  ;;  %v2981_v15 = vld [vmem:[%s3957_s1 + $0x800] ss:$16 sps:$4 sm:$0xff]   ;;  %v2992_v13 = vld [vmem:[%s3957_s1 + $0x82c] ss:$16 sps:$4 sm:$0xff]  }
  0xc5   :  { %1957 = vmatprep.mubr.bf16.mxu0 %v2258_v16  ;;  %2162 = vmatprep.mubr.bf16.mxu1 %v2258_v16  ;;  %v2984_v16 = vld [vmem:[%s3957_s1 + $0x808] ss:$16 sps:$4 sm:$0xff]  }
  0xc7   :  { %1928 = vmatpush1.bf16.msra.mxu0 %v2889_v17  ;;  %2133 = vmatpush1.bf16.msra.mxu1 %v2892_v18  ;;  %v2989_v17 = vld [vmem:[%s3957_s1 + $0x824] ss:$16 sps:$4 sm:$0xff]   ;;  %v2987_v18 = vld [vmem:[%s3957_s1 + $0x820] ss:$16 sps:$4 sm:$0xff]  }
  0xc8   :  { %1929 = vmatprep.subr.bf16.mxu0 %v2897_v19  ;;  %2134 = vmatprep.subr.bf16.mxu1 %v2900_v20  ;;  %v2990_v19 = vld [vmem:[%s3957_s1 + $0x828] ss:$16 sps:$4 sm:$0xff]   ;;  %v2995_v20 = vld [vmem:[%s3957_s1 + $0x844] ss:$16 sps:$4 sm:$0xff]  }
  0xcb   :  { %1930 = vmatpush1.bf16.msra.mxu0 %v2895_v21  ;;  %2135 = vmatpush1.bf16.msra.mxu1 %v2898_v22  ;;  %v2998_v21 = vld [vmem:[%s3957_s1 + $0x84c] ss:$16 sps:$4 sm:$0xff]   ;;  %v3030_v22 = vmov 0  }
  0xcc   :  { %1931 = vmatprep.subr.bf16.mxu0 %v2903_v23  ;;  %2136 = vmatprep.subr.bf16.mxu1 %v2906_v24  ;;  %v2993_v23 = vld [vmem:[%s3957_s1 + $0x840] ss:$16 sps:$4 sm:$0xff]   ;;  %v2996_v24 = vld [vmem:[%s3957_s1 + $0x848] ss:$16 sps:$4 sm:$0xff]  }
  0xcf   :  { %1932 = vmatpush1.bf16.msra.mxu0 %v2901_v25  ;;  %2137 = vmatpush1.bf16.msra.mxu1 %v2904_v26  ;;  %v3001_v25 = vld [vmem:[%s3957_s1 + $0x864] ss:$16 sps:$4 sm:$0xff]   ;;  %v3004_v26 = vld [vmem:[%s3957_s1 + $0x86c] ss:$16 sps:$4 sm:$0xff]  }
  0xd0   :  { %1933 = vmatprep.subr.bf16.mxu0 %v2909_v27  ;;  %2138 = vmatprep.subr.bf16.mxu1 %v2912_v28  ;;  %v2999_v27 = vld [vmem:[%s3957_s1 + $0x860] ss:$16 sps:$4 sm:$0xff]   ;;  %v3002_v28 = vld [vmem:[%s3957_s1 + $0x868] ss:$16 sps:$4 sm:$0xff]  }
  0xd3   :  { %1934 = vmatpush1.bf16.msra.mxu0 %v2907_v29  ;;  %2139 = vmatpush1.bf16.msra.mxu1 %v2910_v30  ;;  %v3007_v29 = vld [vmem:[%s3957_s1 + $0x884] ss:$16 sps:$4 sm:$0xff]   ;;  %v3010_v30 = vld [vmem:[%s3957_s1 + $0x88c] ss:$16 sps:$4 sm:$0xff]  }
  0xd4   :  { %1935 = vmatprep.subr.bf16.mxu0 %v2915_v31  ;;  %2140 = vmatprep.subr.bf16.mxu1 %v2918_v32  ;;  %v3005_v31 = vld [vmem:[%s3957_s1 + $0x880] ss:$16 sps:$4 sm:$0xff]   ;;  %v3008_v32 = vld [vmem:[%s3957_s1 + $0x888] ss:$16 sps:$4 sm:$0xff]  }
  0xd7   :  { %1936 = vmatpush1.bf16.msra.mxu0 %v2913_v33  ;;  %2141 = vmatpush1.bf16.msra.mxu1 %v2916_v34  ;;  %v3013_v33 = vld [vmem:[%s3957_s1 + $0x8a4] ss:$16 sps:$4 sm:$0xff]   ;;  %v3016_v34 = vld [vmem:[%s3957_s1 + $0x8ac] ss:$16 sps:$4 sm:$0xff]  }
  0xd8   :  { %1937 = vmatprep.subr.bf16.mxu0 %v2921_v35  ;;  %2142 = vmatprep.subr.bf16.mxu1 %v2924_v36  ;;  %v3011_v35 = vld [vmem:[%s3957_s1 + $0x8a0] ss:$16 sps:$4 sm:$0xff]   ;;  %v3014_v36 = vld [vmem:[%s3957_s1 + $0x8a8] ss:$16 sps:$4 sm:$0xff]  }
  0xdb   :  { %1938 = vmatpush1.bf16.msra.mxu0 %v2919_v37  ;;  %2143 = vmatpush1.bf16.msra.mxu1 %v2922_v38  ;;  %v3019_v37 = vld [vmem:[%s3957_s1 + $0x8c4] ss:$16 sps:$4 sm:$0xff]   ;;  %v3022_v38 = vld [vmem:[%s3957_s1 + $0x8cc] ss:$16 sps:$4 sm:$0xff]  }
  0xdc   :  { %1939 = vmatprep.subr.bf16.mxu0 %v2927_v39  ;;  %2144 = vmatprep.subr.bf16.mxu1 %v2930_v40  ;;  %v3017_v39 = vld [vmem:[%s3957_s1 + $0x8c0] ss:$16 sps:$4 sm:$0xff]   ;;  %v3020_v40 = vld [vmem:[%s3957_s1 + $0x8c8] ss:$16 sps:$4 sm:$0xff]  }
  0xdf   :  { %1940 = vmatpush1.bf16.msra.mxu0 %v2925_v41  ;;  %2145 = vmatpush1.bf16.msra.mxu1 %v2928_v42  ;;  %v3025_v41 = vld [vmem:[%s3957_s1 + $0x8e4] ss:$16 sps:$4 sm:$0xff]   ;;  %v3028_v42 = vld [vmem:[%s3957_s1 + $0x8ec] ss:$16 sps:$4 sm:$0xff]  }
  0xe0   :  { %1941 = vmatprep.subr.bf16.mxu0 %v2933_v43  ;;  %2146 = vmatprep.subr.bf16.mxu1 %v2936_v44  ;;  %v3023_v43 = vld [vmem:[%s3957_s1 + $0x8e0] ss:$16 sps:$4 sm:$0xff]   ;;  %v3026_v44 = vld [vmem:[%s3957_s1 + $0x8e8] ss:$16 sps:$4 sm:$0xff]  }
  0xe3   :  { %1942 = vmatpush1.bf16.msra.mxu0 %v2931_v45  ;;  %2147 = vmatpush1.bf16.msra.mxu1 %v2934_v46  ;;  %v3029_v45 = vld [vmem:[%s3958_s0 + $0x20] ss:$0 sps:$4 sm:$0xff]   ;;  %v310_v46 = vlaneseq }
  0xe4   :  { %1943 = vmatprep.subr.bf16.mxu0 %v2939_v47  ;;  %2148 = vmatprep.subr.bf16.mxu1 %v2942_v48 }
  0xe5   :  { %v311_v47 = vshrl.u32 %v310_v46, 7 }
  0xe7   :  { %1944 = vmatpush1.bf16.msra.mxu0 %v2937_v49  ;;  %2149 = vmatpush1.bf16.msra.mxu1 %v2940_v50  ;;  %v312_v48 = vsub.s32 0, %v311_v47  ;;  %v320_v49 = vsub.s32 2, %v311_v47  ;;  %v308_v50 = vld [vmem:[%s3959_s2] sm:$0xf] }
  0xe8   :  { %1945 = vmatprep.subr.bf16.mxu0 %v2945_v51  ;;  %2150 = vmatprep.subr.bf16.mxu1 %v2948_v52  ;;  %v316_v51 = vsub.s32 1, %v311_v47  ;;  %v324_v52 = vsub.s32 3, %v311_v47 }
  0xeb   :  { %1946 = vmatpush1.bf16.msra.mxu0 %v2943_v53  ;;  %2151 = vmatpush1.bf16.msra.mxu1 %v2946_v54  ;;  %v313_v53 = vrot.slane %v308_v50, %v312_v48  ;;  %v321_v54 = vrot.slane %v308_v50, %v320_v49 }
  0xec   :  { %1947 = vmatprep.subr.bf16.mxu0 %v2951_v55  ;;  %2152 = vmatprep.subr.bf16.mxu1 %v2954_v56  ;;  %v317_v55 = vrot.slane %v308_v50, %v316_v51  ;;  %v325_v56 = vrot.slane %v308_v50, %v324_v52 }
  0xef   :  { %1948 = vmatpush1.bf16.msra.mxu0 %v2949_v57  ;;  %2153 = vmatpush1.bf16.msra.mxu1 %v2952_v58 }
  0xf0   :  { %1949 = vmatprep.subr.bf16.mxu0 %v2957_v59  ;;  %2154 = vmatprep.subr.bf16.mxu1 %v2960_v60 }
  0xf3   :  { %1950 = vmatpush1.bf16.msra.mxu0 %v2955_v61  ;;  %2155 = vmatpush1.bf16.msra.mxu1 %v2958_v62 }
  0xf4   :  { %1951 = vmatprep.subr.bf16.mxu0 %v2963_v63  ;;  %2156 = vmatprep.subr.bf16.mxu1 %v2966_v0 }
  0xf7   :  { %1952 = vmatpush1.bf16.msra.mxu0 %v2961_v1  ;;  %2157 = vmatpush1.bf16.msra.mxu1 %v2964_v2 }
  0xf8   :  { %1953 = vmatprep.subr.bf16.mxu0 %v2969_v3  ;;  %2158 = vmatprep.subr.bf16.mxu1 %v2972_v4 }
  0xfb   :  { %1954 = vmatpush1.bf16.msra.mxu0 %v2967_v5  ;;  %2159 = vmatpush1.bf16.msra.mxu1 %v2970_v6 }
  0xfc   :  { %1955 = vmatprep.subr.bf16.mxu0 %v2975_v7  ;;  %2160 = vmatprep.subr.bf16.mxu1 %v2978_v8 }
  0xff   :  { %1956 = vmatpush1.bf16.msra.mxu0 %v2973_v9  ;;  %2161 = vmatpush1.bf16.msra.mxu1 %v2976_v10 }
 0x100   :  { %1966 = vmatprep.subr.bf16.mxu0 %v2983_v12  ;;  %2171 = vmatprep.subr.bf16.mxu1 %v2986_v14 }
 0x102   :  { %1958 = vmatmul.mubr.bf16.vlgmr.msra.gmra.mrb[0].mxu0 %v2257_v11  ;;  %2163 = vmatmul.mubr.bf16.vlgmr.msra.gmra.mrb[0].mxu1 %v2257_v11 }
 0x103   :  { %1967 = vmatpush1.bf16.msra.mxu0 %v2981_v15  ;;  %2172 = vmatpush1.bf16.msra.mxu1 %v2984_v16 }
 0x104   :  { %1968 = vmatprep.subr.bf16.mxu0 %v2989_v17  ;;  %2173 = vmatprep.subr.bf16.mxu1 %v2992_v13 }
 0x105   :  { %1998 = vmatprep.mubr.bf16.mxu0 %v3030_v22  ;;  %2203 = vmatprep.mubr.bf16.mxu1 %v3030_v22 }
 0x107   :  { %1969 = vmatpush1.bf16.msra.mxu0 %v2987_v18  ;;  %2174 = vmatpush1.bf16.msra.mxu1 %v2990_v19 }
 0x108   :  { %1970 = vmatprep.subr.bf16.mxu0 %v2995_v20  ;;  %2175 = vmatprep.subr.bf16.mxu1 %v2998_v21 }
 0x10b   :  { %1971 = vmatpush1.bf16.msra.mxu0 %v2993_v23  ;;  %2176 = vmatpush1.bf16.msra.mxu1 %v2996_v24 }
 0x10c   :  { %1972 = vmatprep.subr.bf16.mxu0 %v3001_v25  ;;  %2177 = vmatprep.subr.bf16.mxu1 %v3004_v26 }
 0x10f   :  { %1973 = vmatpush1.bf16.msra.mxu0 %v2999_v27  ;;  %2178 = vmatpush1.bf16.msra.mxu1 %v3002_v28 }
 0x110   :  { %1974 = vmatprep.subr.bf16.mxu0 %v3007_v29  ;;  %2179 = vmatprep.subr.bf16.mxu1 %v3010_v30 }
 0x113   :  { %1975 = vmatpush1.bf16.msra.mxu0 %v3005_v31  ;;  %2180 = vmatpush1.bf16.msra.mxu1 %v3008_v32 }
 0x114   :  { %1976 = vmatprep.subr.bf16.mxu0 %v3013_v33  ;;  %2181 = vmatprep.subr.bf16.mxu1 %v3016_v34 }
 0x117   :  { %1977 = vmatpush1.bf16.msra.mxu0 %v3011_v35  ;;  %2182 = vmatpush1.bf16.msra.mxu1 %v3014_v36 }
 0x118   :  { %1978 = vmatprep.subr.bf16.mxu0 %v3019_v37  ;;  %2183 = vmatprep.subr.bf16.mxu1 %v3022_v38 }
 0x11b   :  { %1979 = vmatpush1.bf16.msra.mxu0 %v3017_v39  ;;  %2184 = vmatpush1.bf16.msra.mxu1 %v3020_v40 }
 0x11c   :  { %1980 = vmatprep.subr.bf16.mxu0 %v3025_v41  ;;  %2185 = vmatprep.subr.bf16.mxu1 %v3028_v42 }
 0x11f   :  { %1981 = vmatpush1.bf16.msra.mxu0 %v3023_v43  ;;  %2186 = vmatpush1.bf16.msra.mxu1 %v3026_v44 }
 0x122   :  { %1999 = vmatmul.mubr.bf16.vlgmr.msra.gmra.mrb[0].mxu0 %v3029_v45  ;;  %2204 = vmatmul.mubr.bf16.vlgmr.msra.gmra.mrb[0].mxu1 %v3029_v45 }
 0x1f5   :  { %v2000_v57 = vpop.f32.mrb[0].mxu0  ;;  %v2205_v58 = vpop.f32.mrb[0].mxu1 }
 0x1f6   :  { %v2552_v59 = vadd.f32 %v2000_v57, %v313_v53  ;;  %v2554_v60 = vadd.f32 %v2205_v58, %v321_v54  ;;  %v2002_v61 = vpop.f32.mrb[1].mxu0  ;;  %v2207_v62 = vpop.f32.mrb[1].mxu1 }
 0x1f7   :  { %v2553_v63 = vadd.f32 %v2002_v61, %v317_v55  ;;  %v2555_v0 = vadd.f32 %v2207_v62, %v325_v56  ;;  %v2004_v1 = vpop.f32.mrb[2].mxu0  ;;  %v2209_v2 = vpop.f32.mrb[2].mxu1 }
 0x1f8   :  { %v2221_v3 = vmax.f32 %v2552_v59, 0.0  ;;  %v2005_v4 = vpop.f32.mrb[3].mxu0  ;;  %v2210_v5 = vpop.f32.mrb[3].mxu1 }
 0x1f9   :  { %v2222_v6 = vmax.f32 %v2553_v63, 0.0  ;;  %v2551_v7 = vpack.c.bf16 %v2555_v0, %v2554_v60 }
 0x1fb   :  { %v2550_v8 = vpack.c.bf16 %v2222_v6, %v2221_v3  ;;  %2246 = vst [vmem:[%s3960_s3 + $0x8] sm:$0xff] %v2551_v7 }
 0x1fd   :  { %2245 = vst [vmem:[%s3960_s3] sm:$0xff] %v2550_v8 }

// kernel: _lambda_.23
= control target key start
LH: loop header
LB: loop body
LE: loop exit
PB: predicated region body
PF: predicated region fallthrough
CT: control target
= control target key end

     0   :  { %s3943_s1 = inlined_call_operand.vmem [shape: bf16[2304,256], index: 1, kind: input, shape index: {}]   ;;  %s3944_s0 = inlined_call_operand.vmem [shape: bf16[8,2304], index: 0, kind: input, shape index: {}]   ;;  %s3945_s2 = inlined_call_operand.vmem [shape: f32[1,256], index: 2, kind: input, shape index: {}]   ;;  %s3946_s3 = inlined_call_operand.vmem [shape: bf16[8,256], index: 3, kind: input, shape index: {}]   ;;  %s3947_s4 = inlined_call_operand.vmem [shape: bf16[8,256], index: 4, kind: output, shape index: {}]  }
   0x1   :  { %v2526_v0 = vld [vmem:[%s3943_s1 + $0x4] ss:$8 sps:$4 sm:$0xff]   ;;  %v2528_v1 = vld [vmem:[%s3943_s1] ss:$8 sps:$4 sm:$0xff]   ;;  %v2532_v4 = vld [vmem:[%s3943_s1 + $0x14] ss:$8 sps:$4 sm:$0xff]  }
   0x2   :  { %1829 = vmatprep.subr.bf16.mxu0 %v2526_v0  ;;  %v2529_v2 = vld [vmem:[%s3943_s1 + $0x104] ss:$8 sps:$4 sm:$0xff]   ;;  %v2531_v3 = vld [vmem:[%s3943_s1 + $0x100] ss:$8 sps:$4 sm:$0xff]   ;;  %v2534_v5 = vld [vmem:[%s3943_s1 + $0x10] ss:$8 sps:$4 sm:$0xff]  }
   0x3   :  { %1830 = vmatpush1.bf16.msra.mxu0 %v2528_v1  ;;  %1870 = vmatprep.subr.bf16.mxu1 %v2529_v2  ;;  %v2535_v6 = vld [vmem:[%s3943_s1 + $0x114] ss:$8 sps:$4 sm:$0xff]   ;;  %v2537_v7 = vld [vmem:[%s3943_s1 + $0x110] ss:$8 sps:$4 sm:$0xff]   ;;  %v2538_v8 = vld [vmem:[%s3943_s1 + $0x24] ss:$8 sps:$4 sm:$0xff]  }
   0x4   :  { %1871 = vmatpush1.bf16.msra.mxu1 %v2531_v3  ;;  %1831 = vmatprep.subr.bf16.mxu0 %v2532_v4  ;;  %v2540_v9 = vld [vmem:[%s3943_s1 + $0x20] ss:$8 sps:$4 sm:$0xff]   ;;  %v2541_v10 = vld [vmem:[%s3943_s1 + $0x124] ss:$8 sps:$4 sm:$0xff]   ;;  %v2544_v11 = vld [vmem:[%s3943_s1 + $0x34] ss:$8 sps:$4 sm:$0xff]  }
   0x5   :  { %1872 = vmatprep.subr.bf16.mxu1 %v2535_v6  ;;  %v2543_v12 = vld [vmem:[%s3943_s1 + $0x120] ss:$8 sps:$4 sm:$0xff]   ;;  %v2547_v13 = vld [vmem:[%s3943_s1 + $0x134] ss:$8 sps:$4 sm:$0xff]   ;;  %v2546_v14 = vld [vmem:[%s3943_s1 + $0x30] ss:$8 sps:$4 sm:$0xff]  }
   0x6   :  { %v2550_v15 = vld [vmem:[%s3943_s1 + $0x44] ss:$8 sps:$4 sm:$0xff]   ;;  %v2549_v16 = vld [vmem:[%s3943_s1 + $0x130] ss:$8 sps:$4 sm:$0xff]   ;;  %v2552_v18 = vld [vmem:[%s3943_s1 + $0x40] ss:$8 sps:$4 sm:$0xff]  }
   0x7   :  { %1832 = vmatpush1.bf16.msra.mxu0 %v2534_v5  ;;  %v2553_v17 = vld [vmem:[%s3943_s1 + $0x144] ss:$8 sps:$4 sm:$0xff]   ;;  %v2556_v19 = vld [vmem:[%s3943_s1 + $0x54] ss:$8 sps:$4 sm:$0xff]   ;;  %v2555_v20 = vld [vmem:[%s3943_s1 + $0x140] ss:$8 sps:$4 sm:$0xff]  }
   0x8   :  { %1833 = vmatprep.subr.bf16.mxu0 %v2538_v8  ;;  %1873 = vmatpush1.bf16.msra.mxu1 %v2537_v7  ;;  %v2559_v21 = vld [vmem:[%s3943_s1 + $0x154] ss:$8 sps:$4 sm:$0xff]   ;;  %v2558_v22 = vld [vmem:[%s3943_s1 + $0x50] ss:$8 sps:$4 sm:$0xff]   ;;  %v2562_v23 = vld [vmem:[%s3943_s1 + $0x64] ss:$8 sps:$4 sm:$0xff]  }
   0x9   :  { %1874 = vmatprep.subr.bf16.mxu1 %v2541_v10  ;;  %v2561_v24 = vld [vmem:[%s3943_s1 + $0x150] ss:$8 sps:$4 sm:$0xff]   ;;  %v2565_v25 = vld [vmem:[%s3943_s1 + $0x164] ss:$8 sps:$4 sm:$0xff]   ;;  %v2564_v26 = vld [vmem:[%s3943_s1 + $0x60] ss:$8 sps:$4 sm:$0xff]  }
   0xa   :  { %v2568_v27 = vld [vmem:[%s3943_s1 + $0x74] ss:$8 sps:$4 sm:$0xff]   ;;  %v2567_v28 = vld [vmem:[%s3943_s1 + $0x160] ss:$8 sps:$4 sm:$0xff]   ;;  %v2570_v30 = vld [vmem:[%s3943_s1 + $0x70] ss:$8 sps:$4 sm:$0xff]  }
   0xb   :  { %1834 = vmatpush1.bf16.msra.mxu0 %v2540_v9  ;;  %v2571_v29 = vld [vmem:[%s3943_s1 + $0x174] ss:$8 sps:$4 sm:$0xff]   ;;  %v2574_v31 = vld [vmem:[%s3943_s1 + $0x84] ss:$8 sps:$4 sm:$0xff]   ;;  %v2573_v32 = vld [vmem:[%s3943_s1 + $0x170] ss:$8 sps:$4 sm:$0xff]  }
   0xc   :  { %1835 = vmatprep.subr.bf16.mxu0 %v2544_v11  ;;  %1875 = vmatpush1.bf16.msra.mxu1 %v2543_v12  ;;  %v2577_v33 = vld [vmem:[%s3943_s1 + $0x184] ss:$8 sps:$4 sm:$0xff]   ;;  %v2576_v34 = vld [vmem:[%s3943_s1 + $0x80] ss:$8 sps:$4 sm:$0xff]   ;;  %v2580_v35 = vld [vmem:[%s3943_s1 + $0x94] ss:$8 sps:$4 sm:$0xff]  }
   0xd   :  { %1876 = vmatprep.subr.bf16.mxu1 %v2547_v13  ;;  %v2579_v36 = vld [vmem:[%s3943_s1 + $0x180] ss:$8 sps:$4 sm:$0xff]   ;;  %v2583_v37 = vld [vmem:[%s3943_s1 + $0x194] ss:$8 sps:$4 sm:$0xff]   ;;  %v2582_v38 = vld [vmem:[%s3943_s1 + $0x90] ss:$8 sps:$4 sm:$0xff]  }
   0xe   :  { %v2586_v39 = vld [vmem:[%s3943_s1 + $0xa4] ss:$8 sps:$4 sm:$0xff]   ;;  %v2585_v40 = vld [vmem:[%s3943_s1 + $0x190] ss:$8 sps:$4 sm:$0xff]   ;;  %v2588_v42 = vld [vmem:[%s3943_s1 + $0xa0] ss:$8 sps:$4 sm:$0xff]  }
   0xf   :  { %1836 = vmatpush1.bf16.msra.mxu0 %v2546_v14  ;;  %v2589_v41 = vld [vmem:[%s3943_s1 + $0x1a4] ss:$8 sps:$4 sm:$0xff]   ;;  %v2592_v43 = vld [vmem:[%s3943_s1 + $0xb4] ss:$8 sps:$4 sm:$0xff]   ;;  %v2591_v44 = vld [vmem:[%s3943_s1 + $0x1a0] ss:$8 sps:$4 sm:$0xff]  }
  0x10   :  { %1837 = vmatprep.subr.bf16.mxu0 %v2550_v15  ;;  %1877 = vmatpush1.bf16.msra.mxu1 %v2549_v16  ;;  %v2595_v45 = vld [vmem:[%s3943_s1 + $0x1b4] ss:$8 sps:$4 sm:$0xff]   ;;  %v17_v46 = vld [vmem:[%s3944_s0] sm:$0xff]  ;;  %v2594_v47 = vld [vmem:[%s3943_s1 + $0xb0] ss:$8 sps:$4 sm:$0xff]  }
  0x11   :  { %1878 = vmatprep.subr.bf16.mxu1 %v2553_v17  ;;  %v2219_v48 = vcombine.high %v17_v46, %v17_v46  ;;  %v2598_v49 = vld [vmem:[%s3943_s1 + $0xc4] ss:$8 sps:$4 sm:$0xff]   ;;  %v2597_v51 = vld [vmem:[%s3943_s1 + $0x1b0] ss:$8 sps:$4 sm:$0xff]   ;;  %v2600_v54 = vld [vmem:[%s3943_s1 + $0xc0] ss:$8 sps:$4 sm:$0xff]   ;;  %v2218_v5 = vcombine.low %v17_v46, %v17_v46 }
  0x12   :  { %v18_v50 = vld [vmem:[%s3944_s0 + $0x8] sm:$0xff]  ;;  %v2604_v55 = vld [vmem:[%s3943_s1 + $0xd4] ss:$8 sps:$4 sm:$0xff]   ;;  %v2606_v58 = vld [vmem:[%s3943_s1 + $0xd0] ss:$8 sps:$4 sm:$0xff]  }
  0x13   :  { %1838 = vmatpush1.bf16.msra.mxu0 %v2552_v18  ;;  %1861 = vmatprep.mubr.bf16.mxu0 %v2219_v48  ;;  %v2221_v52 = vcombine.high %v18_v50, %v18_v50  ;;  %v2601_v53 = vld [vmem:[%s3943_s1 + $0x1c4] ss:$8 sps:$4 sm:$0xff]   ;;  %v2603_v56 = vld [vmem:[%s3943_s1 + $0x1c0] ss:$8 sps:$4 sm:$0xff]   ;;  %v2607_v57 = vld [vmem:[%s3943_s1 + $0x1d4] ss:$8 sps:$4 sm:$0xff]   ;;  %v2220_v8 = vcombine.low %v18_v50, %v18_v50 }
  0x14   :  { %1839 = vmatprep.subr.bf16.mxu0 %v2556_v19  ;;  %1879 = vmatpush1.bf16.msra.mxu1 %v2555_v20  ;;  %v2610_v59 = vld [vmem:[%s3943_s1 + $0xe4] ss:$8 sps:$4 sm:$0xff]   ;;  %v2609_v60 = vld [vmem:[%s3943_s1 + $0x1d0] ss:$8 sps:$4 sm:$0xff]   ;;  %v2612_v62 = vld [vmem:[%s3943_s1 + $0xe0] ss:$8 sps:$4 sm:$0xff]  }
  0x15   :  { %1880 = vmatprep.subr.bf16.mxu1 %v2559_v21  ;;  %1902 = vmatprep.mubr.bf16.mxu1 %v2221_v52  ;;  %v2613_v61 = vld [vmem:[%s3943_s1 + $0x1e4] ss:$8 sps:$4 sm:$0xff]   ;;  %v2616_v63 = vld [vmem:[%s3943_s1 + $0xf4] ss:$8 sps:$4 sm:$0xff]   ;;  %v2615_v0 = vld [vmem:[%s3943_s1 + $0x1e0] ss:$8 sps:$4 sm:$0xff]  }
  0x16   :  { %v2619_v1 = vld [vmem:[%s3943_s1 + $0x1f4] ss:$8 sps:$4 sm:$0xff]   ;;  %v2618_v2 = vld [vmem:[%s3943_s1 + $0xf0] ss:$8 sps:$4 sm:$0xff]   ;;  %v2626_v3 = vld [vmem:[%s3943_s1 + $0x204] ss:$8 sps:$4 sm:$0xff]  }
  0x17   :  { %1840 = vmatpush1.bf16.msra.mxu0 %v2558_v22  ;;  %v2623_v4 = vld [vmem:[%s3943_s1 + $0x1f0] ss:$8 sps:$4 sm:$0xff]   ;;  %v2631_v6 = vld [vmem:[%s3943_s1 + $0x304] ss:$8 sps:$4 sm:$0xff]   ;;  %v2624_v7 = vld [vmem:[%s3943_s1 + $0x200] ss:$8 sps:$4 sm:$0xff]  }
  0x18   :  { %1841 = vmatprep.subr.bf16.mxu0 %v2562_v23  ;;  %1881 = vmatpush1.bf16.msra.mxu1 %v2561_v24  ;;  %v2634_v9 = vld [vmem:[%s3943_s1 + $0x214] ss:$8 sps:$4 sm:$0xff]   ;;  %v2629_v10 = vld [vmem:[%s3943_s1 + $0x300] ss:$8 sps:$4 sm:$0xff]   ;;  %v2632_v12 = vld [vmem:[%s3943_s1 + $0x210] ss:$8 sps:$4 sm:$0xff]  }
  0x19   :  { %1882 = vmatprep.subr.bf16.mxu1 %v2565_v25  ;;  %v2637_v11 = vld [vmem:[%s3943_s1 + $0x314] ss:$8 sps:$4 sm:$0xff]   ;;  %v2640_v13 = vld [vmem:[%s3943_s1 + $0x224] ss:$8 sps:$4 sm:$0xff]   ;;  %v2635_v14 = vld [vmem:[%s3943_s1 + $0x310] ss:$8 sps:$4 sm:$0xff]  }
  0x1a   :  { %v2643_v15 = vld [vmem:[%s3943_s1 + $0x324] ss:$8 sps:$4 sm:$0xff]   ;;  %v2638_v16 = vld [vmem:[%s3943_s1 + $0x220] ss:$8 sps:$4 sm:$0xff]   ;;  %v2646_v17 = vld [vmem:[%s3943_s1 + $0x234] ss:$8 sps:$4 sm:$0xff]  }
  0x1b   :  { %1842 = vmatpush1.bf16.msra.mxu0 %v2564_v26  ;;  %v2641_v18 = vld [vmem:[%s3943_s1 + $0x320] ss:$8 sps:$4 sm:$0xff]   ;;  %v2649_v19 = vld [vmem:[%s3943_s1 + $0x334] ss:$8 sps:$4 sm:$0xff]   ;;  %v2644_v20 = vld [vmem:[%s3943_s1 + $0x230] ss:$8 sps:$4 sm:$0xff]  }
  0x1c   :  { %1843 = vmatprep.subr.bf16.mxu0 %v2568_v27  ;;  %1883 = vmatpush1.bf16.msra.mxu1 %v2567_v28  ;;  %v2652_v21 = vld [vmem:[%s3943_s1 + $0x244] ss:$8 sps:$4 sm:$0xff]   ;;  %v2647_v22 = vld [vmem:[%s3943_s1 + $0x330] ss:$8 sps:$4 sm:$0xff]   ;;  %v2650_v24 = vld [vmem:[%s3943_s1 + $0x240] ss:$8 sps:$4 sm:$0xff]  }
  0x1d   :  { %1884 = vmatprep.subr.bf16.mxu1 %v2571_v29  ;;  %v2655_v23 = vld [vmem:[%s3943_s1 + $0x344] ss:$8 sps:$4 sm:$0xff]   ;;  %v2658_v25 = vld [vmem:[%s3943_s1 + $0x254] ss:$8 sps:$4 sm:$0xff]   ;;  %v2653_v26 = vld [vmem:[%s3943_s1 + $0x340] ss:$8 sps:$4 sm:$0xff]  }
  0x1e   :  { %v2661_v27 = vld [vmem:[%s3943_s1 + $0x354] ss:$8 sps:$4 sm:$0xff]   ;;  %v2656_v28 = vld [vmem:[%s3943_s1 + $0x250] ss:$8 sps:$4 sm:$0xff]   ;;  %v2664_v29 = vld [vmem:[%s3943_s1 + $0x264] ss:$8 sps:$4 sm:$0xff]  }
  0x1f   :  { %1844 = vmatpush1.bf16.msra.mxu0 %v2570_v30  ;;  %v2659_v30 = vld [vmem:[%s3943_s1 + $0x350] ss:$8 sps:$4 sm:$0xff]   ;;  %v2677_v46 = vld [vmem:[%s3943_s1 + $0x380] ss:$8 sps:$4 sm:$0xff]  }
  0x20   :  { %1845 = vmatprep.subr.bf16.mxu0 %v2574_v31  ;;  %1885 = vmatpush1.bf16.msra.mxu1 %v2573_v32  ;;  %v2667_v31 = vld [vmem:[%s3943_s1 + $0x364] ss:$8 sps:$4 sm:$0xff]   ;;  %v3280_v32 = vld [vmem:[%s3944_s0 + $0x10] sm:$0xff]  ;;  %v2686_v52 = vld [vmem:[%s3943_s1 + $0x2a0] ss:$8 sps:$4 sm:$0xff]  }
  0x21   :  { %1886 = vmatprep.subr.bf16.mxu1 %v2577_v33  ;;  %v2662_v33 = vld [vmem:[%s3943_s1 + $0x260] ss:$8 sps:$4 sm:$0xff]   ;;  %v2680_v48 = vld [vmem:[%s3943_s1 + $0x290] ss:$8 sps:$4 sm:$0xff]  }
  0x22   :  { %v2683_v50 = vld [vmem:[%s3943_s1 + $0x390] ss:$8 sps:$4 sm:$0xff]  }
  0x23   :  { %1846 = vmatpush1.bf16.msra.mxu0 %v2576_v34  ;;  %v2223_v34 = vcombine.high %v3280_v32, %v3280_v32 }
  0x24   :  { %1847 = vmatprep.subr.bf16.mxu0 %v2580_v35  ;;  %1887 = vmatpush1.bf16.msra.mxu1 %v2579_v36  ;;  %v3290_v35 = vld [vmem:[%s3944_s0 + $0x18] sm:$0xff] }
  0x25   :  { %1888 = vmatprep.subr.bf16.mxu1 %v2583_v37  ;;  %v2670_v36 = vld [vmem:[%s3943_s1 + $0x274] ss:$8 sps:$4 sm:$0xff]   ;;  %v2225_v37 = vcombine.high %v3290_v35, %v3290_v35 }
  0x27   :  { %1848 = vmatpush1.bf16.msra.mxu0 %v2582_v38  ;;  %v2665_v38 = vld [vmem:[%s3943_s1 + $0x360] ss:$8 sps:$4 sm:$0xff]  }
  0x28   :  { %1849 = vmatprep.subr.bf16.mxu0 %v2586_v39  ;;  %1889 = vmatpush1.bf16.msra.mxu1 %v2585_v40  ;;  %v2673_v39 = vld [vmem:[%s3943_s1 + $0x374] ss:$8 sps:$4 sm:$0xff]   ;;  %v2668_v40 = vld [vmem:[%s3943_s1 + $0x270] ss:$8 sps:$4 sm:$0xff]  }
  0x29   :  { %1890 = vmatprep.subr.bf16.mxu1 %v2589_v41  ;;  %v2676_v41 = vld [vmem:[%s3943_s1 + $0x284] ss:$8 sps:$4 sm:$0xff]  }
  0x2b   :  { %1850 = vmatpush1.bf16.msra.mxu0 %v2588_v42  ;;  %v2671_v42 = vld [vmem:[%s3943_s1 + $0x370] ss:$8 sps:$4 sm:$0xff]  }
  0x2c   :  { %1851 = vmatprep.subr.bf16.mxu0 %v2592_v43  ;;  %1891 = vmatpush1.bf16.msra.mxu1 %v2591_v44  ;;  %v2679_v43 = vld [vmem:[%s3943_s1 + $0x384] ss:$8 sps:$4 sm:$0xff]   ;;  %v2674_v44 = vld [vmem:[%s3943_s1 + $0x280] ss:$8 sps:$4 sm:$0xff]  }
  0x2d   :  { %1892 = vmatprep.subr.bf16.mxu1 %v2595_v45  ;;  %v2682_v45 = vld [vmem:[%s3943_s1 + $0x294] ss:$8 sps:$4 sm:$0xff]  }
  0x2f   :  { %1852 = vmatpush1.bf16.msra.mxu0 %v2594_v47  ;;  %v2685_v47 = vld [vmem:[%s3943_s1 + $0x394] ss:$8 sps:$4 sm:$0xff]  }
  0x30   :  { %1853 = vmatprep.subr.bf16.mxu0 %v2598_v49  ;;  %1893 = vmatpush1.bf16.msra.mxu1 %v2597_v51  ;;  %v2688_v49 = vld [vmem:[%s3943_s1 + $0x2a4] ss:$8 sps:$4 sm:$0xff]  }
  0x31   :  { %1894 = vmatprep.subr.bf16.mxu1 %v2601_v53  ;;  %v2691_v51 = vld [vmem:[%s3943_s1 + $0x3a4] ss:$8 sps:$4 sm:$0xff]   ;;  %v2694_v53 = vld [vmem:[%s3943_s1 + $0x2b4] ss:$8 sps:$4 sm:$0xff]  }
  0x33   :  { %1854 = vmatpush1.bf16.msra.mxu0 %v2600_v54  ;;  %v2689_v54 = vld [vmem:[%s3943_s1 + $0x3a0] ss:$8 sps:$4 sm:$0xff]  }
  0x34   :  { %1855 = vmatprep.subr.bf16.mxu0 %v2604_v55  ;;  %1895 = vmatpush1.bf16.msra.mxu1 %v2603_v56  ;;  %v2697_v55 = vld [vmem:[%s3943_s1 + $0x3b4] ss:$8 sps:$4 sm:$0xff]   ;;  %v2692_v56 = vld [vmem:[%s3943_s1 + $0x2b0] ss:$8 sps:$4 sm:$0xff]  }
  0x35   :  { %1896 = vmatprep.subr.bf16.mxu1 %v2607_v57  ;;  %v2700_v57 = vld [vmem:[%s3943_s1 + $0x2c4] ss:$8 sps:$4 sm:$0xff]  }
  0x37   :  { %1856 = vmatpush1.bf16.msra.mxu0 %v2606_v58  ;;  %v2695_v58 = vld [vmem:[%s3943_s1 + $0x3b0] ss:$8 sps:$4 sm:$0xff]  }
  0x38   :  { %1857 = vmatprep.subr.bf16.mxu0 %v2610_v59  ;;  %1897 = vmatpush1.bf16.msra.mxu1 %v2609_v60  ;;  %v2703_v59 = vld [vmem:[%s3943_s1 + $0x3c4] ss:$8 sps:$4 sm:$0xff]   ;;  %v2698_v60 = vld [vmem:[%s3943_s1 + $0x2c0] ss:$8 sps:$4 sm:$0xff]  }
  0x39   :  { %1898 = vmatprep.subr.bf16.mxu1 %v2613_v61  ;;  %v2706_v61 = vld [vmem:[%s3943_s1 + $0x2d4] ss:$8 sps:$4 sm:$0xff]  }
  0x3b   :  { %1858 = vmatpush1.bf16.msra.mxu0 %v2612_v62  ;;  %v2701_v62 = vld [vmem:[%s3943_s1 + $0x3c0] ss:$8 sps:$4 sm:$0xff]  }
  0x3c   :  { %1859 = vmatprep.subr.bf16.mxu0 %v2616_v63  ;;  %1899 = vmatpush1.bf16.msra.mxu1 %v2615_v0  ;;  %v2709_v63 = vld [vmem:[%s3943_s1 + $0x3d4] ss:$8 sps:$4 sm:$0xff]   ;;  %v2704_v0 = vld [vmem:[%s3943_s1 + $0x2d0] ss:$8 sps:$4 sm:$0xff]  }
  0x3d   :  { %1900 = vmatprep.subr.bf16.mxu1 %v2619_v1  ;;  %v2712_v1 = vld [vmem:[%s3943_s1 + $0x2e4] ss:$8 sps:$4 sm:$0xff]  }
  0x3f   :  { %1860 = vmatpush1.bf16.msra.mxu0 %v2618_v2  ;;  %v2707_v2 = vld [vmem:[%s3943_s1 + $0x3d0] ss:$8 sps:$4 sm:$0xff]  }
  0x40   :  { %1911 = vmatprep.subr.bf16.mxu0 %v2626_v3  ;;  %1901 = vmatpush1.bf16.msra.mxu1 %v2623_v4  ;;  %v2715_v3 = vld [vmem:[%s3943_s1 + $0x3e4] ss:$8 sps:$4 sm:$0xff]   ;;  %v2710_v4 = vld [vmem:[%s3943_s1 + $0x2e0] ss:$8 sps:$4 sm:$0xff]  }
  0x41   :  { %1952 = vmatprep.subr.bf16.mxu1 %v2631_v6  ;;  %v2713_v6 = vld [vmem:[%s3943_s1 + $0x3e0] ss:$8 sps:$4 sm:$0xff]  }
  0x42   :  { %1862 = vmatmul.mubr.bf16.vlgmr.msra.gmra.mrb[0].mxu0 %v2218_v5  ;;  %v2718_v5 = vld [vmem:[%s3943_s1 + $0x2f4] ss:$8 sps:$4 sm:$0xff]  }
  0x43   :  { %1912 = vmatpush1.bf16.msra.mxu0 %v2624_v7  ;;  %1903 = vmatmul.mubr.bf16.vlgmr.msra.gmra.mrb[0].mxu1 %v2220_v8  ;;  %v2721_v7 = vld [vmem:[%s3943_s1 + $0x3f4] ss:$8 sps:$4 sm:$0xff]   ;;  %v2716_v8 = vld [vmem:[%s3943_s1 + $0x2f0] ss:$8 sps:$4 sm:$0xff]  }
  0x44   :  { %1913 = vmatprep.subr.bf16.mxu0 %v2634_v9  ;;  %1953 = vmatpush1.bf16.msra.mxu1 %v2629_v10  ;;  %v2726_v9 = vld [vmem:[%s3943_s1 + $0x404] ss:$8 sps:$4 sm:$0xff]   ;;  %v2719_v10 = vld [vmem:[%s3943_s1 + $0x3f0] ss:$8 sps:$4 sm:$0xff]  }
  0x45   :  { %1954 = vmatprep.subr.bf16.mxu1 %v2637_v11  ;;  %1943 = vmatprep.mubr.bf16.mxu0 %v2223_v34  ;;  %v2222_v11 = vcombine.low %v3280_v32, %v3280_v32  ;;  %v2747_v32 = vld [vmem:[%s3943_s1 + $0x530] ss:$8 sps:$4 sm:$0xff]   ;;  %v2750_v34 = vld [vmem:[%s3943_s1 + $0x440] ss:$8 sps:$4 sm:$0xff]  }
  0x46   :  { %1984 = vmatprep.mubr.bf16.mxu1 %v2225_v37  ;;  %v2761_v37 = vld [vmem:[%s3943_s1 + $0x554] ss:$8 sps:$4 sm:$0xff]  }
  0x47   :  { %1914 = vmatpush1.bf16.msra.mxu0 %v2632_v12  ;;  %v2731_v12 = vld [vmem:[%s3943_s1 + $0x504] ss:$8 sps:$4 sm:$0xff]  }
  0x48   :  { %1915 = vmatprep.subr.bf16.mxu0 %v2640_v13  ;;  %1955 = vmatpush1.bf16.msra.mxu1 %v2635_v14  ;;  %v2724_v13 = vld [vmem:[%s3943_s1 + $0x400] ss:$8 sps:$4 sm:$0xff]   ;;  %v2224_v14 = vcombine.low %v3290_v35, %v3290_v35  ;;  %v2758_v35 = vld [vmem:[%s3943_s1 + $0x454] ss:$8 sps:$4 sm:$0xff]  }
  0x49   :  { %1956 = vmatprep.subr.bf16.mxu1 %v2643_v15  ;;  %v2734_v15 = vld [vmem:[%s3943_s1 + $0x414] ss:$8 sps:$4 sm:$0xff]  }
  0x4b   :  { %1916 = vmatpush1.bf16.msra.mxu0 %v2638_v16  ;;  %v2729_v16 = vld [vmem:[%s3943_s1 + $0x500] ss:$8 sps:$4 sm:$0xff]  }
  0x4c   :  { %1917 = vmatprep.subr.bf16.mxu0 %v2646_v17  ;;  %1957 = vmatpush1.bf16.msra.mxu1 %v2641_v18  ;;  %v3427_v17 = vld [vmem:[%s3944_s0 + $0x20] sm:$0xff]  ;;  %v2732_v18 = vld [vmem:[%s3943_s1 + $0x410] ss:$8 sps:$4 sm:$0xff]  }
  0x4d   :  { %1958 = vmatprep.subr.bf16.mxu1 %v2649_v19  ;;  %v2737_v19 = vld [vmem:[%s3943_s1 + $0x514] ss:$8 sps:$4 sm:$0xff]  }
  0x4f   :  { %1918 = vmatpush1.bf16.msra.mxu0 %v2644_v20  ;;  %v2227_v20 = vcombine.high %v3427_v17, %v3427_v17 }
  0x50   :  { %1919 = vmatprep.subr.bf16.mxu0 %v2652_v21  ;;  %1959 = vmatpush1.bf16.msra.mxu1 %v2647_v22  ;;  %v3440_v21 = vld [vmem:[%s3944_s0 + $0x28] sm:$0xff] }
  0x51   :  { %1960 = vmatprep.subr.bf16.mxu1 %v2655_v23  ;;  %v2740_v22 = vld [vmem:[%s3943_s1 + $0x424] ss:$8 sps:$4 sm:$0xff]   ;;  %v2229_v23 = vcombine.high %v3440_v21, %v3440_v21 }
  0x53   :  { %1920 = vmatpush1.bf16.msra.mxu0 %v2650_v24  ;;  %v2735_v24 = vld [vmem:[%s3943_s1 + $0x510] ss:$8 sps:$4 sm:$0xff]  }
  0x54   :  { %1921 = vmatprep.subr.bf16.mxu0 %v2658_v25  ;;  %1961 = vmatpush1.bf16.msra.mxu1 %v2653_v26  ;;  %v2743_v25 = vld [vmem:[%s3943_s1 + $0x524] ss:$8 sps:$4 sm:$0xff]   ;;  %v2738_v26 = vld [vmem:[%s3943_s1 + $0x420] ss:$8 sps:$4 sm:$0xff]  }
  0x55   :  { %1962 = vmatprep.subr.bf16.mxu1 %v2661_v27  ;;  %v2746_v27 = vld [vmem:[%s3943_s1 + $0x434] ss:$8 sps:$4 sm:$0xff]  }
  0x57   :  { %1922 = vmatpush1.bf16.msra.mxu0 %v2656_v28  ;;  %v2741_v28 = vld [vmem:[%s3943_s1 + $0x520] ss:$8 sps:$4 sm:$0xff]  }
  0x58   :  { %1923 = vmatprep.subr.bf16.mxu0 %v2664_v29  ;;  %1963 = vmatpush1.bf16.msra.mxu1 %v2659_v30  ;;  %v2749_v29 = vld [vmem:[%s3943_s1 + $0x534] ss:$8 sps:$4 sm:$0xff]   ;;  %v2744_v30 = vld [vmem:[%s3943_s1 + $0x430] ss:$8 sps:$4 sm:$0xff]  }
  0x59   :  { %1964 = vmatprep.subr.bf16.mxu1 %v2667_v31  ;;  %v2752_v31 = vld [vmem:[%s3943_s1 + $0x444] ss:$8 sps:$4 sm:$0xff]  }
  0x5b   :  { %1924 = vmatpush1.bf16.msra.mxu0 %v2662_v33  ;;  %v2755_v33 = vld [vmem:[%s3943_s1 + $0x544] ss:$8 sps:$4 sm:$0xff]  }
  0x5c   :  { %1925 = vmatprep.subr.bf16.mxu0 %v2670_v36  ;;  %1965 = vmatpush1.bf16.msra.mxu1 %v2665_v38  ;;  %v2753_v36 = vld [vmem:[%s3943_s1 + $0x540] ss:$8 sps:$4 sm:$0xff]   ;;  %v2756_v38 = vld [vmem:[%s3943_s1 + $0x450] ss:$8 sps:$4 sm:$0xff]  }
  0x5d   :  { %1966 = vmatprep.subr.bf16.mxu1 %v2673_v39  ;;  %v2764_v39 = vld [vmem:[%s3943_s1 + $0x464] ss:$8 sps:$4 sm:$0xff]  }
  0x5f   :  { %1926 = vmatpush1.bf16.msra.mxu0 %v2668_v40  ;;  %v2759_v40 = vld [vmem:[%s3943_s1 + $0x550] ss:$8 sps:$4 sm:$0xff]  }
  0x60   :  { %1927 = vmatprep.subr.bf16.mxu0 %v2676_v41  ;;  %1967 = vmatpush1.bf16.msra.mxu1 %v2671_v42  ;;  %v2767_v41 = vld [vmem:[%s3943_s1 + $0x564] ss:$8 sps:$4 sm:$0xff]   ;;  %v2762_v42 = vld [vmem:[%s3943_s1 + $0x460] ss:$8 sps:$4 sm:$0xff]  }
  0x61   :  { %1968 = vmatprep.subr.bf16.mxu1 %v2679_v43  ;;  %v2770_v43 = vld [vmem:[%s3943_s1 + $0x474] ss:$8 sps:$4 sm:$0xff]  }
  0x63   :  { %1928 = vmatpush1.bf16.msra.mxu0 %v2674_v44  ;;  %v2765_v44 = vld [vmem:[%s3943_s1 + $0x560] ss:$8 sps:$4 sm:$0xff]  }
  0x64   :  { %1929 = vmatprep.subr.bf16.mxu0 %v2682_v45  ;;  %1969 = vmatpush1.bf16.msra.mxu1 %v2677_v46  ;;  %v2773_v45 = vld [vmem:[%s3943_s1 + $0x574] ss:$8 sps:$4 sm:$0xff]   ;;  %v2768_v46 = vld [vmem:[%s3943_s1 + $0x470] ss:$8 sps:$4 sm:$0xff]  }
  0x65   :  { %1970 = vmatprep.subr.bf16.mxu1 %v2685_v47  ;;  %v2776_v47 = vld [vmem:[%s3943_s1 + $0x484] ss:$8 sps:$4 sm:$0xff]  }
  0x67   :  { %1930 = vmatpush1.bf16.msra.mxu0 %v2680_v48  ;;  %v2771_v48 = vld [vmem:[%s3943_s1 + $0x570] ss:$8 sps:$4 sm:$0xff]  }
  0x68   :  { %1931 = vmatprep.subr.bf16.mxu0 %v2688_v49  ;;  %1971 = vmatpush1.bf16.msra.mxu1 %v2683_v50  ;;  %v2779_v49 = vld [vmem:[%s3943_s1 + $0x584] ss:$8 sps:$4 sm:$0xff]   ;;  %v2774_v50 = vld [vmem:[%s3943_s1 + $0x480] ss:$8 sps:$4 sm:$0xff]  }
  0x69   :  { %1972 = vmatprep.subr.bf16.mxu1 %v2691_v51  ;;  %v2782_v51 = vld [vmem:[%s3943_s1 + $0x494] ss:$8 sps:$4 sm:$0xff]  }
  0x6b   :  { %1932 = vmatpush1.bf16.msra.mxu0 %v2686_v52  ;;  %v2777_v52 = vld [vmem:[%s3943_s1 + $0x580] ss:$8 sps:$4 sm:$0xff]  }
  0x6c   :  { %1933 = vmatprep.subr.bf16.mxu0 %v2694_v53  ;;  %1973 = vmatpush1.bf16.msra.mxu1 %v2689_v54  ;;  %v2785_v53 = vld [vmem:[%s3943_s1 + $0x594] ss:$8 sps:$4 sm:$0xff]   ;;  %v2780_v54 = vld [vmem:[%s3943_s1 + $0x490] ss:$8 sps:$4 sm:$0xff]  }
  0x6d   :  { %1974 = vmatprep.subr.bf16.mxu1 %v2697_v55  ;;  %v2788_v55 = vld [vmem:[%s3943_s1 + $0x4a4] ss:$8 sps:$4 sm:$0xff]  }
  0x6f   :  { %1934 = vmatpush1.bf16.msra.mxu0 %v2692_v56  ;;  %v2783_v56 = vld [vmem:[%s3943_s1 + $0x590] ss:$8 sps:$4 sm:$0xff]  }
  0x70   :  { %1935 = vmatprep.subr.bf16.mxu0 %v2700_v57  ;;  %1975 = vmatpush1.bf16.msra.mxu1 %v2695_v58  ;;  %v2791_v57 = vld [vmem:[%s3943_s1 + $0x5a4] ss:$8 sps:$4 sm:$0xff]   ;;  %v2786_v58 = vld [vmem:[%s3943_s1 + $0x4a0] ss:$8 sps:$4 sm:$0xff]  }
  0x71   :  { %1976 = vmatprep.subr.bf16.mxu1 %v2703_v59  ;;  %v2794_v59 = vld [vmem:[%s3943_s1 + $0x4b4] ss:$8 sps:$4 sm:$0xff]  }
  0x73   :  { %1936 = vmatpush1.bf16.msra.mxu0 %v2698_v60  ;;  %v2789_v60 = vld [vmem:[%s3943_s1 + $0x5a0] ss:$8 sps:$4 sm:$0xff]  }
  0x74   :  { %1937 = vmatprep.subr.bf16.mxu0 %v2706_v61  ;;  %1977 = vmatpush1.bf16.msra.mxu1 %v2701_v62  ;;  %v2797_v61 = vld [vmem:[%s3943_s1 + $0x5b4] ss:$8 sps:$4 sm:$0xff]   ;;  %v2792_v62 = vld [vmem:[%s3943_s1 + $0x4b0] ss:$8 sps:$4 sm:$0xff]  }
  0x75   :  { %1978 = vmatprep.subr.bf16.mxu1 %v2709_v63  ;;  %v2800_v63 = vld [vmem:[%s3943_s1 + $0x4c4] ss:$8 sps:$4 sm:$0xff]  }
  0x77   :  { %1938 = vmatpush1.bf16.msra.mxu0 %v2704_v0  ;;  %v2795_v0 = vld [vmem:[%s3943_s1 + $0x5b0] ss:$8 sps:$4 sm:$0xff]  }
  0x78   :  { %1939 = vmatprep.subr.bf16.mxu0 %v2712_v1  ;;  %1979 = vmatpush1.bf16.msra.mxu1 %v2707_v2  ;;  %v2803_v1 = vld [vmem:[%s3943_s1 + $0x5c4] ss:$8 sps:$4 sm:$0xff]   ;;  %v2798_v2 = vld [vmem:[%s3943_s1 + $0x4c0] ss:$8 sps:$4 sm:$0xff]  }
  0x79   :  { %1980 = vmatprep.subr.bf16.mxu1 %v2715_v3  ;;  %v2806_v3 = vld [vmem:[%s3943_s1 + $0x4d4] ss:$8 sps:$4 sm:$0xff]  }
  0x7b   :  { %1940 = vmatpush1.bf16.msra.mxu0 %v2710_v4  ;;  %v2801_v4 = vld [vmem:[%s3943_s1 + $0x5c0] ss:$8 sps:$4 sm:$0xff]  }
  0x7c   :  { %1941 = vmatprep.subr.bf16.mxu0 %v2718_v5  ;;  %1981 = vmatpush1.bf16.msra.mxu1 %v2713_v6  ;;  %v2809_v5 = vld [vmem:[%s3943_s1 + $0x5d4] ss:$8 sps:$4 sm:$0xff]   ;;  %v2804_v6 = vld [vmem:[%s3943_s1 + $0x4d0] ss:$8 sps:$4 sm:$0xff]  }
  0x7d   :  { %1982 = vmatprep.subr.bf16.mxu1 %v2721_v7  ;;  %v2812_v7 = vld [vmem:[%s3943_s1 + $0x4e4] ss:$8 sps:$4 sm:$0xff]  }
  0x7f   :  { %1942 = vmatpush1.bf16.msra.mxu0 %v2716_v8  ;;  %v2807_v8 = vld [vmem:[%s3943_s1 + $0x5d0] ss:$8 sps:$4 sm:$0xff]  }
  0x80   :  { %1993 = vmatprep.subr.bf16.mxu0 %v2726_v9  ;;  %1983 = vmatpush1.bf16.msra.mxu1 %v2719_v10  ;;  %v2815_v9 = vld [vmem:[%s3943_s1 + $0x5e4] ss:$8 sps:$4 sm:$0xff]   ;;  %v2810_v10 = vld [vmem:[%s3943_s1 + $0x4e0] ss:$8 sps:$4 sm:$0xff]  }
  0x81   :  { %2034 = vmatprep.subr.bf16.mxu1 %v2731_v12  ;;  %v2813_v12 = vld [vmem:[%s3943_s1 + $0x5e0] ss:$8 sps:$4 sm:$0xff]  }
  0x82   :  { %1944 = vmatmul.mubr.bf16.vlgmr.msra.gmra.mrb[4].mxu0 %v2222_v11  ;;  %v2818_v11 = vld [vmem:[%s3943_s1 + $0x4f4] ss:$8 sps:$4 sm:$0xff]  }
  0x83   :  { %1994 = vmatpush1.bf16.msra.mxu0 %v2724_v13  ;;  %1985 = vmatmul.mubr.bf16.vlgmr.msra.gmra.mrb[4].mxu1 %v2224_v14  ;;  %v2816_v13 = vld [vmem:[%s3943_s1 + $0x4f0] ss:$8 sps:$4 sm:$0xff]   ;;  %v2821_v14 = vld [vmem:[%s3943_s1 + $0x5f4] ss:$8 sps:$4 sm:$0xff]  }
  0x84   :  { %1995 = vmatprep.subr.bf16.mxu0 %v2734_v15  ;;  %2035 = vmatpush1.bf16.msra.mxu1 %v2729_v16  ;;  %v2826_v15 = vld [vmem:[%s3943_s1 + $0x604] ss:$8 sps:$4 sm:$0xff]   ;;  %v3618_v16 = vld [vmem:[%s3944_s0 + $0x30] sm:$0xff] }
  0x85   :  { %2025 = vmatprep.mubr.bf16.mxu0 %v2227_v20  ;;  %2036 = vmatprep.subr.bf16.mxu1 %v2737_v19  ;;  %v2226_v19 = vcombine.low %v3427_v17, %v3427_v17  ;;  %v2831_v20 = vld [vmem:[%s3943_s1 + $0x704] ss:$8 sps:$4 sm:$0xff]   ;;  %v2228_v17 = vcombine.low %v3440_v21, %v3440_v21  ;;  %v2832_v21 = vld [vmem:[%s3943_s1 + $0x610] ss:$8 sps:$4 sm:$0xff]  }
  0x86   :  { %2066 = vmatprep.mubr.bf16.mxu1 %v2229_v23  ;;  %v2824_v23 = vld [vmem:[%s3943_s1 + $0x600] ss:$8 sps:$4 sm:$0xff]  }
  0x87   :  { %1996 = vmatpush1.bf16.msra.mxu0 %v2732_v18  ;;  %v2819_v18 = vld [vmem:[%s3943_s1 + $0x5f0] ss:$8 sps:$4 sm:$0xff]  }
  0x88   :  { %1997 = vmatprep.subr.bf16.mxu0 %v2740_v22  ;;  %2037 = vmatpush1.bf16.msra.mxu1 %v2735_v24  ;;  %v3631_v22 = vld [vmem:[%s3944_s0 + $0x38] sm:$0xff]  ;;  %v2231_v24 = vcombine.high %v3618_v16, %v3618_v16 }
  0x89   :  { %2038 = vmatprep.subr.bf16.mxu1 %v2743_v25  ;;  %v2834_v25 = vld [vmem:[%s3943_s1 + $0x614] ss:$8 sps:$4 sm:$0xff]  }
  0x8b   :  { %1998 = vmatpush1.bf16.msra.mxu0 %v2738_v26  ;;  %v2829_v26 = vld [vmem:[%s3943_s1 + $0x700] ss:$8 sps:$4 sm:$0xff]  }
  0x8c   :  { %1999 = vmatprep.subr.bf16.mxu0 %v2746_v27  ;;  %2039 = vmatpush1.bf16.msra.mxu1 %v2741_v28  ;;  %v2233_v27 = vcombine.high %v3631_v22, %v3631_v22  ;;  %v2837_v28 = vld [vmem:[%s3943_s1 + $0x714] ss:$8 sps:$4 sm:$0xff]  }
  0x8d   :  { %2040 = vmatprep.subr.bf16.mxu1 %v2749_v29  ;;  %v2840_v29 = vld [vmem:[%s3943_s1 + $0x624] ss:$8 sps:$4 sm:$0xff]  }
  0x8f   :  { %2000 = vmatpush1.bf16.msra.mxu0 %v2744_v30  ;;  %v2835_v30 = vld [vmem:[%s3943_s1 + $0x710] ss:$8 sps:$4 sm:$0xff]  }
  0x90   :  { %2001 = vmatprep.subr.bf16.mxu0 %v2752_v31  ;;  %2041 = vmatpush1.bf16.msra.mxu1 %v2747_v32  ;;  %v2843_v31 = vld [vmem:[%s3943_s1 + $0x724] ss:$8 sps:$4 sm:$0xff]   ;;  %v2838_v32 = vld [vmem:[%s3943_s1 + $0x620] ss:$8 sps:$4 sm:$0xff]  }
  0x91   :  { %2042 = vmatprep.subr.bf16.mxu1 %v2755_v33  ;;  %v2846_v33 = vld [vmem:[%s3943_s1 + $0x634] ss:$8 sps:$4 sm:$0xff]  }
  0x93   :  { %2002 = vmatpush1.bf16.msra.mxu0 %v2750_v34  ;;  %v2841_v34 = vld [vmem:[%s3943_s1 + $0x720] ss:$8 sps:$4 sm:$0xff]  }
  0x94   :  { %2003 = vmatprep.subr.bf16.mxu0 %v2758_v35  ;;  %2043 = vmatpush1.bf16.msra.mxu1 %v2753_v36  ;;  %v2849_v35 = vld [vmem:[%s3943_s1 + $0x734] ss:$8 sps:$4 sm:$0xff]   ;;  %v2844_v36 = vld [vmem:[%s3943_s1 + $0x630] ss:$8 sps:$4 sm:$0xff]  }
  0x95   :  { %2044 = vmatprep.subr.bf16.mxu1 %v2761_v37  ;;  %v2852_v37 = vld [vmem:[%s3943_s1 + $0x644] ss:$8 sps:$4 sm:$0xff]  }
  0x97   :  { %2004 = vmatpush1.bf16.msra.mxu0 %v2756_v38  ;;  %v2847_v38 = vld [vmem:[%s3943_s1 + $0x730] ss:$8 sps:$4 sm:$0xff]  }
  0x98   :  { %2005 = vmatprep.subr.bf16.mxu0 %v2764_v39  ;;  %2045 = vmatpush1.bf16.msra.mxu1 %v2759_v40  ;;  %v2855_v39 = vld [vmem:[%s3943_s1 + $0x744] ss:$8 sps:$4 sm:$0xff]   ;;  %v2850_v40 = vld [vmem:[%s3943_s1 + $0x640] ss:$8 sps:$4 sm:$0xff]  }
  0x99   :  { %2046 = vmatprep.subr.bf16.mxu1 %v2767_v41  ;;  %v2858_v41 = vld [vmem:[%s3943_s1 + $0x654] ss:$8 sps:$4 sm:$0xff]  }
  0x9b   :  { %2006 = vmatpush1.bf16.msra.mxu0 %v2762_v42  ;;  %v2853_v42 = vld [vmem:[%s3943_s1 + $0x740] ss:$8 sps:$4 sm:$0xff]  }
  0x9c   :  { %2007 = vmatprep.subr.bf16.mxu0 %v2770_v43  ;;  %2047 = vmatpush1.bf16.msra.mxu1 %v2765_v44  ;;  %v2861_v43 = vld [vmem:[%s3943_s1 + $0x754] ss:$8 sps:$4 sm:$0xff]   ;;  %v2856_v44 = vld [vmem:[%s3943_s1 + $0x650] ss:$8 sps:$4 sm:$0xff]  }
  0x9d   :  { %2048 = vmatprep.subr.bf16.mxu1 %v2773_v45  ;;  %v2864_v45 = vld [vmem:[%s3943_s1 + $0x664] ss:$8 sps:$4 sm:$0xff]  }
  0x9f   :  { %2008 = vmatpush1.bf16.msra.mxu0 %v2768_v46  ;;  %v2859_v46 = vld [vmem:[%s3943_s1 + $0x750] ss:$8 sps:$4 sm:$0xff]  }
  0xa0   :  { %2009 = vmatprep.subr.bf16.mxu0 %v2776_v47  ;;  %2049 = vmatpush1.bf16.msra.mxu1 %v2771_v48  ;;  %v2867_v47 = vld [vmem:[%s3943_s1 + $0x764] ss:$8 sps:$4 sm:$0xff]   ;;  %v2862_v48 = vld [vmem:[%s3943_s1 + $0x660] ss:$8 sps:$4 sm:$0xff]  }
  0xa1   :  { %2050 = vmatprep.subr.bf16.mxu1 %v2779_v49  ;;  %v2870_v49 = vld [vmem:[%s3943_s1 + $0x674] ss:$8 sps:$4 sm:$0xff]  }
  0xa3   :  { %2010 = vmatpush1.bf16.msra.mxu0 %v2774_v50  ;;  %v2865_v50 = vld [vmem:[%s3943_s1 + $0x760] ss:$8 sps:$4 sm:$0xff]  }
  0xa4   :  { %2011 = vmatprep.subr.bf16.mxu0 %v2782_v51  ;;  %2051 = vmatpush1.bf16.msra.mxu1 %v2777_v52  ;;  %v2873_v51 = vld [vmem:[%s3943_s1 + $0x774] ss:$8 sps:$4 sm:$0xff]   ;;  %v2868_v52 = vld [vmem:[%s3943_s1 + $0x670] ss:$8 sps:$4 sm:$0xff]  }
  0xa5   :  { %2052 = vmatprep.subr.bf16.mxu1 %v2785_v53  ;;  %v2876_v53 = vld [vmem:[%s3943_s1 + $0x684] ss:$8 sps:$4 sm:$0xff]  }
  0xa7   :  { %2012 = vmatpush1.bf16.msra.mxu0 %v2780_v54  ;;  %v2871_v54 = vld [vmem:[%s3943_s1 + $0x770] ss:$8 sps:$4 sm:$0xff]  }
  0xa8   :  { %2013 = vmatprep.subr.bf16.mxu0 %v2788_v55  ;;  %2053 = vmatpush1.bf16.msra.mxu1 %v2783_v56  ;;  %v2879_v55 = vld [vmem:[%s3943_s1 + $0x784] ss:$8 sps:$4 sm:$0xff]   ;;  %v2874_v56 = vld [vmem:[%s3943_s1 + $0x680] ss:$8 sps:$4 sm:$0xff]  }
  0xa9   :  { %2054 = vmatprep.subr.bf16.mxu1 %v2791_v57  ;;  %v2882_v57 = vld [vmem:[%s3943_s1 + $0x694] ss:$8 sps:$4 sm:$0xff]  }
  0xab   :  { %2014 = vmatpush1.bf16.msra.mxu0 %v2786_v58  ;;  %v2877_v58 = vld [vmem:[%s3943_s1 + $0x780] ss:$8 sps:$4 sm:$0xff]  }
  0xac   :  { %2015 = vmatprep.subr.bf16.mxu0 %v2794_v59  ;;  %2055 = vmatpush1.bf16.msra.mxu1 %v2789_v60  ;;  %v2885_v59 = vld [vmem:[%s3943_s1 + $0x794] ss:$8 sps:$4 sm:$0xff]   ;;  %v2880_v60 = vld [vmem:[%s3943_s1 + $0x690] ss:$8 sps:$4 sm:$0xff]  }
  0xad   :  { %2056 = vmatprep.subr.bf16.mxu1 %v2797_v61  ;;  %v2888_v61 = vld [vmem:[%s3943_s1 + $0x6a4] ss:$8 sps:$4 sm:$0xff]  }
  0xaf   :  { %2016 = vmatpush1.bf16.msra.mxu0 %v2792_v62  ;;  %v2883_v62 = vld [vmem:[%s3943_s1 + $0x790] ss:$8 sps:$4 sm:$0xff]  }
  0xb0   :  { %2017 = vmatprep.subr.bf16.mxu0 %v2800_v63  ;;  %2057 = vmatpush1.bf16.msra.mxu1 %v2795_v0  ;;  %v2891_v63 = vld [vmem:[%s3943_s1 + $0x7a4] ss:$8 sps:$4 sm:$0xff]   ;;  %v2886_v0 = vld [vmem:[%s3943_s1 + $0x6a0] ss:$8 sps:$4 sm:$0xff]  }
  0xb1   :  { %2058 = vmatprep.subr.bf16.mxu1 %v2803_v1  ;;  %v2894_v1 = vld [vmem:[%s3943_s1 + $0x6b4] ss:$8 sps:$4 sm:$0xff]  }
  0xb3   :  { %2018 = vmatpush1.bf16.msra.mxu0 %v2798_v2  ;;  %v2889_v2 = vld [vmem:[%s3943_s1 + $0x7a0] ss:$8 sps:$4 sm:$0xff]  }
  0xb4   :  { %2019 = vmatprep.subr.bf16.mxu0 %v2806_v3  ;;  %2059 = vmatpush1.bf16.msra.mxu1 %v2801_v4  ;;  %v2897_v3 = vld [vmem:[%s3943_s1 + $0x7b4] ss:$8 sps:$4 sm:$0xff]   ;;  %v2892_v4 = vld [vmem:[%s3943_s1 + $0x6b0] ss:$8 sps:$4 sm:$0xff]  }
  0xb5   :  { %2060 = vmatprep.subr.bf16.mxu1 %v2809_v5  ;;  %v2900_v5 = vld [vmem:[%s3943_s1 + $0x6c4] ss:$8 sps:$4 sm:$0xff]  }
  0xb7   :  { %2020 = vmatpush1.bf16.msra.mxu0 %v2804_v6  ;;  %v2895_v6 = vld [vmem:[%s3943_s1 + $0x7b0] ss:$8 sps:$4 sm:$0xff]  }
  0xb8   :  { %2021 = vmatprep.subr.bf16.mxu0 %v2812_v7  ;;  %2061 = vmatpush1.bf16.msra.mxu1 %v2807_v8  ;;  %v2903_v7 = vld [vmem:[%s3943_s1 + $0x7c4] ss:$8 sps:$4 sm:$0xff]   ;;  %v2898_v8 = vld [vmem:[%s3943_s1 + $0x6c0] ss:$8 sps:$4 sm:$0xff]  }
  0xb9   :  { %2062 = vmatprep.subr.bf16.mxu1 %v2815_v9  ;;  %v2906_v9 = vld [vmem:[%s3943_s1 + $0x6d4] ss:$8 sps:$4 sm:$0xff]  }
  0xbb   :  { %2022 = vmatpush1.bf16.msra.mxu0 %v2810_v10  ;;  %v2901_v10 = vld [vmem:[%s3943_s1 + $0x7c0] ss:$8 sps:$4 sm:$0xff]  }
  0xbc   :  { %2023 = vmatprep.subr.bf16.mxu0 %v2818_v11  ;;  %2063 = vmatpush1.bf16.msra.mxu1 %v2813_v12  ;;  %v2909_v11 = vld [vmem:[%s3943_s1 + $0x7d4] ss:$8 sps:$4 sm:$0xff]   ;;  %v2904_v12 = vld [vmem:[%s3943_s1 + $0x6d0] ss:$8 sps:$4 sm:$0xff]  }
  0xbd   :  { %2064 = vmatprep.subr.bf16.mxu1 %v2821_v14  ;;  %v2907_v14 = vld [vmem:[%s3943_s1 + $0x7d0] ss:$8 sps:$4 sm:$0xff]  }
  0xbf   :  { %2024 = vmatpush1.bf16.msra.mxu0 %v2816_v13  ;;  %v2912_v13 = vld [vmem:[%s3943_s1 + $0x6e4] ss:$8 sps:$4 sm:$0xff]  }
  0xc0   :  { %2075 = vmatprep.subr.bf16.mxu0 %v2826_v15  ;;  %2065 = vmatpush1.bf16.msra.mxu1 %v2819_v18  ;;  %v2915_v15 = vld [vmem:[%s3943_s1 + $0x7e4] ss:$8 sps:$4 sm:$0xff]   ;;  %v2910_v18 = vld [vmem:[%s3943_s1 + $0x6e0] ss:$8 sps:$4 sm:$0xff]  }
  0xc1   :  { %2116 = vmatprep.subr.bf16.mxu1 %v2831_v20  ;;  %v2913_v20 = vld [vmem:[%s3943_s1 + $0x7e0] ss:$8 sps:$4 sm:$0xff]  }
  0xc2   :  { %2026 = vmatmul.mubr.bf16.vlgmr.msra.gmra.mrb[8].mxu0 %v2226_v19  ;;  %v2918_v19 = vld [vmem:[%s3943_s1 + $0x6f4] ss:$8 sps:$4 sm:$0xff]  }
  0xc3   :  { %2076 = vmatpush1.bf16.msra.mxu0 %v2824_v23  ;;  %2107 = vmatprep.mubr.bf16.mxu0 %v2231_v24  ;;  %v2921_v23 = vld [vmem:[%s3943_s1 + $0x7f4] ss:$8 sps:$4 sm:$0xff]   ;;  %v2916_v24 = vld [vmem:[%s3943_s1 + $0x6f0] ss:$8 sps:$4 sm:$0xff]  }
  0xc4   :  { %2067 = vmatmul.mubr.bf16.vlgmr.msra.gmra.mrb[8].mxu1 %v2228_v17  ;;  %2077 = vmatprep.subr.bf16.mxu0 %v2834_v25  ;;  %v2926_v17 = vld [vmem:[%s3943_s1 + $0x804] ss:$8 sps:$4 sm:$0xff]  }
  0xc5   :  { %2117 = vmatpush1.bf16.msra.mxu1 %v2829_v26  ;;  %2148 = vmatprep.mubr.bf16.mxu1 %v2233_v27  ;;  %v3828_v25 = vld [vmem:[%s3944_s0 + $0x40] sm:$0xff]  ;;  %v2919_v26 = vld [vmem:[%s3943_s1 + $0x7f0] ss:$8 sps:$4 sm:$0xff]   ;;  %v2230_v27 = vcombine.low %v3618_v16, %v3618_v16 }
  0xc6   :  { %2118 = vmatprep.subr.bf16.mxu1 %v2837_v28  ;;  %v2924_v28 = vld [vmem:[%s3943_s1 + $0x800] ss:$8 sps:$4 sm:$0xff]   ;;  %v2929_v16 = vld [vmem:[%s3943_s1 + $0x810] ss:$8 sps:$4 sm:$0xff]  }
  0xc7   :  { %2078 = vmatpush1.bf16.msra.mxu0 %v2832_v21  ;;  %v2235_v21 = vcombine.high %v3828_v25, %v3828_v25 }
  0xc8   :  { %2079 = vmatprep.subr.bf16.mxu0 %v2840_v29  ;;  %v2232_v29 = vcombine.low %v3631_v22, %v3631_v22  ;;  %v2932_v22 = vld [vmem:[%s3943_s1 + $0x820] ss:$8 sps:$4 sm:$0xff]  }
  0xc9   :  { %2119 = vmatpush1.bf16.msra.mxu1 %v2835_v30  ;;  %v2931_v30 = vld [vmem:[%s3943_s1 + $0x814] ss:$8 sps:$4 sm:$0xff]  }
  0xca   :  { %2120 = vmatprep.subr.bf16.mxu1 %v2843_v31  ;;  %v2934_v31 = vld [vmem:[%s3943_s1 + $0x824] ss:$8 sps:$4 sm:$0xff]  }
  0xcb   :  { %2080 = vmatpush1.bf16.msra.mxu0 %v2838_v32  ;;  %v316_v32 = vlaneseq }
  0xcc   :  { %2081 = vmatprep.subr.bf16.mxu0 %v2846_v33  ;;  %v2937_v33 = vld [vmem:[%s3943_s1 + $0x834] ss:$8 sps:$4 sm:$0xff]  }
  0xcd   :  { %2121 = vmatpush1.bf16.msra.mxu1 %v2841_v34  ;;  %v317_v34 = vshrl.u32 %v316_v32, 7 }
  0xce   :  { %2122 = vmatprep.subr.bf16.mxu1 %v2849_v35  ;;  %v2935_v35 = vld [vmem:[%s3943_s1 + $0x830] ss:$8 sps:$4 sm:$0xff]  }
  0xcf   :  { %2082 = vmatpush1.bf16.msra.mxu0 %v2844_v36  ;;  %v2940_v36 = vld [vmem:[%s3943_s1 + $0x844] ss:$8 sps:$4 sm:$0xff]  }
  0xd0   :  { %2083 = vmatprep.subr.bf16.mxu0 %v2852_v37  ;;  %v318_v37 = vsub.s32 0, %v317_v34 }
  0xd1   :  { %2123 = vmatpush1.bf16.msra.mxu1 %v2847_v38  ;;  %v2938_v38 = vld [vmem:[%s3943_s1 + $0x840] ss:$8 sps:$4 sm:$0xff]  }
  0xd2   :  { %2124 = vmatprep.subr.bf16.mxu1 %v2855_v39  ;;  %v314_v39 = vld [vmem:[%s3945_s2] sm:$0x3] }
  0xd3   :  { %2084 = vmatpush1.bf16.msra.mxu0 %v2850_v40  ;;  %v322_v40 = vsub.s32 1, %v317_v34 }
  0xd4   :  { %2085 = vmatprep.subr.bf16.mxu0 %v2858_v41  ;;  %v2943_v41 = vld [vmem:[%s3943_s1 + $0x854] ss:$8 sps:$4 sm:$0xff]  }
  0xd5   :  { %2125 = vmatpush1.bf16.msra.mxu1 %v2853_v42  ;;  %v319_v42 = vrot.slane %v314_v39, %v318_v37 }
  0xd6   :  { %2126 = vmatprep.subr.bf16.mxu1 %v2861_v43  ;;  %v323_v43 = vrot.slane %v314_v39, %v322_v40 }
  0xd7   :  { %2086 = vmatpush1.bf16.msra.mxu0 %v2856_v44  ;;  %v2941_v44 = vld [vmem:[%s3943_s1 + $0x850] ss:$8 sps:$4 sm:$0xff]  }
  0xd8   :  { %2087 = vmatprep.subr.bf16.mxu0 %v2864_v45  ;;  %v2946_v45 = vld [vmem:[%s3943_s1 + $0x864] ss:$8 sps:$4 sm:$0xff]  }
  0xd9   :  { %2127 = vmatpush1.bf16.msra.mxu1 %v2859_v46 }
  0xda   :  { %2128 = vmatprep.subr.bf16.mxu1 %v2867_v47 }
  0xdb   :  { %2088 = vmatpush1.bf16.msra.mxu0 %v2862_v48 }
  0xdc   :  { %2089 = vmatprep.subr.bf16.mxu0 %v2870_v49 }
  0xdd   :  { %2129 = vmatpush1.bf16.msra.mxu1 %v2865_v50 }
  0xde   :  { %2130 = vmatprep.subr.bf16.mxu1 %v2873_v51 }
  0xdf   :  { %2090 = vmatpush1.bf16.msra.mxu0 %v2868_v52  ;;  %v2944_v52 = vld [vmem:[%s3943_s1 + $0x860] ss:$8 sps:$4 sm:$0xff]  }
  0xe0   :  { %2091 = vmatprep.subr.bf16.mxu0 %v2876_v53 }
  0xe1   :  { %2131 = vmatpush1.bf16.msra.mxu1 %v2871_v54 }
  0xe2   :  { %2132 = vmatprep.subr.bf16.mxu1 %v2879_v55 }
  0xe3   :  { %2092 = vmatpush1.bf16.msra.mxu0 %v2874_v56  ;;  %v2949_v56 = vld [vmem:[%s3943_s1 + $0x874] ss:$8 sps:$4 sm:$0xff]  }
  0xe4   :  { %2093 = vmatprep.subr.bf16.mxu0 %v2882_v57 }
  0xe5   :  { %2133 = vmatpush1.bf16.msra.mxu1 %v2877_v58 }
  0xe6   :  { %2134 = vmatprep.subr.bf16.mxu1 %v2885_v59 }
  0xe7   :  { %2094 = vmatpush1.bf16.msra.mxu0 %v2880_v60  ;;  %v2947_v60 = vld [vmem:[%s3943_s1 + $0x870] ss:$8 sps:$4 sm:$0xff]  }
  0xe8   :  { %2095 = vmatprep.subr.bf16.mxu0 %v2888_v61  ;;  %v2952_v61 = vld [vmem:[%s3943_s1 + $0x884] ss:$8 sps:$4 sm:$0xff]  }
  0xe9   :  { %2135 = vmatpush1.bf16.msra.mxu1 %v2883_v62  ;;  %v2950_v62 = vld [vmem:[%s3943_s1 + $0x880] ss:$8 sps:$4 sm:$0xff]  }
  0xea   :  { %2136 = vmatprep.subr.bf16.mxu1 %v2891_v63  ;;  %v2955_v63 = vld [vmem:[%s3943_s1 + $0x894] ss:$8 sps:$4 sm:$0xff]  }
  0xeb   :  { %2096 = vmatpush1.bf16.msra.mxu0 %v2886_v0  ;;  %v2953_v0 = vld [vmem:[%s3943_s1 + $0x890] ss:$8 sps:$4 sm:$0xff]  }
  0xec   :  { %2097 = vmatprep.subr.bf16.mxu0 %v2894_v1  ;;  %v2958_v1 = vld [vmem:[%s3943_s1 + $0x8a4] ss:$8 sps:$4 sm:$0xff]  }
  0xed   :  { %2137 = vmatpush1.bf16.msra.mxu1 %v2889_v2  ;;  %v2956_v2 = vld [vmem:[%s3943_s1 + $0x8a0] ss:$8 sps:$4 sm:$0xff]  }
  0xee   :  { %2138 = vmatprep.subr.bf16.mxu1 %v2897_v3  ;;  %v2961_v3 = vld [vmem:[%s3943_s1 + $0x8b4] ss:$8 sps:$4 sm:$0xff]  }
  0xef   :  { %2098 = vmatpush1.bf16.msra.mxu0 %v2892_v4  ;;  %v2959_v4 = vld [vmem:[%s3943_s1 + $0x8b0] ss:$8 sps:$4 sm:$0xff]  }
  0xf0   :  { %2099 = vmatprep.subr.bf16.mxu0 %v2900_v5  ;;  %v2964_v5 = vld [vmem:[%s3943_s1 + $0x8c4] ss:$8 sps:$4 sm:$0xff]  }
  0xf1   :  { %2139 = vmatpush1.bf16.msra.mxu1 %v2895_v6  ;;  %v2962_v6 = vld [vmem:[%s3943_s1 + $0x8c0] ss:$8 sps:$4 sm:$0xff]  }
  0xf2   :  { %2140 = vmatprep.subr.bf16.mxu1 %v2903_v7  ;;  %v2967_v7 = vld [vmem:[%s3943_s1 + $0x8d4] ss:$8 sps:$4 sm:$0xff]  }
  0xf3   :  { %2100 = vmatpush1.bf16.msra.mxu0 %v2898_v8  ;;  %v2965_v8 = vld [vmem:[%s3943_s1 + $0x8d0] ss:$8 sps:$4 sm:$0xff]  }
  0xf4   :  { %2101 = vmatprep.subr.bf16.mxu0 %v2906_v9  ;;  %v2970_v9 = vld [vmem:[%s3943_s1 + $0x8e4] ss:$8 sps:$4 sm:$0xff]  }
  0xf5   :  { %2141 = vmatpush1.bf16.msra.mxu1 %v2901_v10  ;;  %v2968_v10 = vld [vmem:[%s3943_s1 + $0x8e0] ss:$8 sps:$4 sm:$0xff]  }
  0xf6   :  { %2142 = vmatprep.subr.bf16.mxu1 %v2909_v11  ;;  %v2973_v11 = vld [vmem:[%s3943_s1 + $0x8f4] ss:$8 sps:$4 sm:$0xff]  }
  0xf7   :  { %2102 = vmatpush1.bf16.msra.mxu0 %v2904_v12  ;;  %v2971_v12 = vld [vmem:[%s3943_s1 + $0x8f0] ss:$8 sps:$4 sm:$0xff]  }
  0xf8   :  { %2103 = vmatprep.subr.bf16.mxu0 %v2912_v13  ;;  %v2234_v13 = vcombine.low %v3828_v25, %v3828_v25 }
  0xf9   :  { %2143 = vmatpush1.bf16.msra.mxu1 %v2907_v14 }
  0xfa   :  { %2144 = vmatprep.subr.bf16.mxu1 %v2915_v15 }
  0xfb   :  { %2104 = vmatpush1.bf16.msra.mxu0 %v2910_v18 }
  0xfc   :  { %2105 = vmatprep.subr.bf16.mxu0 %v2918_v19 }
  0xfd   :  { %2145 = vmatpush1.bf16.msra.mxu1 %v2913_v20 }
  0xfe   :  { %2146 = vmatprep.subr.bf16.mxu1 %v2921_v23 }
  0xff   :  { %2106 = vmatpush1.bf16.msra.mxu0 %v2916_v24 }
 0x100   :  { %2157 = vmatprep.subr.bf16.mxu0 %v2926_v17 }
 0x101   :  { %2147 = vmatpush1.bf16.msra.mxu1 %v2919_v26 }
 0x102   :  { %2108 = vmatmul.mubr.bf16.vlgmr.msra.gmra.mrb[12].mxu0 %v2230_v27 }
 0x103   :  { %2158 = vmatpush1.bf16.msra.mxu0 %v2924_v28  ;;  %2189 = vmatprep.mubr.bf16.mxu0 %v2235_v21 }
 0x104   :  { %2149 = vmatmul.mubr.bf16.vlgmr.msra.gmra.mrb[12].mxu1 %v2232_v29  ;;  %2159 = vmatprep.subr.bf16.mxu0 %v2931_v30 }
 0x107   :  { %2160 = vmatpush1.bf16.msra.mxu0 %v2929_v16 }
 0x108   :  { %2161 = vmatprep.subr.bf16.mxu0 %v2934_v31 }
 0x10b   :  { %2162 = vmatpush1.bf16.msra.mxu0 %v2932_v22 }
 0x10c   :  { %2163 = vmatprep.subr.bf16.mxu0 %v2937_v33 }
 0x10f   :  { %2164 = vmatpush1.bf16.msra.mxu0 %v2935_v35 }
 0x110   :  { %2165 = vmatprep.subr.bf16.mxu0 %v2940_v36 }
 0x113   :  { %2166 = vmatpush1.bf16.msra.mxu0 %v2938_v38 }
 0x114   :  { %2167 = vmatprep.subr.bf16.mxu0 %v2943_v41 }
 0x115   :  { %v1863_v46 = vpop.f32.mrb[0].mxu0 }
 0x116   :  { %v1864_v47 = vadd.f32 %v1863_v46, %v319_v42  ;;  %v1865_v48 = vpop.f32.mrb[1].mxu0  ;;  %v1904_v51 = vpop.f32.mrb[0].mxu1 }
 0x117   :  { %v1866_v49 = vadd.f32 %v1865_v48, %v323_v43  ;;  %v1867_v50 = vpop.f32.mrb[2].mxu0  ;;  %2168 = vmatpush1.bf16.msra.mxu0 %v2941_v44  ;;  %v1906_v55 = vpop.f32.mrb[1].mxu1 }
 0x118   :  { %v1905_v53 = vadd.f32 %v1904_v51, %v1864_v47  ;;  %v1868_v54 = vpop.f32.mrb[3].mxu0  ;;  %2169 = vmatprep.subr.bf16.mxu0 %v2946_v45  ;;  %v1908_v58 = vpop.f32.mrb[2].mxu1  ;;  %v2198_v50 = vld [vmem:[%s3946_s3] sm:$0xff] }
 0x119   :  { %v1907_v57 = vadd.f32 %v1906_v55, %v1866_v49  ;;  %v1909_v59 = vpop.f32.mrb[3].mxu1  ;;  %v2199_v51 = vunpack.c.l.bf16 %v2198_v50 }
 0x11b   :  { %2170 = vmatpush1.bf16.msra.mxu0 %v2944_v52 }
 0x11c   :  { %2171 = vmatprep.subr.bf16.mxu0 %v2949_v56 }
 0x11f   :  { %2172 = vmatpush1.bf16.msra.mxu0 %v2947_v60 }
 0x120   :  { %2173 = vmatprep.subr.bf16.mxu0 %v2952_v61 }
 0x123   :  { %2174 = vmatpush1.bf16.msra.mxu0 %v2950_v62 }
 0x124   :  { %2175 = vmatprep.subr.bf16.mxu0 %v2955_v63 }
 0x127   :  { %2176 = vmatpush1.bf16.msra.mxu0 %v2953_v0 }
 0x128   :  { %2177 = vmatprep.subr.bf16.mxu0 %v2958_v1 }
 0x12b   :  { %2178 = vmatpush1.bf16.msra.mxu0 %v2956_v2 }
 0x12c   :  { %2179 = vmatprep.subr.bf16.mxu0 %v2961_v3 }
 0x12f   :  { %2180 = vmatpush1.bf16.msra.mxu0 %v2959_v4 }
 0x130   :  { %2181 = vmatprep.subr.bf16.mxu0 %v2964_v5 }
 0x133   :  { %2182 = vmatpush1.bf16.msra.mxu0 %v2962_v6 }
 0x134   :  { %2183 = vmatprep.subr.bf16.mxu0 %v2967_v7 }
 0x137   :  { %2184 = vmatpush1.bf16.msra.mxu0 %v2965_v8 }
 0x138   :  { %2185 = vmatprep.subr.bf16.mxu0 %v2970_v9 }
 0x13b   :  { %2186 = vmatpush1.bf16.msra.mxu0 %v2968_v10 }
 0x13c   :  { %2187 = vmatprep.subr.bf16.mxu0 %v2973_v11 }
 0x13f   :  { %2188 = vmatpush1.bf16.msra.mxu0 %v2971_v12 }
 0x142   :  { %2190 = vmatmul.mubr.bf16.vlgmr.msra.gmra.mrb[16].mxu0 %v2234_v13 }
 0x155   :  { %v1945_v14 = vpop.f32.mrb[4].mxu0 }
 0x156   :  { %v1946_v15 = vadd.f32 %v1945_v14, %v1905_v53  ;;  %v1947_v18 = vpop.f32.mrb[5].mxu0  ;;  %v1986_v23 = vpop.f32.mrb[4].mxu1  ;;  %v2200_v53 = vunpack.c.h.bf16 %v2198_v50 }
 0x157   :  { %v1948_v19 = vadd.f32 %v1947_v18, %v1907_v57  ;;  %v1949_v20 = vpop.f32.mrb[6].mxu0  ;;  %v1988_v26 = vpop.f32.mrb[5].mxu1 }
 0x158   :  { %v1987_v24 = vadd.f32 %v1986_v23, %v1946_v15  ;;  %v1950_v17 = vpop.f32.mrb[7].mxu0  ;;  %v1990_v28 = vpop.f32.mrb[6].mxu1 }
 0x159   :  { %v1989_v27 = vadd.f32 %v1988_v26, %v1948_v19  ;;  %v1991_v21 = vpop.f32.mrb[7].mxu1 }
 0x195   :  { %v2027_v29 = vpop.f32.mrb[8].mxu0 }
 0x196   :  { %v2028_v30 = vadd.f32 %v2027_v29, %v1987_v24  ;;  %v2029_v16 = vpop.f32.mrb[9].mxu0 }
 0x197   :  { %v2030_v31 = vadd.f32 %v2029_v16, %v1989_v27  ;;  %v2031_v32 = vpop.f32.mrb[10].mxu0  ;;  %v2068_v25 = vpop.f32.mrb[8].mxu1 }
 0x198   :  { %v2069_v22 = vadd.f32 %v2068_v25, %v2028_v30  ;;  %v2032_v33 = vpop.f32.mrb[11].mxu0  ;;  %v2070_v34 = vpop.f32.mrb[9].mxu1 }
 0x199   :  { %v2071_v35 = vadd.f32 %v2070_v34, %v2030_v31  ;;  %v2072_v36 = vpop.f32.mrb[10].mxu1 }
 0x19a   :  { %v2073_v37 = vpop.f32.mrb[11].mxu1 }
 0x1d5   :  { %v2109_v38 = vpop.f32.mrb[12].mxu0 }
 0x1d6   :  { %v2110_v39 = vadd.f32 %v2109_v38, %v2069_v22  ;;  %v2111_v40 = vpop.f32.mrb[13].mxu0 }
 0x1d7   :  { %v2112_v41 = vadd.f32 %v2111_v40, %v2071_v35  ;;  %v2113_v42 = vpop.f32.mrb[14].mxu0  ;;  %v2150_v43 = vpop.f32.mrb[12].mxu1 }
 0x1d8   :  { %v2151_v44 = vadd.f32 %v2150_v43, %v2110_v39  ;;  %v2114_v45 = vpop.f32.mrb[15].mxu0  ;;  %v2152_v46 = vpop.f32.mrb[13].mxu1 }
 0x1d9   :  { %v2153_v47 = vadd.f32 %v2152_v46, %v2112_v41  ;;  %v2154_v48 = vpop.f32.mrb[14].mxu1 }
 0x1da   :  { %v2155_v49 = vpop.f32.mrb[15].mxu1 }
 0x215   :  { %v2191_v52 = vpop.f32.mrb[16].mxu0 }
 0x216   :  { %v2192_v54 = vadd.f32 %v2191_v52, %v2151_v44  ;;  %v2193_v55 = vpop.f32.mrb[17].mxu0 }
 0x217   :  { %v2194_v56 = vadd.f32 %v2193_v55, %v2153_v47  ;;  %v2195_v57 = vpop.f32.mrb[18].mxu0 }
 0x218   :  { %v2201_v58 = vadd.f32 %v2199_v51, %v2192_v54  ;;  %v2196_v59 = vpop.f32.mrb[19].mxu0 }
 0x219   :  { %v2202_v60 = vadd.f32 %v2200_v53, %v2194_v56 }
 0x21a   :  { %v2203_v61 = vmax.f32 %v2201_v58, 0.0 }
 0x21b   :  { %v2204_v62 = vmax.f32 %v2202_v60, 0.0 }
 0x21d   :  { %v2525_v63 = vpack.c.bf16 %v2204_v62, %v2203_v61 }
 0x21f   :  { %2213 = vst [vmem:[%s3947_s4] sm:$0xff] %v2525_v63 }

// kernel: _lambda_.24
= control target key start
LH: loop header
LB: loop body
LE: loop exit
PB: predicated region body
PF: predicated region fallthrough
CT: control target
= control target key end

     0   :  { %s3959_s1 = inlined_call_operand.vmem [shape: bf16[2304,256], index: 1, kind: input, shape index: {}]   ;;  %s3960_s0 = inlined_call_operand.vmem [shape: bf16[8,2304], index: 0, kind: input, shape index: {}]   ;;  %s3961_s2 = inlined_call_operand.vmem [shape: f32[1,256], index: 2, kind: input, shape index: {}]   ;;  %s3962_s3 = inlined_call_operand.vmem [shape: bf16[8,256], index: 3, kind: output, shape index: {}]  }
   0x1   :  { %v2550_v0 = vld [vmem:[%s3959_s1 + $0x4] ss:$8 sps:$4 sm:$0xff]   ;;  %v2554_v2 = vld [vmem:[%s3959_s1] ss:$8 sps:$4 sm:$0xff]   ;;  %v2556_v4 = vld [vmem:[%s3959_s1 + $0x14] ss:$8 sps:$4 sm:$0xff]  }
   0x2   :  { %v2552_v1 = vld [vmem:[%s3959_s1 + $0x404] ss:$8 sps:$4 sm:$0xff]   ;;  %1826 = vmatprep.subr.bf16.mxu1 %v2550_v0  ;;  %v2555_v3 = vld [vmem:[%s3959_s1 + $0x400] ss:$8 sps:$4 sm:$0xff]   ;;  %v2558_v5 = vld [vmem:[%s3959_s1 + $0x414] ss:$8 sps:$4 sm:$0xff]  }
   0x3   :  { %1990 = vmatprep.subr.bf16.mxu0 %v2552_v1  ;;  %1827 = vmatpush1.bf16.msra.mxu1 %v2554_v2  ;;  %v2560_v6 = vld [vmem:[%s3959_s1 + $0x10] ss:$8 sps:$4 sm:$0xff]   ;;  %v2562_v8 = vld [vmem:[%s3959_s1 + $0x24] ss:$8 sps:$4 sm:$0xff]   ;;  %v2566_v10 = vld [vmem:[%s3959_s1 + $0x20] ss:$8 sps:$4 sm:$0xff]  }
   0x4   :  { %1991 = vmatpush1.bf16.msra.mxu0 %v2555_v3  ;;  %1828 = vmatprep.subr.bf16.mxu1 %v2556_v4  ;;  %v2561_v7 = vld [vmem:[%s3959_s1 + $0x410] ss:$8 sps:$4 sm:$0xff]   ;;  %v2564_v9 = vld [vmem:[%s3959_s1 + $0x424] ss:$8 sps:$4 sm:$0xff]   ;;  %v2567_v11 = vld [vmem:[%s3959_s1 + $0x420] ss:$8 sps:$4 sm:$0xff]  }
   0x5   :  { %1992 = vmatprep.subr.bf16.mxu0 %v2558_v5  ;;  %v2568_v12 = vld [vmem:[%s3959_s1 + $0x34] ss:$8 sps:$4 sm:$0xff]   ;;  %v2572_v14 = vld [vmem:[%s3959_s1 + $0x30] ss:$8 sps:$4 sm:$0xff]   ;;  %v2574_v16 = vld [vmem:[%s3959_s1 + $0x44] ss:$8 sps:$4 sm:$0xff]  }
   0x6   :  { %v2570_v13 = vld [vmem:[%s3959_s1 + $0x434] ss:$8 sps:$4 sm:$0xff]   ;;  %v2573_v15 = vld [vmem:[%s3959_s1 + $0x430] ss:$8 sps:$4 sm:$0xff]   ;;  %v2576_v17 = vld [vmem:[%s3959_s1 + $0x444] ss:$8 sps:$4 sm:$0xff]  }
   0x7   :  { %1829 = vmatpush1.bf16.msra.mxu1 %v2560_v6  ;;  %v2578_v18 = vld [vmem:[%s3959_s1 + $0x40] ss:$8 sps:$4 sm:$0xff]   ;;  %v2580_v20 = vld [vmem:[%s3959_s1 + $0x54] ss:$8 sps:$4 sm:$0xff]   ;;  %v2584_v22 = vld [vmem:[%s3959_s1 + $0x50] ss:$8 sps:$4 sm:$0xff]  }
   0x8   :  { %1993 = vmatpush1.bf16.msra.mxu0 %v2561_v7  ;;  %1830 = vmatprep.subr.bf16.mxu1 %v2562_v8  ;;  %v2579_v19 = vld [vmem:[%s3959_s1 + $0x440] ss:$8 sps:$4 sm:$0xff]   ;;  %v2582_v21 = vld [vmem:[%s3959_s1 + $0x454] ss:$8 sps:$4 sm:$0xff]   ;;  %v2585_v23 = vld [vmem:[%s3959_s1 + $0x450] ss:$8 sps:$4 sm:$0xff]  }
   0x9   :  { %1994 = vmatprep.subr.bf16.mxu0 %v2564_v9  ;;  %v2586_v24 = vld [vmem:[%s3959_s1 + $0x64] ss:$8 sps:$4 sm:$0xff]   ;;  %v2590_v26 = vld [vmem:[%s3959_s1 + $0x60] ss:$8 sps:$4 sm:$0xff]   ;;  %v2592_v28 = vld [vmem:[%s3959_s1 + $0x74] ss:$8 sps:$4 sm:$0xff]  }
   0xa   :  { %v2588_v25 = vld [vmem:[%s3959_s1 + $0x464] ss:$8 sps:$4 sm:$0xff]   ;;  %v2591_v27 = vld [vmem:[%s3959_s1 + $0x460] ss:$8 sps:$4 sm:$0xff]   ;;  %v2594_v29 = vld [vmem:[%s3959_s1 + $0x474] ss:$8 sps:$4 sm:$0xff]  }
   0xb   :  { %1831 = vmatpush1.bf16.msra.mxu1 %v2566_v10  ;;  %v2596_v30 = vld [vmem:[%s3959_s1 + $0x70] ss:$8 sps:$4 sm:$0xff]   ;;  %v2598_v32 = vld [vmem:[%s3959_s1 + $0x84] ss:$8 sps:$4 sm:$0xff]   ;;  %v2602_v34 = vld [vmem:[%s3959_s1 + $0x80] ss:$8 sps:$4 sm:$0xff]  }
   0xc   :  { %1995 = vmatpush1.bf16.msra.mxu0 %v2567_v11  ;;  %1832 = vmatprep.subr.bf16.mxu1 %v2568_v12  ;;  %v2597_v31 = vld [vmem:[%s3959_s1 + $0x470] ss:$8 sps:$4 sm:$0xff]   ;;  %v2600_v33 = vld [vmem:[%s3959_s1 + $0x484] ss:$8 sps:$4 sm:$0xff]   ;;  %v2603_v35 = vld [vmem:[%s3959_s1 + $0x480] ss:$8 sps:$4 sm:$0xff]  }
   0xd   :  { %1996 = vmatprep.subr.bf16.mxu0 %v2570_v13  ;;  %v2604_v36 = vld [vmem:[%s3959_s1 + $0x94] ss:$8 sps:$4 sm:$0xff]   ;;  %v2608_v38 = vld [vmem:[%s3959_s1 + $0x90] ss:$8 sps:$4 sm:$0xff]   ;;  %v2610_v40 = vld [vmem:[%s3959_s1 + $0xa4] ss:$8 sps:$4 sm:$0xff]  }
   0xe   :  { %v2606_v37 = vld [vmem:[%s3959_s1 + $0x494] ss:$8 sps:$4 sm:$0xff]   ;;  %v2609_v39 = vld [vmem:[%s3959_s1 + $0x490] ss:$8 sps:$4 sm:$0xff]   ;;  %v2612_v41 = vld [vmem:[%s3959_s1 + $0x4a4] ss:$8 sps:$4 sm:$0xff]  }
   0xf   :  { %1833 = vmatpush1.bf16.msra.mxu1 %v2572_v14  ;;  %v2614_v42 = vld [vmem:[%s3959_s1 + $0xa0] ss:$8 sps:$4 sm:$0xff]   ;;  %v2616_v44 = vld [vmem:[%s3959_s1 + $0xb4] ss:$8 sps:$4 sm:$0xff]   ;;  %v2620_v47 = vld [vmem:[%s3959_s1 + $0xb0] ss:$8 sps:$4 sm:$0xff]  }
  0x10   :  { %1997 = vmatpush1.bf16.msra.mxu0 %v2573_v15  ;;  %1834 = vmatprep.subr.bf16.mxu1 %v2574_v16  ;;  %v2615_v43 = vld [vmem:[%s3959_s1 + $0x4a0] ss:$8 sps:$4 sm:$0xff]   ;;  %v2618_v45 = vld [vmem:[%s3959_s1 + $0x4b4] ss:$8 sps:$4 sm:$0xff]   ;;  %v2621_v49 = vld [vmem:[%s3959_s1 + $0x4b0] ss:$8 sps:$4 sm:$0xff]  }
  0x11   :  { %1998 = vmatprep.subr.bf16.mxu0 %v2576_v17  ;;  %v14_v46 = vld [vmem:[%s3960_s0] sm:$0xff]  ;;  %v2628_v56 = vld [vmem:[%s3959_s1 + $0xd4] ss:$8 sps:$4 sm:$0xff]   ;;  %v2632_v58 = vld [vmem:[%s3959_s1 + $0xd0] ss:$8 sps:$4 sm:$0xff]  }
  0x12   :  { %v2211_v48 = vcombine.high %v14_v46, %v14_v46  ;;  %v18_v50 = vld [vmem:[%s3960_s0 + $0x20] sm:$0xff]  ;;  %v2630_v57 = vld [vmem:[%s3959_s1 + $0x4d4] ss:$8 sps:$4 sm:$0xff]   ;;  %v2633_v59 = vld [vmem:[%s3959_s1 + $0x4d0] ss:$8 sps:$4 sm:$0xff]   ;;  %v2210_v6 = vcombine.low %v14_v46, %v14_v46 }
  0x13   :  { %1835 = vmatpush1.bf16.msra.mxu1 %v2578_v18  ;;  %v2622_v51 = vld [vmem:[%s3959_s1 + $0xc4] ss:$8 sps:$4 sm:$0xff]   ;;  %v2219_v53 = vcombine.high %v18_v50, %v18_v50  ;;  %v2626_v54 = vld [vmem:[%s3959_s1 + $0xc0] ss:$8 sps:$4 sm:$0xff]   ;;  %v2640_v0 = vld [vmem:[%s3959_s1 + $0xf4] ss:$8 sps:$4 sm:$0xff]   ;;  %v2218_v7 = vcombine.low %v18_v50, %v18_v50 }
  0x14   :  { %1999 = vmatpush1.bf16.msra.mxu0 %v2579_v19  ;;  %1836 = vmatprep.subr.bf16.mxu1 %v2580_v20  ;;  %v2624_v52 = vld [vmem:[%s3959_s1 + $0x4c4] ss:$8 sps:$4 sm:$0xff]   ;;  %v2627_v55 = vld [vmem:[%s3959_s1 + $0x4c0] ss:$8 sps:$4 sm:$0xff]   ;;  %v2642_v1 = vld [vmem:[%s3959_s1 + $0x4f4] ss:$8 sps:$4 sm:$0xff]  }
  0x15   :  { %2000 = vmatprep.subr.bf16.mxu0 %v2582_v21  ;;  %1858 = vmatprep.mubr.bf16.mxu1 %v2211_v48  ;;  %v2634_v60 = vld [vmem:[%s3959_s1 + $0xe4] ss:$8 sps:$4 sm:$0xff]   ;;  %v2638_v62 = vld [vmem:[%s3959_s1 + $0xe0] ss:$8 sps:$4 sm:$0xff]   ;;  %v2644_v2 = vld [vmem:[%s3959_s1 + $0xf0] ss:$8 sps:$4 sm:$0xff]  }
  0x16   :  { %2022 = vmatprep.mubr.bf16.mxu0 %v2219_v53  ;;  %v2636_v61 = vld [vmem:[%s3959_s1 + $0x4e4] ss:$8 sps:$4 sm:$0xff]   ;;  %v2639_v63 = vld [vmem:[%s3959_s1 + $0x4e0] ss:$8 sps:$4 sm:$0xff]   ;;  %v2645_v3 = vld [vmem:[%s3959_s1 + $0x4f0] ss:$8 sps:$4 sm:$0xff]  }
  0x17   :  { %1837 = vmatpush1.bf16.msra.mxu1 %v2584_v22  ;;  %v2650_v4 = vld [vmem:[%s3959_s1 + $0x104] ss:$8 sps:$4 sm:$0xff]   ;;  %v2648_v8 = vld [vmem:[%s3959_s1 + $0x100] ss:$8 sps:$4 sm:$0xff]   ;;  %v2658_v10 = vld [vmem:[%s3959_s1 + $0x114] ss:$8 sps:$4 sm:$0xff]  }
  0x18   :  { %2001 = vmatpush1.bf16.msra.mxu0 %v2585_v23  ;;  %1838 = vmatprep.subr.bf16.mxu1 %v2586_v24  ;;  %v2655_v5 = vld [vmem:[%s3959_s1 + $0x504] ss:$8 sps:$4 sm:$0xff]   ;;  %v2653_v9 = vld [vmem:[%s3959_s1 + $0x500] ss:$8 sps:$4 sm:$0xff]   ;;  %v2661_v11 = vld [vmem:[%s3959_s1 + $0x514] ss:$8 sps:$4 sm:$0xff]  }
  0x19   :  { %2002 = vmatprep.subr.bf16.mxu0 %v2588_v25  ;;  %v2656_v12 = vld [vmem:[%s3959_s1 + $0x110] ss:$8 sps:$4 sm:$0xff]   ;;  %v2664_v14 = vld [vmem:[%s3959_s1 + $0x124] ss:$8 sps:$4 sm:$0xff]   ;;  %v2662_v16 = vld [vmem:[%s3959_s1 + $0x120] ss:$8 sps:$4 sm:$0xff]  }
  0x1a   :  { %v2659_v13 = vld [vmem:[%s3959_s1 + $0x510] ss:$8 sps:$4 sm:$0xff]   ;;  %v2667_v15 = vld [vmem:[%s3959_s1 + $0x524] ss:$8 sps:$4 sm:$0xff]   ;;  %v2665_v17 = vld [vmem:[%s3959_s1 + $0x520] ss:$8 sps:$4 sm:$0xff]  }
  0x1b   :  { %1839 = vmatpush1.bf16.msra.mxu1 %v2590_v26  ;;  %v2670_v18 = vld [vmem:[%s3959_s1 + $0x134] ss:$8 sps:$4 sm:$0xff]   ;;  %v2668_v20 = vld [vmem:[%s3959_s1 + $0x130] ss:$8 sps:$4 sm:$0xff]   ;;  %v2676_v22 = vld [vmem:[%s3959_s1 + $0x144] ss:$8 sps:$4 sm:$0xff]  }
  0x1c   :  { %2003 = vmatpush1.bf16.msra.mxu0 %v2591_v27  ;;  %1840 = vmatprep.subr.bf16.mxu1 %v2592_v28  ;;  %v2673_v19 = vld [vmem:[%s3959_s1 + $0x534] ss:$8 sps:$4 sm:$0xff]   ;;  %v2671_v21 = vld [vmem:[%s3959_s1 + $0x530] ss:$8 sps:$4 sm:$0xff]   ;;  %v2679_v23 = vld [vmem:[%s3959_s1 + $0x544] ss:$8 sps:$4 sm:$0xff]  }
  0x1d   :  { %2004 = vmatprep.subr.bf16.mxu0 %v2594_v29  ;;  %v2674_v24 = vld [vmem:[%s3959_s1 + $0x140] ss:$8 sps:$4 sm:$0xff]   ;;  %v2682_v26 = vld [vmem:[%s3959_s1 + $0x154] ss:$8 sps:$4 sm:$0xff]   ;;  %v2680_v28 = vld [vmem:[%s3959_s1 + $0x150] ss:$8 sps:$4 sm:$0xff]  }
  0x1e   :  { %v2677_v25 = vld [vmem:[%s3959_s1 + $0x540] ss:$8 sps:$4 sm:$0xff]   ;;  %v2685_v27 = vld [vmem:[%s3959_s1 + $0x554] ss:$8 sps:$4 sm:$0xff]   ;;  %v2683_v29 = vld [vmem:[%s3959_s1 + $0x550] ss:$8 sps:$4 sm:$0xff]  }
  0x1f   :  { %1841 = vmatpush1.bf16.msra.mxu1 %v2596_v30  ;;  %v2688_v30 = vld [vmem:[%s3959_s1 + $0x164] ss:$8 sps:$4 sm:$0xff]   ;;  %v2706_v46 = vld [vmem:[%s3959_s1 + $0x194] ss:$8 sps:$4 sm:$0xff]   ;;  %v2704_v48 = vld [vmem:[%s3959_s1 + $0x190] ss:$8 sps:$4 sm:$0xff]  }
  0x20   :  { %2005 = vmatpush1.bf16.msra.mxu0 %v2597_v31  ;;  %1842 = vmatprep.subr.bf16.mxu1 %v2598_v32  ;;  %v2691_v31 = vld [vmem:[%s3959_s1 + $0x564] ss:$8 sps:$4 sm:$0xff]   ;;  %v2713_v53 = vld [vmem:[%s3959_s1 + $0x5a0] ss:$8 sps:$4 sm:$0xff]  }
  0x21   :  { %2006 = vmatprep.subr.bf16.mxu0 %v2600_v33  ;;  %v3299_v32 = vld [vmem:[%s3960_s0 + $0x8] sm:$0xff] }
  0x22   :  { %v2686_v33 = vld [vmem:[%s3959_s1 + $0x160] ss:$8 sps:$4 sm:$0xff]   ;;  %v2712_v50 = vld [vmem:[%s3959_s1 + $0x1a4] ss:$8 sps:$4 sm:$0xff]  }
  0x23   :  { %1843 = vmatpush1.bf16.msra.mxu1 %v2602_v34  ;;  %v2689_v34 = vld [vmem:[%s3959_s1 + $0x560] ss:$8 sps:$4 sm:$0xff]  }
  0x24   :  { %2007 = vmatpush1.bf16.msra.mxu0 %v2603_v35  ;;  %1844 = vmatprep.subr.bf16.mxu1 %v2604_v36  ;;  %v2213_v35 = vcombine.high %v3299_v32, %v3299_v32  ;;  %v3312_v36 = vld [vmem:[%s3960_s0 + $0x28] sm:$0xff] }
  0x25   :  { %2008 = vmatprep.subr.bf16.mxu0 %v2606_v37  ;;  %v2694_v37 = vld [vmem:[%s3959_s1 + $0x174] ss:$8 sps:$4 sm:$0xff]  }
  0x27   :  { %1845 = vmatpush1.bf16.msra.mxu1 %v2608_v38  ;;  %v2221_v38 = vcombine.high %v3312_v36, %v3312_v36 }
  0x28   :  { %2009 = vmatpush1.bf16.msra.mxu0 %v2609_v39  ;;  %1846 = vmatprep.subr.bf16.mxu1 %v2610_v40  ;;  %v2697_v39 = vld [vmem:[%s3959_s1 + $0x574] ss:$8 sps:$4 sm:$0xff]   ;;  %v2692_v40 = vld [vmem:[%s3959_s1 + $0x170] ss:$8 sps:$4 sm:$0xff]  }
  0x29   :  { %2010 = vmatprep.subr.bf16.mxu0 %v2612_v41  ;;  %v2695_v41 = vld [vmem:[%s3959_s1 + $0x570] ss:$8 sps:$4 sm:$0xff]  }
  0x2b   :  { %1847 = vmatpush1.bf16.msra.mxu1 %v2614_v42  ;;  %v2700_v42 = vld [vmem:[%s3959_s1 + $0x184] ss:$8 sps:$4 sm:$0xff]  }
  0x2c   :  { %2011 = vmatpush1.bf16.msra.mxu0 %v2615_v43  ;;  %1848 = vmatprep.subr.bf16.mxu1 %v2616_v44  ;;  %v2703_v43 = vld [vmem:[%s3959_s1 + $0x584] ss:$8 sps:$4 sm:$0xff]   ;;  %v2698_v44 = vld [vmem:[%s3959_s1 + $0x180] ss:$8 sps:$4 sm:$0xff]  }
  0x2d   :  { %2012 = vmatprep.subr.bf16.mxu0 %v2618_v45  ;;  %v2701_v45 = vld [vmem:[%s3959_s1 + $0x580] ss:$8 sps:$4 sm:$0xff]  }
  0x2f   :  { %1849 = vmatpush1.bf16.msra.mxu1 %v2620_v47  ;;  %v2709_v47 = vld [vmem:[%s3959_s1 + $0x594] ss:$8 sps:$4 sm:$0xff]  }
  0x30   :  { %2013 = vmatpush1.bf16.msra.mxu0 %v2621_v49  ;;  %1850 = vmatprep.subr.bf16.mxu1 %v2622_v51  ;;  %v2707_v49 = vld [vmem:[%s3959_s1 + $0x590] ss:$8 sps:$4 sm:$0xff]   ;;  %v2715_v51 = vld [vmem:[%s3959_s1 + $0x5a4] ss:$8 sps:$4 sm:$0xff]  }
  0x31   :  { %2014 = vmatprep.subr.bf16.mxu0 %v2624_v52  ;;  %v2710_v52 = vld [vmem:[%s3959_s1 + $0x1a0] ss:$8 sps:$4 sm:$0xff]  }
  0x33   :  { %1851 = vmatpush1.bf16.msra.mxu1 %v2626_v54  ;;  %v2718_v54 = vld [vmem:[%s3959_s1 + $0x1b4] ss:$8 sps:$4 sm:$0xff]  }
  0x34   :  { %2015 = vmatpush1.bf16.msra.mxu0 %v2627_v55  ;;  %1852 = vmatprep.subr.bf16.mxu1 %v2628_v56  ;;  %v2721_v55 = vld [vmem:[%s3959_s1 + $0x5b4] ss:$8 sps:$4 sm:$0xff]   ;;  %v2716_v56 = vld [vmem:[%s3959_s1 + $0x1b0] ss:$8 sps:$4 sm:$0xff]  }
  0x35   :  { %2016 = vmatprep.subr.bf16.mxu0 %v2630_v57  ;;  %v2719_v57 = vld [vmem:[%s3959_s1 + $0x5b0] ss:$8 sps:$4 sm:$0xff]  }
  0x37   :  { %1853 = vmatpush1.bf16.msra.mxu1 %v2632_v58  ;;  %v2724_v58 = vld [vmem:[%s3959_s1 + $0x1c4] ss:$8 sps:$4 sm:$0xff]  }
  0x38   :  { %2017 = vmatpush1.bf16.msra.mxu0 %v2633_v59  ;;  %1854 = vmatprep.subr.bf16.mxu1 %v2634_v60  ;;  %v2727_v59 = vld [vmem:[%s3959_s1 + $0x5c4] ss:$8 sps:$4 sm:$0xff]   ;;  %v2722_v60 = vld [vmem:[%s3959_s1 + $0x1c0] ss:$8 sps:$4 sm:$0xff]  }
  0x39   :  { %2018 = vmatprep.subr.bf16.mxu0 %v2636_v61  ;;  %v2725_v61 = vld [vmem:[%s3959_s1 + $0x5c0] ss:$8 sps:$4 sm:$0xff]  }
  0x3b   :  { %1855 = vmatpush1.bf16.msra.mxu1 %v2638_v62  ;;  %v2730_v62 = vld [vmem:[%s3959_s1 + $0x1d4] ss:$8 sps:$4 sm:$0xff]  }
  0x3c   :  { %2019 = vmatpush1.bf16.msra.mxu0 %v2639_v63  ;;  %1856 = vmatprep.subr.bf16.mxu1 %v2640_v0  ;;  %v2733_v63 = vld [vmem:[%s3959_s1 + $0x5d4] ss:$8 sps:$4 sm:$0xff]   ;;  %v2728_v0 = vld [vmem:[%s3959_s1 + $0x1d0] ss:$8 sps:$4 sm:$0xff]  }
  0x3d   :  { %2020 = vmatprep.subr.bf16.mxu0 %v2642_v1  ;;  %v2731_v1 = vld [vmem:[%s3959_s1 + $0x5d0] ss:$8 sps:$4 sm:$0xff]  }
  0x3f   :  { %1857 = vmatpush1.bf16.msra.mxu1 %v2644_v2  ;;  %v2736_v2 = vld [vmem:[%s3959_s1 + $0x1e4] ss:$8 sps:$4 sm:$0xff]  }
  0x40   :  { %2021 = vmatpush1.bf16.msra.mxu0 %v2645_v3  ;;  %1867 = vmatprep.subr.bf16.mxu1 %v2650_v4  ;;  %v2739_v3 = vld [vmem:[%s3959_s1 + $0x5e4] ss:$8 sps:$4 sm:$0xff]   ;;  %v2734_v4 = vld [vmem:[%s3959_s1 + $0x1e0] ss:$8 sps:$4 sm:$0xff]  }
  0x41   :  { %2031 = vmatprep.subr.bf16.mxu0 %v2655_v5  ;;  %v2737_v5 = vld [vmem:[%s3959_s1 + $0x5e0] ss:$8 sps:$4 sm:$0xff]  }
  0x42   :  { %1859 = vmatmul.mubr.bf16.vlgmr.msra.gmra.mrb[0].mxu1 %v2210_v6  ;;  %v2742_v6 = vld [vmem:[%s3959_s1 + $0x1f4] ss:$8 sps:$4 sm:$0xff]  }
  0x43   :  { %2023 = vmatmul.mubr.bf16.vlgmr.msra.gmra.mrb[0].mxu0 %v2218_v7  ;;  %1868 = vmatpush1.bf16.msra.mxu1 %v2648_v8  ;;  %v2745_v7 = vld [vmem:[%s3959_s1 + $0x5f4] ss:$8 sps:$4 sm:$0xff]   ;;  %v2740_v8 = vld [vmem:[%s3959_s1 + $0x1f0] ss:$8 sps:$4 sm:$0xff]  }
  0x44   :  { %2032 = vmatpush1.bf16.msra.mxu0 %v2653_v9  ;;  %1869 = vmatprep.subr.bf16.mxu1 %v2658_v10  ;;  %v2743_v9 = vld [vmem:[%s3959_s1 + $0x5f0] ss:$8 sps:$4 sm:$0xff]   ;;  %v2750_v10 = vld [vmem:[%s3959_s1 + $0x204] ss:$8 sps:$4 sm:$0xff]  }
  0x45   :  { %2033 = vmatprep.subr.bf16.mxu0 %v2661_v11  ;;  %1899 = vmatprep.mubr.bf16.mxu1 %v2213_v35  ;;  %v2755_v11 = vld [vmem:[%s3959_s1 + $0x604] ss:$8 sps:$4 sm:$0xff]   ;;  %v2777_v35 = vld [vmem:[%s3959_s1 + $0x640] ss:$8 sps:$4 sm:$0xff]  }
  0x46   :  { %2063 = vmatprep.mubr.bf16.mxu0 %v2221_v38  ;;  %v2780_v38 = vld [vmem:[%s3959_s1 + $0x250] ss:$8 sps:$4 sm:$0xff]  }
  0x47   :  { %1870 = vmatpush1.bf16.msra.mxu1 %v2656_v12  ;;  %v2212_v12 = vcombine.low %v3299_v32, %v3299_v32  ;;  %v2776_v32 = vld [vmem:[%s3959_s1 + $0x244] ss:$8 sps:$4 sm:$0xff]  }
  0x48   :  { %2034 = vmatpush1.bf16.msra.mxu0 %v2659_v13  ;;  %1871 = vmatprep.subr.bf16.mxu1 %v2664_v14  ;;  %v2748_v13 = vld [vmem:[%s3959_s1 + $0x200] ss:$8 sps:$4 sm:$0xff]   ;;  %v2220_v14 = vcombine.low %v3312_v36, %v3312_v36  ;;  %v2782_v36 = vld [vmem:[%s3959_s1 + $0x254] ss:$8 sps:$4 sm:$0xff]  }
  0x49   :  { %2035 = vmatprep.subr.bf16.mxu0 %v2667_v15  ;;  %v2753_v15 = vld [vmem:[%s3959_s1 + $0x600] ss:$8 sps:$4 sm:$0xff]  }
  0x4b   :  { %1872 = vmatpush1.bf16.msra.mxu1 %v2662_v16  ;;  %v2758_v16 = vld [vmem:[%s3959_s1 + $0x214] ss:$8 sps:$4 sm:$0xff]  }
  0x4c   :  { %2036 = vmatpush1.bf16.msra.mxu0 %v2665_v17  ;;  %1873 = vmatprep.subr.bf16.mxu1 %v2670_v18  ;;  %v2761_v17 = vld [vmem:[%s3959_s1 + $0x614] ss:$8 sps:$4 sm:$0xff]  }
  0x4d   :  { %2037 = vmatprep.subr.bf16.mxu0 %v2673_v19  ;;  %v3449_v18 = vld [vmem:[%s3960_s0 + $0x10] sm:$0xff] }
  0x4e   :  { %v2215_v19 = vcombine.high %v3449_v18, %v3449_v18 }
  0x4f   :  { %1874 = vmatpush1.bf16.msra.mxu1 %v2668_v20  ;;  %v3456_v20 = vld [vmem:[%s3960_s0 + $0x30] sm:$0xff] }
  0x50   :  { %2038 = vmatpush1.bf16.msra.mxu0 %v2671_v21  ;;  %1875 = vmatprep.subr.bf16.mxu1 %v2676_v22  ;;  %v2756_v21 = vld [vmem:[%s3959_s1 + $0x210] ss:$8 sps:$4 sm:$0xff]  }
  0x51   :  { %2039 = vmatprep.subr.bf16.mxu0 %v2679_v23  ;;  %v2759_v22 = vld [vmem:[%s3959_s1 + $0x610] ss:$8 sps:$4 sm:$0xff]   ;;  %v2223_v23 = vcombine.high %v3456_v20, %v3456_v20 }
  0x53   :  { %1876 = vmatpush1.bf16.msra.mxu1 %v2674_v24  ;;  %v2764_v24 = vld [vmem:[%s3959_s1 + $0x224] ss:$8 sps:$4 sm:$0xff]  }
  0x54   :  { %2040 = vmatpush1.bf16.msra.mxu0 %v2677_v25  ;;  %1877 = vmatprep.subr.bf16.mxu1 %v2682_v26  ;;  %v2767_v25 = vld [vmem:[%s3959_s1 + $0x624] ss:$8 sps:$4 sm:$0xff]   ;;  %v2762_v26 = vld [vmem:[%s3959_s1 + $0x220] ss:$8 sps:$4 sm:$0xff]  }
  0x55   :  { %2041 = vmatprep.subr.bf16.mxu0 %v2685_v27  ;;  %v2765_v27 = vld [vmem:[%s3959_s1 + $0x620] ss:$8 sps:$4 sm:$0xff]  }
  0x57   :  { %1878 = vmatpush1.bf16.msra.mxu1 %v2680_v28  ;;  %v2770_v28 = vld [vmem:[%s3959_s1 + $0x234] ss:$8 sps:$4 sm:$0xff]  }
  0x58   :  { %2042 = vmatpush1.bf16.msra.mxu0 %v2683_v29  ;;  %1879 = vmatprep.subr.bf16.mxu1 %v2688_v30  ;;  %v2773_v29 = vld [vmem:[%s3959_s1 + $0x634] ss:$8 sps:$4 sm:$0xff]   ;;  %v2768_v30 = vld [vmem:[%s3959_s1 + $0x230] ss:$8 sps:$4 sm:$0xff]  }
  0x59   :  { %2043 = vmatprep.subr.bf16.mxu0 %v2691_v31  ;;  %v2771_v31 = vld [vmem:[%s3959_s1 + $0x630] ss:$8 sps:$4 sm:$0xff]  }
  0x5b   :  { %1880 = vmatpush1.bf16.msra.mxu1 %v2686_v33  ;;  %v2779_v33 = vld [vmem:[%s3959_s1 + $0x644] ss:$8 sps:$4 sm:$0xff]  }
  0x5c   :  { %2044 = vmatpush1.bf16.msra.mxu0 %v2689_v34  ;;  %1881 = vmatprep.subr.bf16.mxu1 %v2694_v37  ;;  %v2774_v34 = vld [vmem:[%s3959_s1 + $0x240] ss:$8 sps:$4 sm:$0xff]   ;;  %v2785_v37 = vld [vmem:[%s3959_s1 + $0x654] ss:$8 sps:$4 sm:$0xff]  }
  0x5d   :  { %2045 = vmatprep.subr.bf16.mxu0 %v2697_v39  ;;  %v2783_v39 = vld [vmem:[%s3959_s1 + $0x650] ss:$8 sps:$4 sm:$0xff]  }
  0x5f   :  { %1882 = vmatpush1.bf16.msra.mxu1 %v2692_v40  ;;  %v2788_v40 = vld [vmem:[%s3959_s1 + $0x264] ss:$8 sps:$4 sm:$0xff]  }
  0x60   :  { %2046 = vmatpush1.bf16.msra.mxu0 %v2695_v41  ;;  %1883 = vmatprep.subr.bf16.mxu1 %v2700_v42  ;;  %v2791_v41 = vld [vmem:[%s3959_s1 + $0x664] ss:$8 sps:$4 sm:$0xff]   ;;  %v2786_v42 = vld [vmem:[%s3959_s1 + $0x260] ss:$8 sps:$4 sm:$0xff]  }
  0x61   :  { %2047 = vmatprep.subr.bf16.mxu0 %v2703_v43  ;;  %v2789_v43 = vld [vmem:[%s3959_s1 + $0x660] ss:$8 sps:$4 sm:$0xff]  }
  0x63   :  { %1884 = vmatpush1.bf16.msra.mxu1 %v2698_v44  ;;  %v2794_v44 = vld [vmem:[%s3959_s1 + $0x274] ss:$8 sps:$4 sm:$0xff]  }
  0x64   :  { %2048 = vmatpush1.bf16.msra.mxu0 %v2701_v45  ;;  %1885 = vmatprep.subr.bf16.mxu1 %v2706_v46  ;;  %v2797_v45 = vld [vmem:[%s3959_s1 + $0x674] ss:$8 sps:$4 sm:$0xff]   ;;  %v2792_v46 = vld [vmem:[%s3959_s1 + $0x270] ss:$8 sps:$4 sm:$0xff]  }
  0x65   :  { %2049 = vmatprep.subr.bf16.mxu0 %v2709_v47  ;;  %v2795_v47 = vld [vmem:[%s3959_s1 + $0x670] ss:$8 sps:$4 sm:$0xff]  }
  0x67   :  { %1886 = vmatpush1.bf16.msra.mxu1 %v2704_v48  ;;  %v2800_v48 = vld [vmem:[%s3959_s1 + $0x284] ss:$8 sps:$4 sm:$0xff]  }
  0x68   :  { %2050 = vmatpush1.bf16.msra.mxu0 %v2707_v49  ;;  %1887 = vmatprep.subr.bf16.mxu1 %v2712_v50  ;;  %v2803_v49 = vld [vmem:[%s3959_s1 + $0x684] ss:$8 sps:$4 sm:$0xff]   ;;  %v2798_v50 = vld [vmem:[%s3959_s1 + $0x280] ss:$8 sps:$4 sm:$0xff]  }
  0x69   :  { %2051 = vmatprep.subr.bf16.mxu0 %v2715_v51  ;;  %v2801_v51 = vld [vmem:[%s3959_s1 + $0x680] ss:$8 sps:$4 sm:$0xff]  }
  0x6b   :  { %1888 = vmatpush1.bf16.msra.mxu1 %v2710_v52  ;;  %v2806_v52 = vld [vmem:[%s3959_s1 + $0x294] ss:$8 sps:$4 sm:$0xff]  }
  0x6c   :  { %2052 = vmatpush1.bf16.msra.mxu0 %v2713_v53  ;;  %1889 = vmatprep.subr.bf16.mxu1 %v2718_v54  ;;  %v2809_v53 = vld [vmem:[%s3959_s1 + $0x694] ss:$8 sps:$4 sm:$0xff]   ;;  %v2804_v54 = vld [vmem:[%s3959_s1 + $0x290] ss:$8 sps:$4 sm:$0xff]  }
  0x6d   :  { %2053 = vmatprep.subr.bf16.mxu0 %v2721_v55  ;;  %v2807_v55 = vld [vmem:[%s3959_s1 + $0x690] ss:$8 sps:$4 sm:$0xff]  }
  0x6f   :  { %1890 = vmatpush1.bf16.msra.mxu1 %v2716_v56  ;;  %v2812_v56 = vld [vmem:[%s3959_s1 + $0x2a4] ss:$8 sps:$4 sm:$0xff]  }
  0x70   :  { %2054 = vmatpush1.bf16.msra.mxu0 %v2719_v57  ;;  %1891 = vmatprep.subr.bf16.mxu1 %v2724_v58  ;;  %v2815_v57 = vld [vmem:[%s3959_s1 + $0x6a4] ss:$8 sps:$4 sm:$0xff]   ;;  %v2810_v58 = vld [vmem:[%s3959_s1 + $0x2a0] ss:$8 sps:$4 sm:$0xff]  }
  0x71   :  { %2055 = vmatprep.subr.bf16.mxu0 %v2727_v59  ;;  %v2813_v59 = vld [vmem:[%s3959_s1 + $0x6a0] ss:$8 sps:$4 sm:$0xff]  }
  0x73   :  { %1892 = vmatpush1.bf16.msra.mxu1 %v2722_v60  ;;  %v2818_v60 = vld [vmem:[%s3959_s1 + $0x2b4] ss:$8 sps:$4 sm:$0xff]  }
  0x74   :  { %2056 = vmatpush1.bf16.msra.mxu0 %v2725_v61  ;;  %1893 = vmatprep.subr.bf16.mxu1 %v2730_v62  ;;  %v2821_v61 = vld [vmem:[%s3959_s1 + $0x6b4] ss:$8 sps:$4 sm:$0xff]   ;;  %v2816_v62 = vld [vmem:[%s3959_s1 + $0x2b0] ss:$8 sps:$4 sm:$0xff]  }
  0x75   :  { %2057 = vmatprep.subr.bf16.mxu0 %v2733_v63  ;;  %v2819_v63 = vld [vmem:[%s3959_s1 + $0x6b0] ss:$8 sps:$4 sm:$0xff]  }
  0x77   :  { %1894 = vmatpush1.bf16.msra.mxu1 %v2728_v0  ;;  %v2824_v0 = vld [vmem:[%s3959_s1 + $0x2c4] ss:$8 sps:$4 sm:$0xff]  }
  0x78   :  { %2058 = vmatpush1.bf16.msra.mxu0 %v2731_v1  ;;  %1895 = vmatprep.subr.bf16.mxu1 %v2736_v2  ;;  %v2827_v1 = vld [vmem:[%s3959_s1 + $0x6c4] ss:$8 sps:$4 sm:$0xff]   ;;  %v2822_v2 = vld [vmem:[%s3959_s1 + $0x2c0] ss:$8 sps:$4 sm:$0xff]  }
  0x79   :  { %2059 = vmatprep.subr.bf16.mxu0 %v2739_v3  ;;  %v2825_v3 = vld [vmem:[%s3959_s1 + $0x6c0] ss:$8 sps:$4 sm:$0xff]  }
  0x7b   :  { %1896 = vmatpush1.bf16.msra.mxu1 %v2734_v4  ;;  %v2830_v4 = vld [vmem:[%s3959_s1 + $0x2d4] ss:$8 sps:$4 sm:$0xff]  }
  0x7c   :  { %2060 = vmatpush1.bf16.msra.mxu0 %v2737_v5  ;;  %1897 = vmatprep.subr.bf16.mxu1 %v2742_v6  ;;  %v2833_v5 = vld [vmem:[%s3959_s1 + $0x6d4] ss:$8 sps:$4 sm:$0xff]   ;;  %v2828_v6 = vld [vmem:[%s3959_s1 + $0x2d0] ss:$8 sps:$4 sm:$0xff]  }
  0x7d   :  { %2061 = vmatprep.subr.bf16.mxu0 %v2745_v7  ;;  %v2831_v7 = vld [vmem:[%s3959_s1 + $0x6d0] ss:$8 sps:$4 sm:$0xff]  }
  0x7f   :  { %1898 = vmatpush1.bf16.msra.mxu1 %v2740_v8  ;;  %v2836_v8 = vld [vmem:[%s3959_s1 + $0x2e4] ss:$8 sps:$4 sm:$0xff]  }
  0x80   :  { %2062 = vmatpush1.bf16.msra.mxu0 %v2743_v9  ;;  %1908 = vmatprep.subr.bf16.mxu1 %v2750_v10  ;;  %v2839_v9 = vld [vmem:[%s3959_s1 + $0x6e4] ss:$8 sps:$4 sm:$0xff]   ;;  %v2834_v10 = vld [vmem:[%s3959_s1 + $0x2e0] ss:$8 sps:$4 sm:$0xff]  }
  0x81   :  { %2072 = vmatprep.subr.bf16.mxu0 %v2755_v11  ;;  %v2837_v11 = vld [vmem:[%s3959_s1 + $0x6e0] ss:$8 sps:$4 sm:$0xff]  }
  0x82   :  { %1900 = vmatmul.mubr.bf16.vlgmr.msra.gmra.mrb[0].mxu1 %v2212_v12  ;;  %v2842_v12 = vld [vmem:[%s3959_s1 + $0x2f4] ss:$8 sps:$4 sm:$0xff]  }
  0x83   :  { %2064 = vmatmul.mubr.bf16.vlgmr.msra.gmra.mrb[0].mxu0 %v2220_v14  ;;  %1909 = vmatpush1.bf16.msra.mxu1 %v2748_v13  ;;  %v2845_v13 = vld [vmem:[%s3959_s1 + $0x6f4] ss:$8 sps:$4 sm:$0xff]   ;;  %v2840_v14 = vld [vmem:[%s3959_s1 + $0x2f0] ss:$8 sps:$4 sm:$0xff]  }
  0x84   :  { %2073 = vmatpush1.bf16.msra.mxu0 %v2753_v15  ;;  %1910 = vmatprep.subr.bf16.mxu1 %v2758_v16  ;;  %v2843_v15 = vld [vmem:[%s3959_s1 + $0x6f0] ss:$8 sps:$4 sm:$0xff]   ;;  %v2850_v16 = vld [vmem:[%s3959_s1 + $0x304] ss:$8 sps:$4 sm:$0xff]  }
  0x85   :  { %2074 = vmatprep.subr.bf16.mxu0 %v2761_v17  ;;  %1940 = vmatprep.mubr.bf16.mxu1 %v2215_v19  ;;  %v2855_v17 = vld [vmem:[%s3959_s1 + $0x704] ss:$8 sps:$4 sm:$0xff]   ;;  %v2848_v19 = vld [vmem:[%s3959_s1 + $0x300] ss:$8 sps:$4 sm:$0xff]  }
  0x86   :  { %2104 = vmatprep.mubr.bf16.mxu0 %v2223_v23  ;;  %v2222_v23 = vcombine.low %v3456_v20, %v3456_v20 }
  0x87   :  { %1911 = vmatpush1.bf16.msra.mxu1 %v2756_v21  ;;  %v2853_v21 = vld [vmem:[%s3959_s1 + $0x700] ss:$8 sps:$4 sm:$0xff]  }
  0x88   :  { %2075 = vmatpush1.bf16.msra.mxu0 %v2759_v22  ;;  %1912 = vmatprep.subr.bf16.mxu1 %v2764_v24  ;;  %v2214_v22 = vcombine.low %v3449_v18, %v3449_v18  ;;  %v3653_v24 = vld [vmem:[%s3960_s0 + $0x18] sm:$0xff] }
  0x89   :  { %2076 = vmatprep.subr.bf16.mxu0 %v2767_v25  ;;  %v3658_v25 = vld [vmem:[%s3960_s0 + $0x38] sm:$0xff]  ;;  %v2217_v20 = vcombine.high %v3653_v24, %v3653_v24 }
  0x8a   :  { %v2861_v18 = vld [vmem:[%s3959_s1 + $0x714] ss:$8 sps:$4 sm:$0xff]  }
  0x8b   :  { %1913 = vmatpush1.bf16.msra.mxu1 %v2762_v26  ;;  %v2858_v26 = vld [vmem:[%s3959_s1 + $0x314] ss:$8 sps:$4 sm:$0xff]  }
  0x8c   :  { %2077 = vmatpush1.bf16.msra.mxu0 %v2765_v27  ;;  %1914 = vmatprep.subr.bf16.mxu1 %v2770_v28  ;;  %v2225_v27 = vcombine.high %v3658_v25, %v3658_v25  ;;  %v2856_v28 = vld [vmem:[%s3959_s1 + $0x310] ss:$8 sps:$4 sm:$0xff]  }
  0x8d   :  { %2078 = vmatprep.subr.bf16.mxu0 %v2773_v29  ;;  %v2859_v29 = vld [vmem:[%s3959_s1 + $0x710] ss:$8 sps:$4 sm:$0xff]  }
  0x8f   :  { %1915 = vmatpush1.bf16.msra.mxu1 %v2768_v30  ;;  %v2864_v30 = vld [vmem:[%s3959_s1 + $0x324] ss:$8 sps:$4 sm:$0xff]  }
  0x90   :  { %2079 = vmatpush1.bf16.msra.mxu0 %v2771_v31  ;;  %1916 = vmatprep.subr.bf16.mxu1 %v2776_v32  ;;  %v2867_v31 = vld [vmem:[%s3959_s1 + $0x724] ss:$8 sps:$4 sm:$0xff]   ;;  %v2862_v32 = vld [vmem:[%s3959_s1 + $0x320] ss:$8 sps:$4 sm:$0xff]  }
  0x91   :  { %2080 = vmatprep.subr.bf16.mxu0 %v2779_v33  ;;  %v2865_v33 = vld [vmem:[%s3959_s1 + $0x720] ss:$8 sps:$4 sm:$0xff]  }
  0x93   :  { %1917 = vmatpush1.bf16.msra.mxu1 %v2774_v34  ;;  %v2870_v34 = vld [vmem:[%s3959_s1 + $0x334] ss:$8 sps:$4 sm:$0xff]  }
  0x94   :  { %2081 = vmatpush1.bf16.msra.mxu0 %v2777_v35  ;;  %1918 = vmatprep.subr.bf16.mxu1 %v2782_v36  ;;  %v2873_v35 = vld [vmem:[%s3959_s1 + $0x734] ss:$8 sps:$4 sm:$0xff]   ;;  %v2868_v36 = vld [vmem:[%s3959_s1 + $0x330] ss:$8 sps:$4 sm:$0xff]  }
  0x95   :  { %2082 = vmatprep.subr.bf16.mxu0 %v2785_v37  ;;  %v2871_v37 = vld [vmem:[%s3959_s1 + $0x730] ss:$8 sps:$4 sm:$0xff]  }
  0x97   :  { %1919 = vmatpush1.bf16.msra.mxu1 %v2780_v38  ;;  %v2876_v38 = vld [vmem:[%s3959_s1 + $0x344] ss:$8 sps:$4 sm:$0xff]  }
  0x98   :  { %2083 = vmatpush1.bf16.msra.mxu0 %v2783_v39  ;;  %1920 = vmatprep.subr.bf16.mxu1 %v2788_v40  ;;  %v2879_v39 = vld [vmem:[%s3959_s1 + $0x744] ss:$8 sps:$4 sm:$0xff]   ;;  %v2874_v40 = vld [vmem:[%s3959_s1 + $0x340] ss:$8 sps:$4 sm:$0xff]  }
  0x99   :  { %2084 = vmatprep.subr.bf16.mxu0 %v2791_v41  ;;  %v2877_v41 = vld [vmem:[%s3959_s1 + $0x740] ss:$8 sps:$4 sm:$0xff]  }
  0x9b   :  { %1921 = vmatpush1.bf16.msra.mxu1 %v2786_v42  ;;  %v2882_v42 = vld [vmem:[%s3959_s1 + $0x354] ss:$8 sps:$4 sm:$0xff]  }
  0x9c   :  { %2085 = vmatpush1.bf16.msra.mxu0 %v2789_v43  ;;  %1922 = vmatprep.subr.bf16.mxu1 %v2794_v44  ;;  %v2885_v43 = vld [vmem:[%s3959_s1 + $0x754] ss:$8 sps:$4 sm:$0xff]   ;;  %v2880_v44 = vld [vmem:[%s3959_s1 + $0x350] ss:$8 sps:$4 sm:$0xff]  }
  0x9d   :  { %2086 = vmatprep.subr.bf16.mxu0 %v2797_v45  ;;  %v2883_v45 = vld [vmem:[%s3959_s1 + $0x750] ss:$8 sps:$4 sm:$0xff]  }
  0x9f   :  { %1923 = vmatpush1.bf16.msra.mxu1 %v2792_v46  ;;  %v2888_v46 = vld [vmem:[%s3959_s1 + $0x364] ss:$8 sps:$4 sm:$0xff]  }
  0xa0   :  { %2087 = vmatpush1.bf16.msra.mxu0 %v2795_v47  ;;  %1924 = vmatprep.subr.bf16.mxu1 %v2800_v48  ;;  %v2891_v47 = vld [vmem:[%s3959_s1 + $0x764] ss:$8 sps:$4 sm:$0xff]   ;;  %v2886_v48 = vld [vmem:[%s3959_s1 + $0x360] ss:$8 sps:$4 sm:$0xff]  }
  0xa1   :  { %2088 = vmatprep.subr.bf16.mxu0 %v2803_v49  ;;  %v2889_v49 = vld [vmem:[%s3959_s1 + $0x760] ss:$8 sps:$4 sm:$0xff]  }
  0xa3   :  { %1925 = vmatpush1.bf16.msra.mxu1 %v2798_v50  ;;  %v2894_v50 = vld [vmem:[%s3959_s1 + $0x374] ss:$8 sps:$4 sm:$0xff]  }
  0xa4   :  { %2089 = vmatpush1.bf16.msra.mxu0 %v2801_v51  ;;  %1926 = vmatprep.subr.bf16.mxu1 %v2806_v52  ;;  %v2897_v51 = vld [vmem:[%s3959_s1 + $0x774] ss:$8 sps:$4 sm:$0xff]   ;;  %v2892_v52 = vld [vmem:[%s3959_s1 + $0x370] ss:$8 sps:$4 sm:$0xff]  }
  0xa5   :  { %2090 = vmatprep.subr.bf16.mxu0 %v2809_v53  ;;  %v2895_v53 = vld [vmem:[%s3959_s1 + $0x770] ss:$8 sps:$4 sm:$0xff]  }
  0xa7   :  { %1927 = vmatpush1.bf16.msra.mxu1 %v2804_v54  ;;  %v2900_v54 = vld [vmem:[%s3959_s1 + $0x384] ss:$8 sps:$4 sm:$0xff]  }
  0xa8   :  { %2091 = vmatpush1.bf16.msra.mxu0 %v2807_v55  ;;  %1928 = vmatprep.subr.bf16.mxu1 %v2812_v56  ;;  %v2903_v55 = vld [vmem:[%s3959_s1 + $0x784] ss:$8 sps:$4 sm:$0xff]   ;;  %v2898_v56 = vld [vmem:[%s3959_s1 + $0x380] ss:$8 sps:$4 sm:$0xff]  }
  0xa9   :  { %2092 = vmatprep.subr.bf16.mxu0 %v2815_v57  ;;  %v2901_v57 = vld [vmem:[%s3959_s1 + $0x780] ss:$8 sps:$4 sm:$0xff]  }
  0xab   :  { %1929 = vmatpush1.bf16.msra.mxu1 %v2810_v58  ;;  %v2906_v58 = vld [vmem:[%s3959_s1 + $0x394] ss:$8 sps:$4 sm:$0xff]  }
  0xac   :  { %2093 = vmatpush1.bf16.msra.mxu0 %v2813_v59  ;;  %1930 = vmatprep.subr.bf16.mxu1 %v2818_v60  ;;  %v2909_v59 = vld [vmem:[%s3959_s1 + $0x794] ss:$8 sps:$4 sm:$0xff]   ;;  %v2904_v60 = vld [vmem:[%s3959_s1 + $0x390] ss:$8 sps:$4 sm:$0xff]  }
  0xad   :  { %2094 = vmatprep.subr.bf16.mxu0 %v2821_v61  ;;  %v2907_v61 = vld [vmem:[%s3959_s1 + $0x790] ss:$8 sps:$4 sm:$0xff]  }
  0xaf   :  { %1931 = vmatpush1.bf16.msra.mxu1 %v2816_v62  ;;  %v2912_v62 = vld [vmem:[%s3959_s1 + $0x3a4] ss:$8 sps:$4 sm:$0xff]  }
  0xb0   :  { %2095 = vmatpush1.bf16.msra.mxu0 %v2819_v63  ;;  %1932 = vmatprep.subr.bf16.mxu1 %v2824_v0  ;;  %v2915_v63 = vld [vmem:[%s3959_s1 + $0x7a4] ss:$8 sps:$4 sm:$0xff]   ;;  %v2910_v0 = vld [vmem:[%s3959_s1 + $0x3a0] ss:$8 sps:$4 sm:$0xff]  }
  0xb1   :  { %2096 = vmatprep.subr.bf16.mxu0 %v2827_v1  ;;  %v2913_v1 = vld [vmem:[%s3959_s1 + $0x7a0] ss:$8 sps:$4 sm:$0xff]  }
  0xb3   :  { %1933 = vmatpush1.bf16.msra.mxu1 %v2822_v2  ;;  %v2918_v2 = vld [vmem:[%s3959_s1 + $0x3b4] ss:$8 sps:$4 sm:$0xff]  }
  0xb4   :  { %2097 = vmatpush1.bf16.msra.mxu0 %v2825_v3  ;;  %1934 = vmatprep.subr.bf16.mxu1 %v2830_v4  ;;  %v2921_v3 = vld [vmem:[%s3959_s1 + $0x7b4] ss:$8 sps:$4 sm:$0xff]   ;;  %v2916_v4 = vld [vmem:[%s3959_s1 + $0x3b0] ss:$8 sps:$4 sm:$0xff]  }
  0xb5   :  { %2098 = vmatprep.subr.bf16.mxu0 %v2833_v5  ;;  %v2919_v5 = vld [vmem:[%s3959_s1 + $0x7b0] ss:$8 sps:$4 sm:$0xff]  }
  0xb7   :  { %1935 = vmatpush1.bf16.msra.mxu1 %v2828_v6  ;;  %v2924_v6 = vld [vmem:[%s3959_s1 + $0x3c4] ss:$8 sps:$4 sm:$0xff]  }
  0xb8   :  { %2099 = vmatpush1.bf16.msra.mxu0 %v2831_v7  ;;  %1936 = vmatprep.subr.bf16.mxu1 %v2836_v8  ;;  %v2927_v7 = vld [vmem:[%s3959_s1 + $0x7c4] ss:$8 sps:$4 sm:$0xff]   ;;  %v2922_v8 = vld [vmem:[%s3959_s1 + $0x3c0] ss:$8 sps:$4 sm:$0xff]  }
  0xb9   :  { %2100 = vmatprep.subr.bf16.mxu0 %v2839_v9  ;;  %v2925_v9 = vld [vmem:[%s3959_s1 + $0x7c0] ss:$8 sps:$4 sm:$0xff]  }
  0xbb   :  { %1937 = vmatpush1.bf16.msra.mxu1 %v2834_v10  ;;  %v2930_v10 = vld [vmem:[%s3959_s1 + $0x3d4] ss:$8 sps:$4 sm:$0xff]  }
  0xbc   :  { %2101 = vmatpush1.bf16.msra.mxu0 %v2837_v11  ;;  %1938 = vmatprep.subr.bf16.mxu1 %v2842_v12  ;;  %v2933_v11 = vld [vmem:[%s3959_s1 + $0x7d4] ss:$8 sps:$4 sm:$0xff]   ;;  %v2928_v12 = vld [vmem:[%s3959_s1 + $0x3d0] ss:$8 sps:$4 sm:$0xff]  }
  0xbd   :  { %2102 = vmatprep.subr.bf16.mxu0 %v2845_v13  ;;  %v2931_v13 = vld [vmem:[%s3959_s1 + $0x7d0] ss:$8 sps:$4 sm:$0xff]  }
  0xbf   :  { %1939 = vmatpush1.bf16.msra.mxu1 %v2840_v14  ;;  %v2936_v14 = vld [vmem:[%s3959_s1 + $0x3e4] ss:$8 sps:$4 sm:$0xff]  }
  0xc0   :  { %2103 = vmatpush1.bf16.msra.mxu0 %v2843_v15  ;;  %1949 = vmatprep.subr.bf16.mxu1 %v2850_v16  ;;  %v2939_v15 = vld [vmem:[%s3959_s1 + $0x7e4] ss:$8 sps:$4 sm:$0xff]   ;;  %v2934_v16 = vld [vmem:[%s3959_s1 + $0x3e0] ss:$8 sps:$4 sm:$0xff]  }
  0xc1   :  { %2113 = vmatprep.subr.bf16.mxu0 %v2855_v17  ;;  %v2937_v17 = vld [vmem:[%s3959_s1 + $0x7e0] ss:$8 sps:$4 sm:$0xff]  }
  0xc2   :  { %1941 = vmatmul.mubr.bf16.vlgmr.msra.gmra.mrb[0].mxu1 %v2214_v22  ;;  %v2940_v22 = vld [vmem:[%s3959_s1 + $0x3f0] ss:$8 sps:$4 sm:$0xff]  }
  0xc3   :  { %2105 = vmatmul.mubr.bf16.vlgmr.msra.gmra.mrb[0].mxu0 %v2222_v23  ;;  %1950 = vmatpush1.bf16.msra.mxu1 %v2848_v19  ;;  %v2942_v19 = vld [vmem:[%s3959_s1 + $0x3f4] ss:$8 sps:$4 sm:$0xff]   ;;  %v2943_v23 = vld [vmem:[%s3959_s1 + $0x7f0] ss:$8 sps:$4 sm:$0xff]  }
  0xc4   :  { %2114 = vmatpush1.bf16.msra.mxu0 %v2853_v21  ;;  %1951 = vmatprep.subr.bf16.mxu1 %v2858_v26  ;;  %v2945_v21 = vld [vmem:[%s3959_s1 + $0x7f4] ss:$8 sps:$4 sm:$0xff]   ;;  %v2952_v26 = vld [vmem:[%s3959_s1 + $0x804] ss:$8 sps:$4 sm:$0xff]  }
  0xc5   :  { %2115 = vmatprep.subr.bf16.mxu0 %v2861_v18  ;;  %1981 = vmatprep.mubr.bf16.mxu1 %v2217_v20  ;;  %v3850_v18 = vld [vmem:[%s3960_s0 + $0x40] sm:$0xff]  ;;  %v2216_v20 = vcombine.low %v3653_v24, %v3653_v24  ;;  %v2953_v24 = vld [vmem:[%s3959_s1 + $0x810] ss:$8 sps:$4 sm:$0xff]  }
  0xc6   :  { %2145 = vmatprep.mubr.bf16.mxu0 %v2225_v27  ;;  %v2224_v27 = vcombine.low %v3658_v25, %v3658_v25  ;;  %v2958_v25 = vld [vmem:[%s3959_s1 + $0x824] ss:$8 sps:$4 sm:$0xff]  }
  0xc7   :  { %1952 = vmatpush1.bf16.msra.mxu1 %v2856_v28  ;;  %v2950_v28 = vld [vmem:[%s3959_s1 + $0x800] ss:$8 sps:$4 sm:$0xff]  }
  0xc8   :  { %2116 = vmatpush1.bf16.msra.mxu0 %v2859_v29  ;;  %1953 = vmatprep.subr.bf16.mxu1 %v2864_v30  ;;  %v2227_v29 = vcombine.high %v3850_v18, %v3850_v18  ;;  %v2955_v30 = vld [vmem:[%s3959_s1 + $0x814] ss:$8 sps:$4 sm:$0xff]  }
  0xc9   :  { %2117 = vmatprep.subr.bf16.mxu0 %v2867_v31  ;;  %v2956_v31 = vld [vmem:[%s3959_s1 + $0x820] ss:$8 sps:$4 sm:$0xff]  }
  0xcb   :  { %1954 = vmatpush1.bf16.msra.mxu1 %v2862_v32  ;;  %v2961_v32 = vld [vmem:[%s3959_s1 + $0x834] ss:$8 sps:$4 sm:$0xff]  }
  0xcc   :  { %2118 = vmatpush1.bf16.msra.mxu0 %v2865_v33  ;;  %1955 = vmatprep.subr.bf16.mxu1 %v2870_v34  ;;  %v2959_v33 = vld [vmem:[%s3959_s1 + $0x830] ss:$8 sps:$4 sm:$0xff]   ;;  %v2964_v34 = vld [vmem:[%s3959_s1 + $0x844] ss:$8 sps:$4 sm:$0xff]  }
  0xcd   :  { %2119 = vmatprep.subr.bf16.mxu0 %v2873_v35  ;;  %v2962_v35 = vld [vmem:[%s3959_s1 + $0x840] ss:$8 sps:$4 sm:$0xff]  }
  0xcf   :  { %1956 = vmatpush1.bf16.msra.mxu1 %v2868_v36  ;;  %v2967_v36 = vld [vmem:[%s3959_s1 + $0x854] ss:$8 sps:$4 sm:$0xff]  }
  0xd0   :  { %2120 = vmatpush1.bf16.msra.mxu0 %v2871_v37  ;;  %1957 = vmatprep.subr.bf16.mxu1 %v2876_v38  ;;  %v2965_v37 = vld [vmem:[%s3959_s1 + $0x850] ss:$8 sps:$4 sm:$0xff]   ;;  %v2970_v38 = vld [vmem:[%s3959_s1 + $0x864] ss:$8 sps:$4 sm:$0xff]  }
  0xd1   :  { %2121 = vmatprep.subr.bf16.mxu0 %v2879_v39  ;;  %v2968_v39 = vld [vmem:[%s3959_s1 + $0x860] ss:$8 sps:$4 sm:$0xff]  }
  0xd3   :  { %1958 = vmatpush1.bf16.msra.mxu1 %v2874_v40  ;;  %v2973_v40 = vld [vmem:[%s3959_s1 + $0x874] ss:$8 sps:$4 sm:$0xff]  }
  0xd4   :  { %2122 = vmatpush1.bf16.msra.mxu0 %v2877_v41  ;;  %1959 = vmatprep.subr.bf16.mxu1 %v2882_v42  ;;  %v2971_v41 = vld [vmem:[%s3959_s1 + $0x870] ss:$8 sps:$4 sm:$0xff]   ;;  %v2976_v42 = vld [vmem:[%s3959_s1 + $0x884] ss:$8 sps:$4 sm:$0xff]  }
  0xd5   :  { %2123 = vmatprep.subr.bf16.mxu0 %v2885_v43  ;;  %v2974_v43 = vld [vmem:[%s3959_s1 + $0x880] ss:$8 sps:$4 sm:$0xff]  }
  0xd7   :  { %1960 = vmatpush1.bf16.msra.mxu1 %v2880_v44  ;;  %v2979_v44 = vld [vmem:[%s3959_s1 + $0x894] ss:$8 sps:$4 sm:$0xff]  }
  0xd8   :  { %2124 = vmatpush1.bf16.msra.mxu0 %v2883_v45  ;;  %1961 = vmatprep.subr.bf16.mxu1 %v2888_v46  ;;  %v2977_v45 = vld [vmem:[%s3959_s1 + $0x890] ss:$8 sps:$4 sm:$0xff]   ;;  %v2982_v46 = vld [vmem:[%s3959_s1 + $0x8a4] ss:$8 sps:$4 sm:$0xff]  }
  0xd9   :  { %2125 = vmatprep.subr.bf16.mxu0 %v2891_v47  ;;  %v2980_v47 = vld [vmem:[%s3959_s1 + $0x8a0] ss:$8 sps:$4 sm:$0xff]  }
  0xdb   :  { %1962 = vmatpush1.bf16.msra.mxu1 %v2886_v48  ;;  %v2985_v48 = vld [vmem:[%s3959_s1 + $0x8b4] ss:$8 sps:$4 sm:$0xff]  }
  0xdc   :  { %2126 = vmatpush1.bf16.msra.mxu0 %v2889_v49  ;;  %1963 = vmatprep.subr.bf16.mxu1 %v2894_v50  ;;  %v2983_v49 = vld [vmem:[%s3959_s1 + $0x8b0] ss:$8 sps:$4 sm:$0xff]   ;;  %v2988_v50 = vld [vmem:[%s3959_s1 + $0x8c4] ss:$8 sps:$4 sm:$0xff]  }
  0xdd   :  { %2127 = vmatprep.subr.bf16.mxu0 %v2897_v51  ;;  %v2986_v51 = vld [vmem:[%s3959_s1 + $0x8c0] ss:$8 sps:$4 sm:$0xff]  }
  0xdf   :  { %1964 = vmatpush1.bf16.msra.mxu1 %v2892_v52  ;;  %v2991_v52 = vld [vmem:[%s3959_s1 + $0x8d4] ss:$8 sps:$4 sm:$0xff]  }
  0xe0   :  { %2128 = vmatpush1.bf16.msra.mxu0 %v2895_v53  ;;  %1965 = vmatprep.subr.bf16.mxu1 %v2900_v54  ;;  %v2989_v53 = vld [vmem:[%s3959_s1 + $0x8d0] ss:$8 sps:$4 sm:$0xff]   ;;  %v2994_v54 = vld [vmem:[%s3959_s1 + $0x8e4] ss:$8 sps:$4 sm:$0xff]  }
  0xe1   :  { %2129 = vmatprep.subr.bf16.mxu0 %v2903_v55  ;;  %v2992_v55 = vld [vmem:[%s3959_s1 + $0x8e0] ss:$8 sps:$4 sm:$0xff]  }
  0xe3   :  { %1966 = vmatpush1.bf16.msra.mxu1 %v2898_v56  ;;  %v2997_v56 = vld [vmem:[%s3959_s1 + $0x8f4] ss:$8 sps:$4 sm:$0xff]  }
  0xe4   :  { %2130 = vmatpush1.bf16.msra.mxu0 %v2901_v57  ;;  %1967 = vmatprep.subr.bf16.mxu1 %v2906_v58  ;;  %v2995_v57 = vld [vmem:[%s3959_s1 + $0x8f0] ss:$8 sps:$4 sm:$0xff]   ;;  %v2226_v58 = vcombine.low %v3850_v18, %v3850_v18 }
  0xe5   :  { %2131 = vmatprep.subr.bf16.mxu0 %v2909_v59 }
  0xe7   :  { %1968 = vmatpush1.bf16.msra.mxu1 %v2904_v60 }
  0xe8   :  { %2132 = vmatpush1.bf16.msra.mxu0 %v2907_v61  ;;  %1969 = vmatprep.subr.bf16.mxu1 %v2912_v62 }
  0xe9   :  { %2133 = vmatprep.subr.bf16.mxu0 %v2915_v63  ;;  %v313_v63 = vlaneseq }
  0xeb   :  { %1970 = vmatpush1.bf16.msra.mxu1 %v2910_v0  ;;  %v314_v0 = vshrl.u32 %v313_v63, 7 }
  0xec   :  { %2134 = vmatpush1.bf16.msra.mxu0 %v2913_v1  ;;  %1971 = vmatprep.subr.bf16.mxu1 %v2918_v2  ;;  %v311_v2 = vld [vmem:[%s3961_s2] sm:$0x3] }
  0xed   :  { %2135 = vmatprep.subr.bf16.mxu0 %v2921_v3  ;;  %v315_v1 = vsub.s32 0, %v314_v0  ;;  %v319_v3 = vsub.s32 1, %v314_v0 }
  0xef   :  { %1972 = vmatpush1.bf16.msra.mxu1 %v2916_v4  ;;  %v316_v4 = vrot.slane %v311_v2, %v315_v1 }
  0xf0   :  { %2136 = vmatpush1.bf16.msra.mxu0 %v2919_v5  ;;  %1973 = vmatprep.subr.bf16.mxu1 %v2924_v6  ;;  %v320_v5 = vrot.slane %v311_v2, %v319_v3 }
  0xf1   :  { %2137 = vmatprep.subr.bf16.mxu0 %v2927_v7 }
  0xf3   :  { %1974 = vmatpush1.bf16.msra.mxu1 %v2922_v8 }
  0xf4   :  { %2138 = vmatpush1.bf16.msra.mxu0 %v2925_v9  ;;  %1975 = vmatprep.subr.bf16.mxu1 %v2930_v10 }
  0xf5   :  { %2139 = vmatprep.subr.bf16.mxu0 %v2933_v11 }
  0xf7   :  { %1976 = vmatpush1.bf16.msra.mxu1 %v2928_v12 }
  0xf8   :  { %2140 = vmatpush1.bf16.msra.mxu0 %v2931_v13  ;;  %1977 = vmatprep.subr.bf16.mxu1 %v2936_v14 }
  0xf9   :  { %2141 = vmatprep.subr.bf16.mxu0 %v2939_v15 }
  0xfb   :  { %1978 = vmatpush1.bf16.msra.mxu1 %v2934_v16 }
  0xfc   :  { %2142 = vmatpush1.bf16.msra.mxu0 %v2937_v17  ;;  %1979 = vmatprep.subr.bf16.mxu1 %v2942_v19 }
  0xfd   :  { %2143 = vmatprep.subr.bf16.mxu0 %v2945_v21 }
  0xff   :  { %1980 = vmatpush1.bf16.msra.mxu1 %v2940_v22 }
 0x100   :  { %2144 = vmatpush1.bf16.msra.mxu0 %v2943_v23 }
 0x101   :  { %2154 = vmatprep.subr.bf16.mxu0 %v2952_v26 }
 0x102   :  { %1982 = vmatmul.mubr.bf16.vlgmr.msra.gmra.mrb[0].mxu1 %v2216_v20 }
 0x103   :  { %2146 = vmatmul.mubr.bf16.vlgmr.msra.gmra.mrb[0].mxu0 %v2224_v27 }
 0x104   :  { %2155 = vmatpush1.bf16.msra.mxu0 %v2950_v28  ;;  %2186 = vmatprep.mubr.bf16.mxu0 %v2227_v29 }
 0x105   :  { %2156 = vmatprep.subr.bf16.mxu0 %v2955_v30 }
 0x108   :  { %2157 = vmatpush1.bf16.msra.mxu0 %v2953_v24 }
 0x109   :  { %2158 = vmatprep.subr.bf16.mxu0 %v2958_v25 }
 0x10c   :  { %2159 = vmatpush1.bf16.msra.mxu0 %v2956_v31 }
 0x10d   :  { %2160 = vmatprep.subr.bf16.mxu0 %v2961_v32 }
 0x110   :  { %2161 = vmatpush1.bf16.msra.mxu0 %v2959_v33 }
 0x111   :  { %2162 = vmatprep.subr.bf16.mxu0 %v2964_v34 }
 0x114   :  { %2163 = vmatpush1.bf16.msra.mxu0 %v2962_v35 }
 0x115   :  { %2164 = vmatprep.subr.bf16.mxu0 %v2967_v36 }
 0x118   :  { %2165 = vmatpush1.bf16.msra.mxu0 %v2965_v37 }
 0x119   :  { %2166 = vmatprep.subr.bf16.mxu0 %v2970_v38 }
 0x11c   :  { %2167 = vmatpush1.bf16.msra.mxu0 %v2968_v39 }
 0x11d   :  { %2168 = vmatprep.subr.bf16.mxu0 %v2973_v40 }
 0x120   :  { %2169 = vmatpush1.bf16.msra.mxu0 %v2971_v41 }
 0x121   :  { %2170 = vmatprep.subr.bf16.mxu0 %v2976_v42 }
 0x124   :  { %2171 = vmatpush1.bf16.msra.mxu0 %v2974_v43 }
 0x125   :  { %2172 = vmatprep.subr.bf16.mxu0 %v2979_v44 }
 0x128   :  { %2173 = vmatpush1.bf16.msra.mxu0 %v2977_v45 }
 0x129   :  { %2174 = vmatprep.subr.bf16.mxu0 %v2982_v46 }
 0x12c   :  { %2175 = vmatpush1.bf16.msra.mxu0 %v2980_v47 }
 0x12d   :  { %2176 = vmatprep.subr.bf16.mxu0 %v2985_v48 }
 0x130   :  { %2177 = vmatpush1.bf16.msra.mxu0 %v2983_v49 }
 0x131   :  { %2178 = vmatprep.subr.bf16.mxu0 %v2988_v50 }
 0x134   :  { %2179 = vmatpush1.bf16.msra.mxu0 %v2986_v51 }
 0x135   :  { %2180 = vmatprep.subr.bf16.mxu0 %v2991_v52 }
 0x138   :  { %2181 = vmatpush1.bf16.msra.mxu0 %v2989_v53 }
 0x139   :  { %2182 = vmatprep.subr.bf16.mxu0 %v2994_v54 }
 0x13c   :  { %2183 = vmatpush1.bf16.msra.mxu0 %v2992_v55 }
 0x13d   :  { %2184 = vmatprep.subr.bf16.mxu0 %v2997_v56 }
 0x140   :  { %2185 = vmatpush1.bf16.msra.mxu0 %v2995_v57 }
 0x143   :  { %2187 = vmatmul.mubr.bf16.vlgmr.msra.gmra.mrb[0].mxu0 %v2226_v58 }
 0x1d5   :  { %v1983_v59 = vpop.f32.mrb[0].mxu1 }
 0x1d6   :  { %v1985_v60 = vpop.f32.mrb[1].mxu1  ;;  %v2518_v6 = vadd.f32 %v1983_v59, %v316_v4 }
 0x1d7   :  { %v1987_v61 = vpop.f32.mrb[2].mxu1  ;;  %v2520_v7 = vadd.f32 %v1985_v60, %v320_v5 }
 0x1d8   :  { %v1988_v62 = vpop.f32.mrb[3].mxu1 }
 0x216   :  { %v2188_v8 = vpop.f32.mrb[0].mxu0 }
 0x217   :  { %v2519_v9 = vadd.f32 %v2518_v6, %v2188_v8  ;;  %v2190_v10 = vpop.f32.mrb[1].mxu0 }
 0x218   :  { %v2521_v11 = vadd.f32 %v2520_v7, %v2190_v10  ;;  %v2192_v12 = vpop.f32.mrb[2].mxu0 }
 0x219   :  { %v2195_v13 = vmax.f32 %v2519_v9, 0.0  ;;  %v2193_v14 = vpop.f32.mrb[3].mxu0 }
 0x21a   :  { %v2196_v15 = vmax.f32 %v2521_v11, 0.0 }
 0x21c   :  { %v2517_v16 = vpack.c.bf16 %v2196_v15, %v2195_v13 }
 0x21e   :  { %2205 = vst [vmem:[%s3962_s3] sm:$0xff] %v2517_v16 }

// kernel: _lambda_.25
= control target key start
LH: loop header
LB: loop body
LE: loop exit
PB: predicated region body
PF: predicated region fallthrough
CT: control target
= control target key end

     0   :  { %vm2207_vm0 = vcmask 64512   ;;  %s4033_s1 = inlined_call_operand.vmem [shape: bf16[2304,256], index: 1, kind: input, shape index: {}]   ;;  %s4034_s0 = inlined_call_operand.vmem [shape: bf16[8,2304], index: 0, kind: input, shape index: {}]   ;;  %s4035_s2 = inlined_call_operand.vmem [shape: f32[1,256], index: 2, kind: input, shape index: {}]   ;;  %s4036_s3 = inlined_call_operand.vmem [shape: bf16[8,256], index: 3, kind: input, shape index: {}]   ;;  %s4037_s4 = inlined_call_operand.vmem [shape: f32[2,8], index: 4, kind: input, shape index: {}]   ;;  %s4038_s5 = inlined_call_operand.vmem [shape: f32[2,256], index: 5, kind: output, shape index: {}]  }
   0x1   :  { %v2607_v0 = vld [vmem:[%s4033_s1 + $0x4] ss:$8 sps:$4 sm:$0xff]   ;;  %v2609_v1 = vld [vmem:[%s4033_s1] ss:$8 sps:$4 sm:$0xff]   ;;  %v2613_v4 = vld [vmem:[%s4033_s1 + $0x14] ss:$8 sps:$4 sm:$0xff]  }
   0x2   :  { %1832 = vmatprep.subr.bf16.mxu0 %v2607_v0  ;;  %v2610_v2 = vld [vmem:[%s4033_s1 + $0x104] ss:$8 sps:$4 sm:$0xff]   ;;  %v2612_v3 = vld [vmem:[%s4033_s1 + $0x100] ss:$8 sps:$4 sm:$0xff]   ;;  %v2615_v5 = vld [vmem:[%s4033_s1 + $0x10] ss:$8 sps:$4 sm:$0xff]  }
   0x3   :  { %1833 = vmatpush1.bf16.msra.mxu0 %v2609_v1  ;;  %1873 = vmatprep.subr.bf16.mxu1 %v2610_v2  ;;  %v2616_v6 = vld [vmem:[%s4033_s1 + $0x114] ss:$8 sps:$4 sm:$0xff]   ;;  %v2618_v7 = vld [vmem:[%s4033_s1 + $0x110] ss:$8 sps:$4 sm:$0xff]   ;;  %v2619_v8 = vld [vmem:[%s4033_s1 + $0x24] ss:$8 sps:$4 sm:$0xff]  }
   0x4   :  { %1874 = vmatpush1.bf16.msra.mxu1 %v2612_v3  ;;  %1834 = vmatprep.subr.bf16.mxu0 %v2613_v4  ;;  %v2621_v9 = vld [vmem:[%s4033_s1 + $0x20] ss:$8 sps:$4 sm:$0xff]   ;;  %v2622_v10 = vld [vmem:[%s4033_s1 + $0x124] ss:$8 sps:$4 sm:$0xff]   ;;  %v2625_v11 = vld [vmem:[%s4033_s1 + $0x34] ss:$8 sps:$4 sm:$0xff]  }
   0x5   :  { %1875 = vmatprep.subr.bf16.mxu1 %v2616_v6  ;;  %v2624_v12 = vld [vmem:[%s4033_s1 + $0x120] ss:$8 sps:$4 sm:$0xff]   ;;  %v2628_v13 = vld [vmem:[%s4033_s1 + $0x134] ss:$8 sps:$4 sm:$0xff]   ;;  %v2627_v14 = vld [vmem:[%s4033_s1 + $0x30] ss:$8 sps:$4 sm:$0xff]  }
   0x6   :  { %v2631_v15 = vld [vmem:[%s4033_s1 + $0x44] ss:$8 sps:$4 sm:$0xff]   ;;  %v2630_v16 = vld [vmem:[%s4033_s1 + $0x130] ss:$8 sps:$4 sm:$0xff]   ;;  %v2633_v18 = vld [vmem:[%s4033_s1 + $0x40] ss:$8 sps:$4 sm:$0xff]  }
   0x7   :  { %1835 = vmatpush1.bf16.msra.mxu0 %v2615_v5  ;;  %v2634_v17 = vld [vmem:[%s4033_s1 + $0x144] ss:$8 sps:$4 sm:$0xff]   ;;  %v2637_v19 = vld [vmem:[%s4033_s1 + $0x54] ss:$8 sps:$4 sm:$0xff]   ;;  %v2636_v20 = vld [vmem:[%s4033_s1 + $0x140] ss:$8 sps:$4 sm:$0xff]  }
   0x8   :  { %1836 = vmatprep.subr.bf16.mxu0 %v2619_v8  ;;  %1876 = vmatpush1.bf16.msra.mxu1 %v2618_v7  ;;  %v2640_v21 = vld [vmem:[%s4033_s1 + $0x154] ss:$8 sps:$4 sm:$0xff]   ;;  %v2639_v22 = vld [vmem:[%s4033_s1 + $0x50] ss:$8 sps:$4 sm:$0xff]   ;;  %v2643_v23 = vld [vmem:[%s4033_s1 + $0x64] ss:$8 sps:$4 sm:$0xff]  }
   0x9   :  { %1877 = vmatprep.subr.bf16.mxu1 %v2622_v10  ;;  %v2642_v24 = vld [vmem:[%s4033_s1 + $0x150] ss:$8 sps:$4 sm:$0xff]   ;;  %v2646_v25 = vld [vmem:[%s4033_s1 + $0x164] ss:$8 sps:$4 sm:$0xff]   ;;  %v2645_v26 = vld [vmem:[%s4033_s1 + $0x60] ss:$8 sps:$4 sm:$0xff]  }
   0xa   :  { %v2649_v27 = vld [vmem:[%s4033_s1 + $0x74] ss:$8 sps:$4 sm:$0xff]   ;;  %v2648_v28 = vld [vmem:[%s4033_s1 + $0x160] ss:$8 sps:$4 sm:$0xff]   ;;  %v2651_v30 = vld [vmem:[%s4033_s1 + $0x70] ss:$8 sps:$4 sm:$0xff]  }
   0xb   :  { %1837 = vmatpush1.bf16.msra.mxu0 %v2621_v9  ;;  %v2652_v29 = vld [vmem:[%s4033_s1 + $0x174] ss:$8 sps:$4 sm:$0xff]   ;;  %v2655_v31 = vld [vmem:[%s4033_s1 + $0x84] ss:$8 sps:$4 sm:$0xff]   ;;  %v2654_v32 = vld [vmem:[%s4033_s1 + $0x170] ss:$8 sps:$4 sm:$0xff]  }
   0xc   :  { %1838 = vmatprep.subr.bf16.mxu0 %v2625_v11  ;;  %1878 = vmatpush1.bf16.msra.mxu1 %v2624_v12  ;;  %v2658_v33 = vld [vmem:[%s4033_s1 + $0x184] ss:$8 sps:$4 sm:$0xff]   ;;  %v2657_v34 = vld [vmem:[%s4033_s1 + $0x80] ss:$8 sps:$4 sm:$0xff]   ;;  %v2661_v35 = vld [vmem:[%s4033_s1 + $0x94] ss:$8 sps:$4 sm:$0xff]  }
   0xd   :  { %1879 = vmatprep.subr.bf16.mxu1 %v2628_v13  ;;  %v2660_v36 = vld [vmem:[%s4033_s1 + $0x180] ss:$8 sps:$4 sm:$0xff]   ;;  %v2664_v37 = vld [vmem:[%s4033_s1 + $0x194] ss:$8 sps:$4 sm:$0xff]   ;;  %v2663_v38 = vld [vmem:[%s4033_s1 + $0x90] ss:$8 sps:$4 sm:$0xff]  }
   0xe   :  { %v2667_v39 = vld [vmem:[%s4033_s1 + $0xa4] ss:$8 sps:$4 sm:$0xff]   ;;  %v2666_v40 = vld [vmem:[%s4033_s1 + $0x190] ss:$8 sps:$4 sm:$0xff]   ;;  %v2669_v42 = vld [vmem:[%s4033_s1 + $0xa0] ss:$8 sps:$4 sm:$0xff]  }
   0xf   :  { %1839 = vmatpush1.bf16.msra.mxu0 %v2627_v14  ;;  %v2670_v41 = vld [vmem:[%s4033_s1 + $0x1a4] ss:$8 sps:$4 sm:$0xff]   ;;  %v2673_v43 = vld [vmem:[%s4033_s1 + $0xb4] ss:$8 sps:$4 sm:$0xff]   ;;  %v2672_v44 = vld [vmem:[%s4033_s1 + $0x1a0] ss:$8 sps:$4 sm:$0xff]  }
  0x10   :  { %1840 = vmatprep.subr.bf16.mxu0 %v2631_v15  ;;  %1880 = vmatpush1.bf16.msra.mxu1 %v2630_v16  ;;  %v2676_v45 = vld [vmem:[%s4033_s1 + $0x1b4] ss:$8 sps:$4 sm:$0xff]   ;;  %v20_v46 = vld [vmem:[%s4034_s0] sm:$0xff]  ;;  %v2675_v47 = vld [vmem:[%s4033_s1 + $0xb0] ss:$8 sps:$4 sm:$0xff]  }
  0x11   :  { %1881 = vmatprep.subr.bf16.mxu1 %v2634_v17  ;;  %v2299_v48 = vcombine.high %v20_v46, %v20_v46  ;;  %v2679_v49 = vld [vmem:[%s4033_s1 + $0xc4] ss:$8 sps:$4 sm:$0xff]   ;;  %v2678_v51 = vld [vmem:[%s4033_s1 + $0x1b0] ss:$8 sps:$4 sm:$0xff]   ;;  %v2681_v54 = vld [vmem:[%s4033_s1 + $0xc0] ss:$8 sps:$4 sm:$0xff]   ;;  %v2298_v5 = vcombine.low %v20_v46, %v20_v46 }
  0x12   :  { %v21_v50 = vld [vmem:[%s4034_s0 + $0x8] sm:$0xff]  ;;  %v2685_v55 = vld [vmem:[%s4033_s1 + $0xd4] ss:$8 sps:$4 sm:$0xff]   ;;  %v2687_v58 = vld [vmem:[%s4033_s1 + $0xd0] ss:$8 sps:$4 sm:$0xff]  }
  0x13   :  { %1841 = vmatpush1.bf16.msra.mxu0 %v2633_v18  ;;  %1864 = vmatprep.mubr.bf16.mxu0 %v2299_v48  ;;  %v2301_v52 = vcombine.high %v21_v50, %v21_v50  ;;  %v2682_v53 = vld [vmem:[%s4033_s1 + $0x1c4] ss:$8 sps:$4 sm:$0xff]   ;;  %v2684_v56 = vld [vmem:[%s4033_s1 + $0x1c0] ss:$8 sps:$4 sm:$0xff]   ;;  %v2688_v57 = vld [vmem:[%s4033_s1 + $0x1d4] ss:$8 sps:$4 sm:$0xff]   ;;  %v2300_v8 = vcombine.low %v21_v50, %v21_v50 }
  0x14   :  { %1842 = vmatprep.subr.bf16.mxu0 %v2637_v19  ;;  %1882 = vmatpush1.bf16.msra.mxu1 %v2636_v20  ;;  %v2691_v59 = vld [vmem:[%s4033_s1 + $0xe4] ss:$8 sps:$4 sm:$0xff]   ;;  %v2690_v60 = vld [vmem:[%s4033_s1 + $0x1d0] ss:$8 sps:$4 sm:$0xff]   ;;  %v2693_v62 = vld [vmem:[%s4033_s1 + $0xe0] ss:$8 sps:$4 sm:$0xff]  }
  0x15   :  { %1883 = vmatprep.subr.bf16.mxu1 %v2640_v21  ;;  %1905 = vmatprep.mubr.bf16.mxu1 %v2301_v52  ;;  %v2694_v61 = vld [vmem:[%s4033_s1 + $0x1e4] ss:$8 sps:$4 sm:$0xff]   ;;  %v2697_v63 = vld [vmem:[%s4033_s1 + $0xf4] ss:$8 sps:$4 sm:$0xff]   ;;  %v2696_v0 = vld [vmem:[%s4033_s1 + $0x1e0] ss:$8 sps:$4 sm:$0xff]  }
  0x16   :  { %v2700_v1 = vld [vmem:[%s4033_s1 + $0x1f4] ss:$8 sps:$4 sm:$0xff]   ;;  %v2699_v2 = vld [vmem:[%s4033_s1 + $0xf0] ss:$8 sps:$4 sm:$0xff]   ;;  %v2707_v3 = vld [vmem:[%s4033_s1 + $0x204] ss:$8 sps:$4 sm:$0xff]  }
  0x17   :  { %1843 = vmatpush1.bf16.msra.mxu0 %v2639_v22  ;;  %v2704_v4 = vld [vmem:[%s4033_s1 + $0x1f0] ss:$8 sps:$4 sm:$0xff]   ;;  %v2712_v6 = vld [vmem:[%s4033_s1 + $0x304] ss:$8 sps:$4 sm:$0xff]   ;;  %v2705_v7 = vld [vmem:[%s4033_s1 + $0x200] ss:$8 sps:$4 sm:$0xff]  }
  0x18   :  { %1844 = vmatprep.subr.bf16.mxu0 %v2643_v23  ;;  %1884 = vmatpush1.bf16.msra.mxu1 %v2642_v24  ;;  %v2715_v9 = vld [vmem:[%s4033_s1 + $0x214] ss:$8 sps:$4 sm:$0xff]   ;;  %v2710_v10 = vld [vmem:[%s4033_s1 + $0x300] ss:$8 sps:$4 sm:$0xff]   ;;  %v2713_v12 = vld [vmem:[%s4033_s1 + $0x210] ss:$8 sps:$4 sm:$0xff]  }
  0x19   :  { %1885 = vmatprep.subr.bf16.mxu1 %v2646_v25  ;;  %v2718_v11 = vld [vmem:[%s4033_s1 + $0x314] ss:$8 sps:$4 sm:$0xff]   ;;  %v2721_v13 = vld [vmem:[%s4033_s1 + $0x224] ss:$8 sps:$4 sm:$0xff]   ;;  %v2716_v14 = vld [vmem:[%s4033_s1 + $0x310] ss:$8 sps:$4 sm:$0xff]  }
  0x1a   :  { %v2724_v15 = vld [vmem:[%s4033_s1 + $0x324] ss:$8 sps:$4 sm:$0xff]   ;;  %v2719_v16 = vld [vmem:[%s4033_s1 + $0x220] ss:$8 sps:$4 sm:$0xff]   ;;  %v2727_v17 = vld [vmem:[%s4033_s1 + $0x234] ss:$8 sps:$4 sm:$0xff]  }
  0x1b   :  { %1845 = vmatpush1.bf16.msra.mxu0 %v2645_v26  ;;  %v2722_v18 = vld [vmem:[%s4033_s1 + $0x320] ss:$8 sps:$4 sm:$0xff]   ;;  %v2730_v19 = vld [vmem:[%s4033_s1 + $0x334] ss:$8 sps:$4 sm:$0xff]   ;;  %v2725_v20 = vld [vmem:[%s4033_s1 + $0x230] ss:$8 sps:$4 sm:$0xff]  }
  0x1c   :  { %1846 = vmatprep.subr.bf16.mxu0 %v2649_v27  ;;  %1886 = vmatpush1.bf16.msra.mxu1 %v2648_v28  ;;  %v2733_v21 = vld [vmem:[%s4033_s1 + $0x244] ss:$8 sps:$4 sm:$0xff]   ;;  %v2728_v22 = vld [vmem:[%s4033_s1 + $0x330] ss:$8 sps:$4 sm:$0xff]   ;;  %v2731_v24 = vld [vmem:[%s4033_s1 + $0x240] ss:$8 sps:$4 sm:$0xff]  }
  0x1d   :  { %1887 = vmatprep.subr.bf16.mxu1 %v2652_v29  ;;  %v2736_v23 = vld [vmem:[%s4033_s1 + $0x344] ss:$8 sps:$4 sm:$0xff]   ;;  %v2739_v25 = vld [vmem:[%s4033_s1 + $0x254] ss:$8 sps:$4 sm:$0xff]   ;;  %v2734_v26 = vld [vmem:[%s4033_s1 + $0x340] ss:$8 sps:$4 sm:$0xff]  }
  0x1e   :  { %v2742_v27 = vld [vmem:[%s4033_s1 + $0x354] ss:$8 sps:$4 sm:$0xff]   ;;  %v2737_v28 = vld [vmem:[%s4033_s1 + $0x250] ss:$8 sps:$4 sm:$0xff]   ;;  %v2745_v29 = vld [vmem:[%s4033_s1 + $0x264] ss:$8 sps:$4 sm:$0xff]  }
  0x1f   :  { %1847 = vmatpush1.bf16.msra.mxu0 %v2651_v30  ;;  %v2740_v30 = vld [vmem:[%s4033_s1 + $0x350] ss:$8 sps:$4 sm:$0xff]   ;;  %v2758_v46 = vld [vmem:[%s4033_s1 + $0x380] ss:$8 sps:$4 sm:$0xff]  }
  0x20   :  { %1848 = vmatprep.subr.bf16.mxu0 %v2655_v31  ;;  %1888 = vmatpush1.bf16.msra.mxu1 %v2654_v32  ;;  %v2748_v31 = vld [vmem:[%s4033_s1 + $0x364] ss:$8 sps:$4 sm:$0xff]   ;;  %v3367_v32 = vld [vmem:[%s4034_s0 + $0x10] sm:$0xff]  ;;  %v2767_v52 = vld [vmem:[%s4033_s1 + $0x2a0] ss:$8 sps:$4 sm:$0xff]  }
  0x21   :  { %1889 = vmatprep.subr.bf16.mxu1 %v2658_v33  ;;  %v2743_v33 = vld [vmem:[%s4033_s1 + $0x260] ss:$8 sps:$4 sm:$0xff]   ;;  %v2761_v48 = vld [vmem:[%s4033_s1 + $0x290] ss:$8 sps:$4 sm:$0xff]  }
  0x22   :  { %v2764_v50 = vld [vmem:[%s4033_s1 + $0x390] ss:$8 sps:$4 sm:$0xff]  }
  0x23   :  { %1849 = vmatpush1.bf16.msra.mxu0 %v2657_v34  ;;  %v2303_v34 = vcombine.high %v3367_v32, %v3367_v32 }
  0x24   :  { %1850 = vmatprep.subr.bf16.mxu0 %v2661_v35  ;;  %1890 = vmatpush1.bf16.msra.mxu1 %v2660_v36  ;;  %v3377_v35 = vld [vmem:[%s4034_s0 + $0x18] sm:$0xff] }
  0x25   :  { %1891 = vmatprep.subr.bf16.mxu1 %v2664_v37  ;;  %v2751_v36 = vld [vmem:[%s4033_s1 + $0x274] ss:$8 sps:$4 sm:$0xff]   ;;  %v2305_v37 = vcombine.high %v3377_v35, %v3377_v35 }
  0x27   :  { %1851 = vmatpush1.bf16.msra.mxu0 %v2663_v38  ;;  %v2746_v38 = vld [vmem:[%s4033_s1 + $0x360] ss:$8 sps:$4 sm:$0xff]  }
  0x28   :  { %1852 = vmatprep.subr.bf16.mxu0 %v2667_v39  ;;  %1892 = vmatpush1.bf16.msra.mxu1 %v2666_v40  ;;  %v2754_v39 = vld [vmem:[%s4033_s1 + $0x374] ss:$8 sps:$4 sm:$0xff]   ;;  %v2749_v40 = vld [vmem:[%s4033_s1 + $0x270] ss:$8 sps:$4 sm:$0xff]  }
  0x29   :  { %1893 = vmatprep.subr.bf16.mxu1 %v2670_v41  ;;  %v2757_v41 = vld [vmem:[%s4033_s1 + $0x284] ss:$8 sps:$4 sm:$0xff]  }
  0x2b   :  { %1853 = vmatpush1.bf16.msra.mxu0 %v2669_v42  ;;  %v2752_v42 = vld [vmem:[%s4033_s1 + $0x370] ss:$8 sps:$4 sm:$0xff]  }
  0x2c   :  { %1854 = vmatprep.subr.bf16.mxu0 %v2673_v43  ;;  %1894 = vmatpush1.bf16.msra.mxu1 %v2672_v44  ;;  %v2760_v43 = vld [vmem:[%s4033_s1 + $0x384] ss:$8 sps:$4 sm:$0xff]   ;;  %v2755_v44 = vld [vmem:[%s4033_s1 + $0x280] ss:$8 sps:$4 sm:$0xff]  }
  0x2d   :  { %1895 = vmatprep.subr.bf16.mxu1 %v2676_v45  ;;  %v2763_v45 = vld [vmem:[%s4033_s1 + $0x294] ss:$8 sps:$4 sm:$0xff]  }
  0x2f   :  { %1855 = vmatpush1.bf16.msra.mxu0 %v2675_v47  ;;  %v2766_v47 = vld [vmem:[%s4033_s1 + $0x394] ss:$8 sps:$4 sm:$0xff]  }
  0x30   :  { %1856 = vmatprep.subr.bf16.mxu0 %v2679_v49  ;;  %1896 = vmatpush1.bf16.msra.mxu1 %v2678_v51  ;;  %v2769_v49 = vld [vmem:[%s4033_s1 + $0x2a4] ss:$8 sps:$4 sm:$0xff]  }
  0x31   :  { %1897 = vmatprep.subr.bf16.mxu1 %v2682_v53  ;;  %v2772_v51 = vld [vmem:[%s4033_s1 + $0x3a4] ss:$8 sps:$4 sm:$0xff]   ;;  %v2775_v53 = vld [vmem:[%s4033_s1 + $0x2b4] ss:$8 sps:$4 sm:$0xff]  }
  0x33   :  { %1857 = vmatpush1.bf16.msra.mxu0 %v2681_v54  ;;  %v2770_v54 = vld [vmem:[%s4033_s1 + $0x3a0] ss:$8 sps:$4 sm:$0xff]  }
  0x34   :  { %1858 = vmatprep.subr.bf16.mxu0 %v2685_v55  ;;  %1898 = vmatpush1.bf16.msra.mxu1 %v2684_v56  ;;  %v2778_v55 = vld [vmem:[%s4033_s1 + $0x3b4] ss:$8 sps:$4 sm:$0xff]   ;;  %v2773_v56 = vld [vmem:[%s4033_s1 + $0x2b0] ss:$8 sps:$4 sm:$0xff]  }
  0x35   :  { %1899 = vmatprep.subr.bf16.mxu1 %v2688_v57  ;;  %v2781_v57 = vld [vmem:[%s4033_s1 + $0x2c4] ss:$8 sps:$4 sm:$0xff]  }
  0x37   :  { %1859 = vmatpush1.bf16.msra.mxu0 %v2687_v58  ;;  %v2776_v58 = vld [vmem:[%s4033_s1 + $0x3b0] ss:$8 sps:$4 sm:$0xff]  }
  0x38   :  { %1860 = vmatprep.subr.bf16.mxu0 %v2691_v59  ;;  %1900 = vmatpush1.bf16.msra.mxu1 %v2690_v60  ;;  %v2784_v59 = vld [vmem:[%s4033_s1 + $0x3c4] ss:$8 sps:$4 sm:$0xff]   ;;  %v2779_v60 = vld [vmem:[%s4033_s1 + $0x2c0] ss:$8 sps:$4 sm:$0xff]  }
  0x39   :  { %1901 = vmatprep.subr.bf16.mxu1 %v2694_v61  ;;  %v2787_v61 = vld [vmem:[%s4033_s1 + $0x2d4] ss:$8 sps:$4 sm:$0xff]  }
  0x3b   :  { %1861 = vmatpush1.bf16.msra.mxu0 %v2693_v62  ;;  %v2782_v62 = vld [vmem:[%s4033_s1 + $0x3c0] ss:$8 sps:$4 sm:$0xff]  }
  0x3c   :  { %1862 = vmatprep.subr.bf16.mxu0 %v2697_v63  ;;  %1902 = vmatpush1.bf16.msra.mxu1 %v2696_v0  ;;  %v2790_v63 = vld [vmem:[%s4033_s1 + $0x3d4] ss:$8 sps:$4 sm:$0xff]   ;;  %v2785_v0 = vld [vmem:[%s4033_s1 + $0x2d0] ss:$8 sps:$4 sm:$0xff]  }
  0x3d   :  { %1903 = vmatprep.subr.bf16.mxu1 %v2700_v1  ;;  %v2793_v1 = vld [vmem:[%s4033_s1 + $0x2e4] ss:$8 sps:$4 sm:$0xff]  }
  0x3f   :  { %1863 = vmatpush1.bf16.msra.mxu0 %v2699_v2  ;;  %v2788_v2 = vld [vmem:[%s4033_s1 + $0x3d0] ss:$8 sps:$4 sm:$0xff]  }
  0x40   :  { %1914 = vmatprep.subr.bf16.mxu0 %v2707_v3  ;;  %1904 = vmatpush1.bf16.msra.mxu1 %v2704_v4  ;;  %v2796_v3 = vld [vmem:[%s4033_s1 + $0x3e4] ss:$8 sps:$4 sm:$0xff]   ;;  %v2791_v4 = vld [vmem:[%s4033_s1 + $0x2e0] ss:$8 sps:$4 sm:$0xff]  }
  0x41   :  { %1955 = vmatprep.subr.bf16.mxu1 %v2712_v6  ;;  %v2794_v6 = vld [vmem:[%s4033_s1 + $0x3e0] ss:$8 sps:$4 sm:$0xff]  }
  0x42   :  { %1865 = vmatmul.mubr.bf16.vlgmr.msra.gmra.mrb[0].mxu0 %v2298_v5  ;;  %v2799_v5 = vld [vmem:[%s4033_s1 + $0x2f4] ss:$8 sps:$4 sm:$0xff]  }
  0x43   :  { %1915 = vmatpush1.bf16.msra.mxu0 %v2705_v7  ;;  %1906 = vmatmul.mubr.bf16.vlgmr.msra.gmra.mrb[0].mxu1 %v2300_v8  ;;  %v2802_v7 = vld [vmem:[%s4033_s1 + $0x3f4] ss:$8 sps:$4 sm:$0xff]   ;;  %v2797_v8 = vld [vmem:[%s4033_s1 + $0x2f0] ss:$8 sps:$4 sm:$0xff]  }
  0x44   :  { %1916 = vmatprep.subr.bf16.mxu0 %v2715_v9  ;;  %1956 = vmatpush1.bf16.msra.mxu1 %v2710_v10  ;;  %v2807_v9 = vld [vmem:[%s4033_s1 + $0x404] ss:$8 sps:$4 sm:$0xff]   ;;  %v2800_v10 = vld [vmem:[%s4033_s1 + $0x3f0] ss:$8 sps:$4 sm:$0xff]  }
  0x45   :  { %1957 = vmatprep.subr.bf16.mxu1 %v2718_v11  ;;  %1946 = vmatprep.mubr.bf16.mxu0 %v2303_v34  ;;  %v2302_v11 = vcombine.low %v3367_v32, %v3367_v32  ;;  %v2828_v32 = vld [vmem:[%s4033_s1 + $0x530] ss:$8 sps:$4 sm:$0xff]   ;;  %v2831_v34 = vld [vmem:[%s4033_s1 + $0x440] ss:$8 sps:$4 sm:$0xff]  }
  0x46   :  { %1987 = vmatprep.mubr.bf16.mxu1 %v2305_v37  ;;  %v2842_v37 = vld [vmem:[%s4033_s1 + $0x554] ss:$8 sps:$4 sm:$0xff]  }
  0x47   :  { %1917 = vmatpush1.bf16.msra.mxu0 %v2713_v12  ;;  %v2812_v12 = vld [vmem:[%s4033_s1 + $0x504] ss:$8 sps:$4 sm:$0xff]  }
  0x48   :  { %1918 = vmatprep.subr.bf16.mxu0 %v2721_v13  ;;  %1958 = vmatpush1.bf16.msra.mxu1 %v2716_v14  ;;  %v2805_v13 = vld [vmem:[%s4033_s1 + $0x400] ss:$8 sps:$4 sm:$0xff]   ;;  %v2304_v14 = vcombine.low %v3377_v35, %v3377_v35  ;;  %v2839_v35 = vld [vmem:[%s4033_s1 + $0x454] ss:$8 sps:$4 sm:$0xff]  }
  0x49   :  { %1959 = vmatprep.subr.bf16.mxu1 %v2724_v15  ;;  %v2815_v15 = vld [vmem:[%s4033_s1 + $0x414] ss:$8 sps:$4 sm:$0xff]  }
  0x4b   :  { %1919 = vmatpush1.bf16.msra.mxu0 %v2719_v16  ;;  %v2810_v16 = vld [vmem:[%s4033_s1 + $0x500] ss:$8 sps:$4 sm:$0xff]  }
  0x4c   :  { %1920 = vmatprep.subr.bf16.mxu0 %v2727_v17  ;;  %1960 = vmatpush1.bf16.msra.mxu1 %v2722_v18  ;;  %v3514_v17 = vld [vmem:[%s4034_s0 + $0x20] sm:$0xff]  ;;  %v2813_v18 = vld [vmem:[%s4033_s1 + $0x410] ss:$8 sps:$4 sm:$0xff]  }
  0x4d   :  { %1961 = vmatprep.subr.bf16.mxu1 %v2730_v19  ;;  %v2818_v19 = vld [vmem:[%s4033_s1 + $0x514] ss:$8 sps:$4 sm:$0xff]  }
  0x4f   :  { %1921 = vmatpush1.bf16.msra.mxu0 %v2725_v20  ;;  %v2307_v20 = vcombine.high %v3514_v17, %v3514_v17 }
  0x50   :  { %1922 = vmatprep.subr.bf16.mxu0 %v2733_v21  ;;  %1962 = vmatpush1.bf16.msra.mxu1 %v2728_v22  ;;  %v3527_v21 = vld [vmem:[%s4034_s0 + $0x28] sm:$0xff] }
  0x51   :  { %1963 = vmatprep.subr.bf16.mxu1 %v2736_v23  ;;  %v2821_v22 = vld [vmem:[%s4033_s1 + $0x424] ss:$8 sps:$4 sm:$0xff]   ;;  %v2309_v23 = vcombine.high %v3527_v21, %v3527_v21 }
  0x53   :  { %1923 = vmatpush1.bf16.msra.mxu0 %v2731_v24  ;;  %v2816_v24 = vld [vmem:[%s4033_s1 + $0x510] ss:$8 sps:$4 sm:$0xff]  }
  0x54   :  { %1924 = vmatprep.subr.bf16.mxu0 %v2739_v25  ;;  %1964 = vmatpush1.bf16.msra.mxu1 %v2734_v26  ;;  %v2824_v25 = vld [vmem:[%s4033_s1 + $0x524] ss:$8 sps:$4 sm:$0xff]   ;;  %v2819_v26 = vld [vmem:[%s4033_s1 + $0x420] ss:$8 sps:$4 sm:$0xff]  }
  0x55   :  { %1965 = vmatprep.subr.bf16.mxu1 %v2742_v27  ;;  %v2827_v27 = vld [vmem:[%s4033_s1 + $0x434] ss:$8 sps:$4 sm:$0xff]  }
  0x57   :  { %1925 = vmatpush1.bf16.msra.mxu0 %v2737_v28  ;;  %v2822_v28 = vld [vmem:[%s4033_s1 + $0x520] ss:$8 sps:$4 sm:$0xff]  }
  0x58   :  { %1926 = vmatprep.subr.bf16.mxu0 %v2745_v29  ;;  %1966 = vmatpush1.bf16.msra.mxu1 %v2740_v30  ;;  %v2830_v29 = vld [vmem:[%s4033_s1 + $0x534] ss:$8 sps:$4 sm:$0xff]   ;;  %v2825_v30 = vld [vmem:[%s4033_s1 + $0x430] ss:$8 sps:$4 sm:$0xff]  }
  0x59   :  { %1967 = vmatprep.subr.bf16.mxu1 %v2748_v31  ;;  %v2833_v31 = vld [vmem:[%s4033_s1 + $0x444] ss:$8 sps:$4 sm:$0xff]  }
  0x5b   :  { %1927 = vmatpush1.bf16.msra.mxu0 %v2743_v33  ;;  %v2836_v33 = vld [vmem:[%s4033_s1 + $0x544] ss:$8 sps:$4 sm:$0xff]  }
  0x5c   :  { %1928 = vmatprep.subr.bf16.mxu0 %v2751_v36  ;;  %1968 = vmatpush1.bf16.msra.mxu1 %v2746_v38  ;;  %v2834_v36 = vld [vmem:[%s4033_s1 + $0x540] ss:$8 sps:$4 sm:$0xff]   ;;  %v2837_v38 = vld [vmem:[%s4033_s1 + $0x450] ss:$8 sps:$4 sm:$0xff]  }
  0x5d   :  { %1969 = vmatprep.subr.bf16.mxu1 %v2754_v39  ;;  %v2845_v39 = vld [vmem:[%s4033_s1 + $0x464] ss:$8 sps:$4 sm:$0xff]  }
  0x5f   :  { %1929 = vmatpush1.bf16.msra.mxu0 %v2749_v40  ;;  %v2840_v40 = vld [vmem:[%s4033_s1 + $0x550] ss:$8 sps:$4 sm:$0xff]  }
  0x60   :  { %1930 = vmatprep.subr.bf16.mxu0 %v2757_v41  ;;  %1970 = vmatpush1.bf16.msra.mxu1 %v2752_v42  ;;  %v2848_v41 = vld [vmem:[%s4033_s1 + $0x564] ss:$8 sps:$4 sm:$0xff]   ;;  %v2843_v42 = vld [vmem:[%s4033_s1 + $0x460] ss:$8 sps:$4 sm:$0xff]  }
  0x61   :  { %1971 = vmatprep.subr.bf16.mxu1 %v2760_v43  ;;  %v2851_v43 = vld [vmem:[%s4033_s1 + $0x474] ss:$8 sps:$4 sm:$0xff]  }
  0x63   :  { %1931 = vmatpush1.bf16.msra.mxu0 %v2755_v44  ;;  %v2846_v44 = vld [vmem:[%s4033_s1 + $0x560] ss:$8 sps:$4 sm:$0xff]  }
  0x64   :  { %1932 = vmatprep.subr.bf16.mxu0 %v2763_v45  ;;  %1972 = vmatpush1.bf16.msra.mxu1 %v2758_v46  ;;  %v2854_v45 = vld [vmem:[%s4033_s1 + $0x574] ss:$8 sps:$4 sm:$0xff]   ;;  %v2849_v46 = vld [vmem:[%s4033_s1 + $0x470] ss:$8 sps:$4 sm:$0xff]  }
  0x65   :  { %1973 = vmatprep.subr.bf16.mxu1 %v2766_v47  ;;  %v2857_v47 = vld [vmem:[%s4033_s1 + $0x484] ss:$8 sps:$4 sm:$0xff]  }
  0x67   :  { %1933 = vmatpush1.bf16.msra.mxu0 %v2761_v48  ;;  %v2852_v48 = vld [vmem:[%s4033_s1 + $0x570] ss:$8 sps:$4 sm:$0xff]  }
  0x68   :  { %1934 = vmatprep.subr.bf16.mxu0 %v2769_v49  ;;  %1974 = vmatpush1.bf16.msra.mxu1 %v2764_v50  ;;  %v2860_v49 = vld [vmem:[%s4033_s1 + $0x584] ss:$8 sps:$4 sm:$0xff]   ;;  %v2855_v50 = vld [vmem:[%s4033_s1 + $0x480] ss:$8 sps:$4 sm:$0xff]  }
  0x69   :  { %1975 = vmatprep.subr.bf16.mxu1 %v2772_v51  ;;  %v2863_v51 = vld [vmem:[%s4033_s1 + $0x494] ss:$8 sps:$4 sm:$0xff]  }
  0x6b   :  { %1935 = vmatpush1.bf16.msra.mxu0 %v2767_v52  ;;  %v2858_v52 = vld [vmem:[%s4033_s1 + $0x580] ss:$8 sps:$4 sm:$0xff]  }
  0x6c   :  { %1936 = vmatprep.subr.bf16.mxu0 %v2775_v53  ;;  %1976 = vmatpush1.bf16.msra.mxu1 %v2770_v54  ;;  %v2866_v53 = vld [vmem:[%s4033_s1 + $0x594] ss:$8 sps:$4 sm:$0xff]   ;;  %v2861_v54 = vld [vmem:[%s4033_s1 + $0x490] ss:$8 sps:$4 sm:$0xff]  }
  0x6d   :  { %1977 = vmatprep.subr.bf16.mxu1 %v2778_v55  ;;  %v2869_v55 = vld [vmem:[%s4033_s1 + $0x4a4] ss:$8 sps:$4 sm:$0xff]  }
  0x6f   :  { %1937 = vmatpush1.bf16.msra.mxu0 %v2773_v56  ;;  %v2864_v56 = vld [vmem:[%s4033_s1 + $0x590] ss:$8 sps:$4 sm:$0xff]  }
  0x70   :  { %1938 = vmatprep.subr.bf16.mxu0 %v2781_v57  ;;  %1978 = vmatpush1.bf16.msra.mxu1 %v2776_v58  ;;  %v2872_v57 = vld [vmem:[%s4033_s1 + $0x5a4] ss:$8 sps:$4 sm:$0xff]   ;;  %v2867_v58 = vld [vmem:[%s4033_s1 + $0x4a0] ss:$8 sps:$4 sm:$0xff]  }
  0x71   :  { %1979 = vmatprep.subr.bf16.mxu1 %v2784_v59  ;;  %v2875_v59 = vld [vmem:[%s4033_s1 + $0x4b4] ss:$8 sps:$4 sm:$0xff]  }
  0x73   :  { %1939 = vmatpush1.bf16.msra.mxu0 %v2779_v60  ;;  %v2870_v60 = vld [vmem:[%s4033_s1 + $0x5a0] ss:$8 sps:$4 sm:$0xff]  }
  0x74   :  { %1940 = vmatprep.subr.bf16.mxu0 %v2787_v61  ;;  %1980 = vmatpush1.bf16.msra.mxu1 %v2782_v62  ;;  %v2878_v61 = vld [vmem:[%s4033_s1 + $0x5b4] ss:$8 sps:$4 sm:$0xff]   ;;  %v2873_v62 = vld [vmem:[%s4033_s1 + $0x4b0] ss:$8 sps:$4 sm:$0xff]  }
  0x75   :  { %1981 = vmatprep.subr.bf16.mxu1 %v2790_v63  ;;  %v2881_v63 = vld [vmem:[%s4033_s1 + $0x4c4] ss:$8 sps:$4 sm:$0xff]  }
  0x77   :  { %1941 = vmatpush1.bf16.msra.mxu0 %v2785_v0  ;;  %v2876_v0 = vld [vmem:[%s4033_s1 + $0x5b0] ss:$8 sps:$4 sm:$0xff]  }
  0x78   :  { %1942 = vmatprep.subr.bf16.mxu0 %v2793_v1  ;;  %1982 = vmatpush1.bf16.msra.mxu1 %v2788_v2  ;;  %v2884_v1 = vld [vmem:[%s4033_s1 + $0x5c4] ss:$8 sps:$4 sm:$0xff]   ;;  %v2879_v2 = vld [vmem:[%s4033_s1 + $0x4c0] ss:$8 sps:$4 sm:$0xff]  }
  0x79   :  { %1983 = vmatprep.subr.bf16.mxu1 %v2796_v3  ;;  %v2887_v3 = vld [vmem:[%s4033_s1 + $0x4d4] ss:$8 sps:$4 sm:$0xff]  }
  0x7b   :  { %1943 = vmatpush1.bf16.msra.mxu0 %v2791_v4  ;;  %v2882_v4 = vld [vmem:[%s4033_s1 + $0x5c0] ss:$8 sps:$4 sm:$0xff]  }
  0x7c   :  { %1944 = vmatprep.subr.bf16.mxu0 %v2799_v5  ;;  %1984 = vmatpush1.bf16.msra.mxu1 %v2794_v6  ;;  %v2890_v5 = vld [vmem:[%s4033_s1 + $0x5d4] ss:$8 sps:$4 sm:$0xff]   ;;  %v2885_v6 = vld [vmem:[%s4033_s1 + $0x4d0] ss:$8 sps:$4 sm:$0xff]  }
  0x7d   :  { %1985 = vmatprep.subr.bf16.mxu1 %v2802_v7  ;;  %v2893_v7 = vld [vmem:[%s4033_s1 + $0x4e4] ss:$8 sps:$4 sm:$0xff]  }
  0x7f   :  { %1945 = vmatpush1.bf16.msra.mxu0 %v2797_v8  ;;  %v2888_v8 = vld [vmem:[%s4033_s1 + $0x5d0] ss:$8 sps:$4 sm:$0xff]  }
  0x80   :  { %1996 = vmatprep.subr.bf16.mxu0 %v2807_v9  ;;  %1986 = vmatpush1.bf16.msra.mxu1 %v2800_v10  ;;  %v2896_v9 = vld [vmem:[%s4033_s1 + $0x5e4] ss:$8 sps:$4 sm:$0xff]   ;;  %v2891_v10 = vld [vmem:[%s4033_s1 + $0x4e0] ss:$8 sps:$4 sm:$0xff]  }
  0x81   :  { %2037 = vmatprep.subr.bf16.mxu1 %v2812_v12  ;;  %v2894_v12 = vld [vmem:[%s4033_s1 + $0x5e0] ss:$8 sps:$4 sm:$0xff]  }
  0x82   :  { %1947 = vmatmul.mubr.bf16.vlgmr.msra.gmra.mrb[4].mxu0 %v2302_v11  ;;  %v2899_v11 = vld [vmem:[%s4033_s1 + $0x4f4] ss:$8 sps:$4 sm:$0xff]  }
  0x83   :  { %1997 = vmatpush1.bf16.msra.mxu0 %v2805_v13  ;;  %1988 = vmatmul.mubr.bf16.vlgmr.msra.gmra.mrb[4].mxu1 %v2304_v14  ;;  %v2897_v13 = vld [vmem:[%s4033_s1 + $0x4f0] ss:$8 sps:$4 sm:$0xff]   ;;  %v2902_v14 = vld [vmem:[%s4033_s1 + $0x5f4] ss:$8 sps:$4 sm:$0xff]  }
  0x84   :  { %1998 = vmatprep.subr.bf16.mxu0 %v2815_v15  ;;  %2038 = vmatpush1.bf16.msra.mxu1 %v2810_v16  ;;  %v2907_v15 = vld [vmem:[%s4033_s1 + $0x604] ss:$8 sps:$4 sm:$0xff]   ;;  %v3705_v16 = vld [vmem:[%s4034_s0 + $0x30] sm:$0xff] }
  0x85   :  { %2028 = vmatprep.mubr.bf16.mxu0 %v2307_v20  ;;  %2039 = vmatprep.subr.bf16.mxu1 %v2818_v19  ;;  %v2306_v19 = vcombine.low %v3514_v17, %v3514_v17  ;;  %v2912_v20 = vld [vmem:[%s4033_s1 + $0x704] ss:$8 sps:$4 sm:$0xff]   ;;  %v2308_v17 = vcombine.low %v3527_v21, %v3527_v21  ;;  %v2913_v21 = vld [vmem:[%s4033_s1 + $0x610] ss:$8 sps:$4 sm:$0xff]  }
  0x86   :  { %2069 = vmatprep.mubr.bf16.mxu1 %v2309_v23  ;;  %v2905_v23 = vld [vmem:[%s4033_s1 + $0x600] ss:$8 sps:$4 sm:$0xff]  }
  0x87   :  { %1999 = vmatpush1.bf16.msra.mxu0 %v2813_v18  ;;  %v2900_v18 = vld [vmem:[%s4033_s1 + $0x5f0] ss:$8 sps:$4 sm:$0xff]  }
  0x88   :  { %2000 = vmatprep.subr.bf16.mxu0 %v2821_v22  ;;  %2040 = vmatpush1.bf16.msra.mxu1 %v2816_v24  ;;  %v3718_v22 = vld [vmem:[%s4034_s0 + $0x38] sm:$0xff]  ;;  %v2311_v24 = vcombine.high %v3705_v16, %v3705_v16 }
  0x89   :  { %2041 = vmatprep.subr.bf16.mxu1 %v2824_v25  ;;  %v2915_v25 = vld [vmem:[%s4033_s1 + $0x614] ss:$8 sps:$4 sm:$0xff]  }
  0x8b   :  { %2001 = vmatpush1.bf16.msra.mxu0 %v2819_v26  ;;  %v2910_v26 = vld [vmem:[%s4033_s1 + $0x700] ss:$8 sps:$4 sm:$0xff]  }
  0x8c   :  { %2002 = vmatprep.subr.bf16.mxu0 %v2827_v27  ;;  %2042 = vmatpush1.bf16.msra.mxu1 %v2822_v28  ;;  %v2313_v27 = vcombine.high %v3718_v22, %v3718_v22  ;;  %v2918_v28 = vld [vmem:[%s4033_s1 + $0x714] ss:$8 sps:$4 sm:$0xff]  }
  0x8d   :  { %2043 = vmatprep.subr.bf16.mxu1 %v2830_v29  ;;  %v2921_v29 = vld [vmem:[%s4033_s1 + $0x624] ss:$8 sps:$4 sm:$0xff]  }
  0x8f   :  { %2003 = vmatpush1.bf16.msra.mxu0 %v2825_v30  ;;  %v2916_v30 = vld [vmem:[%s4033_s1 + $0x710] ss:$8 sps:$4 sm:$0xff]  }
  0x90   :  { %2004 = vmatprep.subr.bf16.mxu0 %v2833_v31  ;;  %2044 = vmatpush1.bf16.msra.mxu1 %v2828_v32  ;;  %v2924_v31 = vld [vmem:[%s4033_s1 + $0x724] ss:$8 sps:$4 sm:$0xff]   ;;  %v2919_v32 = vld [vmem:[%s4033_s1 + $0x620] ss:$8 sps:$4 sm:$0xff]  }
  0x91   :  { %2045 = vmatprep.subr.bf16.mxu1 %v2836_v33  ;;  %v2927_v33 = vld [vmem:[%s4033_s1 + $0x634] ss:$8 sps:$4 sm:$0xff]  }
  0x93   :  { %2005 = vmatpush1.bf16.msra.mxu0 %v2831_v34  ;;  %v2922_v34 = vld [vmem:[%s4033_s1 + $0x720] ss:$8 sps:$4 sm:$0xff]  }
  0x94   :  { %2006 = vmatprep.subr.bf16.mxu0 %v2839_v35  ;;  %2046 = vmatpush1.bf16.msra.mxu1 %v2834_v36  ;;  %v2930_v35 = vld [vmem:[%s4033_s1 + $0x734] ss:$8 sps:$4 sm:$0xff]   ;;  %v2925_v36 = vld [vmem:[%s4033_s1 + $0x630] ss:$8 sps:$4 sm:$0xff]  }
  0x95   :  { %2047 = vmatprep.subr.bf16.mxu1 %v2842_v37  ;;  %v2933_v37 = vld [vmem:[%s4033_s1 + $0x644] ss:$8 sps:$4 sm:$0xff]  }
  0x97   :  { %2007 = vmatpush1.bf16.msra.mxu0 %v2837_v38  ;;  %v2928_v38 = vld [vmem:[%s4033_s1 + $0x730] ss:$8 sps:$4 sm:$0xff]  }
  0x98   :  { %2008 = vmatprep.subr.bf16.mxu0 %v2845_v39  ;;  %2048 = vmatpush1.bf16.msra.mxu1 %v2840_v40  ;;  %v2936_v39 = vld [vmem:[%s4033_s1 + $0x744] ss:$8 sps:$4 sm:$0xff]   ;;  %v2931_v40 = vld [vmem:[%s4033_s1 + $0x640] ss:$8 sps:$4 sm:$0xff]  }
  0x99   :  { %2049 = vmatprep.subr.bf16.mxu1 %v2848_v41  ;;  %v2939_v41 = vld [vmem:[%s4033_s1 + $0x654] ss:$8 sps:$4 sm:$0xff]  }
  0x9b   :  { %2009 = vmatpush1.bf16.msra.mxu0 %v2843_v42  ;;  %v2934_v42 = vld [vmem:[%s4033_s1 + $0x740] ss:$8 sps:$4 sm:$0xff]  }
  0x9c   :  { %2010 = vmatprep.subr.bf16.mxu0 %v2851_v43  ;;  %2050 = vmatpush1.bf16.msra.mxu1 %v2846_v44  ;;  %v2942_v43 = vld [vmem:[%s4033_s1 + $0x754] ss:$8 sps:$4 sm:$0xff]   ;;  %v2937_v44 = vld [vmem:[%s4033_s1 + $0x650] ss:$8 sps:$4 sm:$0xff]  }
  0x9d   :  { %2051 = vmatprep.subr.bf16.mxu1 %v2854_v45  ;;  %v2945_v45 = vld [vmem:[%s4033_s1 + $0x664] ss:$8 sps:$4 sm:$0xff]  }
  0x9f   :  { %2011 = vmatpush1.bf16.msra.mxu0 %v2849_v46  ;;  %v2940_v46 = vld [vmem:[%s4033_s1 + $0x750] ss:$8 sps:$4 sm:$0xff]  }
  0xa0   :  { %2012 = vmatprep.subr.bf16.mxu0 %v2857_v47  ;;  %2052 = vmatpush1.bf16.msra.mxu1 %v2852_v48  ;;  %v2948_v47 = vld [vmem:[%s4033_s1 + $0x764] ss:$8 sps:$4 sm:$0xff]   ;;  %v2943_v48 = vld [vmem:[%s4033_s1 + $0x660] ss:$8 sps:$4 sm:$0xff]  }
  0xa1   :  { %2053 = vmatprep.subr.bf16.mxu1 %v2860_v49  ;;  %v2951_v49 = vld [vmem:[%s4033_s1 + $0x674] ss:$8 sps:$4 sm:$0xff]  }
  0xa3   :  { %2013 = vmatpush1.bf16.msra.mxu0 %v2855_v50  ;;  %v2946_v50 = vld [vmem:[%s4033_s1 + $0x760] ss:$8 sps:$4 sm:$0xff]  }
  0xa4   :  { %2014 = vmatprep.subr.bf16.mxu0 %v2863_v51  ;;  %2054 = vmatpush1.bf16.msra.mxu1 %v2858_v52  ;;  %v2954_v51 = vld [vmem:[%s4033_s1 + $0x774] ss:$8 sps:$4 sm:$0xff]   ;;  %v2949_v52 = vld [vmem:[%s4033_s1 + $0x670] ss:$8 sps:$4 sm:$0xff]  }
  0xa5   :  { %2055 = vmatprep.subr.bf16.mxu1 %v2866_v53  ;;  %v2957_v53 = vld [vmem:[%s4033_s1 + $0x684] ss:$8 sps:$4 sm:$0xff]  }
  0xa7   :  { %2015 = vmatpush1.bf16.msra.mxu0 %v2861_v54  ;;  %v2952_v54 = vld [vmem:[%s4033_s1 + $0x770] ss:$8 sps:$4 sm:$0xff]  }
  0xa8   :  { %2016 = vmatprep.subr.bf16.mxu0 %v2869_v55  ;;  %2056 = vmatpush1.bf16.msra.mxu1 %v2864_v56  ;;  %v2960_v55 = vld [vmem:[%s4033_s1 + $0x784] ss:$8 sps:$4 sm:$0xff]   ;;  %v2955_v56 = vld [vmem:[%s4033_s1 + $0x680] ss:$8 sps:$4 sm:$0xff]  }
  0xa9   :  { %2057 = vmatprep.subr.bf16.mxu1 %v2872_v57  ;;  %v2963_v57 = vld [vmem:[%s4033_s1 + $0x694] ss:$8 sps:$4 sm:$0xff]  }
  0xab   :  { %2017 = vmatpush1.bf16.msra.mxu0 %v2867_v58  ;;  %v2958_v58 = vld [vmem:[%s4033_s1 + $0x780] ss:$8 sps:$4 sm:$0xff]  }
  0xac   :  { %2018 = vmatprep.subr.bf16.mxu0 %v2875_v59  ;;  %2058 = vmatpush1.bf16.msra.mxu1 %v2870_v60  ;;  %v2966_v59 = vld [vmem:[%s4033_s1 + $0x794] ss:$8 sps:$4 sm:$0xff]   ;;  %v2961_v60 = vld [vmem:[%s4033_s1 + $0x690] ss:$8 sps:$4 sm:$0xff]  }
  0xad   :  { %2059 = vmatprep.subr.bf16.mxu1 %v2878_v61  ;;  %v2969_v61 = vld [vmem:[%s4033_s1 + $0x6a4] ss:$8 sps:$4 sm:$0xff]  }
  0xaf   :  { %2019 = vmatpush1.bf16.msra.mxu0 %v2873_v62  ;;  %v2964_v62 = vld [vmem:[%s4033_s1 + $0x790] ss:$8 sps:$4 sm:$0xff]  }
  0xb0   :  { %2020 = vmatprep.subr.bf16.mxu0 %v2881_v63  ;;  %2060 = vmatpush1.bf16.msra.mxu1 %v2876_v0  ;;  %v2972_v63 = vld [vmem:[%s4033_s1 + $0x7a4] ss:$8 sps:$4 sm:$0xff]   ;;  %v2967_v0 = vld [vmem:[%s4033_s1 + $0x6a0] ss:$8 sps:$4 sm:$0xff]  }
  0xb1   :  { %2061 = vmatprep.subr.bf16.mxu1 %v2884_v1  ;;  %v2975_v1 = vld [vmem:[%s4033_s1 + $0x6b4] ss:$8 sps:$4 sm:$0xff]  }
  0xb3   :  { %2021 = vmatpush1.bf16.msra.mxu0 %v2879_v2  ;;  %v2970_v2 = vld [vmem:[%s4033_s1 + $0x7a0] ss:$8 sps:$4 sm:$0xff]  }
  0xb4   :  { %2022 = vmatprep.subr.bf16.mxu0 %v2887_v3  ;;  %2062 = vmatpush1.bf16.msra.mxu1 %v2882_v4  ;;  %v2978_v3 = vld [vmem:[%s4033_s1 + $0x7b4] ss:$8 sps:$4 sm:$0xff]   ;;  %v2973_v4 = vld [vmem:[%s4033_s1 + $0x6b0] ss:$8 sps:$4 sm:$0xff]  }
  0xb5   :  { %2063 = vmatprep.subr.bf16.mxu1 %v2890_v5  ;;  %v2981_v5 = vld [vmem:[%s4033_s1 + $0x6c4] ss:$8 sps:$4 sm:$0xff]  }
  0xb7   :  { %2023 = vmatpush1.bf16.msra.mxu0 %v2885_v6  ;;  %v2976_v6 = vld [vmem:[%s4033_s1 + $0x7b0] ss:$8 sps:$4 sm:$0xff]  }
  0xb8   :  { %2024 = vmatprep.subr.bf16.mxu0 %v2893_v7  ;;  %2064 = vmatpush1.bf16.msra.mxu1 %v2888_v8  ;;  %v2984_v7 = vld [vmem:[%s4033_s1 + $0x7c4] ss:$8 sps:$4 sm:$0xff]   ;;  %v2979_v8 = vld [vmem:[%s4033_s1 + $0x6c0] ss:$8 sps:$4 sm:$0xff]  }
  0xb9   :  { %2065 = vmatprep.subr.bf16.mxu1 %v2896_v9  ;;  %v2987_v9 = vld [vmem:[%s4033_s1 + $0x6d4] ss:$8 sps:$4 sm:$0xff]  }
  0xbb   :  { %2025 = vmatpush1.bf16.msra.mxu0 %v2891_v10  ;;  %v2982_v10 = vld [vmem:[%s4033_s1 + $0x7c0] ss:$8 sps:$4 sm:$0xff]  }
  0xbc   :  { %2026 = vmatprep.subr.bf16.mxu0 %v2899_v11  ;;  %2066 = vmatpush1.bf16.msra.mxu1 %v2894_v12  ;;  %v2990_v11 = vld [vmem:[%s4033_s1 + $0x7d4] ss:$8 sps:$4 sm:$0xff]   ;;  %v2985_v12 = vld [vmem:[%s4033_s1 + $0x6d0] ss:$8 sps:$4 sm:$0xff]  }
  0xbd   :  { %2067 = vmatprep.subr.bf16.mxu1 %v2902_v14  ;;  %v2988_v14 = vld [vmem:[%s4033_s1 + $0x7d0] ss:$8 sps:$4 sm:$0xff]  }
  0xbf   :  { %2027 = vmatpush1.bf16.msra.mxu0 %v2897_v13  ;;  %v2993_v13 = vld [vmem:[%s4033_s1 + $0x6e4] ss:$8 sps:$4 sm:$0xff]  }
  0xc0   :  { %2078 = vmatprep.subr.bf16.mxu0 %v2907_v15  ;;  %2068 = vmatpush1.bf16.msra.mxu1 %v2900_v18  ;;  %v2996_v15 = vld [vmem:[%s4033_s1 + $0x7e4] ss:$8 sps:$4 sm:$0xff]   ;;  %v2991_v18 = vld [vmem:[%s4033_s1 + $0x6e0] ss:$8 sps:$4 sm:$0xff]  }
  0xc1   :  { %2119 = vmatprep.subr.bf16.mxu1 %v2912_v20  ;;  %v2994_v20 = vld [vmem:[%s4033_s1 + $0x7e0] ss:$8 sps:$4 sm:$0xff]  }
  0xc2   :  { %2029 = vmatmul.mubr.bf16.vlgmr.msra.gmra.mrb[8].mxu0 %v2306_v19  ;;  %v2999_v19 = vld [vmem:[%s4033_s1 + $0x6f4] ss:$8 sps:$4 sm:$0xff]  }
  0xc3   :  { %2079 = vmatpush1.bf16.msra.mxu0 %v2905_v23  ;;  %2110 = vmatprep.mubr.bf16.mxu0 %v2311_v24  ;;  %v3002_v23 = vld [vmem:[%s4033_s1 + $0x7f4] ss:$8 sps:$4 sm:$0xff]   ;;  %v2997_v24 = vld [vmem:[%s4033_s1 + $0x6f0] ss:$8 sps:$4 sm:$0xff]  }
  0xc4   :  { %2070 = vmatmul.mubr.bf16.vlgmr.msra.gmra.mrb[8].mxu1 %v2308_v17  ;;  %2080 = vmatprep.subr.bf16.mxu0 %v2915_v25  ;;  %v3007_v17 = vld [vmem:[%s4033_s1 + $0x804] ss:$8 sps:$4 sm:$0xff]  }
  0xc5   :  { %2120 = vmatpush1.bf16.msra.mxu1 %v2910_v26  ;;  %2151 = vmatprep.mubr.bf16.mxu1 %v2313_v27  ;;  %v3915_v25 = vld [vmem:[%s4034_s0 + $0x40] sm:$0xff]  ;;  %v3000_v26 = vld [vmem:[%s4033_s1 + $0x7f0] ss:$8 sps:$4 sm:$0xff]   ;;  %v2310_v27 = vcombine.low %v3705_v16, %v3705_v16 }
  0xc6   :  { %2121 = vmatprep.subr.bf16.mxu1 %v2918_v28  ;;  %v3005_v28 = vld [vmem:[%s4033_s1 + $0x800] ss:$8 sps:$4 sm:$0xff]   ;;  %v3010_v16 = vld [vmem:[%s4033_s1 + $0x810] ss:$8 sps:$4 sm:$0xff]  }
  0xc7   :  { %2081 = vmatpush1.bf16.msra.mxu0 %v2913_v21  ;;  %v2315_v21 = vcombine.high %v3915_v25, %v3915_v25 }
  0xc8   :  { %2082 = vmatprep.subr.bf16.mxu0 %v2921_v29  ;;  %v2312_v29 = vcombine.low %v3718_v22, %v3718_v22  ;;  %v3013_v22 = vld [vmem:[%s4033_s1 + $0x820] ss:$8 sps:$4 sm:$0xff]  }
  0xc9   :  { %2122 = vmatpush1.bf16.msra.mxu1 %v2916_v30  ;;  %v3012_v30 = vld [vmem:[%s4033_s1 + $0x814] ss:$8 sps:$4 sm:$0xff]  }
  0xca   :  { %2123 = vmatprep.subr.bf16.mxu1 %v2924_v31  ;;  %v3015_v31 = vld [vmem:[%s4033_s1 + $0x824] ss:$8 sps:$4 sm:$0xff]  }
  0xcb   :  { %2083 = vmatpush1.bf16.msra.mxu0 %v2919_v32  ;;  %v319_v32 = vlaneseq }
  0xcc   :  { %2084 = vmatprep.subr.bf16.mxu0 %v2927_v33  ;;  %v3018_v33 = vld [vmem:[%s4033_s1 + $0x834] ss:$8 sps:$4 sm:$0xff]  }
  0xcd   :  { %2124 = vmatpush1.bf16.msra.mxu1 %v2922_v34  ;;  %v320_v34 = vshrl.u32 %v319_v32, 7 }
  0xce   :  { %2125 = vmatprep.subr.bf16.mxu1 %v2930_v35  ;;  %v3016_v35 = vld [vmem:[%s4033_s1 + $0x830] ss:$8 sps:$4 sm:$0xff]  }
  0xcf   :  { %2085 = vmatpush1.bf16.msra.mxu0 %v2925_v36  ;;  %v3021_v36 = vld [vmem:[%s4033_s1 + $0x844] ss:$8 sps:$4 sm:$0xff]  }
  0xd0   :  { %2086 = vmatprep.subr.bf16.mxu0 %v2933_v37  ;;  %v321_v37 = vsub.s32 0, %v320_v34 }
  0xd1   :  { %2126 = vmatpush1.bf16.msra.mxu1 %v2928_v38  ;;  %v3019_v38 = vld [vmem:[%s4033_s1 + $0x840] ss:$8 sps:$4 sm:$0xff]  }
  0xd2   :  { %2127 = vmatprep.subr.bf16.mxu1 %v2936_v39  ;;  %v317_v39 = vld [vmem:[%s4035_s2] sm:$0x3] }
  0xd3   :  { %2087 = vmatpush1.bf16.msra.mxu0 %v2931_v40  ;;  %v325_v40 = vsub.s32 1, %v320_v34 }
  0xd4   :  { %2088 = vmatprep.subr.bf16.mxu0 %v2939_v41  ;;  %v3024_v41 = vld [vmem:[%s4033_s1 + $0x854] ss:$8 sps:$4 sm:$0xff]  }
  0xd5   :  { %2128 = vmatpush1.bf16.msra.mxu1 %v2934_v42  ;;  %v322_v42 = vrot.slane %v317_v39, %v321_v37 }
  0xd6   :  { %2129 = vmatprep.subr.bf16.mxu1 %v2942_v43  ;;  %v326_v43 = vrot.slane %v317_v39, %v325_v40 }
  0xd7   :  { %2089 = vmatpush1.bf16.msra.mxu0 %v2937_v44  ;;  %v3022_v44 = vld [vmem:[%s4033_s1 + $0x850] ss:$8 sps:$4 sm:$0xff]  }
  0xd8   :  { %2090 = vmatprep.subr.bf16.mxu0 %v2945_v45  ;;  %v3027_v45 = vld [vmem:[%s4033_s1 + $0x864] ss:$8 sps:$4 sm:$0xff]  }
  0xd9   :  { %2130 = vmatpush1.bf16.msra.mxu1 %v2940_v46 }
  0xda   :  { %2131 = vmatprep.subr.bf16.mxu1 %v2948_v47 }
  0xdb   :  { %2091 = vmatpush1.bf16.msra.mxu0 %v2943_v48 }
  0xdc   :  { %2092 = vmatprep.subr.bf16.mxu0 %v2951_v49 }
  0xdd   :  { %2132 = vmatpush1.bf16.msra.mxu1 %v2946_v50 }
  0xde   :  { %2133 = vmatprep.subr.bf16.mxu1 %v2954_v51 }
  0xdf   :  { %2093 = vmatpush1.bf16.msra.mxu0 %v2949_v52  ;;  %v3025_v52 = vld [vmem:[%s4033_s1 + $0x860] ss:$8 sps:$4 sm:$0xff]  }
  0xe0   :  { %2094 = vmatprep.subr.bf16.mxu0 %v2957_v53 }
  0xe1   :  { %2134 = vmatpush1.bf16.msra.mxu1 %v2952_v54 }
  0xe2   :  { %2135 = vmatprep.subr.bf16.mxu1 %v2960_v55 }
  0xe3   :  { %2095 = vmatpush1.bf16.msra.mxu0 %v2955_v56  ;;  %v3030_v56 = vld [vmem:[%s4033_s1 + $0x874] ss:$8 sps:$4 sm:$0xff]  }
  0xe4   :  { %2096 = vmatprep.subr.bf16.mxu0 %v2963_v57 }
  0xe5   :  { %2136 = vmatpush1.bf16.msra.mxu1 %v2958_v58 }
  0xe6   :  { %2137 = vmatprep.subr.bf16.mxu1 %v2966_v59 }
  0xe7   :  { %2097 = vmatpush1.bf16.msra.mxu0 %v2961_v60  ;;  %v3028_v60 = vld [vmem:[%s4033_s1 + $0x870] ss:$8 sps:$4 sm:$0xff]  }
  0xe8   :  { %2098 = vmatprep.subr.bf16.mxu0 %v2969_v61  ;;  %v3033_v61 = vld [vmem:[%s4033_s1 + $0x884] ss:$8 sps:$4 sm:$0xff]  }
  0xe9   :  { %2138 = vmatpush1.bf16.msra.mxu1 %v2964_v62  ;;  %v3031_v62 = vld [vmem:[%s4033_s1 + $0x880] ss:$8 sps:$4 sm:$0xff]  }
  0xea   :  { %2139 = vmatprep.subr.bf16.mxu1 %v2972_v63  ;;  %v3036_v63 = vld [vmem:[%s4033_s1 + $0x894] ss:$8 sps:$4 sm:$0xff]  }
  0xeb   :  { %2099 = vmatpush1.bf16.msra.mxu0 %v2967_v0  ;;  %v3034_v0 = vld [vmem:[%s4033_s1 + $0x890] ss:$8 sps:$4 sm:$0xff]  }
  0xec   :  { %2100 = vmatprep.subr.bf16.mxu0 %v2975_v1  ;;  %v3039_v1 = vld [vmem:[%s4033_s1 + $0x8a4] ss:$8 sps:$4 sm:$0xff]  }
  0xed   :  { %2140 = vmatpush1.bf16.msra.mxu1 %v2970_v2  ;;  %v3037_v2 = vld [vmem:[%s4033_s1 + $0x8a0] ss:$8 sps:$4 sm:$0xff]  }
  0xee   :  { %2141 = vmatprep.subr.bf16.mxu1 %v2978_v3  ;;  %v3042_v3 = vld [vmem:[%s4033_s1 + $0x8b4] ss:$8 sps:$4 sm:$0xff]  }
  0xef   :  { %2101 = vmatpush1.bf16.msra.mxu0 %v2973_v4  ;;  %v3040_v4 = vld [vmem:[%s4033_s1 + $0x8b0] ss:$8 sps:$4 sm:$0xff]  }
  0xf0   :  { %2102 = vmatprep.subr.bf16.mxu0 %v2981_v5  ;;  %v3045_v5 = vld [vmem:[%s4033_s1 + $0x8c4] ss:$8 sps:$4 sm:$0xff]  }
  0xf1   :  { %2142 = vmatpush1.bf16.msra.mxu1 %v2976_v6  ;;  %v3043_v6 = vld [vmem:[%s4033_s1 + $0x8c0] ss:$8 sps:$4 sm:$0xff]  }
  0xf2   :  { %2143 = vmatprep.subr.bf16.mxu1 %v2984_v7  ;;  %v3048_v7 = vld [vmem:[%s4033_s1 + $0x8d4] ss:$8 sps:$4 sm:$0xff]  }
  0xf3   :  { %2103 = vmatpush1.bf16.msra.mxu0 %v2979_v8  ;;  %v3046_v8 = vld [vmem:[%s4033_s1 + $0x8d0] ss:$8 sps:$4 sm:$0xff]  }
  0xf4   :  { %2104 = vmatprep.subr.bf16.mxu0 %v2987_v9  ;;  %v3051_v9 = vld [vmem:[%s4033_s1 + $0x8e4] ss:$8 sps:$4 sm:$0xff]  }
  0xf5   :  { %2144 = vmatpush1.bf16.msra.mxu1 %v2982_v10  ;;  %v3049_v10 = vld [vmem:[%s4033_s1 + $0x8e0] ss:$8 sps:$4 sm:$0xff]  }
  0xf6   :  { %2145 = vmatprep.subr.bf16.mxu1 %v2990_v11  ;;  %v3054_v11 = vld [vmem:[%s4033_s1 + $0x8f4] ss:$8 sps:$4 sm:$0xff]  }
  0xf7   :  { %2105 = vmatpush1.bf16.msra.mxu0 %v2985_v12  ;;  %v3052_v12 = vld [vmem:[%s4033_s1 + $0x8f0] ss:$8 sps:$4 sm:$0xff]  }
  0xf8   :  { %2106 = vmatprep.subr.bf16.mxu0 %v2993_v13  ;;  %v2314_v13 = vcombine.low %v3915_v25, %v3915_v25 }
  0xf9   :  { %2146 = vmatpush1.bf16.msra.mxu1 %v2988_v14 }
  0xfa   :  { %2147 = vmatprep.subr.bf16.mxu1 %v2996_v15 }
  0xfb   :  { %2107 = vmatpush1.bf16.msra.mxu0 %v2991_v18 }
  0xfc   :  { %2108 = vmatprep.subr.bf16.mxu0 %v2999_v19 }
  0xfd   :  { %2148 = vmatpush1.bf16.msra.mxu1 %v2994_v20 }
  0xfe   :  { %2149 = vmatprep.subr.bf16.mxu1 %v3002_v23 }
  0xff   :  { %2109 = vmatpush1.bf16.msra.mxu0 %v2997_v24 }
 0x100   :  { %2160 = vmatprep.subr.bf16.mxu0 %v3007_v17 }
 0x101   :  { %2150 = vmatpush1.bf16.msra.mxu1 %v3000_v26 }
 0x102   :  { %2111 = vmatmul.mubr.bf16.vlgmr.msra.gmra.mrb[12].mxu0 %v2310_v27 }
 0x103   :  { %2161 = vmatpush1.bf16.msra.mxu0 %v3005_v28  ;;  %2192 = vmatprep.mubr.bf16.mxu0 %v2315_v21 }
 0x104   :  { %2152 = vmatmul.mubr.bf16.vlgmr.msra.gmra.mrb[12].mxu1 %v2312_v29  ;;  %2162 = vmatprep.subr.bf16.mxu0 %v3012_v30 }
 0x107   :  { %2163 = vmatpush1.bf16.msra.mxu0 %v3010_v16 }
 0x108   :  { %2164 = vmatprep.subr.bf16.mxu0 %v3015_v31 }
 0x10b   :  { %2165 = vmatpush1.bf16.msra.mxu0 %v3013_v22 }
 0x10c   :  { %2166 = vmatprep.subr.bf16.mxu0 %v3018_v33 }
 0x10f   :  { %2167 = vmatpush1.bf16.msra.mxu0 %v3016_v35 }
 0x110   :  { %2168 = vmatprep.subr.bf16.mxu0 %v3021_v36 }
 0x113   :  { %2169 = vmatpush1.bf16.msra.mxu0 %v3019_v38  ;;  %v3057_v38 = vmov 0.0  }
 0x114   :  { %2170 = vmatprep.subr.bf16.mxu0 %v3024_v41  ;;  %2275 = vmatprep.mubr.f32.mxu1 %v3057_v38 }
 0x115   :  { %v1866_v46 = vpop.f32.mrb[0].mxu0 }
 0x116   :  { %v1867_v47 = vadd.f32 %v1866_v46, %v322_v42  ;;  %v1868_v48 = vpop.f32.mrb[1].mxu0  ;;  %v1907_v51 = vpop.f32.mrb[0].mxu1 }
 0x117   :  { %v1869_v49 = vadd.f32 %v1868_v48, %v326_v43  ;;  %v1870_v50 = vpop.f32.mrb[2].mxu0  ;;  %2171 = vmatpush1.bf16.msra.mxu0 %v3022_v44  ;;  %v1909_v55 = vpop.f32.mrb[1].mxu1 }
 0x118   :  { %v1908_v53 = vadd.f32 %v1907_v51, %v1867_v47  ;;  %v1871_v54 = vpop.f32.mrb[3].mxu0  ;;  %2172 = vmatprep.subr.bf16.mxu0 %v3027_v45  ;;  %v1911_v58 = vpop.f32.mrb[2].mxu1  ;;  %v2201_v51 = vld [vmem:[%s4036_s3] sm:$0xff] }
 0x119   :  { %v1910_v57 = vadd.f32 %v1909_v55, %v1869_v49  ;;  %v1912_v59 = vpop.f32.mrb[3].mxu1  ;;  %v2202_v55 = vunpack.c.l.bf16 %v2201_v51 }
 0x11b   :  { %2173 = vmatpush1.bf16.msra.mxu0 %v3025_v52 }
 0x11c   :  { %2174 = vmatprep.subr.bf16.mxu0 %v3030_v56 }
 0x11f   :  { %2175 = vmatpush1.bf16.msra.mxu0 %v3028_v60 }
 0x120   :  { %2176 = vmatprep.subr.bf16.mxu0 %v3033_v61 }
 0x123   :  { %2177 = vmatpush1.bf16.msra.mxu0 %v3031_v62  ;;  %v2206_v62 = vld [vmem:[%s4037_s4] sm:$0x3] }
 0x124   :  { %2178 = vmatprep.subr.bf16.mxu0 %v3036_v63 }
 0x127   :  { %2179 = vmatpush1.bf16.msra.mxu0 %v3034_v0 }
 0x128   :  { %2180 = vmatprep.subr.bf16.mxu0 %v3039_v1 }
 0x12b   :  { %2181 = vmatpush1.bf16.msra.mxu0 %v3037_v2 }
 0x12c   :  { %2182 = vmatprep.subr.bf16.mxu0 %v3042_v3 }
 0x12f   :  { %2183 = vmatpush1.bf16.msra.mxu0 %v3040_v4 }
 0x130   :  { %2184 = vmatprep.subr.bf16.mxu0 %v3045_v5 }
 0x133   :  { %2185 = vmatpush1.bf16.msra.mxu0 %v3043_v6 }
 0x134   :  { %2186 = vmatprep.subr.bf16.mxu0 %v3048_v7 }
 0x137   :  { %2187 = vmatpush1.bf16.msra.mxu0 %v3046_v8 }
 0x138   :  { %2188 = vmatprep.subr.bf16.mxu0 %v3051_v9 }
 0x13b   :  { %2189 = vmatpush1.bf16.msra.mxu0 %v3049_v10 }
 0x13c   :  { %2190 = vmatprep.subr.bf16.mxu0 %v3054_v11 }
 0x13f   :  { %2191 = vmatpush1.bf16.msra.mxu0 %v3052_v12 }
 0x142   :  { %2193 = vmatmul.mubr.bf16.vlgmr.msra.gmra.mrb[16].mxu0 %v2314_v13 }
 0x155   :  { %v1948_v14 = vpop.f32.mrb[4].mxu0 }
 0x156   :  { %v1949_v15 = vadd.f32 %v1948_v14, %v1908_v53  ;;  %v1950_v18 = vpop.f32.mrb[5].mxu0  ;;  %v1989_v23 = vpop.f32.mrb[4].mxu1  ;;  %v2203_v53 = vunpack.c.h.bf16 %v2201_v51 }
 0x157   :  { %v1951_v19 = vadd.f32 %v1950_v18, %v1910_v57  ;;  %v1952_v20 = vpop.f32.mrb[6].mxu0  ;;  %v1991_v26 = vpop.f32.mrb[5].mxu1 }
 0x158   :  { %v1990_v24 = vadd.f32 %v1989_v23, %v1949_v15  ;;  %v1953_v17 = vpop.f32.mrb[7].mxu0  ;;  %v1993_v28 = vpop.f32.mrb[6].mxu1 }
 0x159   :  { %v1992_v27 = vadd.f32 %v1991_v26, %v1951_v19  ;;  %v1994_v21 = vpop.f32.mrb[7].mxu1 }
 0x195   :  { %v2030_v29 = vpop.f32.mrb[8].mxu0 }
 0x196   :  { %v2031_v30 = vadd.f32 %v2030_v29, %v1990_v24  ;;  %v2032_v16 = vpop.f32.mrb[9].mxu0 }
 0x197   :  { %v2033_v31 = vadd.f32 %v2032_v16, %v1992_v27  ;;  %v2034_v32 = vpop.f32.mrb[10].mxu0  ;;  %v2071_v25 = vpop.f32.mrb[8].mxu1 }
 0x198   :  { %v2072_v22 = vadd.f32 %v2071_v25, %v2031_v30  ;;  %v2035_v33 = vpop.f32.mrb[11].mxu0  ;;  %v2073_v34 = vpop.f32.mrb[9].mxu1 }
 0x199   :  { %v2074_v35 = vadd.f32 %v2073_v34, %v2033_v31  ;;  %v2075_v36 = vpop.f32.mrb[10].mxu1 }
 0x19a   :  { %v2076_v37 = vpop.f32.mrb[11].mxu1 }
 0x1d5   :  { %v2112_v39 = vpop.f32.mrb[12].mxu0 }
 0x1d6   :  { %v2113_v40 = vadd.f32 %v2112_v39, %v2072_v22  ;;  %v2114_v41 = vpop.f32.mrb[13].mxu0 }
 0x1d7   :  { %v2115_v42 = vadd.f32 %v2114_v41, %v2074_v35  ;;  %v2116_v43 = vpop.f32.mrb[14].mxu0  ;;  %v2153_v44 = vpop.f32.mrb[12].mxu1 }
 0x1d8   :  { %v2154_v45 = vadd.f32 %v2153_v44, %v2113_v40  ;;  %v2117_v46 = vpop.f32.mrb[15].mxu0  ;;  %v2155_v47 = vpop.f32.mrb[13].mxu1 }
 0x1d9   :  { %v2156_v48 = vadd.f32 %v2155_v47, %v2115_v42  ;;  %v2157_v49 = vpop.f32.mrb[14].mxu1 }
 0x1da   :  { %v2158_v50 = vpop.f32.mrb[15].mxu1 }
 0x215   :  { %v2194_v52 = vpop.f32.mrb[16].mxu0 }
 0x216   :  { %v2195_v54 = vadd.f32 %v2194_v52, %v2154_v45  ;;  %v2196_v56 = vpop.f32.mrb[17].mxu0 }
 0x217   :  { %v2197_v57 = vadd.f32 %v2196_v56, %v2156_v48  ;;  %v2198_v58 = vpop.f32.mrb[18].mxu0 }
 0x218   :  { %v2199_v59 = vpop.f32.mrb[19].mxu0  ;;  %v2204_v61 = vadd.f32 %v2202_v55, %v2195_v54 }
 0x219   :  { %v2205_v60 = vadd.f32 %v2203_v53, %v2197_v57 }
 0x21b   :  { %2211 = vmatprep.subr.mxu1 %v2205_v60 }
 0x21c   :  { %2212 = vmatpush1.msra.mxu1 %v2204_v61 }
 0x21d   :  { %2604 = vmatmul.mubr.msk.f32.vlgmr.msra.gmra.mrb[16].mxu1 %vm2207_vm0, %v2206_v62 }
 0x2f0   :  { %v2277_v63 = vpop.f32.mrb[16].mxu1 }
 0x2f1   :  { %v2279_v0 = vpop.f32.mrb[17].mxu1 }
 0x2f2   :  { %v2284_v1 = vcombine.low %v2277_v63, %v2279_v0 }
 0x2f4   :  { %2605 = vst.sshfl [vmem:[%s4038_s5] sm:$0x33 pattern:$0x76325410] %v2284_v1 }

</bundles_post_ra>
